<compile_context>
chip_gen: v7x
topology: tpu7x:2x2x1
jax: 0.10.0
libtpu: 0.0.40
codegen_flags: <defaults>
</compile_context>

<pallas_src>
import functools

import jax
import jax.numpy as jnp
from jax import lax
from jax.experimental import pallas as pl
from jax.experimental.pallas import tpu as pltpu


_COMPILER_PARAMS = pltpu.CompilerParams(
    dimension_semantics=("parallel",),
    vmem_limit_bytes=32 * 1024 * 1024,
)


# ----------------------------- Pallas kernels -----------------------------

def _conv_mm_kernel(p_ref, w_ref, b_ref, o_ref, *, neg_slope):
    """One M-tile of  patches @ W + b  (optionally fused LeakyReLU).

    p_ref: (TM, K) bf16 im2col patches; w_ref: (K, Cout) bf16; b_ref: (1, Cout) f32.
    """
    y = jnp.dot(p_ref[...], w_ref[...], preferred_element_type=jnp.float32)
    y = y + b_ref[...]
    if neg_slope is not None:
        y = jnp.where(y > 0, y, neg_slope * y)   # f32 epilogue (v5e VPU has no bf16)
    o_ref[...] = y


def _self_attn_kernel(x_ref, wq_ref, bq_ref, wk_ref, bk_ref, wv_ref, bv_ref,
                      gamma_ref, out_ref):
    """SAGAN self-attention for one batch element (channels-last view).

    x_ref: (1, N, C) f32.  Projection weights are bf16 (C8 / C on the lane axis).
    The (N, N) attention map is computed but never written back — the
    Discriminator discards it.
    """
    x = x_ref[0]                                                        # (N, C) f32
    xb = x.astype(jnp.bfloat16)
    q = jnp.dot(xb, wq_ref[...], preferred_element_type=jnp.float32) + bq_ref[...]
    k = jnp.dot(xb, wk_ref[...], preferred_element_type=jnp.float32) + bk_ref[...]
    v = jnp.dot(xb, wv_ref[...], preferred_element_type=jnp.float32) + bv_ref[...]
    # energy[i, j] = sum_c q[i, c] * k[j, c]   (== bmm(Q, K^T), no transpose op)
    energy = lax.dot_general(q, k, (((1,), (1,)), ((), ())),
                             preferred_element_type=jnp.float32)        # (N, N)
    energy = energy - jnp.max(energy, axis=-1, keepdims=True)
    e = jnp.exp(energy)
    attn = e * pl.reciprocal(jnp.sum(e, axis=-1, keepdims=True), approx=True)
    out = jnp.dot(attn, v, preferred_element_type=jnp.float32)          # (N, C)
    gamma = gamma_ref[0]                                                # SMEM scalar
    out_ref[0] = gamma * out + x


# ------------------------------ JAX glue -----------------------------------

def _im2col_nhwc(x, ksize, stride, pad):
    """NHWC -> (B*OH*OW, Kh*Kw*Cin) patches, K axis ordered (kh, kw, cin)."""
    B, H, W, C = x.shape
    xp = jnp.pad(x, ((0, 0), (pad, pad), (pad, pad), (0, 0)))
    OH = (H + 2 * pad - ksize) // stride + 1
    OW = (W + 2 * pad - ksize) // stride + 1
    slices = []
    for kh in range(ksize):
        for kw in range(ksize):
            slices.append(xp[:, kh:kh + stride * OH:stride,
                             kw:kw + stride * OW:stride, :])            # (B,OH,OW,C)
    p = jnp.stack(slices, axis=3)                                       # (B,OH,OW,K*K,C)
    p = p.reshape(B * OH * OW, ksize * ksize * C)                       # free reshape
    return p, OH, OW


def _pick_tm(M, K, Cout):
    """M-tile size: expose >= 2 grid steps (v7x megacore) when M allows, while
    keeping the bf16-patch + f32-output tile footprint modest.  Returned TM is
    always a multiple of 8 that divides M."""
    if M < 16 or M % 16 != 0:
        return M
    tm = M // 2
    budget = 4 * 1024 * 1024                       # bytes per tile (pre double-buffer)
    while tm % 16 == 0 and (tm * K * 2 + tm * Cout * 4) > budget:
        tm //= 2
    return tm


def conv2d_pallas(x_nhwc, w, b, stride, pad, neg_slope):
    """PyTorch-semantics Conv2d (+ optional LeakyReLU) on NHWC activations."""
    B, H, W, Cin = x_nhwc.shape
    Cout, _, ksize, _ = w.shape
    patches, OH, OW = _im2col_nhwc(x_nhwc, ksize, stride, pad)
    patches = patches.astype(jnp.bfloat16)
    M, K = patches.shape
    # (Cout, Cin, Kh, Kw) -> (Kh, Kw, Cin, Cout) -> (K, Cout); matches patch K order.
    wmat = w.transpose(2, 3, 1, 0).reshape(K, Cout).astype(jnp.bfloat16)
    bmat = b.reshape(1, Cout).astype(jnp.float32)
    TM = _pick_tm(M, K, Cout)
    assert M % TM == 0 and TM % 8 == 0, (M, TM)

    y = pl.pallas_call(
        functools.partial(_conv_mm_kernel, neg_slope=neg_slope),
        out_shape=jax.ShapeDtypeStruct((M, Cout), jnp.float32),
        grid=(M // TM,),
        in_specs=[
            pl.BlockSpec((TM, K), lambda i: (i, 0)),
            pl.BlockSpec((K, Cout), lambda i: (0, 0)),
            pl.BlockSpec((1, Cout), lambda i: (0, 0)),
        ],
        out_specs=pl.BlockSpec((TM, Cout), lambda i: (i, 0)),
        compiler_params=_COMPILER_PARAMS,
    )(patches, wmat, bmat)

    return y.reshape(B, OH, OW, Cout)              # channels-last, free reshape


def self_attn_pallas(x_nhwc, wq, bq, wk, bk, wv, bv, gamma):
    """SAGAN Self_Attn on an NHWC feature map; returns NHWC (gamma*attn_out + x).

    The (B, N, N) attention map of the reference module is discarded by the
    Discriminator, so it is neither stored to HBM nor returned.
    """
    B, H, W, C = x_nhwc.shape
    N = H * W
    C8 = wq.shape[0]
    x_nc = x_nhwc.reshape(B, N, C)                                      # free reshape
    wq_t = wq.reshape(C8, C).T.astype(jnp.bfloat16)                     # (C, C8)
    wk_t = wk.reshape(C8, C).T.astype(jnp.bfloat16)
    wv_t = wv.reshape(C, C).T.astype(jnp.bfloat16)                      # (C, C)
    bq2 = bq.reshape(1, C8).astype(jnp.float32)
    bk2 = bk.reshape(1, C8).astype(jnp.float32)
    bv2 = bv.reshape(1, C).astype(jnp.float32)
    gamma1 = gamma.reshape(1).astype(jnp.float32)

    out = pl.pallas_call(
        _self_attn_kernel,
        out_shape=jax.ShapeDtypeStruct((B, N, C), jnp.float32),
        grid=(B,),
        in_specs=[
            pl.BlockSpec((1, N, C), lambda b: (b, 0, 0)),
            pl.BlockSpec((C, C8), lambda b: (0, 0)),
            pl.BlockSpec((1, C8), lambda b: (0, 0)),
            pl.BlockSpec((C, C8), lambda b: (0, 0)),
            pl.BlockSpec((1, C8), lambda b: (0, 0)),
            pl.BlockSpec((C, C), lambda b: (0, 0)),
            pl.BlockSpec((1, C), lambda b: (0, 0)),
            pl.BlockSpec(memory_space=pltpu.MemorySpace.SMEM),
        ],
        out_specs=pl.BlockSpec((1, N, C), lambda b: (b, 0, 0)),
        compiler_params=_COMPILER_PARAMS,
    )(x_nc, wq_t, bq2, wk_t, bk2, wv_t, bv2, gamma1)

    return out.reshape(B, H, W, C)


# ------------------------------ Discriminator ------------------------------

def discriminator_forward(x, p):
    """x: NCHW (B, 3, 64, 64) like the PyTorch module; returns (B,) logits."""
    out = jnp.transpose(x, (0, 2, 3, 1))                     # NCHW -> NHWC, once
    out = conv2d_pallas(out, p["w1"], p["b1"], 2, 1, 0.1)    # (B, 32, 32,  64)
    out = conv2d_pallas(out, p["w2"], p["b2"], 2, 1, 0.1)    # (B, 16, 16, 128)
    out = conv2d_pallas(out, p["w3"], p["b3"], 2, 1, 0.1)    # (B,  8,  8, 256)
    out = self_attn_pallas(out, p["a1_wq"], p["a1_bq"], p["a1_wk"], p["a1_bk"],
                           p["a1_wv"], p["a1_bv"], p["a1_gamma"])
    out = conv2d_pallas(out, p["w4"], p["b4"], 2, 1, 0.1)    # (B,  4,  4, 512)
    out = self_attn_pallas(out, p["a2_wq"], p["a2_bq"], p["a2_wk"], p["a2_bk"],
                           p["a2_wv"], p["a2_bv"], p["a2_gamma"])
    # Final Conv2d(512, 1, 4) over the 4x4 map is one dot per batch element.
    # Cout=1 / M=B would be a lane-sparse Pallas matmul; do it in the wrapper.
    wl_hwc = p["wl"][0].transpose(1, 2, 0)                   # (4, 4, 512)
    logits = jnp.einsum("bhwc,hwc->b", out, wl_hwc) + p["bl"][0]
    return logits                                            # == torch .squeeze() for B>1


def init_params(key):
    def conv_init(k, cout, cin, ks):
        k1, k2 = jax.random.split(k)
        return (jax.random.normal(k1, (cout, cin, ks, ks), jnp.float32) * 0.05,
                jax.random.normal(k2, (cout,), jnp.float32) * 0.05)

    keys = jax.random.split(key, 12)
    p = {}
    p["w1"], p["b1"] = conv_init(keys[0], 64, 3, 4)
    p["w2"], p["b2"] = conv_init(keys[1], 128, 64, 4)
    p["w3"], p["b3"] = conv_init(keys[2], 256, 128, 4)
    p["w4"], p["b4"] = conv_init(keys[3], 512, 256, 4)
    p["wl"], p["bl"] = conv_init(keys[4], 1, 512, 4)
    # Self_Attn(256)
    p["a1_wq"], p["a1_bq"] = conv_init(keys[5], 32, 256, 1)
    p["a1_wk"], p["a1_bk"] = conv_init(keys[6], 32, 256, 1)
    p["a1_wv"], p["a1_bv"] = conv_init(keys[7], 256, 256, 1)
    # nn.Parameter(torch.zeros(1)) in torch; small nonzero here to exercise the path.
    p["a1_gamma"] = jnp.full((1,), 0.1, jnp.float32)
    # Self_Attn(512)
    p["a2_wq"], p["a2_bq"] = conv_init(keys[8], 64, 512, 1)
    p["a2_wk"], p["a2_bk"] = conv_init(keys[9], 64, 512, 1)
    p["a2_wv"], p["a2_bv"] = conv_init(keys[10], 512, 512, 1)
    p["a2_gamma"] = jnp.full((1,), 0.1, jnp.float32)
    return p


if __name__ == "__main__":
    key = jax.random.PRNGKey(0)
    kx, kp = jax.random.split(key)
    # im_size=64 is required by the module (attn1/attn2 channel counts are hard-coded).
    x = jax.random.normal(kx, (2, 3, 64, 64), jnp.float32)
    params = init_params(kp)

    fwd = jax.jit(discriminator_forward)
    out = fwd(x, params)
    jax.block_until_ready(out)
    assert out.shape == (2,), out.shape
    print("KERNEL_OK")
</pallas_src>

<mosaic_0001>
module attributes {stable_mosaic.version = 11 : i64} {
  func.func @_conv_mm_kernel(%arg0: i32, %arg1: memref<1024x48xbf16, #tpu.memory_space<vmem>>, %arg2: memref<48x64xbf16, #tpu.memory_space<vmem>>, %arg3: memref<1x64xf32, #tpu.memory_space<vmem>>, %arg4: memref<1024x64xf32, #tpu.memory_space<vmem>>) attributes {dimension_semantics = [#tpu.dimension_semantics<parallel>], iteration_bounds = array<i64: 2>, scalar_prefetch = 0 : i64, scratch_operands = 0 : i64, tpu.core_type = #tpu.core_type<tc>, window_params = [{transform_indices = @transform_0, window_bounds = array<i64: 1024, 48>}, {pipeline_mode = #tpu.pipeline_mode<synchronous>, transform_indices = @transform_1, window_bounds = array<i64: 48, 64>}, {pipeline_mode = #tpu.pipeline_mode<synchronous>, transform_indices = @transform_2, window_bounds = array<i64: 1, 64>}, {transform_indices = @transform_3, window_bounds = array<i64: 1024, 64>}]} {
    %c0 = arith.constant 0 : index
    %c0_0 = arith.constant 0 : index
    %0 = vector.load %arg1[%c0, %c0_0] : memref<1024x48xbf16, #tpu.memory_space<vmem>>, vector<1024x48xbf16>
    %c0_1 = arith.constant 0 : index
    %c0_2 = arith.constant 0 : index
    %1 = vector.load %arg2[%c0_1, %c0_2] : memref<48x64xbf16, #tpu.memory_space<vmem>>, vector<48x64xbf16>
    %cst = arith.constant dense<0.000000e+00> : vector<1024x64xf32>
    %2 = tpu.matmul %0, %1, %cst {dimension_numbers = #tpu.dot_dimension_numbers<[1], [0], [0], [1], [0, 0, 1, 1], [], []>} : vector<1024x48xbf16>, vector<48x64xbf16>, vector<1024x64xf32> -> vector<1024x64xf32>
    %c0_3 = arith.constant 0 : index
    %c0_4 = arith.constant 0 : index
    %3 = vector.load %arg3[%c0_3, %c0_4] : memref<1x64xf32, #tpu.memory_space<vmem>>, vector<1x64xf32>
    %4 = vector.broadcast %3 : vector<1x64xf32> to vector<1024x64xf32>
    %5 = arith.addf %2, %4 : vector<1024x64xf32>
    %cst_5 = arith.constant 0.000000e+00 : f32
    %6 = vector.broadcast %cst_5 : f32 to vector<1024x64xf32>
    %7 = arith.cmpf ogt, %5, %6 : vector<1024x64xf32>
    %cst_6 = arith.constant 1.000000e-01 : f32
    %8 = vector.broadcast %cst_6 : f32 to vector<1024x64xf32>
    %9 = arith.mulf %8, %5 : vector<1024x64xf32>
    %10 = arith.select %7, %5, %9 : vector<1024x64xi1>, vector<1024x64xf32>
    %c0_7 = arith.constant 0 : index
    %c0_8 = arith.constant 0 : index
    %11 = vector.load %arg4[%c0_7, %c0_8] : memref<1024x64xf32, #tpu.memory_space<vmem>>, vector<1024x64xf32>
    tpu.vector_store %arg4[%c0_7, %c0_8], %10 {strides = array<i32>} : memref<1024x64xf32, #tpu.memory_space<vmem>>, vector<1024x64xf32>,
    return
  }
  func.func @transform_0(%arg0: i32) -> (i32, i32) {
    %c0_i32 = arith.constant 0 : i32
    %c0_i32_0 = arith.constant 0 : i32
    return %arg0, %c0_i32 : i32, i32
  }
  func.func @transform_1(%arg0: i32) -> (i32, i32) {
    %c0_i32 = arith.constant 0 : i32
    %c0_i32_0 = arith.constant 0 : i32
    %c0_i32_1 = arith.constant 0 : i32
    return %c0_i32, %c0_i32_0 : i32, i32
  }
  func.func @transform_2(%arg0: i32) -> (i32, i32) {
    %c0_i32 = arith.constant 0 : i32
    %c0_i32_0 = arith.constant 0 : i32
    %c0_i32_1 = arith.constant 0 : i32
    return %c0_i32, %c0_i32_0 : i32, i32
  }
  func.func @transform_3(%arg0: i32) -> (i32, i32) {
    %c0_i32 = arith.constant 0 : i32
    %c0_i32_0 = arith.constant 0 : i32
    return %arg0, %c0_i32 : i32, i32
  }
}

module attributes {stable_mosaic.version = 11 : i64} {
  func.func @_conv_mm_kernel(%arg0: i32, %arg1: memref<256x1024xbf16, #tpu.memory_space<vmem>>, %arg2: memref<1024x128xbf16, #tpu.memory_space<vmem>>, %arg3: memref<1x128xf32, #tpu.memory_space<vmem>>, %arg4: memref<256x128xf32, #tpu.memory_space<vmem>>) attributes {dimension_semantics = [#tpu.dimension_semantics<parallel>], iteration_bounds = array<i64: 2>, scalar_prefetch = 0 : i64, scratch_operands = 0 : i64, tpu.core_type = #tpu.core_type<tc>, window_params = [{transform_indices = @transform_0, window_bounds = array<i64: 256, 1024>}, {pipeline_mode = #tpu.pipeline_mode<synchronous>, transform_indices = @transform_1, window_bounds = array<i64: 1024, 128>}, {pipeline_mode = #tpu.pipeline_mode<synchronous>, transform_indices = @transform_2, window_bounds = array<i64: 1, 128>}, {transform_indices = @transform_3, window_bounds = array<i64: 256, 128>}]} {
    %c0 = arith.constant 0 : index
    %c0_0 = arith.constant 0 : index
    %0 = vector.load %arg1[%c0, %c0_0] : memref<256x1024xbf16, #tpu.memory_space<vmem>>, vector<256x1024xbf16>
    %c0_1 = arith.constant 0 : index
    %c0_2 = arith.constant 0 : index
    %1 = vector.load %arg2[%c0_1, %c0_2] : memref<1024x128xbf16, #tpu.memory_space<vmem>>, vector<1024x128xbf16>
    %cst = arith.constant dense<0.000000e+00> : vector<256x128xf32>
    %2 = tpu.matmul %0, %1, %cst {dimension_numbers = #tpu.dot_dimension_numbers<[1], [0], [0], [1], [0, 0, 1, 1], [], []>} : vector<256x1024xbf16>, vector<1024x128xbf16>, vector<256x128xf32> -> vector<256x128xf32>
    %c0_3 = arith.constant 0 : index
    %c0_4 = arith.constant 0 : index
    %3 = vector.load %arg3[%c0_3, %c0_4] : memref<1x128xf32, #tpu.memory_space<vmem>>, vector<1x128xf32>
    %4 = vector.broadcast %3 : vector<1x128xf32> to vector<256x128xf32>
    %5 = arith.addf %2, %4 : vector<256x128xf32>
    %cst_5 = arith.constant 0.000000e+00 : f32
    %6 = vector.broadcast %cst_5 : f32 to vector<256x128xf32>
    %7 = arith.cmpf ogt, %5, %6 : vector<256x128xf32>
    %cst_6 = arith.constant 1.000000e-01 : f32
    %8 = vector.broadcast %cst_6 : f32 to vector<256x128xf32>
    %9 = arith.mulf %8, %5 : vector<256x128xf32>
    %10 = arith.select %7, %5, %9 : vector<256x128xi1>, vector<256x128xf32>
    %c0_7 = arith.constant 0 : index
    %c0_8 = arith.constant 0 : index
    %11 = vector.load %arg4[%c0_7, %c0_8] : memref<256x128xf32, #tpu.memory_space<vmem>>, vector<256x128xf32>
    tpu.vector_store %arg4[%c0_7, %c0_8], %10 {strides = array<i32>} : memref<256x128xf32, #tpu.memory_space<vmem>>, vector<256x128xf32>,
    return
  }
  func.func @transform_0(%arg0: i32) -> (i32, i32) {
    %c0_i32 = arith.constant 0 : i32
    %c0_i32_0 = arith.constant 0 : i32
    return %arg0, %c0_i32 : i32, i32
  }
  func.func @transform_1(%arg0: i32) -> (i32, i32) {
    %c0_i32 = arith.constant 0 : i32
    %c0_i32_0 = arith.constant 0 : i32
    %c0_i32_1 = arith.constant 0 : i32
    return %c0_i32, %c0_i32_0 : i32, i32
  }
  func.func @transform_2(%arg0: i32) -> (i32, i32) {
    %c0_i32 = arith.constant 0 : i32
    %c0_i32_0 = arith.constant 0 : i32
    %c0_i32_1 = arith.constant 0 : i32
    return %c0_i32, %c0_i32_0 : i32, i32
  }
  func.func @transform_3(%arg0: i32) -> (i32, i32) {
    %c0_i32 = arith.constant 0 : i32
    %c0_i32_0 = arith.constant 0 : i32
    return %arg0, %c0_i32 : i32, i32
  }
}

module attributes {stable_mosaic.version = 11 : i64} {
  func.func @_conv_mm_kernel(%arg0: i32, %arg1: memref<64x2048xbf16, #tpu.memory_space<vmem>>, %arg2: memref<2048x256xbf16, #tpu.memory_space<vmem>>, %arg3: memref<1x256xf32, #tpu.memory_space<vmem>>, %arg4: memref<64x256xf32, #tpu.memory_space<vmem>>) attributes {dimension_semantics = [#tpu.dimension_semantics<parallel>], iteration_bounds = array<i64: 2>, scalar_prefetch = 0 : i64, scratch_operands = 0 : i64, tpu.core_type = #tpu.core_type<tc>, window_params = [{transform_indices = @transform_0, window_bounds = array<i64: 64, 2048>}, {pipeline_mode = #tpu.pipeline_mode<synchronous>, transform_indices = @transform_1, window_bounds = array<i64: 2048, 256>}, {pipeline_mode = #tpu.pipeline_mode<synchronous>, transform_indices = @transform_2, window_bounds = array<i64: 1, 256>}, {transform_indices = @transform_3, window_bounds = array<i64: 64, 256>}]} {
    %c0 = arith.constant 0 : index
    %c0_0 = arith.constant 0 : index
    %0 = vector.load %arg1[%c0, %c0_0] : memref<64x2048xbf16, #tpu.memory_space<vmem>>, vector<64x2048xbf16>
    %c0_1 = arith.constant 0 : index
    %c0_2 = arith.constant 0 : index
    %1 = vector.load %arg2[%c0_1, %c0_2] : memref<2048x256xbf16, #tpu.memory_space<vmem>>, vector<2048x256xbf16>
    %cst = arith.constant dense<0.000000e+00> : vector<64x256xf32>
    %2 = tpu.matmul %0, %1, %cst {dimension_numbers = #tpu.dot_dimension_numbers<[1], [0], [0], [1], [0, 0, 1, 1], [], []>} : vector<64x2048xbf16>, vector<2048x256xbf16>, vector<64x256xf32> -> vector<64x256xf32>
    %c0_3 = arith.constant 0 : index
    %c0_4 = arith.constant 0 : index
    %3 = vector.load %arg3[%c0_3, %c0_4] : memref<1x256xf32, #tpu.memory_space<vmem>>, vector<1x256xf32>
    %4 = vector.broadcast %3 : vector<1x256xf32> to vector<64x256xf32>
    %5 = arith.addf %2, %4 : vector<64x256xf32>
    %cst_5 = arith.constant 0.000000e+00 : f32
    %6 = vector.broadcast %cst_5 : f32 to vector<64x256xf32>
    %7 = arith.cmpf ogt, %5, %6 : vector<64x256xf32>
    %cst_6 = arith.constant 1.000000e-01 : f32
    %8 = vector.broadcast %cst_6 : f32 to vector<64x256xf32>
    %9 = arith.mulf %8, %5 : vector<64x256xf32>
    %10 = arith.select %7, %5, %9 : vector<64x256xi1>, vector<64x256xf32>
    %c0_7 = arith.constant 0 : index
    %c0_8 = arith.constant 0 : index
    %11 = vector.load %arg4[%c0_7, %c0_8] : memref<64x256xf32, #tpu.memory_space<vmem>>, vector<64x256xf32>
    tpu.vector_store %arg4[%c0_7, %c0_8], %10 {strides = array<i32>} : memref<64x256xf32, #tpu.memory_space<vmem>>, vector<64x256xf32>,
    return
  }
  func.func @transform_0(%arg0: i32) -> (i32, i32) {
    %c0_i32 = arith.constant 0 : i32
    %c0_i32_0 = arith.constant 0 : i32
    return %arg0, %c0_i32 : i32, i32
  }
  func.func @transform_1(%arg0: i32) -> (i32, i32) {
    %c0_i32 = arith.constant 0 : i32
    %c0_i32_0 = arith.constant 0 : i32
    %c0_i32_1 = arith.constant 0 : i32
    return %c0_i32, %c0_i32_0 : i32, i32
  }
  func.func @transform_2(%arg0: i32) -> (i32, i32) {
    %c0_i32 = arith.constant 0 : i32
    %c0_i32_0 = arith.constant 0 : i32
    %c0_i32_1 = arith.constant 0 : i32
    return %c0_i32, %c0_i32_0 : i32, i32
  }
  func.func @transform_3(%arg0: i32) -> (i32, i32) {
    %c0_i32 = arith.constant 0 : i32
    %c0_i32_0 = arith.constant 0 : i32
    return %arg0, %c0_i32 : i32, i32
  }
}

module attributes {stable_mosaic.version = 11 : i64} {
  func.func @_self_attn_kernel(%arg0: i32, %arg1: memref<1x64x256xf32, #tpu.memory_space<vmem>>, %arg2: memref<256x32xbf16, #tpu.memory_space<vmem>>, %arg3: memref<1x32xf32, #tpu.memory_space<vmem>>, %arg4: memref<256x32xbf16, #tpu.memory_space<vmem>>, %arg5: memref<1x32xf32, #tpu.memory_space<vmem>>, %arg6: memref<256x256xbf16, #tpu.memory_space<vmem>>, %arg7: memref<1x256xf32, #tpu.memory_space<vmem>>, %arg8: memref<1xf32, #tpu.memory_space<smem>>, %arg9: memref<1x64x256xf32, #tpu.memory_space<vmem>>) attributes {dimension_semantics = [#tpu.dimension_semantics<parallel>], iteration_bounds = array<i64: 2>, scalar_prefetch = 0 : i64, scratch_operands = 0 : i64, tpu.core_type = #tpu.core_type<tc>, window_params = [{transform_indices = @transform_0, window_bounds = array<i64: 1, 64, 256>}, {pipeline_mode = #tpu.pipeline_mode<synchronous>, transform_indices = @transform_1, window_bounds = array<i64: 256, 32>}, {pipeline_mode = #tpu.pipeline_mode<synchronous>, transform_indices = @transform_2, window_bounds = array<i64: 1, 32>}, {pipeline_mode = #tpu.pipeline_mode<synchronous>, transform_indices = @transform_3, window_bounds = array<i64: 256, 32>}, {pipeline_mode = #tpu.pipeline_mode<synchronous>, transform_indices = @transform_4, window_bounds = array<i64: 1, 32>}, {pipeline_mode = #tpu.pipeline_mode<synchronous>, transform_indices = @transform_5, window_bounds = array<i64: 256, 256>}, {pipeline_mode = #tpu.pipeline_mode<synchronous>, transform_indices = @transform_6, window_bounds = array<i64: 1, 256>}, {transform_indices = @transform_7, window_bounds = array<i64: 1>}, {transform_indices = @transform_8, window_bounds = array<i64: 1, 64, 256>}]} {
    %c0 = arith.constant 0 : index
    %c0_0 = arith.constant 0 : index
    %c0_1 = arith.constant 0 : index
    %0 = vector.load %arg1[%c0, %c0_0, %c0_1] : memref<1x64x256xf32, #tpu.memory_space<vmem>>, vector<1x64x256xf32>
    %1 = vector.shape_cast %0 : vector<1x64x256xf32> to vector<64x256xf32>
    %2 = arith.truncf %1 : vector<64x256xf32> to vector<64x256xbf16>
    %c0_2 = arith.constant 0 : index
    %c0_3 = arith.constant 0 : index
    %3 = vector.load %arg2[%c0_2, %c0_3] : memref<256x32xbf16, #tpu.memory_space<vmem>>, vector<256x32xbf16>
    %cst = arith.constant dense<0.000000e+00> : vector<64x32xf32>
    %4 = tpu.matmul %2, %3, %cst {dimension_numbers = #tpu.dot_dimension_numbers<[1], [0], [0], [1], [0, 0, 1, 1], [], []>} : vector<64x256xbf16>, vector<256x32xbf16>, vector<64x32xf32> -> vector<64x32xf32>
    %c0_4 = arith.constant 0 : index
    %c0_5 = arith.constant 0 : index
    %5 = vector.load %arg3[%c0_4, %c0_5] : memref<1x32xf32, #tpu.memory_space<vmem>>, vector<1x32xf32>
    %6 = vector.broadcast %5 : vector<1x32xf32> to vector<64x32xf32>
    %7 = arith.addf %4, %6 : vector<64x32xf32>
    %c0_6 = arith.constant 0 : index
    %c0_7 = arith.constant 0 : index
    %8 = vector.load %arg4[%c0_6, %c0_7] : memref<256x32xbf16, #tpu.memory_space<vmem>>, vector<256x32xbf16>
    %cst_8 = arith.constant dense<0.000000e+00> : vector<64x32xf32>
    %9 = tpu.matmul %2, %8, %cst_8 {dimension_numbers = #tpu.dot_dimension_numbers<[1], [0], [0], [1], [0, 0, 1, 1], [], []>} : vector<64x256xbf16>, vector<256x32xbf16>, vector<64x32xf32> -> vector<64x32xf32>
    %c0_9 = arith.constant 0 : index
    %c0_10 = arith.constant 0 : index
    %10 = vector.load %arg5[%c0_9, %c0_10] : memref<1x32xf32, #tpu.memory_space<vmem>>, vector<1x32xf32>
    %11 = vector.broadcast %10 : vector<1x32xf32> to vector<64x32xf32>
    %12 = arith.addf %9, %11 : vector<64x32xf32>
    %c0_11 = arith.constant 0 : index
    %c0_12 = arith.constant 0 : index
    %13 = vector.load %arg6[%c0_11, %c0_12] : memref<256x256xbf16, #tpu.memory_space<vmem>>, vector<256x256xbf16>
    %cst_13 = arith.constant dense<0.000000e+00> : vector<64x256xf32>
    %14 = tpu.matmul %2, %13, %cst_13 {dimension_numbers = #tpu.dot_dimension_numbers<[1], [0], [0], [1], [0, 0, 1, 1], [], []>} : vector<64x256xbf16>, vector<256x256xbf16>, vector<64x256xf32> -> vector<64x256xf32>
    %c0_14 = arith.constant 0 : index
    %c0_15 = arith.constant 0 : index
    %15 = vector.load %arg7[%c0_14, %c0_15] : memref<1x256xf32, #tpu.memory_space<vmem>>, vector<1x256xf32>
    %16 = vector.broadcast %15 : vector<1x256xf32> to vector<64x256xf32>
    %17 = arith.addf %14, %16 : vector<64x256xf32>
    %cst_16 = arith.constant dense<0.000000e+00> : vector<64x64xf32>
    %18 = tpu.matmul %7, %12, %cst_16 {dimension_numbers = #tpu.dot_dimension_numbers<[1], [1], [0], [0], [0, 0, 1, 0], [], []>} : vector<64x32xf32>, vector<64x32xf32>, vector<64x64xf32> -> vector<64x64xf32>
    %cst_17 = arith.constant dense<0xFF800000> : vector<64xf32>
    %19 = vector.multi_reduction <maximumf>, %18, %cst_17 [1] : vector<64x64xf32> to vector<64xf32>
    %20 = vector.shape_cast %19 : vector<64xf32> to vector<64x1xf32>
    %21 = vector.broadcast %20 : vector<64x1xf32> to vector<64x64xf32>
    %22 = arith.subf %18, %21 : vector<64x64xf32>
    %23 = math.exp %22 : vector<64x64xf32>
    %cst_18 = arith.constant dense<0.000000e+00> : vector<64xf32>
    %24 = vector.multi_reduction <add>, %23, %cst_18 [1] : vector<64x64xf32> to vector<64xf32>
    %25 = vector.shape_cast %24 : vector<64xf32> to vector<64x1xf32>
    %26 = tpu.reciprocal %25 {approx = true} : vector<64x1xf32> -> vector<64x1xf32>
    %27 = vector.broadcast %26 : vector<64x1xf32> to vector<64x64xf32>
    %28 = arith.mulf %23, %27 : vector<64x64xf32>
    %cst_19 = arith.constant dense<0.000000e+00> : vector<64x256xf32>
    %29 = tpu.matmul %28, %17, %cst_19 {dimension_numbers = #tpu.dot_dimension_numbers<[1], [0], [0], [1], [0, 0, 1, 1], [], []>} : vector<64x64xf32>, vector<64x256xf32>, vector<64x256xf32> -> vector<64x256xf32>
    %c0_20 = arith.constant 0 : index
    %30 = memref.load %arg8[%c0_20] : memref<1xf32, #tpu.memory_space<smem>>
    %31 = vector.broadcast %30 : f32 to vector<64x256xf32>
    %32 = arith.mulf %31, %29 : vector<64x256xf32>
    %33 = arith.addf %32, %1 : vector<64x256xf32>
    %c0_21 = arith.constant 0 : index
    %c0_22 = arith.constant 0 : index
    %c0_23 = arith.constant 0 : index
    %34 = vector.load %arg9[%c0_21, %c0_22, %c0_23] : memref<1x64x256xf32, #tpu.memory_space<vmem>>, vector<1x64x256xf32>
    %35 = vector.shape_cast %34 : vector<1x64x256xf32> to vector<64x256xf32>
    %36 = vector.shape_cast %33 : vector<64x256xf32> to vector<1x64x256xf32>
    tpu.vector_store %arg9[%c0_21, %c0_22, %c0_23], %36 {strides = array<i32>} : memref<1x64x256xf32, #tpu.memory_space<vmem>>, vector<1x64x256xf32>,
    return
  }
  func.func @transform_0(%arg0: i32) -> (i32, i32, i32) {
    %c0_i32 = arith.constant 0 : i32
    %c0_i32_0 = arith.constant 0 : i32
    %c0_i32_1 = arith.constant 0 : i32
    return %arg0, %c0_i32, %c0_i32_0 : i32, i32, i32
  }
  func.func @transform_1(%arg0: i32) -> (i32, i32) {
    %c0_i32 = arith.constant 0 : i32
    %c0_i32_0 = arith.constant 0 : i32
    %c0_i32_1 = arith.constant 0 : i32
    return %c0_i32, %c0_i32_0 : i32, i32
  }
  func.func @transform_2(%arg0: i32) -> (i32, i32) {
    %c0_i32 = arith.constant 0 : i32
    %c0_i32_0 = arith.constant 0 : i32
    %c0_i32_1 = arith.constant 0 : i32
    return %c0_i32, %c0_i32_0 : i32, i32
  }
  func.func @transform_3(%arg0: i32) -> (i32, i32) {
    %c0_i32 = arith.constant 0 : i32
    %c0_i32_0 = arith.constant 0 : i32
    %c0_i32_1 = arith.constant 0 : i32
    return %c0_i32, %c0_i32_0 : i32, i32
  }
  func.func @transform_4(%arg0: i32) -> (i32, i32) {
    %c0_i32 = arith.constant 0 : i32
    %c0_i32_0 = arith.constant 0 : i32
    %c0_i32_1 = arith.constant 0 : i32
    return %c0_i32, %c0_i32_0 : i32, i32
  }
  func.func @transform_5(%arg0: i32) -> (i32, i32) {
    %c0_i32 = arith.constant 0 : i32
    %c0_i32_0 = arith.constant 0 : i32
    %c0_i32_1 = arith.constant 0 : i32
    return %c0_i32, %c0_i32_0 : i32, i32
  }
  func.func @transform_6(%arg0: i32) -> (i32, i32) {
    %c0_i32 = arith.constant 0 : i32
    %c0_i32_0 = arith.constant 0 : i32
    %c0_i32_1 = arith.constant 0 : i32
    return %c0_i32, %c0_i32_0 : i32, i32
  }
  func.func @transform_7(%arg0: i32) -> i32 {
    %c0_i32 = arith.constant 0 : i32
    %c0_i32_0 = arith.constant 0 : i32
    return %c0_i32 : i32
  }
  func.func @transform_8(%arg0: i32) -> (i32, i32, i32) {
    %c0_i32 = arith.constant 0 : i32
    %c0_i32_0 = arith.constant 0 : i32
    %c0_i32_1 = arith.constant 0 : i32
    return %arg0, %c0_i32, %c0_i32_0 : i32, i32, i32
  }
}

module attributes {stable_mosaic.version = 11 : i64} {
  func.func @_conv_mm_kernel(%arg0: i32, %arg1: memref<16x4096xbf16, #tpu.memory_space<vmem>>, %arg2: memref<4096x512xbf16, #tpu.memory_space<vmem>>, %arg3: memref<1x512xf32, #tpu.memory_space<vmem>>, %arg4: memref<16x512xf32, #tpu.memory_space<vmem>>) attributes {dimension_semantics = [#tpu.dimension_semantics<parallel>], iteration_bounds = array<i64: 2>, scalar_prefetch = 0 : i64, scratch_operands = 0 : i64, tpu.core_type = #tpu.core_type<tc>, window_params = [{transform_indices = @transform_0, window_bounds = array<i64: 16, 4096>}, {pipeline_mode = #tpu.pipeline_mode<synchronous>, transform_indices = @transform_1, window_bounds = array<i64: 4096, 512>}, {pipeline_mode = #tpu.pipeline_mode<synchronous>, transform_indices = @transform_2, window_bounds = array<i64: 1, 512>}, {transform_indices = @transform_3, window_bounds = array<i64: 16, 512>}]} {
    %c0 = arith.constant 0 : index
    %c0_0 = arith.constant 0 : index
    %0 = vector.load %arg1[%c0, %c0_0] : memref<16x4096xbf16, #tpu.memory_space<vmem>>, vector<16x4096xbf16>
    %c0_1 = arith.constant 0 : index
    %c0_2 = arith.constant 0 : index
    %1 = vector.load %arg2[%c0_1, %c0_2] : memref<4096x512xbf16, #tpu.memory_space<vmem>>, vector<4096x512xbf16>
    %cst = arith.constant dense<0.000000e+00> : vector<16x512xf32>
    %2 = tpu.matmul %0, %1, %cst {dimension_numbers = #tpu.dot_dimension_numbers<[1], [0], [0], [1], [0, 0, 1, 1], [], []>} : vector<16x4096xbf16>, vector<4096x512xbf16>, vector<16x512xf32> -> vector<16x512xf32>
    %c0_3 = arith.constant 0 : index
    %c0_4 = arith.constant 0 : index
    %3 = vector.load %arg3[%c0_3, %c0_4] : memref<1x512xf32, #tpu.memory_space<vmem>>, vector<1x512xf32>
    %4 = vector.broadcast %3 : vector<1x512xf32> to vector<16x512xf32>
    %5 = arith.addf %2, %4 : vector<16x512xf32>
    %cst_5 = arith.constant 0.000000e+00 : f32
    %6 = vector.broadcast %cst_5 : f32 to vector<16x512xf32>
    %7 = arith.cmpf ogt, %5, %6 : vector<16x512xf32>
    %cst_6 = arith.constant 1.000000e-01 : f32
    %8 = vector.broadcast %cst_6 : f32 to vector<16x512xf32>
    %9 = arith.mulf %8, %5 : vector<16x512xf32>
    %10 = arith.select %7, %5, %9 : vector<16x512xi1>, vector<16x512xf32>
    %c0_7 = arith.constant 0 : index
    %c0_8 = arith.constant 0 : index
    %11 = vector.load %arg4[%c0_7, %c0_8] : memref<16x512xf32, #tpu.memory_space<vmem>>, vector<16x512xf32>
    tpu.vector_store %arg4[%c0_7, %c0_8], %10 {strides = array<i32>} : memref<16x512xf32, #tpu.memory_space<vmem>>, vector<16x512xf32>,
    return
  }
  func.func @transform_0(%arg0: i32) -> (i32, i32) {
    %c0_i32 = arith.constant 0 : i32
    %c0_i32_0 = arith.constant 0 : i32
    return %arg0, %c0_i32 : i32, i32
  }
  func.func @transform_1(%arg0: i32) -> (i32, i32) {
    %c0_i32 = arith.constant 0 : i32
    %c0_i32_0 = arith.constant 0 : i32
    %c0_i32_1 = arith.constant 0 : i32
    return %c0_i32, %c0_i32_0 : i32, i32
  }
  func.func @transform_2(%arg0: i32) -> (i32, i32) {
    %c0_i32 = arith.constant 0 : i32
    %c0_i32_0 = arith.constant 0 : i32
    %c0_i32_1 = arith.constant 0 : i32
    return %c0_i32, %c0_i32_0 : i32, i32
  }
  func.func @transform_3(%arg0: i32) -> (i32, i32) {
    %c0_i32 = arith.constant 0 : i32
    %c0_i32_0 = arith.constant 0 : i32
    return %arg0, %c0_i32 : i32, i32
  }
}

module attributes {stable_mosaic.version = 11 : i64} {
  func.func @_self_attn_kernel(%arg0: i32, %arg1: memref<1x16x512xf32, #tpu.memory_space<vmem>>, %arg2: memref<512x64xbf16, #tpu.memory_space<vmem>>, %arg3: memref<1x64xf32, #tpu.memory_space<vmem>>, %arg4: memref<512x64xbf16, #tpu.memory_space<vmem>>, %arg5: memref<1x64xf32, #tpu.memory_space<vmem>>, %arg6: memref<512x512xbf16, #tpu.memory_space<vmem>>, %arg7: memref<1x512xf32, #tpu.memory_space<vmem>>, %arg8: memref<1xf32, #tpu.memory_space<smem>>, %arg9: memref<1x16x512xf32, #tpu.memory_space<vmem>>) attributes {dimension_semantics = [#tpu.dimension_semantics<parallel>], iteration_bounds = array<i64: 2>, scalar_prefetch = 0 : i64, scratch_operands = 0 : i64, tpu.core_type = #tpu.core_type<tc>, window_params = [{transform_indices = @transform_0, window_bounds = array<i64: 1, 16, 512>}, {pipeline_mode = #tpu.pipeline_mode<synchronous>, transform_indices = @transform_1, window_bounds = array<i64: 512, 64>}, {pipeline_mode = #tpu.pipeline_mode<synchronous>, transform_indices = @transform_2, window_bounds = array<i64: 1, 64>}, {pipeline_mode = #tpu.pipeline_mode<synchronous>, transform_indices = @transform_3, window_bounds = array<i64: 512, 64>}, {pipeline_mode = #tpu.pipeline_mode<synchronous>, transform_indices = @transform_4, window_bounds = array<i64: 1, 64>}, {pipeline_mode = #tpu.pipeline_mode<synchronous>, transform_indices = @transform_5, window_bounds = array<i64: 512, 512>}, {pipeline_mode = #tpu.pipeline_mode<synchronous>, transform_indices = @transform_6, window_bounds = array<i64: 1, 512>}, {transform_indices = @transform_7, window_bounds = array<i64: 1>}, {transform_indices = @transform_8, window_bounds = array<i64: 1, 16, 512>}]} {
    %c0 = arith.constant 0 : index
    %c0_0 = arith.constant 0 : index
    %c0_1 = arith.constant 0 : index
    %0 = vector.load %arg1[%c0, %c0_0, %c0_1] : memref<1x16x512xf32, #tpu.memory_space<vmem>>, vector<1x16x512xf32>
    %1 = vector.shape_cast %0 : vector<1x16x512xf32> to vector<16x512xf32>
    %2 = arith.truncf %1 : vector<16x512xf32> to vector<16x512xbf16>
    %c0_2 = arith.constant 0 : index
    %c0_3 = arith.constant 0 : index
    %3 = vector.load %arg2[%c0_2, %c0_3] : memref<512x64xbf16, #tpu.memory_space<vmem>>, vector<512x64xbf16>
    %cst = arith.constant dense<0.000000e+00> : vector<16x64xf32>
    %4 = tpu.matmul %2, %3, %cst {dimension_numbers = #tpu.dot_dimension_numbers<[1], [0], [0], [1], [0, 0, 1, 1], [], []>} : vector<16x512xbf16>, vector<512x64xbf16>, vector<16x64xf32> -> vector<16x64xf32>
    %c0_4 = arith.constant 0 : index
    %c0_5 = arith.constant 0 : index
    %5 = vector.load %arg3[%c0_4, %c0_5] : memref<1x64xf32, #tpu.memory_space<vmem>>, vector<1x64xf32>
    %6 = vector.broadcast %5 : vector<1x64xf32> to vector<16x64xf32>
    %7 = arith.addf %4, %6 : vector<16x64xf32>
    %c0_6 = arith.constant 0 : index
    %c0_7 = arith.constant 0 : index
    %8 = vector.load %arg4[%c0_6, %c0_7] : memref<512x64xbf16, #tpu.memory_space<vmem>>, vector<512x64xbf16>
    %cst_8 = arith.constant dense<0.000000e+00> : vector<16x64xf32>
    %9 = tpu.matmul %2, %8, %cst_8 {dimension_numbers = #tpu.dot_dimension_numbers<[1], [0], [0], [1], [0, 0, 1, 1], [], []>} : vector<16x512xbf16>, vector<512x64xbf16>, vector<16x64xf32> -> vector<16x64xf32>
    %c0_9 = arith.constant 0 : index
    %c0_10 = arith.constant 0 : index
    %10 = vector.load %arg5[%c0_9, %c0_10] : memref<1x64xf32, #tpu.memory_space<vmem>>, vector<1x64xf32>
    %11 = vector.broadcast %10 : vector<1x64xf32> to vector<16x64xf32>
    %12 = arith.addf %9, %11 : vector<16x64xf32>
    %c0_11 = arith.constant 0 : index
    %c0_12 = arith.constant 0 : index
    %13 = vector.load %arg6[%c0_11, %c0_12] : memref<512x512xbf16, #tpu.memory_space<vmem>>, vector<512x512xbf16>
    %cst_13 = arith.constant dense<0.000000e+00> : vector<16x512xf32>
    %14 = tpu.matmul %2, %13, %cst_13 {dimension_numbers = #tpu.dot_dimension_numbers<[1], [0], [0], [1], [0, 0, 1, 1], [], []>} : vector<16x512xbf16>, vector<512x512xbf16>, vector<16x512xf32> -> vector<16x512xf32>
    %c0_14 = arith.constant 0 : index
    %c0_15 = arith.constant 0 : index
    %15 = vector.load %arg7[%c0_14, %c0_15] : memref<1x512xf32, #tpu.memory_space<vmem>>, vector<1x512xf32>
    %16 = vector.broadcast %15 : vector<1x512xf32> to vector<16x512xf32>
    %17 = arith.addf %14, %16 : vector<16x512xf32>
    %cst_16 = arith.constant dense<0.000000e+00> : vector<16x16xf32>
    %18 = tpu.matmul %7, %12, %cst_16 {dimension_numbers = #tpu.dot_dimension_numbers<[1], [1], [0], [0], [0, 0, 1, 0], [], []>} : vector<16x64xf32>, vector<16x64xf32>, vector<16x16xf32> -> vector<16x16xf32>
    %cst_17 = arith.constant dense<0xFF800000> : vector<16xf32>
    %19 = vector.multi_reduction <maximumf>, %18, %cst_17 [1] : vector<16x16xf32> to vector<16xf32>
    %20 = vector.shape_cast %19 : vector<16xf32> to vector<16x1xf32>
    %21 = vector.broadcast %20 : vector<16x1xf32> to vector<16x16xf32>
    %22 = arith.subf %18, %21 : vector<16x16xf32>
    %23 = math.exp %22 : vector<16x16xf32>
    %cst_18 = arith.constant dense<0.000000e+00> : vector<16xf32>
    %24 = vector.multi_reduction <add>, %23, %cst_18 [1] : vector<16x16xf32> to vector<16xf32>
    %25 = vector.shape_cast %24 : vector<16xf32> to vector<16x1xf32>
    %26 = tpu.reciprocal %25 {approx = true} : vector<16x1xf32> -> vector<16x1xf32>
    %27 = vector.broadcast %26 : vector<16x1xf32> to vector<16x16xf32>
    %28 = arith.mulf %23, %27 : vector<16x16xf32>
    %cst_19 = arith.constant dense<0.000000e+00> : vector<16x512xf32>
    %29 = tpu.matmul %28, %17, %cst_19 {dimension_numbers = #tpu.dot_dimension_numbers<[1], [0], [0], [1], [0, 0, 1, 1], [], []>} : vector<16x16xf32>, vector<16x512xf32>, vector<16x512xf32> -> vector<16x512xf32>
    %c0_20 = arith.constant 0 : index
    %30 = memref.load %arg8[%c0_20] : memref<1xf32, #tpu.memory_space<smem>>
    %31 = vector.broadcast %30 : f32 to vector<16x512xf32>
    %32 = arith.mulf %31, %29 : vector<16x512xf32>
    %33 = arith.addf %32, %1 : vector<16x512xf32>
    %c0_21 = arith.constant 0 : index
    %c0_22 = arith.constant 0 : index
    %c0_23 = arith.constant 0 : index
    %34 = vector.load %arg9[%c0_21, %c0_22, %c0_23] : memref<1x16x512xf32, #tpu.memory_space<vmem>>, vector<1x16x512xf32>
    %35 = vector.shape_cast %34 : vector<1x16x512xf32> to vector<16x512xf32>
    %36 = vector.shape_cast %33 : vector<16x512xf32> to vector<1x16x512xf32>
    tpu.vector_store %arg9[%c0_21, %c0_22, %c0_23], %36 {strides = array<i32>} : memref<1x16x512xf32, #tpu.memory_space<vmem>>, vector<1x16x512xf32>,
    return
  }
  func.func @transform_0(%arg0: i32) -> (i32, i32, i32) {
    %c0_i32 = arith.constant 0 : i32
    %c0_i32_0 = arith.constant 0 : i32
    %c0_i32_1 = arith.constant 0 : i32
    return %arg0, %c0_i32, %c0_i32_0 : i32, i32, i32
  }
  func.func @transform_1(%arg0: i32) -> (i32, i32) {
    %c0_i32 = arith.constant 0 : i32
    %c0_i32_0 = arith.constant 0 : i32
    %c0_i32_1 = arith.constant 0 : i32
    return %c0_i32, %c0_i32_0 : i32, i32
  }
  func.func @transform_2(%arg0: i32) -> (i32, i32) {
    %c0_i32 = arith.constant 0 : i32
    %c0_i32_0 = arith.constant 0 : i32
    %c0_i32_1 = arith.constant 0 : i32
    return %c0_i32, %c0_i32_0 : i32, i32
  }
  func.func @transform_3(%arg0: i32) -> (i32, i32) {
    %c0_i32 = arith.constant 0 : i32
    %c0_i32_0 = arith.constant 0 : i32
    %c0_i32_1 = arith.constant 0 : i32
    return %c0_i32, %c0_i32_0 : i32, i32
  }
  func.func @transform_4(%arg0: i32) -> (i32, i32) {
    %c0_i32 = arith.constant 0 : i32
    %c0_i32_0 = arith.constant 0 : i32
    %c0_i32_1 = arith.constant 0 : i32
    return %c0_i32, %c0_i32_0 : i32, i32
  }
  func.func @transform_5(%arg0: i32) -> (i32, i32) {
    %c0_i32 = arith.constant 0 : i32
    %c0_i32_0 = arith.constant 0 : i32
    %c0_i32_1 = arith.constant 0 : i32
    return %c0_i32, %c0_i32_0 : i32, i32
  }
  func.func @transform_6(%arg0: i32) -> (i32, i32) {
    %c0_i32 = arith.constant 0 : i32
    %c0_i32_0 = arith.constant 0 : i32
    %c0_i32_1 = arith.constant 0 : i32
    return %c0_i32, %c0_i32_0 : i32, i32
  }
  func.func @transform_7(%arg0: i32) -> i32 {
    %c0_i32 = arith.constant 0 : i32
    %c0_i32_0 = arith.constant 0 : i32
    return %c0_i32 : i32
  }
  func.func @transform_8(%arg0: i32) -> (i32, i32, i32) {
    %c0_i32 = arith.constant 0 : i32
    %c0_i32_0 = arith.constant 0 : i32
    %c0_i32_1 = arith.constant 0 : i32
    return %arg0, %c0_i32, %c0_i32_0 : i32, i32, i32
  }
}

</mosaic_0001>

<bundles_post_ra>
// kernel: discriminator_forward.6
= control target key start
LH: loop header
LB: loop body
LE: loop exit
PB: predicated region body
PF: predicated region fallthrough
CT: control target
= control target key end

     0   :  { %s2415_s12 = smov 0   ;;  %s2971_s0 = inlined_call_operand.vmem [shape: bf16[2048,48], index: 0, kind: input, shape index: {}]   ;;  %s2972_s1 = inlined_call_operand.vmem [shape: bf16[48,64], index: 1, kind: input, shape index: {}]   ;;  %s2973_s2 = inlined_call_operand.vmem [shape: f32[1,64], index: 2, kind: input, shape index: {}]   ;;  %s2974_s3 = inlined_call_operand.vmem [shape: f32[2048,64], index: 3, kind: output, shape index: {}]  }
   0x1 LB: > { %s1961_s13 = sadd.s32 4294967295, %s2393_s12   ;;  %p1965_p0 = scmp.ge.s32.totalorder %s2393_s12, 1  ;;  %s2393_s12 = sphi %s2415_s12, %s13_s12  }
   0x2   : > { %p138_p1 = scmp.lt.s32.totalorder %s2393_s12, 3 }
   0x4   : > { %p139_p2 = pnand %p1965_p0, %p138_p1 }
   0x5   : > { %v2319_v0 = vld [vmem:[%s2972_s1] sm:$0xff] (!%p139_p2)   ;;  %s1966_s16 = sshll.u32 (!%p139_p2), %s1961_s13, 7  ;;  %v2320_v1 = vld [vmem:[%s2972_s1 + $0x8] sm:$0xff] (!%p139_p2)   ;;  %v2321_v2 = vld [vmem:[%s2972_s1 + $0x10] sm:$0xff] (!%p139_p2)   ;;  %vm654_vm0 = vcmask (!%p139_p2), 392192   ;;  %vm1776_vm1 = vcmask (!%p139_p2), 523264  }
   0x6   : > { %142 = sbr.rel (%p139_p2) target bundleno = 364 (0x16c), region = 32  ;;  %p163_p3 = scmp.lt.s32.totalorder (!%p139_p2), %s1966_s16, 255  ;;  %2171 = vmatprep.subr.bf16.mxu0 (!%p139_p2), %v2319_v0  ;;  %2305 = vmatprep.subr.bf16.mxu1 (!%p139_p2), %v2319_v0 }
   0x7   : > { %2172 = vmatpush3.bf16.msra.mxu0 (!%p139_p2), %v2319_v0  ;;  %2308 = vmatpush3.bf16.msra.mxu1 (!%p139_p2), %v2319_v0 }
   0x8   : > { %2173 = vmatprep.subr.bf16.mxu0 (!%p139_p2), %v2320_v1  ;;  %2306 = vmatprep.subr.bf16.mxu1 (!%p139_p2), %v2320_v1 }
   0xb   : > { %2174 = vmatpush3.bf16.msra.mxu0 (!%p139_p2), %v2320_v1  ;;  %2309 = vmatpush3.bf16.msra.mxu1 (!%p139_p2), %v2320_v1 }
   0xc   : > { %2175 = vmatprep.subr.bf16.mxu0 (!%p139_p2), %v2321_v2  ;;  %2307 = vmatprep.subr.bf16.mxu1 (!%p139_p2), %v2321_v2 }
   0xd   : > { %s2976_s16 = smov (!%p163_p3, %s1966_s16), 255 }
   0xe   : > { %s1967_s21 = sshll.u32 %s2976_s16, 2  ;;  %s1969_s27 = sshll.u32 %s2976_s16, 3 }
   0xf   : > { %s2438_s24 = scalar_lea.vmem %s2971_s0, %s1967_s21  ;;  %2176 = vmatpush3.bf16.msra.mxu0 %v2321_v2  ;;  %2310 = vmatpush3.bf16.msra.mxu1 %v2321_v2  ;;  %s2581_s30 = scalar_lea.vmem %s2974_s3, %s1969_s27 }
  0x10   : > { %v2322_v3 = vld [vmem:[%s2438_s24] sm:$0xff]   ;;  %v2324_v5 = vld [vmem:[%s2438_s24 + $0x8] sm:$0xff]   ;;  %v2326_v7 = vld [vmem:[%s2438_s24 + $0x10] sm:$0xff]  }
  0x11   : > { %v2323_v4 = vld [vmem:[%s2438_s24 + $0x100] sm:$0xff]   ;;  %2177 = vmatprep.mubr.msk.bf16.mxu0 %vm654_vm0, %v2322_v3  ;;  %v2325_v6 = vld [vmem:[%s2438_s24 + $0x108] sm:$0xff]   ;;  %v2327_v8 = vld [vmem:[%s2438_s24 + $0x110] sm:$0xff]  }
  0x12   : > { %2241 = vmatprep.mubr.msk.bf16.mxu1 %vm654_vm0, %v2323_v4  ;;  %2178 = vmatmul.mubr.msk.bf16.vlgmr.msra.gmra.mrb[0].mxu0 %vm654_vm0, %v2324_v5  ;;  %v2328_v9 = vld [vmem:[%s2438_s24 + $0x18] sm:$0xff]   ;;  %v2330_v11 = vld [vmem:[%s2438_s24 + $0x20] sm:$0xff]   ;;  %v2332_v13 = vld [vmem:[%s2438_s24 + $0x28] sm:$0xff]  }
  0x13   : > { %2242 = vmatmul.mubr.msk.bf16.vlgmr.msra.gmra.mrb[0].mxu1 %vm654_vm0, %v2325_v6  ;;  %2181 = vmatprep.mubr.msk.bf16.mxu0 %vm654_vm0, %v2326_v7  ;;  %v2329_v10 = vld [vmem:[%s2438_s24 + $0x118] sm:$0xff]   ;;  %v2331_v12 = vld [vmem:[%s2438_s24 + $0x120] sm:$0xff]   ;;  %v2333_v14 = vld [vmem:[%s2438_s24 + $0x128] sm:$0xff]  }
  0x14   : > { %2245 = vmatprep.mubr.msk.bf16.mxu1 %vm654_vm0, %v2327_v8  ;;  %v2334_v15 = vld [vmem:[%s2438_s24 + $0x30] sm:$0xff]   ;;  %v2336_v17 = vld [vmem:[%s2438_s24 + $0x38] sm:$0xff]   ;;  %v2338_v19 = vld [vmem:[%s2438_s24 + $0x40] sm:$0xff]  }
  0x15   : > { %v2335_v16 = vld [vmem:[%s2438_s24 + $0x130] sm:$0xff]   ;;  %v2337_v18 = vld [vmem:[%s2438_s24 + $0x138] sm:$0xff]   ;;  %v2339_v20 = vld [vmem:[%s2438_s24 + $0x140] sm:$0xff]  }
  0x16   : > { %v2340_v21 = vld [vmem:[%s2438_s24 + $0x48] sm:$0xff]   ;;  %v2342_v23 = vld [vmem:[%s2438_s24 + $0x50] sm:$0xff]   ;;  %v2344_v25 = vld [vmem:[%s2438_s24 + $0x58] sm:$0xff]  }
  0x17   : > { %v2341_v22 = vld [vmem:[%s2438_s24 + $0x148] sm:$0xff]   ;;  %v2343_v24 = vld [vmem:[%s2438_s24 + $0x150] sm:$0xff]   ;;  %v2345_v26 = vld [vmem:[%s2438_s24 + $0x158] sm:$0xff]  }
  0x18   : > { %v2346_v27 = vld [vmem:[%s2438_s24 + $0x60] sm:$0xff]   ;;  %v2348_v29 = vld [vmem:[%s2438_s24 + $0x68] sm:$0xff]   ;;  %v2350_v31 = vld [vmem:[%s2438_s24 + $0x70] sm:$0xff]  }
  0x19   : > { %v2347_v28 = vld [vmem:[%s2438_s24 + $0x160] sm:$0xff]   ;;  %v2349_v30 = vld [vmem:[%s2438_s24 + $0x168] sm:$0xff]   ;;  %v2351_v32 = vld [vmem:[%s2438_s24 + $0x170] sm:$0xff]  }
  0x1a   : > { %2182 = vmatmul.mubr.msk.bf16.gmra.mrb[4].mxu0 %vm654_vm0, %v2328_v9  ;;  %v2352_v33 = vld [vmem:[%s2438_s24 + $0x78] sm:$0xff]   ;;  %v2354_v35 = vld [vmem:[%s2438_s24 + $0x80] sm:$0xff]   ;;  %v2356_v37 = vld [vmem:[%s2438_s24 + $0x88] sm:$0xff]  }
  0x1b   : > { %2246 = vmatmul.mubr.msk.bf16.gmra.mrb[4].mxu1 %vm654_vm0, %v2329_v10  ;;  %2185 = vmatprep.mubr.msk.bf16.mxu0 %vm654_vm0, %v2330_v11  ;;  %v2353_v34 = vld [vmem:[%s2438_s24 + $0x178] sm:$0xff]   ;;  %v2355_v36 = vld [vmem:[%s2438_s24 + $0x180] sm:$0xff]   ;;  %v2357_v38 = vld [vmem:[%s2438_s24 + $0x188] sm:$0xff]  }
  0x1c   : > { %2249 = vmatprep.mubr.msk.bf16.mxu1 %vm654_vm0, %v2331_v12  ;;  %v2358_v39 = vld [vmem:[%s2438_s24 + $0x90] sm:$0xff]   ;;  %v2360_v41 = vld [vmem:[%s2438_s24 + $0x98] sm:$0xff]   ;;  %v2362_v43 = vld [vmem:[%s2438_s24 + $0xa0] sm:$0xff]  }
  0x1d   : > { %v2359_v40 = vld [vmem:[%s2438_s24 + $0x190] sm:$0xff]   ;;  %v2361_v42 = vld [vmem:[%s2438_s24 + $0x198] sm:$0xff]   ;;  %v2363_v44 = vld [vmem:[%s2438_s24 + $0x1a0] sm:$0xff]  }
  0x1e   : > { %v2364_v45 = vld [vmem:[%s2438_s24 + $0xa8] sm:$0xff]   ;;  %v2366_v47 = vld [vmem:[%s2438_s24 + $0xb0] sm:$0xff]   ;;  %v2368_v49 = vld [vmem:[%s2438_s24 + $0xb8] sm:$0xff]  }
  0x1f   : > { %v2365_v46 = vld [vmem:[%s2438_s24 + $0x1a8] sm:$0xff]   ;;  %v2367_v48 = vld [vmem:[%s2438_s24 + $0x1b0] sm:$0xff]   ;;  %v2369_v50 = vld [vmem:[%s2438_s24 + $0x1b8] sm:$0xff]  }
  0x20   : > { %v2370_v51 = vld [vmem:[%s2438_s24 + $0xc0] sm:$0xff]   ;;  %v2372_v53 = vld [vmem:[%s2438_s24 + $0xc8] sm:$0xff]   ;;  %v2374_v55 = vld [vmem:[%s2438_s24 + $0xd0] sm:$0xff]  }
  0x21   : > { %v2371_v52 = vld [vmem:[%s2438_s24 + $0x1c0] sm:$0xff]   ;;  %v2373_v54 = vld [vmem:[%s2438_s24 + $0x1c8] sm:$0xff]   ;;  %v2375_v56 = vld [vmem:[%s2438_s24 + $0x1d0] sm:$0xff]  }
  0x22   : > { %2186 = vmatmul.mubr.msk.bf16.gmra.mrb[8].mxu0 %vm654_vm0, %v2332_v13  ;;  %v2376_v57 = vld [vmem:[%s2438_s24 + $0xd8] sm:$0xff]   ;;  %v2378_v59 = vld [vmem:[%s2438_s24 + $0xe0] sm:$0xff]   ;;  %v2380_v61 = vld [vmem:[%s2438_s24 + $0xe8] sm:$0xff]  }
  0x23   : > { %2250 = vmatmul.mubr.msk.bf16.gmra.mrb[8].mxu1 %vm654_vm0, %v2333_v14  ;;  %2189 = vmatprep.mubr.msk.bf16.mxu0 %vm654_vm0, %v2334_v15  ;;  %v2377_v58 = vld [vmem:[%s2438_s24 + $0x1d8] sm:$0xff]   ;;  %v2379_v60 = vld [vmem:[%s2438_s24 + $0x1e0] sm:$0xff]   ;;  %v2381_v62 = vld [vmem:[%s2438_s24 + $0x1e8] sm:$0xff]  }
  0x24   : > { %2253 = vmatprep.mubr.msk.bf16.mxu1 %vm654_vm0, %v2335_v16  ;;  %v2382_v63 = vld [vmem:[%s2438_s24 + $0xf0] sm:$0xff]   ;;  %v2384_v1 = vld [vmem:[%s2438_s24 + $0xf8] sm:$0xff]   ;;  %v2571_v3 = vld [vmem:[%s2973_s2] ss:$0 sm:$0xff] }
  0x25   : > { %v2383_v0 = vld [vmem:[%s2438_s24 + $0x1f0] sm:$0xff]   ;;  %v2385_v2 = vld [vmem:[%s2438_s24 + $0x1f8] sm:$0xff]  }
  0x2a   : > { %2190 = vmatmul.mubr.msk.bf16.gmra.mrb[12].mxu0 %vm654_vm0, %v2336_v17 }
  0x2b   : > { %2254 = vmatmul.mubr.msk.bf16.gmra.mrb[12].mxu1 %vm654_vm0, %v2337_v18  ;;  %2193 = vmatprep.mubr.msk.bf16.mxu0 %vm654_vm0, %v2338_v19 }
  0x2c   : > { %2257 = vmatprep.mubr.msk.bf16.mxu1 %vm654_vm0, %v2339_v20 }
  0x32   : > { %2194 = vmatmul.mubr.msk.bf16.gmra.mrb[16].mxu0 %vm654_vm0, %v2340_v21 }
  0x33   : > { %2258 = vmatmul.mubr.msk.bf16.gmra.mrb[16].mxu1 %vm654_vm0, %v2341_v22  ;;  %2197 = vmatprep.mubr.msk.bf16.mxu0 %vm654_vm0, %v2342_v23 }
  0x34   : > { %2261 = vmatprep.mubr.msk.bf16.mxu1 %vm654_vm0, %v2343_v24 }
  0x3a   : > { %2198 = vmatmul.mubr.msk.bf16.gmra.mrb[20].mxu0 %vm654_vm0, %v2344_v25 }
  0x3b   : > { %2262 = vmatmul.mubr.msk.bf16.gmra.mrb[20].mxu1 %vm654_vm0, %v2345_v26  ;;  %2201 = vmatprep.mubr.msk.bf16.mxu0 %vm654_vm0, %v2346_v27 }
  0x3c   : > { %2265 = vmatprep.mubr.msk.bf16.mxu1 %vm654_vm0, %v2347_v28 }
  0x42   : > { %2202 = vmatmul.mubr.msk.bf16.gmra.mrb[24].mxu0 %vm654_vm0, %v2348_v29 }
  0x43   : > { %2266 = vmatmul.mubr.msk.bf16.gmra.mrb[24].mxu1 %vm654_vm0, %v2349_v30  ;;  %2205 = vmatprep.mubr.msk.bf16.mxu0 %vm654_vm0, %v2350_v31 }
  0x44   : > { %2269 = vmatprep.mubr.msk.bf16.mxu1 %vm654_vm0, %v2351_v32 }
  0x4a   : > { %2206 = vmatmul.mubr.msk.bf16.gmra.mrb[28].mxu0 %vm654_vm0, %v2352_v33 }
  0x4b   : > { %2270 = vmatmul.mubr.msk.bf16.gmra.mrb[28].mxu1 %vm654_vm0, %v2353_v34  ;;  %2209 = vmatprep.mubr.msk.bf16.mxu0 %vm654_vm0, %v2354_v35 }
  0x4c   : > { %2273 = vmatprep.mubr.msk.bf16.mxu1 %vm654_vm0, %v2355_v36 }
  0x52   : > { %2210 = vmatmul.mubr.msk.bf16.gmra.mrb[32].mxu0 %vm654_vm0, %v2356_v37 }
  0x53   : > { %2274 = vmatmul.mubr.msk.bf16.gmra.mrb[32].mxu1 %vm654_vm0, %v2357_v38  ;;  %2213 = vmatprep.mubr.msk.bf16.mxu0 %vm654_vm0, %v2358_v39 }
  0x54   : > { %2277 = vmatprep.mubr.msk.bf16.mxu1 %vm654_vm0, %v2359_v40 }
  0x5a   : > { %2214 = vmatmul.mubr.msk.bf16.gmra.mrb[36].mxu0 %vm654_vm0, %v2360_v41 }
  0x5b   : > { %2278 = vmatmul.mubr.msk.bf16.gmra.mrb[36].mxu1 %vm654_vm0, %v2361_v42  ;;  %2217 = vmatprep.mubr.msk.bf16.mxu0 %vm654_vm0, %v2362_v43 }
  0x5c   : > { %2281 = vmatprep.mubr.msk.bf16.mxu1 %vm654_vm0, %v2363_v44 }
  0x62   : > { %2218 = vmatmul.mubr.msk.bf16.gmra.mrb[40].mxu0 %vm654_vm0, %v2364_v45 }
  0x63   : > { %2282 = vmatmul.mubr.msk.bf16.gmra.mrb[40].mxu1 %vm654_vm0, %v2365_v46  ;;  %2221 = vmatprep.mubr.msk.bf16.mxu0 %vm654_vm0, %v2366_v47 }
  0x64   : > { %2285 = vmatprep.mubr.msk.bf16.mxu1 %vm654_vm0, %v2367_v48 }
  0x6a   : > { %2222 = vmatmul.mubr.msk.bf16.gmra.mrb[44].mxu0 %vm654_vm0, %v2368_v49 }
  0x6b   : > { %2286 = vmatmul.mubr.msk.bf16.gmra.mrb[44].mxu1 %vm654_vm0, %v2369_v50  ;;  %2225 = vmatprep.mubr.msk.bf16.mxu0 %vm654_vm0, %v2370_v51 }
  0x6c   : > { %2289 = vmatprep.mubr.msk.bf16.mxu1 %vm654_vm0, %v2371_v52 }
  0x72   : > { %2226 = vmatmul.mubr.msk.bf16.gmra.mrb[48].mxu0 %vm654_vm0, %v2372_v53 }
  0x73   : > { %2290 = vmatmul.mubr.msk.bf16.gmra.mrb[48].mxu1 %vm654_vm0, %v2373_v54  ;;  %2229 = vmatprep.mubr.msk.bf16.mxu0 %vm654_vm0, %v2374_v55 }
  0x74   : > { %2293 = vmatprep.mubr.msk.bf16.mxu1 %vm654_vm0, %v2375_v56 }
  0x7a   : > { %2230 = vmatmul.mubr.msk.bf16.gmra.mrb[52].mxu0 %vm654_vm0, %v2376_v57 }
  0x7b   : > { %2294 = vmatmul.mubr.msk.bf16.gmra.mrb[52].mxu1 %vm654_vm0, %v2377_v58  ;;  %2233 = vmatprep.mubr.msk.bf16.mxu0 %vm654_vm0, %v2378_v59 }
  0x7c   : > { %2297 = vmatprep.mubr.msk.bf16.mxu1 %vm654_vm0, %v2379_v60 }
  0x82   : > { %2234 = vmatmul.mubr.msk.bf16.gmra.mrb[56].mxu0 %vm654_vm0, %v2380_v61 }
  0x83   : > { %2298 = vmatmul.mubr.msk.bf16.gmra.mrb[56].mxu1 %vm654_vm0, %v2381_v62  ;;  %2237 = vmatprep.mubr.msk.bf16.mxu0 %vm654_vm0, %v2382_v63 }
  0x84   : > { %2301 = vmatprep.mubr.msk.bf16.mxu1 %vm654_vm0, %v2383_v0 }
  0x8a   : > { %2238 = vmatmul.mubr.msk.bf16.gmra.mrb[60].mxu0 %vm654_vm0, %v2384_v1 }
  0x8b   : > { %2302 = vmatmul.mubr.msk.bf16.gmra.mrb[60].mxu1 %vm654_vm0, %v2385_v2 }
  0xe5   : > { %v2179_v4 = vpop.f32.mrb[0].mxu0 }
  0xe6   : > { %v2243_v5 = vpop.f32.mrb[0].mxu1  ;;  %v890_v6 = vadd.f32 %v2179_v4, %v2571_v3  ;;  %v881_v8 = vpop.f32.mrb[1].mxu0 }
  0xe7   : > { %v1146_v7 = vadd.f32 %v2243_v5, %v2571_v3  ;;  %v1137_v9 = vpop.f32.mrb[1].mxu1  ;;  %v882_v10 = vadd.f32 %v2571_v3, %v881_v8  ;;  %v2180_v12 = vpop.f32.mrb[2].mxu0 }
  0xe8   : > { %v1138_v11 = vadd.f32 %v2571_v3, %v1137_v9  ;;  %v2244_v13 = vpop.f32.mrb[2].mxu1  ;;  %vm1394_vm2 = vcmp.gt.f32.partialorder %v890_v6, 0.0  ;;  %v1522_v14 = vmul.f32 0.1, %v890_v6  ;;  %v893_v20 = vadd.f32 %v2180_v12, %v2571_v3  ;;  %v884_v22 = vpop.f32.mrb[3].mxu0 }
  0xe9   : > { %vm1458_vm3 = vcmp.gt.f32.partialorder %v1146_v7, 0.0  ;;  %v1586_v15 = vmul.f32 0.1, %v1146_v7  ;;  %vm1392_vm4 = vcmp.gt.f32.partialorder %v882_v10, 0.0  ;;  %v1520_v16 = vmul.f32 0.1, %v882_v10 }
  0xea   : > { %vm1456_vm5 = vcmp.gt.f32.partialorder %v1138_v11, 0.0  ;;  %v1584_v17 = vmul.f32 0.1, %v1138_v11  ;;  %v1650_v18 = vsel %vm1394_vm2, %v890_v6, %v1522_v14  ;;  %v1149_v21 = vadd.f32 %v2244_v13, %v2571_v3  ;;  %v1140_v23 = vpop.f32.mrb[3].mxu1 }
  0xeb   : > { %v1714_v19 = vsel %vm1458_vm3, %v1146_v7, %v1586_v15  ;;  %1779 = vst.msk [vmem:[%s2581_s30 + $0x10] sm:$0xff] %vm1776_vm1, %v1650_v18  ;;  %v1648_v24 = vsel %vm1392_vm4, %v882_v10, %v1520_v16  ;;  %v885_v26 = vadd.f32 %v2571_v3, %v884_v22  ;;  %v1141_v27 = vadd.f32 %v2571_v3, %v1140_v23 }
  0xec   : > { %1843 = vst.msk [vmem:[%s2581_s30 + $0x210] sm:$0xff] %vm1776_vm1, %v1714_v19  ;;  %v1712_v25 = vsel %vm1456_vm5, %v1138_v11, %v1584_v17  ;;  %1777 = vst.msk [vmem:[%s2581_s30] sm:$0xff] %vm1776_vm1, %v1648_v24  ;;  %vm1395_vm6 = vcmp.gt.f32.partialorder %v893_v20, 0.0  ;;  %v1523_v28 = vmul.f32 0.1, %v893_v20  ;;  %vm1459_vm7 = vcmp.gt.f32.partialorder %v1149_v21, 0.0 }
  0xed   : > { %1841 = vst.msk [vmem:[%s2581_s30 + $0x200] sm:$0xff] %vm1776_vm1, %v1712_v25  ;;  %v1587_v29 = vmul.f32 0.1, %v1149_v21  ;;  %vm1393_vm8 = vcmp.gt.f32.partialorder %v885_v26, 0.0  ;;  %v1521_v30 = vmul.f32 0.1, %v885_v26 }
  0xee   : > { %vm1457_vm9 = vcmp.gt.f32.partialorder %v1141_v27, 0.0  ;;  %v1585_v31 = vmul.f32 0.1, %v1141_v27  ;;  %v1651_v32 = vsel %vm1395_vm6, %v893_v20, %v1523_v28  ;;  %v2183_v34 = vpop.f32.mrb[4].mxu0  ;;  %v2247_v35 = vpop.f32.mrb[4].mxu1 }
  0xef   : > { %v1715_v33 = vsel %vm1459_vm7, %v1149_v21, %v1587_v29  ;;  %1780 = vst.msk [vmem:[%s2581_s30 + $0x18] sm:$0xff] %vm1776_vm1, %v1651_v32  ;;  %v1649_v36 = vsel %vm1393_vm8, %v885_v26, %v1521_v30  ;;  %v906_v38 = vadd.f32 %v2183_v34, %v2571_v3  ;;  %v1162_v39 = vadd.f32 %v2247_v35, %v2571_v3  ;;  %v897_v40 = vpop.f32.mrb[5].mxu0  ;;  %v1153_v41 = vpop.f32.mrb[5].mxu1 }
  0xf0   : > { %1844 = vst.msk [vmem:[%s2581_s30 + $0x218] sm:$0xff] %vm1776_vm1, %v1715_v33  ;;  %v1713_v37 = vsel %vm1457_vm9, %v1141_v27, %v1585_v31  ;;  %1778 = vst.msk [vmem:[%s2581_s30 + $0x8] sm:$0xff] %vm1776_vm1, %v1649_v36  ;;  %v898_v42 = vadd.f32 %v2571_v3, %v897_v40  ;;  %v1154_v43 = vadd.f32 %v2571_v3, %v1153_v41  ;;  %v2184_v44 = vpop.f32.mrb[6].mxu0  ;;  %v2248_v45 = vpop.f32.mrb[6].mxu1 }
  0xf1   : > { %1842 = vst.msk [vmem:[%s2581_s30 + $0x208] sm:$0xff] %vm1776_vm1, %v1713_v37  ;;  %vm1398_vm10 = vcmp.gt.f32.partialorder %v906_v38, 0.0  ;;  %v1526_v46 = vmul.f32 0.1, %v906_v38  ;;  %vm1462_vm11 = vcmp.gt.f32.partialorder %v1162_v39, 0.0  ;;  %v909_v52 = vadd.f32 %v2184_v44, %v2571_v3  ;;  %v900_v54 = vpop.f32.mrb[7].mxu0 }
  0xf2   : > { %v1590_v47 = vmul.f32 0.1, %v1162_v39  ;;  %vm1396_vm12 = vcmp.gt.f32.partialorder %v898_v42, 0.0  ;;  %v1524_v48 = vmul.f32 0.1, %v898_v42  ;;  %vm1460_vm13 = vcmp.gt.f32.partialorder %v1154_v43, 0.0 }
  0xf3   : > { %v1588_v49 = vmul.f32 0.1, %v1154_v43  ;;  %v1654_v50 = vsel %vm1398_vm10, %v906_v38, %v1526_v46  ;;  %v1165_v53 = vadd.f32 %v2248_v45, %v2571_v3  ;;  %v1156_v55 = vpop.f32.mrb[7].mxu1  ;;  %v901_v58 = vadd.f32 %v2571_v3, %v900_v54 }
  0xf4   : > { %v1718_v51 = vsel %vm1462_vm11, %v1162_v39, %v1590_v47  ;;  %1783 = vst.msk [vmem:[%s2581_s30 + $0x30] sm:$0xff] %vm1776_vm1, %v1654_v50  ;;  %v1652_v56 = vsel %vm1396_vm12, %v898_v42, %v1524_v48  ;;  %v1157_v59 = vadd.f32 %v2571_v3, %v1156_v55  ;;  %vm1399_vm14 = vcmp.gt.f32.partialorder %v909_v52, 0.0 }
  0xf5   : > { %1847 = vst.msk [vmem:[%s2581_s30 + $0x230] sm:$0xff] %vm1776_vm1, %v1718_v51  ;;  %v1716_v57 = vsel %vm1460_vm13, %v1154_v43, %v1588_v49  ;;  %1781 = vst.msk [vmem:[%s2581_s30 + $0x20] sm:$0xff] %vm1776_vm1, %v1652_v56  ;;  %v1527_v60 = vmul.f32 0.1, %v909_v52  ;;  %vm1463_vm15 = vcmp.gt.f32.partialorder %v1165_v53, 0.0  ;;  %vm1397_vm0 = vcmp.gt.f32.partialorder %v901_v58, 0.0 }
  0xf6   : > { %1845 = vst.msk [vmem:[%s2581_s30 + $0x220] sm:$0xff] %vm1776_vm1, %v1716_v57  ;;  %v1591_v61 = vmul.f32 0.1, %v1165_v53  ;;  %v1525_v62 = vmul.f32 0.1, %v901_v58  ;;  %vm1461_vm2 = vcmp.gt.f32.partialorder %v1157_v59, 0.0 }
  0xf7   : > { %v1589_v63 = vmul.f32 0.1, %v1157_v59  ;;  %v1655_v0 = vsel %vm1399_vm14, %v909_v52, %v1527_v60  ;;  %v2187_v2 = vpop.f32.mrb[8].mxu0  ;;  %v2251_v4 = vpop.f32.mrb[8].mxu1 }
  0xf8   : > { %v1719_v1 = vsel %vm1463_vm15, %v1165_v53, %v1591_v61  ;;  %1784 = vst.msk [vmem:[%s2581_s30 + $0x38] sm:$0xff] %vm1776_vm1, %v1655_v0  ;;  %v1653_v5 = vsel %vm1397_vm0, %v901_v58, %v1525_v62  ;;  %v922_v7 = vadd.f32 %v2187_v2, %v2571_v3  ;;  %v1178_v8 = vadd.f32 %v2251_v4, %v2571_v3  ;;  %v913_v9 = vpop.f32.mrb[9].mxu0  ;;  %v1169_v10 = vpop.f32.mrb[9].mxu1 }
  0xf9   : > { %1848 = vst.msk [vmem:[%s2581_s30 + $0x238] sm:$0xff] %vm1776_vm1, %v1719_v1  ;;  %v1717_v6 = vsel %vm1461_vm2, %v1157_v59, %v1589_v63  ;;  %1782 = vst.msk [vmem:[%s2581_s30 + $0x28] sm:$0xff] %vm1776_vm1, %v1653_v5  ;;  %v914_v11 = vadd.f32 %v2571_v3, %v913_v9  ;;  %v1170_v12 = vadd.f32 %v2571_v3, %v1169_v10  ;;  %v2188_v13 = vpop.f32.mrb[10].mxu0  ;;  %v2252_v14 = vpop.f32.mrb[10].mxu1 }
  0xfa   : > { %1846 = vst.msk [vmem:[%s2581_s30 + $0x228] sm:$0xff] %vm1776_vm1, %v1717_v6  ;;  %vm1402_vm3 = vcmp.gt.f32.partialorder %v922_v7, 0.0  ;;  %v1530_v15 = vmul.f32 0.1, %v922_v7  ;;  %vm1466_vm4 = vcmp.gt.f32.partialorder %v1178_v8, 0.0  ;;  %v925_v21 = vadd.f32 %v2188_v13, %v2571_v3  ;;  %v916_v23 = vpop.f32.mrb[11].mxu0 }
  0xfb   : > { %v1594_v16 = vmul.f32 0.1, %v1178_v8  ;;  %vm1400_vm5 = vcmp.gt.f32.partialorder %v914_v11, 0.0  ;;  %v1528_v17 = vmul.f32 0.1, %v914_v11  ;;  %vm1464_vm6 = vcmp.gt.f32.partialorder %v1170_v12, 0.0 }
  0xfc   : > { %v1592_v18 = vmul.f32 0.1, %v1170_v12  ;;  %v1658_v19 = vsel %vm1402_vm3, %v922_v7, %v1530_v15  ;;  %v1181_v22 = vadd.f32 %v2252_v14, %v2571_v3  ;;  %v1172_v24 = vpop.f32.mrb[11].mxu1  ;;  %v917_v27 = vadd.f32 %v2571_v3, %v916_v23 }
  0xfd   : > { %v1722_v20 = vsel %vm1466_vm4, %v1178_v8, %v1594_v16  ;;  %1787 = vst.msk [vmem:[%s2581_s30 + $0x50] sm:$0xff] %vm1776_vm1, %v1658_v19  ;;  %v1656_v25 = vsel %vm1400_vm5, %v914_v11, %v1528_v17  ;;  %v1173_v28 = vadd.f32 %v2571_v3, %v1172_v24  ;;  %v2191_v29 = vpop.f32.mrb[12].mxu0  ;;  %vm1403_vm7 = vcmp.gt.f32.partialorder %v925_v21, 0.0 }
  0xfe   : > { %1851 = vst.msk [vmem:[%s2581_s30 + $0x250] sm:$0xff] %vm1776_vm1, %v1722_v20  ;;  %v1720_v26 = vsel %vm1464_vm6, %v1170_v12, %v1592_v18  ;;  %v2255_v30 = vpop.f32.mrb[12].mxu1  ;;  %1785 = vst.msk [vmem:[%s2581_s30 + $0x40] sm:$0xff] %vm1776_vm1, %v1656_v25  ;;  %v1531_v31 = vmul.f32 0.1, %v925_v21  ;;  %vm1467_vm8 = vcmp.gt.f32.partialorder %v1181_v22, 0.0  ;;  %v938_v37 = vadd.f32 %v2191_v29, %v2571_v3 }
  0xff   : > { %1849 = vst.msk [vmem:[%s2581_s30 + $0x240] sm:$0xff] %vm1776_vm1, %v1720_v26  ;;  %v1595_v32 = vmul.f32 0.1, %v1181_v22  ;;  %vm1401_vm9 = vcmp.gt.f32.partialorder %v917_v27, 0.0  ;;  %v1529_v33 = vmul.f32 0.1, %v917_v27  ;;  %v1194_v38 = vadd.f32 %v2255_v30, %v2571_v3 }
 0x100   : > { %vm1465_vm10 = vcmp.gt.f32.partialorder %v1173_v28, 0.0  ;;  %v1593_v34 = vmul.f32 0.1, %v1173_v28  ;;  %v1659_v35 = vsel %vm1403_vm7, %v925_v21, %v1531_v31  ;;  %v929_v39 = vpop.f32.mrb[13].mxu0  ;;  %v1185_v40 = vpop.f32.mrb[13].mxu1  ;;  %vm1406_vm11 = vcmp.gt.f32.partialorder %v938_v37, 0.0 }
 0x101   : > { %v1723_v36 = vsel %vm1467_vm8, %v1181_v22, %v1595_v32  ;;  %1788 = vst.msk [vmem:[%s2581_s30 + $0x58] sm:$0xff] %vm1776_vm1, %v1659_v35  ;;  %v1657_v41 = vsel %vm1401_vm9, %v917_v27, %v1529_v33  ;;  %v930_v43 = vadd.f32 %v2571_v3, %v929_v39  ;;  %v1186_v44 = vadd.f32 %v2571_v3, %v1185_v40  ;;  %v2192_v45 = vpop.f32.mrb[14].mxu0  ;;  %v2256_v46 = vpop.f32.mrb[14].mxu1 }
 0x102   : > { %1852 = vst.msk [vmem:[%s2581_s30 + $0x258] sm:$0xff] %vm1776_vm1, %v1723_v36  ;;  %v1721_v42 = vsel %vm1465_vm10, %v1173_v28, %v1593_v34  ;;  %1786 = vst.msk [vmem:[%s2581_s30 + $0x48] sm:$0xff] %vm1776_vm1, %v1657_v41  ;;  %v1534_v47 = vmul.f32 0.1, %v938_v37  ;;  %vm1470_vm12 = vcmp.gt.f32.partialorder %v1194_v38, 0.0  ;;  %v941_v53 = vadd.f32 %v2192_v45, %v2571_v3  ;;  %v932_v55 = vpop.f32.mrb[15].mxu0 }
 0x103   : > { %1850 = vst.msk [vmem:[%s2581_s30 + $0x248] sm:$0xff] %vm1776_vm1, %v1721_v42  ;;  %v1598_v48 = vmul.f32 0.1, %v1194_v38  ;;  %vm1404_vm13 = vcmp.gt.f32.partialorder %v930_v43, 0.0  ;;  %v1532_v49 = vmul.f32 0.1, %v930_v43  ;;  %v1197_v54 = vadd.f32 %v2256_v46, %v2571_v3 }
 0x104   : > { %vm1468_vm14 = vcmp.gt.f32.partialorder %v1186_v44, 0.0  ;;  %v1596_v50 = vmul.f32 0.1, %v1186_v44  ;;  %v1662_v51 = vsel %vm1406_vm11, %v938_v37, %v1534_v47  ;;  %v1188_v56 = vpop.f32.mrb[15].mxu1  ;;  %v933_v59 = vadd.f32 %v2571_v3, %v932_v55 }
 0x105   : > { %v1726_v52 = vsel %vm1470_vm12, %v1194_v38, %v1598_v48  ;;  %1791 = vst.msk [vmem:[%s2581_s30 + $0x70] sm:$0xff] %vm1776_vm1, %v1662_v51  ;;  %v1660_v57 = vsel %vm1404_vm13, %v930_v43, %v1532_v49  ;;  %v1189_v60 = vadd.f32 %v2571_v3, %v1188_v56  ;;  %v2195_v61 = vpop.f32.mrb[16].mxu0  ;;  %vm1407_vm15 = vcmp.gt.f32.partialorder %v941_v53, 0.0 }
 0x106   : > { %1855 = vst.msk [vmem:[%s2581_s30 + $0x270] sm:$0xff] %vm1776_vm1, %v1726_v52  ;;  %v1724_v58 = vsel %vm1468_vm14, %v1186_v44, %v1596_v50  ;;  %v2259_v62 = vpop.f32.mrb[16].mxu1  ;;  %1789 = vst.msk [vmem:[%s2581_s30 + $0x60] sm:$0xff] %vm1776_vm1, %v1660_v57  ;;  %v1535_v63 = vmul.f32 0.1, %v941_v53  ;;  %vm1471_vm0 = vcmp.gt.f32.partialorder %v1197_v54, 0.0  ;;  %v954_v6 = vadd.f32 %v2195_v61, %v2571_v3 }
 0x107   : > { %1853 = vst.msk [vmem:[%s2581_s30 + $0x260] sm:$0xff] %vm1776_vm1, %v1724_v58  ;;  %v1599_v0 = vmul.f32 0.1, %v1197_v54  ;;  %vm1405_vm2 = vcmp.gt.f32.partialorder %v933_v59, 0.0  ;;  %v1533_v1 = vmul.f32 0.1, %v933_v59  ;;  %v1210_v7 = vadd.f32 %v2259_v62, %v2571_v3 }
 0x108   : > { %vm1469_vm3 = vcmp.gt.f32.partialorder %v1189_v60, 0.0  ;;  %v1597_v2 = vmul.f32 0.1, %v1189_v60  ;;  %v1663_v4 = vsel %vm1407_vm15, %v941_v53, %v1535_v63  ;;  %v945_v8 = vpop.f32.mrb[17].mxu0  ;;  %v1201_v9 = vpop.f32.mrb[17].mxu1  ;;  %vm1410_vm4 = vcmp.gt.f32.partialorder %v954_v6, 0.0 }
 0x109   : > { %v1727_v5 = vsel %vm1471_vm0, %v1197_v54, %v1599_v0  ;;  %1792 = vst.msk [vmem:[%s2581_s30 + $0x78] sm:$0xff] %vm1776_vm1, %v1663_v4  ;;  %v1661_v10 = vsel %vm1405_vm2, %v933_v59, %v1533_v1  ;;  %v946_v12 = vadd.f32 %v2571_v3, %v945_v8  ;;  %v1202_v13 = vadd.f32 %v2571_v3, %v1201_v9  ;;  %v2196_v14 = vpop.f32.mrb[18].mxu0  ;;  %v2260_v15 = vpop.f32.mrb[18].mxu1 }
 0x10a   : > { %1856 = vst.msk [vmem:[%s2581_s30 + $0x278] sm:$0xff] %vm1776_vm1, %v1727_v5  ;;  %v1725_v11 = vsel %vm1469_vm3, %v1189_v60, %v1597_v2  ;;  %1790 = vst.msk [vmem:[%s2581_s30 + $0x68] sm:$0xff] %vm1776_vm1, %v1661_v10  ;;  %v1538_v16 = vmul.f32 0.1, %v954_v6  ;;  %vm1474_vm5 = vcmp.gt.f32.partialorder %v1210_v7, 0.0  ;;  %v957_v22 = vadd.f32 %v2196_v14, %v2571_v3  ;;  %v948_v24 = vpop.f32.mrb[19].mxu0 }
 0x10b   : > { %1854 = vst.msk [vmem:[%s2581_s30 + $0x268] sm:$0xff] %vm1776_vm1, %v1725_v11  ;;  %v1602_v17 = vmul.f32 0.1, %v1210_v7  ;;  %vm1408_vm6 = vcmp.gt.f32.partialorder %v946_v12, 0.0  ;;  %v1536_v18 = vmul.f32 0.1, %v946_v12  ;;  %v1213_v23 = vadd.f32 %v2260_v15, %v2571_v3 }
 0x10c   : > { %vm1472_vm7 = vcmp.gt.f32.partialorder %v1202_v13, 0.0  ;;  %v1600_v19 = vmul.f32 0.1, %v1202_v13  ;;  %v1666_v20 = vsel %vm1410_vm4, %v954_v6, %v1538_v16  ;;  %v1204_v25 = vpop.f32.mrb[19].mxu1  ;;  %v949_v28 = vadd.f32 %v2571_v3, %v948_v24 }
 0x10d   : > { %v1730_v21 = vsel %vm1474_vm5, %v1210_v7, %v1602_v17  ;;  %1795 = vst.msk [vmem:[%s2581_s30 + $0x90] sm:$0xff] %vm1776_vm1, %v1666_v20  ;;  %v1664_v26 = vsel %vm1408_vm6, %v946_v12, %v1536_v18  ;;  %v1205_v29 = vadd.f32 %v2571_v3, %v1204_v25  ;;  %v2199_v30 = vpop.f32.mrb[20].mxu0  ;;  %vm1411_vm8 = vcmp.gt.f32.partialorder %v957_v22, 0.0 }
 0x10e   : > { %1859 = vst.msk [vmem:[%s2581_s30 + $0x290] sm:$0xff] %vm1776_vm1, %v1730_v21  ;;  %v1728_v27 = vsel %vm1472_vm7, %v1202_v13, %v1600_v19  ;;  %v2263_v31 = vpop.f32.mrb[20].mxu1  ;;  %1793 = vst.msk [vmem:[%s2581_s30 + $0x80] sm:$0xff] %vm1776_vm1, %v1664_v26  ;;  %v1539_v32 = vmul.f32 0.1, %v957_v22  ;;  %vm1475_vm9 = vcmp.gt.f32.partialorder %v1213_v23, 0.0  ;;  %v970_v38 = vadd.f32 %v2199_v30, %v2571_v3 }
 0x10f   : > { %1857 = vst.msk [vmem:[%s2581_s30 + $0x280] sm:$0xff] %vm1776_vm1, %v1728_v27  ;;  %v1603_v33 = vmul.f32 0.1, %v1213_v23  ;;  %vm1409_vm10 = vcmp.gt.f32.partialorder %v949_v28, 0.0  ;;  %v1537_v34 = vmul.f32 0.1, %v949_v28  ;;  %v1226_v39 = vadd.f32 %v2263_v31, %v2571_v3 }
 0x110   : > { %vm1473_vm11 = vcmp.gt.f32.partialorder %v1205_v29, 0.0  ;;  %v1601_v35 = vmul.f32 0.1, %v1205_v29  ;;  %v1667_v36 = vsel %vm1411_vm8, %v957_v22, %v1539_v32  ;;  %v961_v40 = vpop.f32.mrb[21].mxu0  ;;  %v1217_v41 = vpop.f32.mrb[21].mxu1  ;;  %vm1414_vm12 = vcmp.gt.f32.partialorder %v970_v38, 0.0 }
 0x111   : > { %v1731_v37 = vsel %vm1475_vm9, %v1213_v23, %v1603_v33  ;;  %1796 = vst.msk [vmem:[%s2581_s30 + $0x98] sm:$0xff] %vm1776_vm1, %v1667_v36  ;;  %v1665_v42 = vsel %vm1409_vm10, %v949_v28, %v1537_v34  ;;  %v962_v44 = vadd.f32 %v2571_v3, %v961_v40  ;;  %v1218_v45 = vadd.f32 %v2571_v3, %v1217_v41  ;;  %v2200_v46 = vpop.f32.mrb[22].mxu0  ;;  %v2264_v47 = vpop.f32.mrb[22].mxu1 }
 0x112   : > { %1860 = vst.msk [vmem:[%s2581_s30 + $0x298] sm:$0xff] %vm1776_vm1, %v1731_v37  ;;  %v1729_v43 = vsel %vm1473_vm11, %v1205_v29, %v1601_v35  ;;  %1794 = vst.msk [vmem:[%s2581_s30 + $0x88] sm:$0xff] %vm1776_vm1, %v1665_v42  ;;  %v1542_v48 = vmul.f32 0.1, %v970_v38  ;;  %vm1478_vm13 = vcmp.gt.f32.partialorder %v1226_v39, 0.0  ;;  %v973_v54 = vadd.f32 %v2200_v46, %v2571_v3  ;;  %v964_v56 = vpop.f32.mrb[23].mxu0 }
 0x113   : > { %1858 = vst.msk [vmem:[%s2581_s30 + $0x288] sm:$0xff] %vm1776_vm1, %v1729_v43  ;;  %v1606_v49 = vmul.f32 0.1, %v1226_v39  ;;  %vm1412_vm14 = vcmp.gt.f32.partialorder %v962_v44, 0.0  ;;  %v1540_v50 = vmul.f32 0.1, %v962_v44  ;;  %v1229_v55 = vadd.f32 %v2264_v47, %v2571_v3 }
 0x114   : > { %vm1476_vm15 = vcmp.gt.f32.partialorder %v1218_v45, 0.0  ;;  %v1604_v51 = vmul.f32 0.1, %v1218_v45  ;;  %v1670_v52 = vsel %vm1414_vm12, %v970_v38, %v1542_v48  ;;  %v1220_v57 = vpop.f32.mrb[23].mxu1  ;;  %v965_v60 = vadd.f32 %v2571_v3, %v964_v56 }
 0x115   : > { %v1734_v53 = vsel %vm1478_vm13, %v1226_v39, %v1606_v49  ;;  %1799 = vst.msk [vmem:[%s2581_s30 + $0xb0] sm:$0xff] %vm1776_vm1, %v1670_v52  ;;  %v1668_v58 = vsel %vm1412_vm14, %v962_v44, %v1540_v50  ;;  %v1221_v61 = vadd.f32 %v2571_v3, %v1220_v57  ;;  %v2203_v62 = vpop.f32.mrb[24].mxu0  ;;  %vm1415_vm0 = vcmp.gt.f32.partialorder %v973_v54, 0.0 }
 0x116   : > { %1863 = vst.msk [vmem:[%s2581_s30 + $0x2b0] sm:$0xff] %vm1776_vm1, %v1734_v53  ;;  %v1732_v59 = vsel %vm1476_vm15, %v1218_v45, %v1604_v51  ;;  %v2267_v63 = vpop.f32.mrb[24].mxu1  ;;  %1797 = vst.msk [vmem:[%s2581_s30 + $0xa0] sm:$0xff] %vm1776_vm1, %v1668_v58  ;;  %v1543_v0 = vmul.f32 0.1, %v973_v54  ;;  %vm1479_vm2 = vcmp.gt.f32.partialorder %v1229_v55, 0.0  ;;  %v986_v7 = vadd.f32 %v2203_v62, %v2571_v3 }
 0x117   : > { %1861 = vst.msk [vmem:[%s2581_s30 + $0x2a0] sm:$0xff] %vm1776_vm1, %v1732_v59  ;;  %v1607_v1 = vmul.f32 0.1, %v1229_v55  ;;  %vm1413_vm3 = vcmp.gt.f32.partialorder %v965_v60, 0.0  ;;  %v1541_v2 = vmul.f32 0.1, %v965_v60  ;;  %v1242_v8 = vadd.f32 %v2267_v63, %v2571_v3 }
 0x118   : > { %vm1477_vm4 = vcmp.gt.f32.partialorder %v1221_v61, 0.0  ;;  %v1605_v4 = vmul.f32 0.1, %v1221_v61  ;;  %v1671_v5 = vsel %vm1415_vm0, %v973_v54, %v1543_v0  ;;  %v977_v9 = vpop.f32.mrb[25].mxu0  ;;  %v1233_v10 = vpop.f32.mrb[25].mxu1  ;;  %vm1418_vm5 = vcmp.gt.f32.partialorder %v986_v7, 0.0 }
 0x119   : > { %v1735_v6 = vsel %vm1479_vm2, %v1229_v55, %v1607_v1  ;;  %1800 = vst.msk [vmem:[%s2581_s30 + $0xb8] sm:$0xff] %vm1776_vm1, %v1671_v5  ;;  %v1669_v11 = vsel %vm1413_vm3, %v965_v60, %v1541_v2  ;;  %v978_v13 = vadd.f32 %v2571_v3, %v977_v9  ;;  %v1234_v14 = vadd.f32 %v2571_v3, %v1233_v10  ;;  %v2204_v15 = vpop.f32.mrb[26].mxu0  ;;  %v2268_v16 = vpop.f32.mrb[26].mxu1 }
 0x11a   : > { %1864 = vst.msk [vmem:[%s2581_s30 + $0x2b8] sm:$0xff] %vm1776_vm1, %v1735_v6  ;;  %v1733_v12 = vsel %vm1477_vm4, %v1221_v61, %v1605_v4  ;;  %1798 = vst.msk [vmem:[%s2581_s30 + $0xa8] sm:$0xff] %vm1776_vm1, %v1669_v11  ;;  %v1546_v17 = vmul.f32 0.1, %v986_v7  ;;  %vm1482_vm6 = vcmp.gt.f32.partialorder %v1242_v8, 0.0  ;;  %v989_v23 = vadd.f32 %v2204_v15, %v2571_v3  ;;  %v980_v25 = vpop.f32.mrb[27].mxu0 }
 0x11b   : > { %1862 = vst.msk [vmem:[%s2581_s30 + $0x2a8] sm:$0xff] %vm1776_vm1, %v1733_v12  ;;  %v1610_v18 = vmul.f32 0.1, %v1242_v8  ;;  %vm1416_vm7 = vcmp.gt.f32.partialorder %v978_v13, 0.0  ;;  %v1544_v19 = vmul.f32 0.1, %v978_v13  ;;  %v1245_v24 = vadd.f32 %v2268_v16, %v2571_v3 }
 0x11c   : > { %vm1480_vm8 = vcmp.gt.f32.partialorder %v1234_v14, 0.0  ;;  %v1608_v20 = vmul.f32 0.1, %v1234_v14  ;;  %v1674_v21 = vsel %vm1418_vm5, %v986_v7, %v1546_v17  ;;  %v1236_v26 = vpop.f32.mrb[27].mxu1  ;;  %v981_v29 = vadd.f32 %v2571_v3, %v980_v25 }
 0x11d   : > { %v1738_v22 = vsel %vm1482_vm6, %v1242_v8, %v1610_v18  ;;  %1803 = vst.msk [vmem:[%s2581_s30 + $0xd0] sm:$0xff] %vm1776_vm1, %v1674_v21  ;;  %v1672_v27 = vsel %vm1416_vm7, %v978_v13, %v1544_v19  ;;  %v1237_v30 = vadd.f32 %v2571_v3, %v1236_v26  ;;  %v2207_v31 = vpop.f32.mrb[28].mxu0  ;;  %vm1419_vm9 = vcmp.gt.f32.partialorder %v989_v23, 0.0 }
 0x11e   : > { %1867 = vst.msk [vmem:[%s2581_s30 + $0x2d0] sm:$0xff] %vm1776_vm1, %v1738_v22  ;;  %v1736_v28 = vsel %vm1480_vm8, %v1234_v14, %v1608_v20  ;;  %v2271_v32 = vpop.f32.mrb[28].mxu1  ;;  %1801 = vst.msk [vmem:[%s2581_s30 + $0xc0] sm:$0xff] %vm1776_vm1, %v1672_v27  ;;  %v1547_v33 = vmul.f32 0.1, %v989_v23  ;;  %vm1483_vm10 = vcmp.gt.f32.partialorder %v1245_v24, 0.0  ;;  %v1002_v39 = vadd.f32 %v2207_v31, %v2571_v3 }
 0x11f   : > { %1865 = vst.msk [vmem:[%s2581_s30 + $0x2c0] sm:$0xff] %vm1776_vm1, %v1736_v28  ;;  %v1611_v34 = vmul.f32 0.1, %v1245_v24  ;;  %vm1417_vm11 = vcmp.gt.f32.partialorder %v981_v29, 0.0  ;;  %v1545_v35 = vmul.f32 0.1, %v981_v29  ;;  %v1258_v40 = vadd.f32 %v2271_v32, %v2571_v3 }
 0x120   : > { %vm1481_vm12 = vcmp.gt.f32.partialorder %v1237_v30, 0.0  ;;  %v1609_v36 = vmul.f32 0.1, %v1237_v30  ;;  %v1675_v37 = vsel %vm1419_vm9, %v989_v23, %v1547_v33  ;;  %v993_v41 = vpop.f32.mrb[29].mxu0  ;;  %v1249_v42 = vpop.f32.mrb[29].mxu1  ;;  %vm1422_vm13 = vcmp.gt.f32.partialorder %v1002_v39, 0.0 }
 0x121   : > { %v1739_v38 = vsel %vm1483_vm10, %v1245_v24, %v1611_v34  ;;  %1804 = vst.msk [vmem:[%s2581_s30 + $0xd8] sm:$0xff] %vm1776_vm1, %v1675_v37  ;;  %v1673_v43 = vsel %vm1417_vm11, %v981_v29, %v1545_v35  ;;  %v994_v45 = vadd.f32 %v2571_v3, %v993_v41  ;;  %v1250_v46 = vadd.f32 %v2571_v3, %v1249_v42  ;;  %v2208_v47 = vpop.f32.mrb[30].mxu0  ;;  %v2272_v48 = vpop.f32.mrb[30].mxu1 }
 0x122   : > { %1868 = vst.msk [vmem:[%s2581_s30 + $0x2d8] sm:$0xff] %vm1776_vm1, %v1739_v38  ;;  %v1737_v44 = vsel %vm1481_vm12, %v1237_v30, %v1609_v36  ;;  %1802 = vst.msk [vmem:[%s2581_s30 + $0xc8] sm:$0xff] %vm1776_vm1, %v1673_v43  ;;  %v1550_v49 = vmul.f32 0.1, %v1002_v39  ;;  %vm1486_vm14 = vcmp.gt.f32.partialorder %v1258_v40, 0.0  ;;  %v1005_v55 = vadd.f32 %v2208_v47, %v2571_v3  ;;  %v996_v57 = vpop.f32.mrb[31].mxu0 }
 0x123   : > { %1866 = vst.msk [vmem:[%s2581_s30 + $0x2c8] sm:$0xff] %vm1776_vm1, %v1737_v44  ;;  %v1614_v50 = vmul.f32 0.1, %v1258_v40  ;;  %vm1420_vm15 = vcmp.gt.f32.partialorder %v994_v45, 0.0  ;;  %v1548_v51 = vmul.f32 0.1, %v994_v45  ;;  %v1261_v56 = vadd.f32 %v2272_v48, %v2571_v3 }
 0x124   : > { %vm1484_vm0 = vcmp.gt.f32.partialorder %v1250_v46, 0.0  ;;  %v1612_v52 = vmul.f32 0.1, %v1250_v46  ;;  %v1678_v53 = vsel %vm1422_vm13, %v1002_v39, %v1550_v49  ;;  %v1252_v58 = vpop.f32.mrb[31].mxu1  ;;  %v997_v61 = vadd.f32 %v2571_v3, %v996_v57 }
 0x125   : > { %v1742_v54 = vsel %vm1486_vm14, %v1258_v40, %v1614_v50  ;;  %1807 = vst.msk [vmem:[%s2581_s30 + $0xf0] sm:$0xff] %vm1776_vm1, %v1678_v53  ;;  %v1676_v59 = vsel %vm1420_vm15, %v994_v45, %v1548_v51  ;;  %v1253_v62 = vadd.f32 %v2571_v3, %v1252_v58  ;;  %v2211_v63 = vpop.f32.mrb[32].mxu0  ;;  %vm1423_vm2 = vcmp.gt.f32.partialorder %v1005_v55, 0.0 }
 0x126   : > { %1871 = vst.msk [vmem:[%s2581_s30 + $0x2f0] sm:$0xff] %vm1776_vm1, %v1742_v54  ;;  %v1740_v60 = vsel %vm1484_vm0, %v1250_v46, %v1612_v52  ;;  %v2275_v0 = vpop.f32.mrb[32].mxu1  ;;  %1805 = vst.msk [vmem:[%s2581_s30 + $0xe0] sm:$0xff] %vm1776_vm1, %v1676_v59  ;;  %v1551_v1 = vmul.f32 0.1, %v1005_v55  ;;  %vm1487_vm3 = vcmp.gt.f32.partialorder %v1261_v56, 0.0  ;;  %v1018_v8 = vadd.f32 %v2211_v63, %v2571_v3 }
 0x127   : > { %1869 = vst.msk [vmem:[%s2581_s30 + $0x2e0] sm:$0xff] %vm1776_vm1, %v1740_v60  ;;  %v1615_v2 = vmul.f32 0.1, %v1261_v56  ;;  %vm1421_vm4 = vcmp.gt.f32.partialorder %v997_v61, 0.0  ;;  %v1549_v4 = vmul.f32 0.1, %v997_v61  ;;  %v1274_v9 = vadd.f32 %v2275_v0, %v2571_v3 }
 0x128   : > { %vm1485_vm5 = vcmp.gt.f32.partialorder %v1253_v62, 0.0  ;;  %v1613_v5 = vmul.f32 0.1, %v1253_v62  ;;  %v1679_v6 = vsel %vm1423_vm2, %v1005_v55, %v1551_v1  ;;  %v1009_v10 = vpop.f32.mrb[33].mxu0  ;;  %v1265_v11 = vpop.f32.mrb[33].mxu1  ;;  %vm1426_vm6 = vcmp.gt.f32.partialorder %v1018_v8, 0.0 }
 0x129   : > { %v1743_v7 = vsel %vm1487_vm3, %v1261_v56, %v1615_v2  ;;  %1808 = vst.msk [vmem:[%s2581_s30 + $0xf8] sm:$0xff] %vm1776_vm1, %v1679_v6  ;;  %v1677_v12 = vsel %vm1421_vm4, %v997_v61, %v1549_v4  ;;  %v1010_v14 = vadd.f32 %v2571_v3, %v1009_v10  ;;  %v1266_v15 = vadd.f32 %v2571_v3, %v1265_v11  ;;  %v2212_v16 = vpop.f32.mrb[34].mxu0  ;;  %v2276_v17 = vpop.f32.mrb[34].mxu1 }
 0x12a   : > { %1872 = vst.msk [vmem:[%s2581_s30 + $0x2f8] sm:$0xff] %vm1776_vm1, %v1743_v7  ;;  %v1741_v13 = vsel %vm1485_vm5, %v1253_v62, %v1613_v5  ;;  %1806 = vst.msk [vmem:[%s2581_s30 + $0xe8] sm:$0xff] %vm1776_vm1, %v1677_v12  ;;  %v1554_v18 = vmul.f32 0.1, %v1018_v8  ;;  %vm1490_vm7 = vcmp.gt.f32.partialorder %v1274_v9, 0.0  ;;  %v1021_v24 = vadd.f32 %v2212_v16, %v2571_v3  ;;  %v1012_v26 = vpop.f32.mrb[35].mxu0 }
 0x12b   : > { %1870 = vst.msk [vmem:[%s2581_s30 + $0x2e8] sm:$0xff] %vm1776_vm1, %v1741_v13  ;;  %v1618_v19 = vmul.f32 0.1, %v1274_v9  ;;  %vm1424_vm8 = vcmp.gt.f32.partialorder %v1010_v14, 0.0  ;;  %v1552_v20 = vmul.f32 0.1, %v1010_v14  ;;  %v1277_v25 = vadd.f32 %v2276_v17, %v2571_v3 }
 0x12c   : > { %vm1488_vm9 = vcmp.gt.f32.partialorder %v1266_v15, 0.0  ;;  %v1616_v21 = vmul.f32 0.1, %v1266_v15  ;;  %v1682_v22 = vsel %vm1426_vm6, %v1018_v8, %v1554_v18  ;;  %v1268_v27 = vpop.f32.mrb[35].mxu1  ;;  %v1013_v30 = vadd.f32 %v2571_v3, %v1012_v26 }
 0x12d   : > { %v1746_v23 = vsel %vm1490_vm7, %v1274_v9, %v1618_v19  ;;  %1811 = vst.msk [vmem:[%s2581_s30 + $0x110] sm:$0xff] %vm1776_vm1, %v1682_v22  ;;  %v1680_v28 = vsel %vm1424_vm8, %v1010_v14, %v1552_v20  ;;  %v1269_v31 = vadd.f32 %v2571_v3, %v1268_v27  ;;  %v2215_v32 = vpop.f32.mrb[36].mxu0  ;;  %vm1427_vm10 = vcmp.gt.f32.partialorder %v1021_v24, 0.0 }
 0x12e   : > { %1875 = vst.msk [vmem:[%s2581_s30 + $0x310] sm:$0xff] %vm1776_vm1, %v1746_v23  ;;  %v1744_v29 = vsel %vm1488_vm9, %v1266_v15, %v1616_v21  ;;  %v2279_v33 = vpop.f32.mrb[36].mxu1  ;;  %1809 = vst.msk [vmem:[%s2581_s30 + $0x100] sm:$0xff] %vm1776_vm1, %v1680_v28  ;;  %v1555_v34 = vmul.f32 0.1, %v1021_v24  ;;  %vm1491_vm11 = vcmp.gt.f32.partialorder %v1277_v25, 0.0  ;;  %v1034_v40 = vadd.f32 %v2215_v32, %v2571_v3 }
 0x12f   : > { %1873 = vst.msk [vmem:[%s2581_s30 + $0x300] sm:$0xff] %vm1776_vm1, %v1744_v29  ;;  %v1619_v35 = vmul.f32 0.1, %v1277_v25  ;;  %vm1425_vm12 = vcmp.gt.f32.partialorder %v1013_v30, 0.0  ;;  %v1553_v36 = vmul.f32 0.1, %v1013_v30  ;;  %v1290_v41 = vadd.f32 %v2279_v33, %v2571_v3 }
 0x130   : > { %vm1489_vm13 = vcmp.gt.f32.partialorder %v1269_v31, 0.0  ;;  %v1617_v37 = vmul.f32 0.1, %v1269_v31  ;;  %v1683_v38 = vsel %vm1427_vm10, %v1021_v24, %v1555_v34  ;;  %v1025_v42 = vpop.f32.mrb[37].mxu0  ;;  %v1281_v43 = vpop.f32.mrb[37].mxu1  ;;  %vm1430_vm14 = vcmp.gt.f32.partialorder %v1034_v40, 0.0 }
 0x131   : > { %v1747_v39 = vsel %vm1491_vm11, %v1277_v25, %v1619_v35  ;;  %1812 = vst.msk [vmem:[%s2581_s30 + $0x118] sm:$0xff] %vm1776_vm1, %v1683_v38  ;;  %v1681_v44 = vsel %vm1425_vm12, %v1013_v30, %v1553_v36  ;;  %v1026_v46 = vadd.f32 %v2571_v3, %v1025_v42  ;;  %v1282_v47 = vadd.f32 %v2571_v3, %v1281_v43  ;;  %v2216_v48 = vpop.f32.mrb[38].mxu0  ;;  %v2280_v49 = vpop.f32.mrb[38].mxu1 }
 0x132   : > { %1876 = vst.msk [vmem:[%s2581_s30 + $0x318] sm:$0xff] %vm1776_vm1, %v1747_v39  ;;  %v1745_v45 = vsel %vm1489_vm13, %v1269_v31, %v1617_v37  ;;  %1810 = vst.msk [vmem:[%s2581_s30 + $0x108] sm:$0xff] %vm1776_vm1, %v1681_v44  ;;  %v1558_v50 = vmul.f32 0.1, %v1034_v40  ;;  %vm1494_vm15 = vcmp.gt.f32.partialorder %v1290_v41, 0.0  ;;  %v1037_v56 = vadd.f32 %v2216_v48, %v2571_v3  ;;  %v1028_v58 = vpop.f32.mrb[39].mxu0 }
 0x133   : > { %1874 = vst.msk [vmem:[%s2581_s30 + $0x308] sm:$0xff] %vm1776_vm1, %v1745_v45  ;;  %v1622_v51 = vmul.f32 0.1, %v1290_v41  ;;  %vm1428_vm0 = vcmp.gt.f32.partialorder %v1026_v46, 0.0  ;;  %v1556_v52 = vmul.f32 0.1, %v1026_v46  ;;  %v1293_v57 = vadd.f32 %v2280_v49, %v2571_v3 }
 0x134   : > { %vm1492_vm2 = vcmp.gt.f32.partialorder %v1282_v47, 0.0  ;;  %v1620_v53 = vmul.f32 0.1, %v1282_v47  ;;  %v1686_v54 = vsel %vm1430_vm14, %v1034_v40, %v1558_v50  ;;  %v1284_v59 = vpop.f32.mrb[39].mxu1  ;;  %v1029_v62 = vadd.f32 %v2571_v3, %v1028_v58  ;;  %v2832_v31 = vld [vmem:[%s2973_s2] ss:$0 sm:$0xff] }
 0x135   : > { %v1750_v55 = vsel %vm1494_vm15, %v1290_v41, %v1622_v51  ;;  %1815 = vst.msk [vmem:[%s2581_s30 + $0x130] sm:$0xff] %vm1776_vm1, %v1686_v54  ;;  %v1684_v60 = vsel %vm1428_vm0, %v1026_v46, %v1556_v52  ;;  %v1285_v63 = vadd.f32 %v2571_v3, %v1284_v59  ;;  %v2219_v0 = vpop.f32.mrb[40].mxu0  ;;  %vm1431_vm3 = vcmp.gt.f32.partialorder %v1037_v56, 0.0 }
 0x136   : > { %1879 = vst.msk [vmem:[%s2581_s30 + $0x330] sm:$0xff] %vm1776_vm1, %v1750_v55  ;;  %v1748_v61 = vsel %vm1492_vm2, %v1282_v47, %v1620_v53  ;;  %v2283_v1 = vpop.f32.mrb[40].mxu1  ;;  %1813 = vst.msk [vmem:[%s2581_s30 + $0x120] sm:$0xff] %vm1776_vm1, %v1684_v60  ;;  %v1559_v2 = vmul.f32 0.1, %v1037_v56  ;;  %vm1495_vm4 = vcmp.gt.f32.partialorder %v1293_v57, 0.0  ;;  %v1050_v9 = vadd.f32 %v2219_v0, %v2571_v3 }
 0x137   : > { %1877 = vst.msk [vmem:[%s2581_s30 + $0x320] sm:$0xff] %vm1776_vm1, %v1748_v61  ;;  %v1623_v4 = vmul.f32 0.1, %v1293_v57  ;;  %vm1429_vm5 = vcmp.gt.f32.partialorder %v1029_v62, 0.0  ;;  %v1557_v5 = vmul.f32 0.1, %v1029_v62  ;;  %v1306_v10 = vadd.f32 %v2283_v1, %v2571_v3 }
 0x138   : > { %vm1493_vm6 = vcmp.gt.f32.partialorder %v1285_v63, 0.0  ;;  %v1621_v6 = vmul.f32 0.1, %v1285_v63  ;;  %v1687_v7 = vsel %vm1431_vm3, %v1037_v56, %v1559_v2  ;;  %v1041_v11 = vpop.f32.mrb[41].mxu0  ;;  %v1297_v12 = vpop.f32.mrb[41].mxu1  ;;  %vm1434_vm7 = vcmp.gt.f32.partialorder %v1050_v9, 0.0 }
 0x139   : > { %v1751_v8 = vsel %vm1495_vm4, %v1293_v57, %v1623_v4  ;;  %1816 = vst.msk [vmem:[%s2581_s30 + $0x138] sm:$0xff] %vm1776_vm1, %v1687_v7  ;;  %v1685_v13 = vsel %vm1429_vm5, %v1029_v62, %v1557_v5  ;;  %v1042_v15 = vadd.f32 %v2571_v3, %v1041_v11  ;;  %v1298_v16 = vadd.f32 %v2571_v3, %v1297_v12  ;;  %v2220_v17 = vpop.f32.mrb[42].mxu0  ;;  %v2284_v18 = vpop.f32.mrb[42].mxu1 }
 0x13a   : > { %1880 = vst.msk [vmem:[%s2581_s30 + $0x338] sm:$0xff] %vm1776_vm1, %v1751_v8  ;;  %v1749_v14 = vsel %vm1493_vm6, %v1285_v63, %v1621_v6  ;;  %1814 = vst.msk [vmem:[%s2581_s30 + $0x128] sm:$0xff] %vm1776_vm1, %v1685_v13  ;;  %v1562_v19 = vmul.f32 0.1, %v1050_v9  ;;  %vm1498_vm8 = vcmp.gt.f32.partialorder %v1306_v10, 0.0  ;;  %v1053_v25 = vadd.f32 %v2220_v17, %v2571_v3  ;;  %v1044_v27 = vpop.f32.mrb[43].mxu0 }
 0x13b   : > { %1878 = vst.msk [vmem:[%s2581_s30 + $0x328] sm:$0xff] %vm1776_vm1, %v1749_v14  ;;  %v1626_v20 = vmul.f32 0.1, %v1306_v10  ;;  %vm1432_vm9 = vcmp.gt.f32.partialorder %v1042_v15, 0.0  ;;  %v1560_v21 = vmul.f32 0.1, %v1042_v15  ;;  %v1309_v26 = vadd.f32 %v2284_v18, %v2571_v3 }
 0x13c   : > { %vm1496_vm10 = vcmp.gt.f32.partialorder %v1298_v16, 0.0  ;;  %v1624_v22 = vmul.f32 0.1, %v1298_v16  ;;  %v1690_v23 = vsel %vm1434_vm7, %v1050_v9, %v1562_v19  ;;  %v1300_v28 = vpop.f32.mrb[43].mxu1  ;;  %v1045_v32 = vadd.f32 %v2832_v31, %v1044_v27 }
 0x13d   : > { %v1754_v24 = vsel %vm1498_vm8, %v1306_v10, %v1626_v20  ;;  %1819 = vst.msk [vmem:[%s2581_s30 + $0x150] sm:$0xff] %vm1776_vm1, %v1690_v23  ;;  %v1688_v29 = vsel %vm1432_vm9, %v1042_v15, %v1560_v21  ;;  %v1301_v33 = vadd.f32 %v2832_v31, %v1300_v28  ;;  %v2223_v34 = vpop.f32.mrb[44].mxu0  ;;  %vm1435_vm11 = vcmp.gt.f32.partialorder %v1053_v25, 0.0 }
 0x13e   : > { %1883 = vst.msk [vmem:[%s2581_s30 + $0x350] sm:$0xff] %vm1776_vm1, %v1754_v24  ;;  %v1752_v30 = vsel %vm1496_vm10, %v1298_v16, %v1624_v22  ;;  %v2287_v35 = vpop.f32.mrb[44].mxu1  ;;  %1817 = vst.msk [vmem:[%s2581_s30 + $0x140] sm:$0xff] %vm1776_vm1, %v1688_v29  ;;  %v1563_v3 = vmul.f32 0.1, %v1053_v25  ;;  %vm1499_vm12 = vcmp.gt.f32.partialorder %v1309_v26, 0.0  ;;  %v1066_v41 = vadd.f32 %v2832_v31, %v2223_v34 }
 0x13f   : > { %1881 = vst.msk [vmem:[%s2581_s30 + $0x340] sm:$0xff] %vm1776_vm1, %v1752_v30  ;;  %v1627_v36 = vmul.f32 0.1, %v1309_v26  ;;  %vm1433_vm13 = vcmp.gt.f32.partialorder %v1045_v32, 0.0  ;;  %v1561_v37 = vmul.f32 0.1, %v1045_v32  ;;  %v1322_v42 = vadd.f32 %v2832_v31, %v2287_v35 }
 0x140   : > { %vm1497_vm14 = vcmp.gt.f32.partialorder %v1301_v33, 0.0  ;;  %v1625_v38 = vmul.f32 0.1, %v1301_v33  ;;  %v1691_v39 = vsel %vm1435_vm11, %v1053_v25, %v1563_v3  ;;  %v1057_v43 = vpop.f32.mrb[45].mxu0  ;;  %v1313_v44 = vpop.f32.mrb[45].mxu1  ;;  %vm1438_vm15 = vcmp.gt.f32.partialorder %v1066_v41, 0.0 }
 0x141   : > { %v1755_v40 = vsel %vm1499_vm12, %v1309_v26, %v1627_v36  ;;  %1820 = vst.msk [vmem:[%s2581_s30 + $0x158] sm:$0xff] %vm1776_vm1, %v1691_v39  ;;  %v1689_v45 = vsel %vm1433_vm13, %v1045_v32, %v1561_v37  ;;  %v1058_v47 = vadd.f32 %v2832_v31, %v1057_v43  ;;  %v1314_v48 = vadd.f32 %v2832_v31, %v1313_v44  ;;  %v2224_v49 = vpop.f32.mrb[46].mxu0  ;;  %v2288_v50 = vpop.f32.mrb[46].mxu1 }
 0x142   : > { %1884 = vst.msk [vmem:[%s2581_s30 + $0x358] sm:$0xff] %vm1776_vm1, %v1755_v40  ;;  %v1753_v46 = vsel %vm1497_vm14, %v1301_v33, %v1625_v38  ;;  %1818 = vst.msk [vmem:[%s2581_s30 + $0x148] sm:$0xff] %vm1776_vm1, %v1689_v45  ;;  %v1566_v51 = vmul.f32 0.1, %v1066_v41  ;;  %vm1502_vm0 = vcmp.gt.f32.partialorder %v1322_v42, 0.0  ;;  %v1069_v57 = vadd.f32 %v2832_v31, %v2224_v49  ;;  %v1060_v59 = vpop.f32.mrb[47].mxu0 }
 0x143   : > { %1882 = vst.msk [vmem:[%s2581_s30 + $0x348] sm:$0xff] %vm1776_vm1, %v1753_v46  ;;  %v1630_v52 = vmul.f32 0.1, %v1322_v42  ;;  %vm1436_vm2 = vcmp.gt.f32.partialorder %v1058_v47, 0.0  ;;  %v1564_v53 = vmul.f32 0.1, %v1058_v47  ;;  %v1325_v58 = vadd.f32 %v2832_v31, %v2288_v50 }
 0x144   : > { %vm1500_vm3 = vcmp.gt.f32.partialorder %v1314_v48, 0.0  ;;  %v1628_v54 = vmul.f32 0.1, %v1314_v48  ;;  %v1694_v55 = vsel %vm1438_vm15, %v1066_v41, %v1566_v51  ;;  %v1316_v60 = vpop.f32.mrb[47].mxu1  ;;  %v1061_v63 = vadd.f32 %v2832_v31, %v1060_v59 }
 0x145   : > { %v1758_v56 = vsel %vm1502_vm0, %v1322_v42, %v1630_v52  ;;  %1823 = vst.msk [vmem:[%s2581_s30 + $0x170] sm:$0xff] %vm1776_vm1, %v1694_v55  ;;  %v1692_v61 = vsel %vm1436_vm2, %v1058_v47, %v1564_v53  ;;  %v1317_v0 = vadd.f32 %v2832_v31, %v1316_v60  ;;  %v2227_v1 = vpop.f32.mrb[48].mxu0  ;;  %vm1439_vm4 = vcmp.gt.f32.partialorder %v1069_v57, 0.0 }
 0x146   : > { %1887 = vst.msk [vmem:[%s2581_s30 + $0x370] sm:$0xff] %vm1776_vm1, %v1758_v56  ;;  %v1756_v62 = vsel %vm1500_vm3, %v1314_v48, %v1628_v54  ;;  %v2291_v2 = vpop.f32.mrb[48].mxu1  ;;  %1821 = vst.msk [vmem:[%s2581_s30 + $0x160] sm:$0xff] %vm1776_vm1, %v1692_v61  ;;  %v1567_v4 = vmul.f32 0.1, %v1069_v57  ;;  %vm1503_vm5 = vcmp.gt.f32.partialorder %v1325_v58, 0.0  ;;  %v1082_v10 = vadd.f32 %v2832_v31, %v2227_v1 }
 0x147   : > { %1885 = vst.msk [vmem:[%s2581_s30 + $0x360] sm:$0xff] %vm1776_vm1, %v1756_v62  ;;  %v1631_v5 = vmul.f32 0.1, %v1325_v58  ;;  %vm1437_vm6 = vcmp.gt.f32.partialorder %v1061_v63, 0.0  ;;  %v1565_v6 = vmul.f32 0.1, %v1061_v63  ;;  %v1338_v11 = vadd.f32 %v2832_v31, %v2291_v2 }
 0x148   : > { %vm1501_vm7 = vcmp.gt.f32.partialorder %v1317_v0, 0.0  ;;  %v1629_v7 = vmul.f32 0.1, %v1317_v0  ;;  %v1695_v8 = vsel %vm1439_vm4, %v1069_v57, %v1567_v4  ;;  %v1073_v12 = vpop.f32.mrb[49].mxu0  ;;  %v1329_v13 = vpop.f32.mrb[49].mxu1  ;;  %vm1442_vm8 = vcmp.gt.f32.partialorder %v1082_v10, 0.0 }
 0x149   : > { %v1759_v9 = vsel %vm1503_vm5, %v1325_v58, %v1631_v5  ;;  %1824 = vst.msk [vmem:[%s2581_s30 + $0x178] sm:$0xff] %vm1776_vm1, %v1695_v8  ;;  %v1693_v14 = vsel %vm1437_vm6, %v1061_v63, %v1565_v6  ;;  %v1074_v16 = vadd.f32 %v2832_v31, %v1073_v12  ;;  %v1330_v17 = vadd.f32 %v2832_v31, %v1329_v13  ;;  %v2228_v18 = vpop.f32.mrb[50].mxu0  ;;  %v2292_v19 = vpop.f32.mrb[50].mxu1 }
 0x14a   : > { %1888 = vst.msk [vmem:[%s2581_s30 + $0x378] sm:$0xff] %vm1776_vm1, %v1759_v9  ;;  %v1757_v15 = vsel %vm1501_vm7, %v1317_v0, %v1629_v7  ;;  %1822 = vst.msk [vmem:[%s2581_s30 + $0x168] sm:$0xff] %vm1776_vm1, %v1693_v14  ;;  %v1570_v20 = vmul.f32 0.1, %v1082_v10  ;;  %vm1506_vm9 = vcmp.gt.f32.partialorder %v1338_v11, 0.0  ;;  %v1085_v26 = vadd.f32 %v2832_v31, %v2228_v18  ;;  %v1076_v28 = vpop.f32.mrb[51].mxu0 }
 0x14b   : > { %1886 = vst.msk [vmem:[%s2581_s30 + $0x368] sm:$0xff] %vm1776_vm1, %v1757_v15  ;;  %v1634_v21 = vmul.f32 0.1, %v1338_v11  ;;  %vm1440_vm10 = vcmp.gt.f32.partialorder %v1074_v16, 0.0  ;;  %v1568_v22 = vmul.f32 0.1, %v1074_v16  ;;  %v1341_v27 = vadd.f32 %v2832_v31, %v2292_v19 }
 0x14c   : > { %vm1504_vm11 = vcmp.gt.f32.partialorder %v1330_v17, 0.0  ;;  %v1632_v23 = vmul.f32 0.1, %v1330_v17  ;;  %v1698_v24 = vsel %vm1442_vm8, %v1082_v10, %v1570_v20  ;;  %v1332_v29 = vpop.f32.mrb[51].mxu1  ;;  %v1077_v33 = vadd.f32 %v2832_v31, %v1076_v28 }
 0x14d   : > { %v1762_v25 = vsel %vm1506_vm9, %v1338_v11, %v1634_v21  ;;  %1827 = vst.msk [vmem:[%s2581_s30 + $0x190] sm:$0xff] %vm1776_vm1, %v1698_v24  ;;  %v1696_v30 = vsel %vm1440_vm10, %v1074_v16, %v1568_v22  ;;  %v1333_v34 = vadd.f32 %v2832_v31, %v1332_v29  ;;  %v2231_v35 = vpop.f32.mrb[52].mxu0  ;;  %vm1443_vm12 = vcmp.gt.f32.partialorder %v1085_v26, 0.0 }
 0x14e   : > { %1891 = vst.msk [vmem:[%s2581_s30 + $0x390] sm:$0xff] %vm1776_vm1, %v1762_v25  ;;  %v1760_v32 = vsel %vm1504_vm11, %v1330_v17, %v1632_v23  ;;  %v2295_v3 = vpop.f32.mrb[52].mxu1  ;;  %1825 = vst.msk [vmem:[%s2581_s30 + $0x180] sm:$0xff] %vm1776_vm1, %v1696_v30  ;;  %v1571_v36 = vmul.f32 0.1, %v1085_v26  ;;  %vm1507_vm13 = vcmp.gt.f32.partialorder %v1341_v27, 0.0  ;;  %v1098_v42 = vadd.f32 %v2832_v31, %v2231_v35 }
 0x14f   : > { %1889 = vst.msk [vmem:[%s2581_s30 + $0x380] sm:$0xff] %vm1776_vm1, %v1760_v32  ;;  %v1635_v37 = vmul.f32 0.1, %v1341_v27  ;;  %vm1441_vm14 = vcmp.gt.f32.partialorder %v1077_v33, 0.0  ;;  %v1569_v38 = vmul.f32 0.1, %v1077_v33  ;;  %v1354_v43 = vadd.f32 %v2832_v31, %v2295_v3 }
 0x150   : > { %vm1505_vm15 = vcmp.gt.f32.partialorder %v1333_v34, 0.0  ;;  %v1633_v39 = vmul.f32 0.1, %v1333_v34  ;;  %v1699_v40 = vsel %vm1443_vm12, %v1085_v26, %v1571_v36  ;;  %v1089_v44 = vpop.f32.mrb[53].mxu0  ;;  %v1345_v45 = vpop.f32.mrb[53].mxu1  ;;  %vm1446_vm0 = vcmp.gt.f32.partialorder %v1098_v42, 0.0 }
 0x151   : > { %v1763_v41 = vsel %vm1507_vm13, %v1341_v27, %v1635_v37  ;;  %1828 = vst.msk [vmem:[%s2581_s30 + $0x198] sm:$0xff] %vm1776_vm1, %v1699_v40  ;;  %v1697_v46 = vsel %vm1441_vm14, %v1077_v33, %v1569_v38  ;;  %v1090_v48 = vadd.f32 %v2832_v31, %v1089_v44  ;;  %v1346_v49 = vadd.f32 %v2832_v31, %v1345_v45  ;;  %v2232_v50 = vpop.f32.mrb[54].mxu0  ;;  %v2296_v51 = vpop.f32.mrb[54].mxu1 }
 0x152   : > { %1892 = vst.msk [vmem:[%s2581_s30 + $0x398] sm:$0xff] %vm1776_vm1, %v1763_v41  ;;  %v1761_v47 = vsel %vm1505_vm15, %v1333_v34, %v1633_v39  ;;  %1826 = vst.msk [vmem:[%s2581_s30 + $0x188] sm:$0xff] %vm1776_vm1, %v1697_v46  ;;  %v1574_v52 = vmul.f32 0.1, %v1098_v42  ;;  %vm1510_vm2 = vcmp.gt.f32.partialorder %v1354_v43, 0.0  ;;  %v1101_v58 = vadd.f32 %v2832_v31, %v2232_v50  ;;  %v1092_v60 = vpop.f32.mrb[55].mxu0 }
 0x153   : > { %1890 = vst.msk [vmem:[%s2581_s30 + $0x388] sm:$0xff] %vm1776_vm1, %v1761_v47  ;;  %v1638_v53 = vmul.f32 0.1, %v1354_v43  ;;  %vm1444_vm3 = vcmp.gt.f32.partialorder %v1090_v48, 0.0  ;;  %v1572_v54 = vmul.f32 0.1, %v1090_v48  ;;  %v1357_v59 = vadd.f32 %v2832_v31, %v2296_v51 }
 0x154   : > { %vm1508_vm4 = vcmp.gt.f32.partialorder %v1346_v49, 0.0  ;;  %v1636_v55 = vmul.f32 0.1, %v1346_v49  ;;  %v1702_v56 = vsel %vm1446_vm0, %v1098_v42, %v1574_v52  ;;  %v1348_v61 = vpop.f32.mrb[55].mxu1  ;;  %v1093_v0 = vadd.f32 %v2832_v31, %v1092_v60 }
 0x155   : > { %v1766_v57 = vsel %vm1510_vm2, %v1354_v43, %v1638_v53  ;;  %1831 = vst.msk [vmem:[%s2581_s30 + $0x1b0] sm:$0xff] %vm1776_vm1, %v1702_v56  ;;  %v1700_v62 = vsel %vm1444_vm3, %v1090_v48, %v1572_v54  ;;  %v1349_v1 = vadd.f32 %v2832_v31, %v1348_v61  ;;  %v2235_v2 = vpop.f32.mrb[56].mxu0  ;;  %vm1447_vm5 = vcmp.gt.f32.partialorder %v1101_v58, 0.0 }
 0x156   : > { %1895 = vst.msk [vmem:[%s2581_s30 + $0x3b0] sm:$0xff] %vm1776_vm1, %v1766_v57  ;;  %v1764_v63 = vsel %vm1508_vm4, %v1346_v49, %v1636_v55  ;;  %v2299_v4 = vpop.f32.mrb[56].mxu1  ;;  %1829 = vst.msk [vmem:[%s2581_s30 + $0x1a0] sm:$0xff] %vm1776_vm1, %v1700_v62  ;;  %v1575_v5 = vmul.f32 0.1, %v1101_v58  ;;  %vm1511_vm6 = vcmp.gt.f32.partialorder %v1357_v59, 0.0  ;;  %v1114_v11 = vadd.f32 %v2832_v31, %v2235_v2 }
 0x157   : > { %1893 = vst.msk [vmem:[%s2581_s30 + $0x3a0] sm:$0xff] %vm1776_vm1, %v1764_v63  ;;  %v1639_v6 = vmul.f32 0.1, %v1357_v59  ;;  %vm1445_vm7 = vcmp.gt.f32.partialorder %v1093_v0, 0.0  ;;  %v1573_v7 = vmul.f32 0.1, %v1093_v0  ;;  %v1370_v12 = vadd.f32 %v2832_v31, %v2299_v4 }
 0x158   : > { %vm1509_vm8 = vcmp.gt.f32.partialorder %v1349_v1, 0.0  ;;  %v1637_v8 = vmul.f32 0.1, %v1349_v1  ;;  %v1703_v9 = vsel %vm1447_vm5, %v1101_v58, %v1575_v5  ;;  %v1105_v13 = vpop.f32.mrb[57].mxu0  ;;  %v1361_v14 = vpop.f32.mrb[57].mxu1  ;;  %vm1450_vm9 = vcmp.gt.f32.partialorder %v1114_v11, 0.0 }
 0x159   : > { %v1767_v10 = vsel %vm1511_vm6, %v1357_v59, %v1639_v6  ;;  %1832 = vst.msk [vmem:[%s2581_s30 + $0x1b8] sm:$0xff] %vm1776_vm1, %v1703_v9  ;;  %v1701_v15 = vsel %vm1445_vm7, %v1093_v0, %v1573_v7  ;;  %v1106_v17 = vadd.f32 %v2832_v31, %v1105_v13  ;;  %v1362_v18 = vadd.f32 %v2832_v31, %v1361_v14  ;;  %v2236_v19 = vpop.f32.mrb[58].mxu0  ;;  %v2300_v20 = vpop.f32.mrb[58].mxu1 }
 0x15a   : > { %1896 = vst.msk [vmem:[%s2581_s30 + $0x3b8] sm:$0xff] %vm1776_vm1, %v1767_v10  ;;  %v1765_v16 = vsel %vm1509_vm8, %v1349_v1, %v1637_v8  ;;  %1830 = vst.msk [vmem:[%s2581_s30 + $0x1a8] sm:$0xff] %vm1776_vm1, %v1701_v15  ;;  %v1578_v21 = vmul.f32 0.1, %v1114_v11  ;;  %vm1514_vm10 = vcmp.gt.f32.partialorder %v1370_v12, 0.0  ;;  %v1117_v27 = vadd.f32 %v2832_v31, %v2236_v19  ;;  %v1108_v29 = vpop.f32.mrb[59].mxu0 }
 0x15b   : > { %1894 = vst.msk [vmem:[%s2581_s30 + $0x3a8] sm:$0xff] %vm1776_vm1, %v1765_v16  ;;  %v1642_v22 = vmul.f32 0.1, %v1370_v12  ;;  %vm1448_vm11 = vcmp.gt.f32.partialorder %v1106_v17, 0.0  ;;  %v1576_v23 = vmul.f32 0.1, %v1106_v17  ;;  %v1373_v28 = vadd.f32 %v2832_v31, %v2300_v20 }
 0x15c   : > { %vm1512_vm12 = vcmp.gt.f32.partialorder %v1362_v18, 0.0  ;;  %v1640_v24 = vmul.f32 0.1, %v1362_v18  ;;  %v1706_v25 = vsel %vm1450_vm9, %v1114_v11, %v1578_v21  ;;  %v1364_v30 = vpop.f32.mrb[59].mxu1  ;;  %v1109_v34 = vadd.f32 %v2832_v31, %v1108_v29 }
 0x15d   : > { %v1770_v26 = vsel %vm1514_vm10, %v1370_v12, %v1642_v22  ;;  %1835 = vst.msk [vmem:[%s2581_s30 + $0x1d0] sm:$0xff] %vm1776_vm1, %v1706_v25  ;;  %v1704_v32 = vsel %vm1448_vm11, %v1106_v17, %v1576_v23  ;;  %v1365_v35 = vadd.f32 %v2832_v31, %v1364_v30  ;;  %v2239_v3 = vpop.f32.mrb[60].mxu0  ;;  %vm1451_vm13 = vcmp.gt.f32.partialorder %v1117_v27, 0.0 }
 0x15e   : > { %1899 = vst.msk [vmem:[%s2581_s30 + $0x3d0] sm:$0xff] %vm1776_vm1, %v1770_v26  ;;  %v1768_v33 = vsel %vm1512_vm12, %v1362_v18, %v1640_v24  ;;  %v2303_v36 = vpop.f32.mrb[60].mxu1  ;;  %1833 = vst.msk [vmem:[%s2581_s30 + $0x1c0] sm:$0xff] %vm1776_vm1, %v1704_v32  ;;  %v1579_v37 = vmul.f32 0.1, %v1117_v27  ;;  %vm1515_vm14 = vcmp.gt.f32.partialorder %v1373_v28, 0.0  ;;  %v1130_v43 = vadd.f32 %v2832_v31, %v2239_v3 }
 0x15f   : > { %1897 = vst.msk [vmem:[%s2581_s30 + $0x3c0] sm:$0xff] %vm1776_vm1, %v1768_v33  ;;  %v1643_v38 = vmul.f32 0.1, %v1373_v28  ;;  %vm1449_vm15 = vcmp.gt.f32.partialorder %v1109_v34, 0.0  ;;  %v1577_v39 = vmul.f32 0.1, %v1109_v34  ;;  %v1386_v44 = vadd.f32 %v2832_v31, %v2303_v36 }
 0x160   : > { %vm1513_vm0 = vcmp.gt.f32.partialorder %v1365_v35, 0.0  ;;  %v1641_v40 = vmul.f32 0.1, %v1365_v35  ;;  %v1707_v41 = vsel %vm1451_vm13, %v1117_v27, %v1579_v37  ;;  %v1121_v45 = vpop.f32.mrb[61].mxu0  ;;  %v1377_v46 = vpop.f32.mrb[61].mxu1  ;;  %vm1454_vm2 = vcmp.gt.f32.partialorder %v1130_v43, 0.0 }
 0x161   : > { %v1771_v42 = vsel %vm1515_vm14, %v1373_v28, %v1643_v38  ;;  %1836 = vst.msk [vmem:[%s2581_s30 + $0x1d8] sm:$0xff] %vm1776_vm1, %v1707_v41  ;;  %v1705_v47 = vsel %vm1449_vm15, %v1109_v34, %v1577_v39  ;;  %v1122_v49 = vadd.f32 %v2832_v31, %v1121_v45  ;;  %v1378_v50 = vadd.f32 %v2832_v31, %v1377_v46  ;;  %v2240_v51 = vpop.f32.mrb[62].mxu0  ;;  %v2304_v52 = vpop.f32.mrb[62].mxu1 }
 0x162   : > { %1900 = vst.msk [vmem:[%s2581_s30 + $0x3d8] sm:$0xff] %vm1776_vm1, %v1771_v42  ;;  %v1769_v48 = vsel %vm1513_vm0, %v1365_v35, %v1641_v40  ;;  %1834 = vst.msk [vmem:[%s2581_s30 + $0x1c8] sm:$0xff] %vm1776_vm1, %v1705_v47  ;;  %v1582_v53 = vmul.f32 0.1, %v1130_v43  ;;  %vm1518_vm3 = vcmp.gt.f32.partialorder %v1386_v44, 0.0  ;;  %v1133_v59 = vadd.f32 %v2832_v31, %v2240_v51  ;;  %v1124_v61 = vpop.f32.mrb[63].mxu0 }
 0x163   : > { %1898 = vst.msk [vmem:[%s2581_s30 + $0x3c8] sm:$0xff] %vm1776_vm1, %v1769_v48  ;;  %v1646_v54 = vmul.f32 0.1, %v1386_v44  ;;  %vm1452_vm4 = vcmp.gt.f32.partialorder %v1122_v49, 0.0  ;;  %v1580_v55 = vmul.f32 0.1, %v1122_v49  ;;  %v1389_v60 = vadd.f32 %v2832_v31, %v2304_v52 }
 0x164   : > { %vm1516_vm5 = vcmp.gt.f32.partialorder %v1378_v50, 0.0  ;;  %v1644_v56 = vmul.f32 0.1, %v1378_v50  ;;  %v1710_v57 = vsel %vm1454_vm2, %v1130_v43, %v1582_v53  ;;  %v1380_v62 = vpop.f32.mrb[63].mxu1  ;;  %v1125_v1 = vadd.f32 %v2832_v31, %v1124_v61 }
 0x165   : > { %v1774_v58 = vsel %vm1518_vm3, %v1386_v44, %v1646_v54  ;;  %1839 = vst.msk [vmem:[%s2581_s30 + $0x1f0] sm:$0xff] %vm1776_vm1, %v1710_v57  ;;  %v1708_v63 = vsel %vm1452_vm4, %v1122_v49, %v1580_v55  ;;  %v1381_v2 = vadd.f32 %v2832_v31, %v1380_v62  ;;  %vm1455_vm6 = vcmp.gt.f32.partialorder %v1133_v59, 0.0 }
 0x166   : > { %1903 = vst.msk [vmem:[%s2581_s30 + $0x3f0] sm:$0xff] %vm1776_vm1, %v1774_v58  ;;  %v1772_v0 = vsel %vm1516_vm5, %v1378_v50, %v1644_v56  ;;  %1837 = vst.msk [vmem:[%s2581_s30 + $0x1e0] sm:$0xff] %vm1776_vm1, %v1708_v63  ;;  %v1583_v4 = vmul.f32 0.1, %v1133_v59  ;;  %vm1519_vm7 = vcmp.gt.f32.partialorder %v1389_v60, 0.0  ;;  %vm1453_vm8 = vcmp.gt.f32.partialorder %v1125_v1, 0.0 }
 0x167   : > { %1901 = vst.msk [vmem:[%s2581_s30 + $0x3e0] sm:$0xff] %vm1776_vm1, %v1772_v0  ;;  %v1647_v5 = vmul.f32 0.1, %v1389_v60  ;;  %v1581_v6 = vmul.f32 0.1, %v1125_v1  ;;  %vm1517_vm9 = vcmp.gt.f32.partialorder %v1381_v2, 0.0 }
 0x168   : > { %v1645_v7 = vmul.f32 0.1, %v1381_v2  ;;  %v1711_v8 = vsel %vm1455_vm6, %v1133_v59, %v1583_v4 }
 0x169   : > { %v1775_v9 = vsel %vm1519_vm7, %v1389_v60, %v1647_v5  ;;  %1840 = vst.msk [vmem:[%s2581_s30 + $0x1f8] sm:$0xff] %vm1776_vm1, %v1711_v8  ;;  %v1709_v31 = vsel %vm1453_vm8, %v1125_v1, %v1581_v6 }
 0x16a   : > { %1904 = vst.msk [vmem:[%s2581_s30 + $0x3f8] sm:$0xff] %vm1776_vm1, %v1775_v9  ;;  %v1773_v10 = vsel %vm1517_vm9, %v1381_v2, %v1645_v7  ;;  %1838 = vst.msk [vmem:[%s2581_s30 + $0x1e8] sm:$0xff] %vm1776_vm1, %v1709_v31 }
 0x16b   : > { %1902 = vst.msk [vmem:[%s2581_s30 + $0x3e8] sm:$0xff] %vm1776_vm1, %v1773_v10 }
 0x16c PF: > { %s13_s12 = sadd.s32 1, %s2393_s12  }
 0x16d   : > { %p10_p4 = scmp.ge.s32.totalorder %s13_s12, 4  }
 0x16f   :  { %12 = sbr.rel (!%p10_p4) target bundleno = 1 (0x1), region = 62 }

// kernel: discriminator_forward.7
= control target key start
LH: loop header
LB: loop body
LE: loop exit
PB: predicated region body
PF: predicated region fallthrough
CT: control target
= control target key end

     0   :  { %s3047_s12 = smov 0   ;;  %s3559_s0 = inlined_call_operand.vmem [shape: bf16[512,1024], index: 0, kind: input, shape index: {}]   ;;  %s3560_s1 = inlined_call_operand.vmem [shape: bf16[1024,128], index: 1, kind: input, shape index: {}]   ;;  %s3561_s2 = inlined_call_operand.vmem [shape: f32[1,128], index: 2, kind: input, shape index: {}]   ;;  %s3562_s3 = inlined_call_operand.vmem [shape: f32[512,128], index: 3, kind: output, shape index: {}]  }
   0x1 LB: > { %s2293_s13 = sadd.s32 4294967295, %s3025_s12   ;;  %p2297_p0 = scmp.ge.s32.totalorder %s3025_s12, 1  ;;  %s3025_s12 = sphi %s3047_s12, %s13_s12  }
   0x2   : > { %p139_p1 = scmp.lt.s32.totalorder %s3025_s12, 3 }
   0x4   : > { %p140_p2 = pnand %p2297_p0, %p139_p1 }
   0x5   : > { %v2955_v0 = vld [vmem:[%s3560_s1 + $0x40] sm:$0xff] (!%p140_p2)   ;;  %v2959_v4 = vld [vmem:[%s3560_s1 + $0x48] sm:$0xff] (!%p140_p2)   ;;  %v2963_v8 = vld [vmem:[%s3560_s1 + $0x50] sm:$0xff] (!%p140_p2)   ;;  %s2298_s21 = sshll.u32 (!%p140_p2), %s2293_s13, 5 }
   0x6   : > { %143 = sbr.rel (%p140_p2) target bundleno = 512 (0x200), region = 32  ;;  %v2956_v1 = vld [vmem:[%s3560_s1 + $0xc0] sm:$0xff] (!%p140_p2)   ;;  %2499 = vmatprep.subr.bf16.mxu0 (!%p140_p2), %v2955_v0  ;;  %v2960_v5 = vld [vmem:[%s3560_s1 + $0xc8] sm:$0xff] (!%p140_p2)   ;;  %v2964_v9 = vld [vmem:[%s3560_s1 + $0xd0] sm:$0xff] (!%p140_p2)   ;;  %p165_p3 = scmp.lt.s32.totalorder (!%p140_p2), %s2298_s21, 63 }
   0x7   : > { %v2957_v2 = vld [vmem:[%s3560_s1] sm:$0xff] (!%p140_p2)   ;;  %2611 = vmatprep.subr.bf16.mxu1 (!%p140_p2), %v2956_v1  ;;  %v2961_v6 = vld [vmem:[%s3560_s1 + $0x8] sm:$0xff] (!%p140_p2)   ;;  %v2965_v10 = vld [vmem:[%s3560_s1 + $0x10] sm:$0xff] (!%p140_p2)  }
   0x8   : > { %v2958_v3 = vld [vmem:[%s3560_s1 + $0x80] sm:$0xff] (!%p140_p2)   ;;  %2500 = vmatpush3.bf16.msra.mxu0 (!%p140_p2), %v2957_v2  ;;  %v2962_v7 = vld [vmem:[%s3560_s1 + $0x88] sm:$0xff] (!%p140_p2)   ;;  %v2966_v11 = vld [vmem:[%s3560_s1 + $0x90] sm:$0xff] (!%p140_p2)  }
   0x9   : > { %2612 = vmatpush3.bf16.msra.mxu1 (!%p140_p2), %v2958_v3  ;;  %2501 = vmatprep.subr.bf16.mxu0 (!%p140_p2), %v2959_v4  ;;  %v2967_v12 = vld [vmem:[%s3560_s1 + $0x58] sm:$0xff] (!%p140_p2)   ;;  %v2971_v16 = vld [vmem:[%s3560_s1 + $0x60] sm:$0xff] (!%p140_p2)   ;;  %v2975_v20 = vld [vmem:[%s3560_s1 + $0x68] sm:$0xff] (!%p140_p2)  }
   0xa   : > { %2613 = vmatprep.subr.bf16.mxu1 (!%p140_p2), %v2960_v5  ;;  %v2968_v13 = vld [vmem:[%s3560_s1 + $0xd8] sm:$0xff] (!%p140_p2)   ;;  %v2972_v17 = vld [vmem:[%s3560_s1 + $0xe0] sm:$0xff] (!%p140_p2)   ;;  %v2976_v21 = vld [vmem:[%s3560_s1 + $0xe8] sm:$0xff] (!%p140_p2)  }
   0xb   : > { %v2969_v14 = vld [vmem:[%s3560_s1 + $0x18] sm:$0xff] (!%p140_p2)   ;;  %v2973_v18 = vld [vmem:[%s3560_s1 + $0x20] sm:$0xff] (!%p140_p2)   ;;  %v2977_v22 = vld [vmem:[%s3560_s1 + $0x28] sm:$0xff] (!%p140_p2)  }
   0xc   : > { %2502 = vmatpush3.bf16.msra.mxu0 (!%p140_p2), %v2961_v6  ;;  %v2970_v15 = vld [vmem:[%s3560_s1 + $0x98] sm:$0xff] (!%p140_p2)   ;;  %v2974_v19 = vld [vmem:[%s3560_s1 + $0xa0] sm:$0xff] (!%p140_p2)   ;;  %v2978_v23 = vld [vmem:[%s3560_s1 + $0xa8] sm:$0xff] (!%p140_p2)  }
   0xd   : > { %2614 = vmatpush3.bf16.msra.mxu1 %v2962_v7  ;;  %2503 = vmatprep.subr.bf16.mxu0 %v2963_v8  ;;  %s3564_s21 = smov (!%p165_p3, %s2298_s21), 63  ;;  %v2979_v24 = vld [vmem:[%s3560_s1 + $0x70] sm:$0xff]   ;;  %v2983_v28 = vld [vmem:[%s3560_s1 + $0x78] sm:$0xff]   ;;  %v2987_v40 = vld [vmem:[%s3560_s1 + $0x140] sm:$0xff]  }
   0xe   : > { %2615 = vmatprep.subr.bf16.mxu1 %v2964_v9  ;;  %v2980_v25 = vld [vmem:[%s3560_s1 + $0xf0] sm:$0xff]   ;;  %s2498_s18 = sshll.u32 %s3564_s21, 5  ;;  %v2984_v29 = vld [vmem:[%s3560_s1 + $0xf8] sm:$0xff]   ;;  %v2988_v41 = vld [vmem:[%s3560_s1 + $0x100] sm:$0xff]  }
   0xf   : > { %v2981_v26 = vld [vmem:[%s3560_s1 + $0x30] sm:$0xff]   ;;  %s3153_s28 = scalar_lea.vmem %s3559_s0, %s2498_s18  ;;  %v2985_v30 = vld [vmem:[%s3560_s1 + $0x38] sm:$0xff]   ;;  %v2989_v42 = vld [vmem:[%s3560_s1 + $0x1c0] sm:$0xff]  }
  0x10   : > { %2504 = vmatpush3.bf16.msra.mxu0 %v2965_v10  ;;  %v2982_v27 = vld [vmem:[%s3560_s1 + $0xb0] sm:$0xff]   ;;  %v2986_v31 = vld [vmem:[%s3560_s1 + $0xb8] sm:$0xff]   ;;  %v178_v32 = vld [vmem:[%s3153_s28] sm:$0xff] }
  0x11   : > { %2616 = vmatpush3.bf16.msra.mxu1 %v2966_v11  ;;  %2505 = vmatprep.subr.bf16.mxu0 %v2967_v12  ;;  %v182_v33 = vld [vmem:[%s3153_s28 + $0x20] sm:$0xff]  ;;  %v179_v34 = vld [vmem:[%s3153_s28 + $0x8] sm:$0xff]  ;;  %v2995_v2 = vld [vmem:[%s3560_s1 + $0x150] sm:$0xff]  }
  0x12   : > { %2617 = vmatprep.subr.bf16.mxu1 %v2968_v13  ;;  %v2304_v35 = vcombine.low %v178_v32, %v182_v33  ;;  %v2305_v36 = vcombine.high %v178_v32, %v182_v33  ;;  %v183_v37 = vld [vmem:[%s3153_s28 + $0x28] sm:$0xff]  ;;  %v2990_v43 = vld [vmem:[%s3560_s1 + $0x180] sm:$0xff]   ;;  %v2996_v4 = vld [vmem:[%s3560_s1 + $0x110] sm:$0xff]  }
  0x13   : > { %v2306_v38 = vcombine.low %v179_v34, %v183_v37  ;;  %v2307_v39 = vcombine.high %v179_v34, %v183_v37  ;;  %v186_v44 = vld [vmem:[%s3153_s28 + $0x40] sm:$0xff]  ;;  %v187_v47 = vld [vmem:[%s3153_s28 + $0x48] sm:$0xff]  ;;  %v2997_v7 = vld [vmem:[%s3560_s1 + $0x1d0] sm:$0xff]  }
  0x14   : > { %2506 = vmatpush3.bf16.msra.mxu0 %v2969_v14  ;;  %1497 = vmatprep.mubr.bf16.mxu0 %v2305_v36  ;;  %v190_v45 = vld [vmem:[%s3153_s28 + $0x60] sm:$0xff]  ;;  %v191_v48 = vld [vmem:[%s3153_s28 + $0x68] sm:$0xff]  ;;  %v2998_v9 = vld [vmem:[%s3560_s1 + $0x190] sm:$0xff]  }
  0x15   : > { %2618 = vmatpush3.bf16.msra.mxu1 %v2970_v15  ;;  %2507 = vmatprep.subr.bf16.mxu0 %v2971_v16  ;;  %v2313_v46 = vcombine.high %v186_v44, %v190_v45  ;;  %v194_v49 = vld [vmem:[%s3153_s28 + $0x80] sm:$0xff]  ;;  %v2315_v50 = vcombine.high %v187_v47, %v191_v48  ;;  %v195_v52 = vld [vmem:[%s3153_s28 + $0x88] sm:$0xff]  ;;  %v2312_v54 = vcombine.low %v186_v44, %v190_v45  ;;  %v2999_v14 = vld [vmem:[%s3560_s1 + $0x158] sm:$0xff]  }
  0x16   : > { %2619 = vmatprep.subr.bf16.mxu1 %v2972_v17  ;;  %1658 = vmatprep.mubr.bf16.mxu1 %v2307_v39  ;;  %v198_v51 = vld [vmem:[%s3153_s28 + $0xa0] sm:$0xff]  ;;  %v199_v53 = vld [vmem:[%s3153_s28 + $0xa8] sm:$0xff]  ;;  %v2314_v56 = vcombine.low %v187_v47, %v191_v48  ;;  %v3000_v15 = vld [vmem:[%s3560_s1 + $0x118] sm:$0xff]  }
  0x17   : > { %v2991_v55 = vld [vmem:[%s3560_s1 + $0x148] sm:$0xff]   ;;  %v2321_v57 = vcombine.high %v194_v49, %v198_v51  ;;  %v2323_v59 = vcombine.high %v195_v52, %v199_v53  ;;  %v202_v62 = vld [vmem:[%s3153_s28 + $0xc0] sm:$0xff]  ;;  %v2320_v3 = vcombine.low %v194_v49, %v198_v51  ;;  %v2322_v5 = vcombine.low %v195_v52, %v199_v53  ;;  %v3001_v17 = vld [vmem:[%s3560_s1 + $0x1d8] sm:$0xff]  }
  0x18   : > { %2508 = vmatpush3.bf16.msra.mxu0 %v2973_v18  ;;  %v2992_v58 = vld [vmem:[%s3560_s1 + $0x108] sm:$0xff]   ;;  %v206_v63 = vld [vmem:[%s3153_s28 + $0xe0] sm:$0xff]  ;;  %v3012_v47 = vld [vmem:[%s3560_s1 + $0x130] sm:$0xff]  }
  0x19   : > { %2620 = vmatpush3.bf16.msra.mxu1 %v2974_v19  ;;  %2509 = vmatprep.subr.bf16.mxu0 %v2975_v20  ;;  %v2993_v60 = vld [vmem:[%s3560_s1 + $0x1c8] sm:$0xff]   ;;  %v2329_v6 = vcombine.high %v202_v62, %v206_v63  ;;  %v210_v10 = vld [vmem:[%s3153_s28 + $0x100] sm:$0xff]  ;;  %v2328_v16 = vcombine.low %v202_v62, %v206_v63  ;;  %v3002_v20 = vld [vmem:[%s3560_s1 + $0x198] sm:$0xff]  }
  0x1a   : > { %2621 = vmatprep.subr.bf16.mxu1 %v2976_v21  ;;  %v2994_v61 = vld [vmem:[%s3560_s1 + $0x188] sm:$0xff]   ;;  %v214_v11 = vld [vmem:[%s3153_s28 + $0x120] sm:$0xff]  ;;  %v3013_v48 = vld [vmem:[%s3560_s1 + $0x1f0] sm:$0xff]  }
  0x1b   : > { %v203_v0 = vld [vmem:[%s3153_s28 + $0xc8] sm:$0xff]  ;;  %v2337_v19 = vcombine.high %v210_v10, %v214_v11  ;;  %v3014_v49 = vld [vmem:[%s3560_s1 + $0x1b0] sm:$0xff]   ;;  %v238_v51 = vld [vmem:[%s3153_s28 + $0x1e0] sm:$0xff] }
  0x1c   : > { %2510 = vmatpush3.bf16.msra.mxu0 %v2977_v22  ;;  %v207_v1 = vld [vmem:[%s3153_s28 + $0xe8] sm:$0xff]  ;;  %v218_v22 = vld [vmem:[%s3153_s28 + $0x140] sm:$0xff] }
  0x1d   : > { %2622 = vmatpush3.bf16.msra.mxu1 %v2978_v23  ;;  %2511 = vmatprep.subr.bf16.mxu0 %v2979_v24  ;;  %v2331_v8 = vcombine.high %v203_v0, %v207_v1  ;;  %v211_v12 = vld [vmem:[%s3153_s28 + $0x108] sm:$0xff]  ;;  %v2330_v18 = vcombine.low %v203_v0, %v207_v1  ;;  %v222_v23 = vld [vmem:[%s3153_s28 + $0x160] sm:$0xff] }
  0x1e   : > { %2623 = vmatprep.subr.bf16.mxu1 %v2980_v25  ;;  %v215_v13 = vld [vmem:[%s3153_s28 + $0x128] sm:$0xff]  ;;  %v3003_v24 = vld [vmem:[%s3560_s1 + $0x160] sm:$0xff]   ;;  %v2345_v32 = vcombine.high %v218_v22, %v222_v23 }
  0x1f   : > { %v2339_v21 = vcombine.high %v211_v12, %v215_v13  ;;  %v219_v25 = vld [vmem:[%s3153_s28 + $0x148] sm:$0xff]  ;;  %v242_v62 = vld [vmem:[%s3153_s28 + $0x200] sm:$0xff] }
  0x20   : > { %2512 = vmatpush3.bf16.msra.mxu0 %v2981_v26  ;;  %v223_v26 = vld [vmem:[%s3153_s28 + $0x168] sm:$0xff]  ;;  %v246_v63 = vld [vmem:[%s3153_s28 + $0x220] sm:$0xff] }
  0x21   : > { %2624 = vmatpush3.bf16.msra.mxu1 %v2982_v27  ;;  %2513 = vmatprep.subr.bf16.mxu0 %v2983_v28  ;;  %v3004_v27 = vld [vmem:[%s3560_s1 + $0x120] sm:$0xff]   ;;  %v2347_v33 = vcombine.high %v219_v25, %v223_v26  ;;  %v3007_v34 = vld [vmem:[%s3560_s1 + $0x168] sm:$0xff]  }
  0x22   : > { %2625 = vmatprep.subr.bf16.mxu1 %v2984_v29  ;;  %v3005_v28 = vld [vmem:[%s3560_s1 + $0x1e0] sm:$0xff]   ;;  %v3008_v36 = vld [vmem:[%s3560_s1 + $0x128] sm:$0xff]  }
  0x23   : > { %v3006_v29 = vld [vmem:[%s3560_s1 + $0x1a0] sm:$0xff]   ;;  %v3009_v37 = vld [vmem:[%s3560_s1 + $0x1e8] sm:$0xff]  }
  0x24   : > { %2514 = vmatpush3.bf16.msra.mxu0 %v2985_v30  ;;  %v2336_v30 = vcombine.low %v210_v10, %v214_v11  ;;  %v3010_v39 = vld [vmem:[%s3560_s1 + $0x1a8] sm:$0xff]   ;;  %v2368_v10 = vcombine.low %v242_v62, %v246_v63 }
  0x25   : > { %2626 = vmatpush3.bf16.msra.mxu1 %v2986_v31  ;;  %2723 = vmatprep.subr.bf16.mxu0 %v2987_v40  ;;  %v2338_v31 = vcombine.low %v211_v12, %v215_v13  ;;  %v227_v40 = vld [vmem:[%s3153_s28 + $0x188] sm:$0xff] }
  0x26   : > { %2835 = vmatprep.subr.bf16.mxu1 %v2989_v42  ;;  %v2344_v42 = vcombine.low %v218_v22, %v222_v23  ;;  %v235_v52 = vld [vmem:[%s3153_s28 + $0x1c8] sm:$0xff]  ;;  %v266_v22 = vld [vmem:[%s3153_s28 + $0x2c0] sm:$0xff] }
  0x27   : > { %1498 = vmatmul.mubr.bf16.vlgmr.msra.gmra.mrb[0].mxu0 %v2304_v35  ;;  %v226_v35 = vld [vmem:[%s3153_s28 + $0x180] sm:$0xff]  ;;  %v239_v53 = vld [vmem:[%s3153_s28 + $0x1e8] sm:$0xff] }
  0x28   : > { %1659 = vmatmul.mubr.bf16.vlgmr.msra.gmra.mrb[0].mxu1 %v2306_v38  ;;  %2724 = vmatpush3.bf16.msra.mxu0 %v2988_v41  ;;  %v230_v38 = vld [vmem:[%s3153_s28 + $0x1a0] sm:$0xff]  ;;  %v231_v41 = vld [vmem:[%s3153_s28 + $0x1a8] sm:$0xff] }
  0x29   : > { %2836 = vmatpush3.bf16.msra.mxu1 %v2990_v43  ;;  %1505 = vmatprep.mubr.bf16.mxu0 %v2313_v46  ;;  %v2346_v43 = vcombine.low %v219_v25, %v223_v26  ;;  %v2353_v44 = vcombine.high %v226_v35, %v230_v38  ;;  %v2355_v45 = vcombine.high %v227_v40, %v231_v41  ;;  %v3011_v46 = vld [vmem:[%s3560_s1 + $0x170] sm:$0xff]   ;;  %v243_v0 = vld [vmem:[%s3153_s28 + $0x208] sm:$0xff]  ;;  %v270_v23 = vld [vmem:[%s3153_s28 + $0x2e0] sm:$0xff] }
  0x2a   : > { %1666 = vmatprep.mubr.bf16.mxu1 %v2315_v50  ;;  %2725 = vmatprep.subr.bf16.mxu0 %v2991_v55  ;;  %v234_v50 = vld [vmem:[%s3153_s28 + $0x1c0] sm:$0xff]  ;;  %v3015_v55 = vld [vmem:[%s3560_s1 + $0x178] sm:$0xff]   ;;  %v247_v1 = vld [vmem:[%s3153_s28 + $0x228] sm:$0xff] }
  0x2b   : > { %2837 = vmatprep.subr.bf16.mxu1 %v2993_v60  ;;  %v3017_v60 = vld [vmem:[%s3560_s1 + $0x1f8] sm:$0xff]   ;;  %v2370_v11 = vcombine.low %v243_v0, %v247_v1  ;;  %v271_v25 = vld [vmem:[%s3153_s28 + $0x2e8] sm:$0xff] }
  0x2c   : > { %2726 = vmatpush3.bf16.msra.mxu0 %v2992_v58  ;;  %v3016_v58 = vld [vmem:[%s3560_s1 + $0x138] sm:$0xff]  }
  0x2d   : > { %2838 = vmatpush3.bf16.msra.mxu1 %v2994_v61  ;;  %2727 = vmatprep.subr.bf16.mxu0 %v2995_v2  ;;  %v3018_v61 = vld [vmem:[%s3560_s1 + $0x1b8] sm:$0xff]   ;;  %v2360_v2 = vcombine.low %v234_v50, %v238_v51 }
  0x2e   : > { %2839 = vmatprep.subr.bf16.mxu1 %v2997_v7  ;;  %v254_v7 = vld [vmem:[%s3153_s28 + $0x260] sm:$0xff] }
  0x2f   : > { %1506 = vmatmul.mubr.bf16.gmra.mrb[4].mxu0 %v2312_v54  ;;  %v2352_v54 = vcombine.low %v226_v35, %v230_v38  ;;  %v282_v38 = vld [vmem:[%s3153_s28 + $0x340] sm:$0xff] }
  0x30   : > { %1667 = vmatmul.mubr.bf16.gmra.mrb[4].mxu1 %v2314_v56  ;;  %1513 = vmatprep.mubr.bf16.mxu0 %v2321_v57  ;;  %v2354_v56 = vcombine.low %v227_v40, %v231_v41  ;;  %v2361_v57 = vcombine.high %v234_v50, %v238_v51  ;;  %v283_v40 = vld [vmem:[%s3153_s28 + $0x348] sm:$0xff] }
  0x31   : > { %1674 = vmatprep.mubr.bf16.mxu1 %v2323_v59  ;;  %2728 = vmatpush3.bf16.msra.mxu0 %v2996_v4  ;;  %v2363_v59 = vcombine.high %v235_v52, %v239_v53  ;;  %v2369_v4 = vcombine.high %v242_v62, %v246_v63  ;;  %v287_v41 = vld [vmem:[%s3153_s28 + $0x368] sm:$0xff]  ;;  %v180_v62 = vld [vmem:[%s3153_s28 + $0x10] sm:$0xff] }
  0x32   : > { %2840 = vmatpush3.bf16.msra.mxu1 %v2998_v9  ;;  %2729 = vmatprep.subr.bf16.mxu0 %v2999_v14  ;;  %v255_v9 = vld [vmem:[%s3153_s28 + $0x268] sm:$0xff]  ;;  %v258_v14 = vld [vmem:[%s3153_s28 + $0x280] sm:$0xff]  ;;  %v2410_v51 = vcombine.low %v283_v40, %v287_v41  ;;  %v184_v63 = vld [vmem:[%s3153_s28 + $0x30] sm:$0xff] }
  0x33   : > { %2841 = vmatprep.subr.bf16.mxu1 %v3001_v17  ;;  %v263_v17 = vld [vmem:[%s3153_s28 + $0x2a8] sm:$0xff] }
  0x35   : > { %2730 = vmatpush3.bf16.msra.mxu0 %v3000_v15  ;;  %v262_v15 = vld [vmem:[%s3153_s28 + $0x2a0] sm:$0xff] }
  0x36   : > { %2842 = vmatpush3.bf16.msra.mxu1 %v3002_v20  ;;  %2731 = vmatprep.subr.bf16.mxu0 %v3003_v24  ;;  %v2385_v20 = vcombine.high %v258_v14, %v262_v15  ;;  %v267_v24 = vld [vmem:[%s3153_s28 + $0x2c8] sm:$0xff]  ;;  %v2384_v26 = vcombine.low %v258_v14, %v262_v15  ;;  %v196_v14 = vld [vmem:[%s3153_s28 + $0x90] sm:$0xff] }
  0x37   : > { %1514 = vmatmul.mubr.bf16.gmra.mrb[8].mxu0 %v2320_v3  ;;  %2843 = vmatprep.subr.bf16.mxu1 %v3005_v28  ;;  %v2362_v3 = vcombine.low %v235_v52, %v239_v53  ;;  %v2393_v28 = vcombine.high %v266_v22, %v270_v23  ;;  %v2394_v35 = vcombine.low %v267_v24, %v271_v25  ;;  %v200_v15 = vld [vmem:[%s3153_s28 + $0xb0] sm:$0xff] }
  0x38   : > { %1675 = vmatmul.mubr.bf16.gmra.mrb[8].mxu1 %v2322_v5  ;;  %1521 = vmatprep.mubr.bf16.mxu0 %v2329_v6  ;;  %v2371_v5 = vcombine.high %v243_v0, %v247_v1  ;;  %v250_v6 = vld [vmem:[%s3153_s28 + $0x240] sm:$0xff]  ;;  %v181_v0 = vld [vmem:[%s3153_s28 + $0x18] sm:$0xff] }
  0x39   : > { %1682 = vmatprep.mubr.bf16.mxu1 %v2331_v8  ;;  %2732 = vmatpush3.bf16.msra.mxu0 %v3004_v27  ;;  %v251_v8 = vld [vmem:[%s3153_s28 + $0x248] sm:$0xff]  ;;  %v2377_v12 = vcombine.high %v250_v6, %v254_v7  ;;  %v185_v1 = vld [vmem:[%s3153_s28 + $0x38] sm:$0xff] }
  0x3a   : > { %2844 = vmatpush3.bf16.msra.mxu1 %v3006_v29  ;;  %2733 = vmatprep.subr.bf16.mxu0 %v3007_v34  ;;  %v2379_v13 = vcombine.high %v251_v8, %v255_v9  ;;  %v2395_v29 = vcombine.high %v267_v24, %v271_v25  ;;  %v2392_v34 = vcombine.low %v266_v22, %v270_v23  ;;  %v204_v22 = vld [vmem:[%s3153_s28 + $0xd0] sm:$0xff]  ;;  %v205_v24 = vld [vmem:[%s3153_s28 + $0xd8] sm:$0xff] }
  0x3b   : > { %2845 = vmatprep.subr.bf16.mxu1 %v3009_v37  ;;  %v208_v23 = vld [vmem:[%s3153_s28 + $0xf0] sm:$0xff]  ;;  %v209_v25 = vld [vmem:[%s3153_s28 + $0xf8] sm:$0xff] }
  0x3d   : > { %2734 = vmatpush3.bf16.msra.mxu0 %v3008_v36 }
  0x3e   : > { %2846 = vmatpush3.bf16.msra.mxu1 %v3010_v39  ;;  %2735 = vmatprep.subr.bf16.mxu0 %v3011_v46  ;;  %v286_v39 = vld [vmem:[%s3153_s28 + $0x360] sm:$0xff] }
  0x3f   : > { %1522 = vmatmul.mubr.bf16.gmra.mrb[12].mxu0 %v2328_v16  ;;  %2847 = vmatprep.subr.bf16.mxu1 %v3013_v48  ;;  %v259_v16 = vld [vmem:[%s3153_s28 + $0x288] sm:$0xff]  ;;  %v290_v46 = vld [vmem:[%s3153_s28 + $0x380] sm:$0xff]  ;;  %v2408_v50 = vcombine.low %v282_v38, %v286_v39 }
  0x40   : > { %1683 = vmatmul.mubr.bf16.gmra.mrb[12].mxu1 %v2330_v18  ;;  %1529 = vmatprep.mubr.bf16.mxu0 %v2337_v19  ;;  %v2376_v18 = vcombine.low %v250_v6, %v254_v7  ;;  %v2378_v19 = vcombine.low %v251_v8, %v255_v9  ;;  %v2386_v27 = vcombine.low %v259_v16, %v263_v17  ;;  %v291_v48 = vld [vmem:[%s3153_s28 + $0x388] sm:$0xff]  ;;  %v188_v6 = vld [vmem:[%s3153_s28 + $0x50] sm:$0xff]  ;;  %v189_v8 = vld [vmem:[%s3153_s28 + $0x58] sm:$0xff] }
  0x41   : > { %1690 = vmatprep.mubr.bf16.mxu1 %v2339_v21  ;;  %2736 = vmatpush3.bf16.msra.mxu0 %v3012_v47  ;;  %v2387_v21 = vcombine.high %v259_v16, %v263_v17  ;;  %v294_v47 = vld [vmem:[%s3153_s28 + $0x3a0] sm:$0xff]  ;;  %v192_v7 = vld [vmem:[%s3153_s28 + $0x70] sm:$0xff]  ;;  %v193_v9 = vld [vmem:[%s3153_s28 + $0x78] sm:$0xff] }
  0x42   : > { %2848 = vmatpush3.bf16.msra.mxu1 %v3014_v49  ;;  %2737 = vmatprep.subr.bf16.mxu0 %v3015_v55  ;;  %v295_v49 = vld [vmem:[%s3153_s28 + $0x3a8] sm:$0xff]  ;;  %v2417_v52 = vcombine.high %v290_v46, %v294_v47  ;;  %v302_v55 = vld [vmem:[%s3153_s28 + $0x3e0] sm:$0xff]  ;;  %v197_v16 = vld [vmem:[%s3153_s28 + $0x98] sm:$0xff] }
  0x43   : > { %2849 = vmatprep.subr.bf16.mxu1 %v3017_v60  ;;  %v2419_v53 = vcombine.high %v291_v48, %v295_v49  ;;  %v201_v17 = vld [vmem:[%s3153_s28 + $0xb8] sm:$0xff] }
  0x45   : > { %2738 = vmatpush3.bf16.msra.mxu0 %v3016_v58  ;;  %v2416_v58 = vcombine.low %v290_v46, %v294_v47  ;;  %v228_v46 = vld [vmem:[%s3153_s28 + $0x190] sm:$0xff] }
  0x46   : > { %2850 = vmatpush3.bf16.msra.mxu1 %v3018_v61  ;;  %v232_v47 = vld [vmem:[%s3153_s28 + $0x1b0] sm:$0xff] }
  0x47   : > { %1530 = vmatmul.mubr.bf16.gmra.mrb[16].mxu0 %v2336_v30  ;;  %v274_v30 = vld [vmem:[%s3153_s28 + $0x300] sm:$0xff] }
  0x48   : > { %1691 = vmatmul.mubr.bf16.gmra.mrb[16].mxu1 %v2338_v31  ;;  %1537 = vmatprep.mubr.bf16.mxu0 %v2345_v32  ;;  %v278_v31 = vld [vmem:[%s3153_s28 + $0x320] sm:$0xff]  ;;  %v275_v32 = vld [vmem:[%s3153_s28 + $0x308] sm:$0xff] }
  0x49   : > { %1698 = vmatprep.mubr.bf16.mxu1 %v2347_v33  ;;  %v279_v33 = vld [vmem:[%s3153_s28 + $0x328] sm:$0xff]  ;;  %v2401_v36 = vcombine.high %v274_v30, %v278_v31 }
  0x4a   : > { %v2403_v37 = vcombine.high %v275_v32, %v279_v33 }
  0x4f   : > { %1538 = vmatmul.mubr.bf16.gmra.mrb[20].mxu0 %v2344_v42  ;;  %v2400_v42 = vcombine.low %v274_v30, %v278_v31  ;;  %v212_v30 = vld [vmem:[%s3153_s28 + $0x110] sm:$0xff] }
  0x50   : > { %1699 = vmatmul.mubr.bf16.gmra.mrb[20].mxu1 %v2346_v43  ;;  %1545 = vmatprep.mubr.bf16.mxu0 %v2353_v44  ;;  %v2402_v43 = vcombine.low %v275_v32, %v279_v33  ;;  %v2409_v44 = vcombine.high %v282_v38, %v286_v39  ;;  %v216_v31 = vld [vmem:[%s3153_s28 + $0x130] sm:$0xff]  ;;  %v213_v32 = vld [vmem:[%s3153_s28 + $0x118] sm:$0xff] }
  0x51   : > { %1706 = vmatprep.mubr.bf16.mxu1 %v2355_v45  ;;  %v2411_v45 = vcombine.high %v283_v40, %v287_v41  ;;  %v217_v33 = vld [vmem:[%s3153_s28 + $0x138] sm:$0xff]  ;;  %v220_v38 = vld [vmem:[%s3153_s28 + $0x150] sm:$0xff] }
  0x52   : > { %v224_v39 = vld [vmem:[%s3153_s28 + $0x170] sm:$0xff]  ;;  %v221_v40 = vld [vmem:[%s3153_s28 + $0x158] sm:$0xff] }
  0x53   : > { %v225_v41 = vld [vmem:[%s3153_s28 + $0x178] sm:$0xff] }
  0x57   : > { %1546 = vmatmul.mubr.bf16.gmra.mrb[24].mxu0 %v2352_v54  ;;  %v298_v54 = vld [vmem:[%s3153_s28 + $0x3c0] sm:$0xff] }
  0x58   : > { %1707 = vmatmul.mubr.bf16.gmra.mrb[24].mxu1 %v2354_v56  ;;  %1553 = vmatprep.mubr.bf16.mxu0 %v2361_v57  ;;  %v299_v56 = vld [vmem:[%s3153_s28 + $0x3c8] sm:$0xff]  ;;  %v2425_v60 = vcombine.high %v298_v54, %v302_v55 }
  0x59   : > { %1714 = vmatprep.mubr.bf16.mxu1 %v2363_v59  ;;  %v303_v57 = vld [vmem:[%s3153_s28 + $0x3e8] sm:$0xff]  ;;  %v2418_v59 = vcombine.low %v291_v48, %v295_v49  ;;  %v229_v48 = vld [vmem:[%s3153_s28 + $0x198] sm:$0xff] }
  0x5a   : > { %v2427_v61 = vcombine.high %v299_v56, %v303_v57  ;;  %v233_v49 = vld [vmem:[%s3153_s28 + $0x1b8] sm:$0xff] }
  0x5f   : > { %1554 = vmatmul.mubr.bf16.gmra.mrb[28].mxu0 %v2360_v2  ;;  %v2424_v2 = vcombine.low %v298_v54, %v302_v55  ;;  %v236_v54 = vld [vmem:[%s3153_s28 + $0x1d0] sm:$0xff] }
  0x60   : > { %1715 = vmatmul.mubr.bf16.gmra.mrb[28].mxu1 %v2362_v3  ;;  %1561 = vmatprep.mubr.bf16.mxu0 %v2369_v4  ;;  %v2426_v3 = vcombine.low %v299_v56, %v303_v57  ;;  %v2309_v4 = vcombine.high %v180_v62, %v184_v63  ;;  %v240_v55 = vld [vmem:[%s3153_s28 + $0x1f0] sm:$0xff]  ;;  %v237_v56 = vld [vmem:[%s3153_s28 + $0x1d8] sm:$0xff] }
  0x61   : > { %1722 = vmatprep.mubr.bf16.mxu1 %v2371_v5  ;;  %v2311_v5 = vcombine.high %v181_v0, %v185_v1  ;;  %v241_v57 = vld [vmem:[%s3153_s28 + $0x1f8] sm:$0xff] }
  0x67   : > { %1562 = vmatmul.mubr.bf16.gmra.mrb[32].mxu0 %v2368_v10  ;;  %v2308_v10 = vcombine.low %v180_v62, %v184_v63  ;;  %v244_v62 = vld [vmem:[%s3153_s28 + $0x210] sm:$0xff] }
  0x68   : > { %1723 = vmatmul.mubr.bf16.gmra.mrb[32].mxu1 %v2370_v11  ;;  %1569 = vmatprep.mubr.bf16.mxu0 %v2377_v12  ;;  %v2310_v11 = vcombine.low %v181_v0, %v185_v1  ;;  %v2317_v12 = vcombine.high %v188_v6, %v192_v7  ;;  %v248_v63 = vld [vmem:[%s3153_s28 + $0x230] sm:$0xff]  ;;  %v245_v0 = vld [vmem:[%s3153_s28 + $0x218] sm:$0xff] }
  0x69   : > { %1730 = vmatprep.mubr.bf16.mxu1 %v2379_v13  ;;  %v2319_v13 = vcombine.high %v189_v8, %v193_v9  ;;  %v249_v1 = vld [vmem:[%s3153_s28 + $0x238] sm:$0xff] }
  0x6f   : > { %1570 = vmatmul.mubr.bf16.gmra.mrb[36].mxu0 %v2376_v18  ;;  %v2316_v18 = vcombine.low %v188_v6, %v192_v7  ;;  %v252_v6 = vld [vmem:[%s3153_s28 + $0x250] sm:$0xff] }
  0x70   : > { %1731 = vmatmul.mubr.bf16.gmra.mrb[36].mxu1 %v2378_v19  ;;  %1577 = vmatprep.mubr.bf16.mxu0 %v2385_v20  ;;  %v2318_v19 = vcombine.low %v189_v8, %v193_v9  ;;  %v2325_v20 = vcombine.high %v196_v14, %v200_v15  ;;  %v256_v7 = vld [vmem:[%s3153_s28 + $0x270] sm:$0xff]  ;;  %v253_v8 = vld [vmem:[%s3153_s28 + $0x258] sm:$0xff] }
  0x71   : > { %1738 = vmatprep.mubr.bf16.mxu1 %v2387_v21  ;;  %v2327_v21 = vcombine.high %v197_v16, %v201_v17  ;;  %v257_v9 = vld [vmem:[%s3153_s28 + $0x278] sm:$0xff] }
  0x77   : > { %1578 = vmatmul.mubr.bf16.gmra.mrb[40].mxu0 %v2384_v26  ;;  %v2324_v26 = vcombine.low %v196_v14, %v200_v15  ;;  %v260_v14 = vld [vmem:[%s3153_s28 + $0x290] sm:$0xff] }
  0x78   : > { %1739 = vmatmul.mubr.bf16.gmra.mrb[40].mxu1 %v2386_v27  ;;  %1585 = vmatprep.mubr.bf16.mxu0 %v2393_v28  ;;  %v2326_v27 = vcombine.low %v197_v16, %v201_v17  ;;  %v2333_v28 = vcombine.high %v204_v22, %v208_v23  ;;  %v264_v15 = vld [vmem:[%s3153_s28 + $0x2b0] sm:$0xff]  ;;  %v261_v16 = vld [vmem:[%s3153_s28 + $0x298] sm:$0xff] }
  0x79   : > { %1746 = vmatprep.mubr.bf16.mxu1 %v2395_v29  ;;  %v2335_v29 = vcombine.high %v205_v24, %v209_v25  ;;  %v265_v17 = vld [vmem:[%s3153_s28 + $0x2b8] sm:$0xff] }
  0x7f   : > { %1586 = vmatmul.mubr.bf16.gmra.mrb[44].mxu0 %v2392_v34  ;;  %v2332_v34 = vcombine.low %v204_v22, %v208_v23  ;;  %v268_v22 = vld [vmem:[%s3153_s28 + $0x2d0] sm:$0xff] }
  0x80   : > { %1747 = vmatmul.mubr.bf16.gmra.mrb[44].mxu1 %v2394_v35  ;;  %1593 = vmatprep.mubr.bf16.mxu0 %v2401_v36  ;;  %v2334_v35 = vcombine.low %v205_v24, %v209_v25  ;;  %v2341_v36 = vcombine.high %v212_v30, %v216_v31  ;;  %v272_v23 = vld [vmem:[%s3153_s28 + $0x2f0] sm:$0xff]  ;;  %v269_v24 = vld [vmem:[%s3153_s28 + $0x2d8] sm:$0xff] }
  0x81   : > { %1754 = vmatprep.mubr.bf16.mxu1 %v2403_v37  ;;  %v2343_v37 = vcombine.high %v213_v32, %v217_v33  ;;  %v273_v25 = vld [vmem:[%s3153_s28 + $0x2f8] sm:$0xff] }
  0x87   : > { %1594 = vmatmul.mubr.bf16.gmra.mrb[48].mxu0 %v2400_v42  ;;  %v2340_v42 = vcombine.low %v212_v30, %v216_v31  ;;  %v276_v30 = vld [vmem:[%s3153_s28 + $0x310] sm:$0xff] }
  0x88   : > { %1755 = vmatmul.mubr.bf16.gmra.mrb[48].mxu1 %v2402_v43  ;;  %1601 = vmatprep.mubr.bf16.mxu0 %v2409_v44  ;;  %v2342_v43 = vcombine.low %v213_v32, %v217_v33  ;;  %v2349_v44 = vcombine.high %v220_v38, %v224_v39  ;;  %v280_v31 = vld [vmem:[%s3153_s28 + $0x330] sm:$0xff]  ;;  %v277_v33 = vld [vmem:[%s3153_s28 + $0x318] sm:$0xff] }
  0x89   : > { %1762 = vmatprep.mubr.bf16.mxu1 %v2411_v45  ;;  %v2351_v45 = vcombine.high %v221_v40, %v225_v41 }
  0x8f   : > { %1602 = vmatmul.mubr.bf16.gmra.mrb[52].mxu0 %v2408_v50  ;;  %v2348_v50 = vcombine.low %v220_v38, %v224_v39  ;;  %v2396_v38 = vcombine.low %v268_v22, %v272_v23 }
  0x90   : > { %1763 = vmatmul.mubr.bf16.gmra.mrb[52].mxu1 %v2410_v51  ;;  %1609 = vmatprep.mubr.bf16.mxu0 %v2417_v52  ;;  %v2350_v51 = vcombine.low %v221_v40, %v225_v41  ;;  %v2357_v52 = vcombine.high %v228_v46, %v232_v47 }
  0x91   : > { %1770 = vmatprep.mubr.bf16.mxu1 %v2419_v53  ;;  %v2359_v53 = vcombine.high %v229_v48, %v233_v49 }
  0x97   : > { %1610 = vmatmul.mubr.bf16.gmra.mrb[56].mxu0 %v2416_v58  ;;  %v2356_v58 = vcombine.low %v228_v46, %v232_v47 }
  0x98   : > { %1771 = vmatmul.mubr.bf16.gmra.mrb[56].mxu1 %v2418_v59  ;;  %1617 = vmatprep.mubr.bf16.mxu0 %v2425_v60  ;;  %v2358_v59 = vcombine.low %v229_v48, %v233_v49  ;;  %v2365_v60 = vcombine.high %v236_v54, %v240_v55 }
  0x99   : > { %1778 = vmatprep.mubr.bf16.mxu1 %v2427_v61  ;;  %v2367_v61 = vcombine.high %v237_v56, %v241_v57 }
  0x9f   : > { %1618 = vmatmul.mubr.bf16.gmra.mrb[60].mxu0 %v2424_v2  ;;  %v2364_v2 = vcombine.low %v236_v54, %v240_v55  ;;  %v284_v54 = vld [vmem:[%s3153_s28 + $0x350] sm:$0xff] }
  0xa0   : > { %1779 = vmatmul.mubr.bf16.gmra.mrb[60].mxu1 %v2426_v3  ;;  %1819 = vmatprep.mubr.bf16.mxu0 %v2309_v4  ;;  %v2366_v3 = vcombine.low %v237_v56, %v241_v57  ;;  %v2373_v4 = vcombine.high %v244_v62, %v248_v63  ;;  %v288_v55 = vld [vmem:[%s3153_s28 + $0x370] sm:$0xff] }
  0xa1   : > { %1980 = vmatprep.mubr.bf16.mxu1 %v2311_v5  ;;  %v2375_v5 = vcombine.high %v245_v0, %v249_v1 }
  0xa7   : > { %1820 = vmatmul.mubr.bf16.vlgmr.msra.gmra.mrb[64].mxu0 %v2308_v10  ;;  %v2372_v10 = vcombine.low %v244_v62, %v248_v63  ;;  %v2404_v62 = vcombine.low %v276_v30, %v280_v31 }
  0xa8   : > { %1981 = vmatmul.mubr.bf16.vlgmr.msra.gmra.mrb[64].mxu1 %v2310_v11  ;;  %1827 = vmatprep.mubr.bf16.mxu0 %v2317_v12  ;;  %v2374_v11 = vcombine.low %v245_v0, %v249_v1  ;;  %v2381_v12 = vcombine.high %v252_v6, %v256_v7 }
  0xa9   : > { %1988 = vmatprep.mubr.bf16.mxu1 %v2319_v13  ;;  %v2383_v13 = vcombine.high %v253_v8, %v257_v9 }
  0xaf   : > { %1828 = vmatmul.mubr.bf16.gmra.mrb[68].mxu0 %v2316_v18  ;;  %v2380_v18 = vcombine.low %v252_v6, %v256_v7 }
  0xb0   : > { %1989 = vmatmul.mubr.bf16.gmra.mrb[68].mxu1 %v2318_v19  ;;  %1835 = vmatprep.mubr.bf16.mxu0 %v2325_v20  ;;  %v2382_v19 = vcombine.low %v253_v8, %v257_v9  ;;  %v2389_v20 = vcombine.high %v260_v14, %v264_v15 }
  0xb1   : > { %1996 = vmatprep.mubr.bf16.mxu1 %v2327_v21  ;;  %v2391_v21 = vcombine.high %v261_v16, %v265_v17 }
  0xb7   : > { %1836 = vmatmul.mubr.bf16.gmra.mrb[72].mxu0 %v2324_v26  ;;  %v2388_v26 = vcombine.low %v260_v14, %v264_v15  ;;  %v292_v14 = vld [vmem:[%s3153_s28 + $0x390] sm:$0xff] }
  0xb8   : > { %1997 = vmatmul.mubr.bf16.gmra.mrb[72].mxu1 %v2326_v27  ;;  %1843 = vmatprep.mubr.bf16.mxu0 %v2333_v28  ;;  %v2390_v27 = vcombine.low %v261_v16, %v265_v17  ;;  %v2397_v28 = vcombine.high %v268_v22, %v272_v23  ;;  %v296_v15 = vld [vmem:[%s3153_s28 + $0x3b0] sm:$0xff]  ;;  %v2412_v22 = vcombine.low %v284_v54, %v288_v55 }
  0xb9   : > { %2004 = vmatprep.mubr.bf16.mxu1 %v2335_v29  ;;  %v2399_v29 = vcombine.high %v269_v24, %v273_v25 }
  0xbf   : > { %1844 = vmatmul.mubr.bf16.gmra.mrb[76].mxu0 %v2332_v34  ;;  %v281_v34 = vld [vmem:[%s3153_s28 + $0x338] sm:$0xff] }
  0xc0   : > { %2005 = vmatmul.mubr.bf16.gmra.mrb[76].mxu1 %v2334_v35  ;;  %1851 = vmatprep.mubr.bf16.mxu0 %v2341_v36  ;;  %v3376_v36 = vld [vmem:[%s3561_s2] ss:$0 sm:$0xff]  ;;  %v2407_v47 = vcombine.high %v277_v33, %v281_v34 }
  0xc1   : > { %2012 = vmatprep.mubr.bf16.mxu1 %v2343_v37 }
  0xc7   : > { %1852 = vmatmul.mubr.bf16.gmra.mrb[80].mxu0 %v2340_v42  ;;  %v2398_v42 = vcombine.low %v269_v24, %v273_v25 }
  0xc8   : > { %2013 = vmatmul.mubr.bf16.gmra.mrb[80].mxu1 %v2342_v43  ;;  %1859 = vmatprep.mubr.bf16.mxu0 %v2349_v44  ;;  %v2405_v43 = vcombine.high %v276_v30, %v280_v31 }
  0xc9   : > { %2020 = vmatprep.mubr.bf16.mxu1 %v2351_v45 }
  0xcf   : > { %1860 = vmatmul.mubr.bf16.gmra.mrb[84].mxu0 %v2348_v50 }
  0xd0   : > { %2021 = vmatmul.mubr.bf16.gmra.mrb[84].mxu1 %v2350_v51  ;;  %1867 = vmatprep.mubr.bf16.mxu0 %v2357_v52 }
  0xd1   : > { %2028 = vmatprep.mubr.bf16.mxu1 %v2359_v53 }
  0xd7   : > { %1868 = vmatmul.mubr.bf16.gmra.mrb[88].mxu0 %v2356_v58  ;;  %v285_v58 = vld [vmem:[%s3153_s28 + $0x358] sm:$0xff] }
  0xd8   : > { %2029 = vmatmul.mubr.bf16.gmra.mrb[88].mxu1 %v2358_v59  ;;  %1875 = vmatprep.mubr.bf16.mxu0 %v2365_v60  ;;  %v289_v59 = vld [vmem:[%s3153_s28 + $0x378] sm:$0xff] }
  0xd9   : > { %2036 = vmatprep.mubr.bf16.mxu1 %v2367_v61  ;;  %v2415_v7 = vcombine.high %v285_v58, %v289_v59 }
  0xdf   : > { %1876 = vmatmul.mubr.bf16.gmra.mrb[92].mxu0 %v2364_v2  ;;  %v2406_v2 = vcombine.low %v277_v33, %v281_v34 }
  0xe0   : > { %2037 = vmatmul.mubr.bf16.gmra.mrb[92].mxu1 %v2366_v3  ;;  %1883 = vmatprep.mubr.bf16.mxu0 %v2373_v4  ;;  %v2413_v3 = vcombine.high %v284_v54, %v288_v55 }
  0xe1   : > { %2044 = vmatprep.mubr.bf16.mxu1 %v2375_v5 }
  0xe7   : > { %1884 = vmatmul.mubr.bf16.gmra.mrb[96].mxu0 %v2372_v10 }
  0xe8   : > { %2045 = vmatmul.mubr.bf16.gmra.mrb[96].mxu1 %v2374_v11  ;;  %1891 = vmatprep.mubr.bf16.mxu0 %v2381_v12 }
  0xe9   : > { %2052 = vmatprep.mubr.bf16.mxu1 %v2383_v13 }
  0xef   : > { %1892 = vmatmul.mubr.bf16.gmra.mrb[100].mxu0 %v2380_v18  ;;  %v293_v18 = vld [vmem:[%s3153_s28 + $0x398] sm:$0xff] }
  0xf0   : > { %2053 = vmatmul.mubr.bf16.gmra.mrb[100].mxu1 %v2382_v19  ;;  %1899 = vmatprep.mubr.bf16.mxu0 %v2389_v20  ;;  %v297_v19 = vld [vmem:[%s3153_s28 + $0x3b8] sm:$0xff] }
  0xf1   : > { %2060 = vmatprep.mubr.bf16.mxu1 %v2391_v21  ;;  %v2423_v31 = vcombine.high %v293_v18, %v297_v19 }
  0xf7   : > { %1900 = vmatmul.mubr.bf16.gmra.mrb[104].mxu0 %v2388_v26  ;;  %v2414_v26 = vcombine.low %v285_v58, %v289_v59 }
  0xf8   : > { %2061 = vmatmul.mubr.bf16.gmra.mrb[104].mxu1 %v2390_v27  ;;  %1907 = vmatprep.mubr.bf16.mxu0 %v2397_v28  ;;  %v2421_v27 = vcombine.high %v292_v14, %v296_v15 }
  0xf9   : > { %2068 = vmatprep.mubr.bf16.mxu1 %v2399_v29 }
  0xfa   : > { %v2515_v32 = vpop.f32.mrb[0].mxu0 }
  0xfb   : > { %v2627_v35 = vpop.f32.mrb[0].mxu1  ;;  %v2516_v37 = vpop.f32.mrb[1].mxu0 }
  0xfc   : > { %v2517_v39 = vadd.f32 %v2516_v37, %v2515_v32  ;;  %v2628_v40 = vpop.f32.mrb[1].mxu1  ;;  %v2518_v41 = vpop.f32.mrb[2].mxu0 }
  0xfd   : > { %v2629_v44 = vadd.f32 %v2628_v40, %v2627_v35  ;;  %v2630_v45 = vpop.f32.mrb[2].mxu1  ;;  %v2519_v46 = vpop.f32.mrb[3].mxu0  ;;  %v304_v40 = vld [vmem:[%s3153_s28 + $0x3f0] sm:$0xff] }
  0xfe   : > { %v1500_v48 = vadd.f32 %v2517_v39, %v3376_v36  ;;  %v2520_v49 = vadd.f32 %v2519_v46, %v2518_v41  ;;  %v2631_v50 = vpop.f32.mrb[3].mxu1  ;;  %v300_v39 = vld [vmem:[%s3153_s28 + $0x3d0] sm:$0xff] }
  0xff   : > { %v2632_v51 = vadd.f32 %v2631_v50, %v2630_v45  ;;  %1908 = vmatmul.mubr.bf16.gmra.mrb[108].mxu0 %v2396_v38 }
 0x100   : > { %v3379_v52 = vadd.f32 %v2629_v44, %v1500_v48  ;;  %v1503_v53 = vadd.f32 %v2520_v49, %v3376_v36  ;;  %2069 = vmatmul.mubr.bf16.gmra.mrb[108].mxu1 %v2398_v42  ;;  %1915 = vmatprep.mubr.bf16.mxu0 %v2405_v43  ;;  %v301_v43 = vld [vmem:[%s3153_s28 + $0x3d8] sm:$0xff] }
 0x101   : > { %2076 = vmatprep.mubr.bf16.mxu1 %v2407_v47  ;;  %v305_v44 = vld [vmem:[%s3153_s28 + $0x3f8] sm:$0xff]  ;;  %v2420_v47 = vcombine.low %v292_v14, %v296_v15  ;;  %s2302_s28 = sshll.u32 %s3564_s21, 3 }
 0x102   : > { %v3384_v56 = vadd.f32 %v2632_v51, %v1503_v53  ;;  %v2521_v57 = vpop.f32.mrb[4].mxu0  ;;  %v2422_v51 = vcombine.low %v293_v18, %v297_v19  ;;  %v2429_v53 = vcombine.high %v300_v39, %v304_v40  ;;  %v2431_v58 = vcombine.high %v301_v43, %v305_v44  ;;  %s3492_s29 = scalar_lea.vmem %s3562_s3, %s2302_s28 }
 0x103   : > { %v2633_v60 = vpop.f32.mrb[4].mxu1  ;;  %v2522_v61 = vpop.f32.mrb[5].mxu0 }
 0x104   : > { %v2523_v63 = vadd.f32 %v2522_v61, %v2521_v57  ;;  %v2634_v0 = vpop.f32.mrb[5].mxu1  ;;  %v2524_v1 = vpop.f32.mrb[6].mxu0 }
 0x105   : > { %v2635_v4 = vadd.f32 %v2634_v0, %v2633_v60  ;;  %v2636_v5 = vpop.f32.mrb[6].mxu1  ;;  %v2525_v6 = vpop.f32.mrb[7].mxu0 }
 0x106   : > { %v1508_v8 = vadd.f32 %v2523_v63, %v3376_v36  ;;  %v2526_v9 = vadd.f32 %v2525_v6, %v2524_v1  ;;  %v2637_v10 = vpop.f32.mrb[7].mxu1 }
 0x107   : > { %v2638_v11 = vadd.f32 %v2637_v10, %v2636_v5  ;;  %1916 = vmatmul.mubr.bf16.gmra.mrb[112].mxu0 %v2404_v62  ;;  %v2428_v5 = vcombine.low %v300_v39, %v304_v40 }
 0x108   : > { %v3389_v12 = vadd.f32 %v2635_v4, %v1508_v8  ;;  %v1511_v13 = vadd.f32 %v2526_v9, %v3376_v36  ;;  %2077 = vmatmul.mubr.bf16.gmra.mrb[112].mxu1 %v2406_v2  ;;  %1923 = vmatprep.mubr.bf16.mxu0 %v2413_v3  ;;  %v2430_v9 = vcombine.low %v301_v43, %v305_v44 }
 0x109   : > { %2084 = vmatprep.mubr.bf16.mxu1 %v2415_v7 }
 0x10a   : > { %v3394_v16 = vadd.f32 %v2638_v11, %v1511_v13  ;;  %v2527_v17 = vpop.f32.mrb[8].mxu0 }
 0x10b   : > { %v2639_v20 = vpop.f32.mrb[8].mxu1  ;;  %v2528_v21 = vpop.f32.mrb[9].mxu0 }
 0x10c   : > { %v2529_v23 = vadd.f32 %v2528_v21, %v2527_v17  ;;  %v2640_v24 = vpop.f32.mrb[9].mxu1  ;;  %v2530_v25 = vpop.f32.mrb[10].mxu0 }
 0x10d   : > { %v2641_v28 = vadd.f32 %v2640_v24, %v2639_v20  ;;  %v2642_v29 = vpop.f32.mrb[10].mxu1  ;;  %v2531_v30 = vpop.f32.mrb[11].mxu0 }
 0x10e   : > { %v1516_v32 = vadd.f32 %v2529_v23, %v3376_v36  ;;  %v2532_v33 = vadd.f32 %v2531_v30, %v2530_v25  ;;  %v2643_v34 = vpop.f32.mrb[11].mxu1 }
 0x10f   : > { %v2644_v35 = vadd.f32 %v2643_v34, %v2642_v29  ;;  %1924 = vmatmul.mubr.bf16.gmra.mrb[116].mxu0 %v2412_v22 }
 0x110   : > { %v3399_v37 = vadd.f32 %v2641_v28, %v1516_v32  ;;  %v1519_v38 = vadd.f32 %v2532_v33, %v3376_v36  ;;  %2085 = vmatmul.mubr.bf16.gmra.mrb[116].mxu1 %v2414_v26  ;;  %1931 = vmatprep.mubr.bf16.mxu0 %v2421_v27 }
 0x111   : > { %2092 = vmatprep.mubr.bf16.mxu1 %v2423_v31 }
 0x112   : > { %v3404_v41 = vadd.f32 %v2644_v35, %v1519_v38  ;;  %v2533_v42 = vpop.f32.mrb[12].mxu0 }
 0x113   : > { %v2645_v45 = vpop.f32.mrb[12].mxu1  ;;  %v2534_v46 = vpop.f32.mrb[13].mxu0 }
 0x114   : > { %v2535_v48 = vadd.f32 %v2534_v46, %v2533_v42  ;;  %v2646_v49 = vpop.f32.mrb[13].mxu1  ;;  %v2536_v50 = vpop.f32.mrb[14].mxu0 }
 0x115   : > { %v2647_v54 = vadd.f32 %v2646_v49, %v2645_v45  ;;  %v2648_v55 = vpop.f32.mrb[14].mxu1  ;;  %v2537_v57 = vpop.f32.mrb[15].mxu0 }
 0x116   : > { %v1524_v59 = vadd.f32 %v2535_v48, %v3376_v36  ;;  %v2538_v60 = vadd.f32 %v2537_v57, %v2536_v50  ;;  %v2649_v61 = vpop.f32.mrb[15].mxu1 }
 0x117   : > { %v2650_v62 = vadd.f32 %v2649_v61, %v2648_v55  ;;  %1932 = vmatmul.mubr.bf16.gmra.mrb[120].mxu0 %v2420_v47 }
 0x118   : > { %v3409_v63 = vadd.f32 %v2647_v54, %v1524_v59  ;;  %v1527_v0 = vadd.f32 %v2538_v60, %v3376_v36  ;;  %2093 = vmatmul.mubr.bf16.gmra.mrb[120].mxu1 %v2422_v51  ;;  %1939 = vmatprep.mubr.bf16.mxu0 %v2429_v53 }
 0x119   : > { %2100 = vmatprep.mubr.bf16.mxu1 %v2431_v58 }
 0x11a   : > { %v3412_v1 = vadd.f32 %v2650_v62, %v1527_v0  ;;  %v2539_v2 = vpop.f32.mrb[16].mxu0 }
 0x11b   : > { %v2651_v3 = vpop.f32.mrb[16].mxu1  ;;  %v2540_v4 = vpop.f32.mrb[17].mxu0 }
 0x11c   : > { %v2541_v6 = vadd.f32 %v2540_v4, %v2539_v2  ;;  %v2652_v7 = vpop.f32.mrb[17].mxu1  ;;  %v2542_v8 = vpop.f32.mrb[18].mxu0 }
 0x11d   : > { %v2653_v10 = vadd.f32 %v2652_v7, %v2651_v3  ;;  %v2654_v11 = vpop.f32.mrb[18].mxu1  ;;  %v2543_v13 = vpop.f32.mrb[19].mxu0 }
 0x11e   : > { %v1532_v14 = vadd.f32 %v2541_v6, %v3376_v36  ;;  %v2544_v15 = vadd.f32 %v2543_v13, %v2542_v8  ;;  %v2655_v17 = vpop.f32.mrb[19].mxu1 }
 0x11f   : > { %v2656_v18 = vadd.f32 %v2655_v17, %v2654_v11  ;;  %1940 = vmatmul.mubr.bf16.gmra.mrb[124].mxu0 %v2428_v5 }
 0x120   : > { %v3415_v19 = vadd.f32 %v2653_v10, %v1532_v14  ;;  %v1535_v20 = vadd.f32 %v2544_v15, %v3376_v36  ;;  %2101 = vmatmul.mubr.bf16.gmra.mrb[124].mxu1 %v2430_v9 }
 0x122   : > { %v3418_v21 = vadd.f32 %v2656_v18, %v1535_v20  ;;  %v2545_v22 = vpop.f32.mrb[20].mxu0 }
 0x123   : > { %v2657_v23 = vpop.f32.mrb[20].mxu1  ;;  %v2546_v24 = vpop.f32.mrb[21].mxu0 }
 0x124   : > { %v2547_v25 = vadd.f32 %v2546_v24, %v2545_v22  ;;  %v2658_v26 = vpop.f32.mrb[21].mxu1  ;;  %v2548_v27 = vpop.f32.mrb[22].mxu0 }
 0x125   : > { %v2659_v28 = vadd.f32 %v2658_v26, %v2657_v23  ;;  %v2660_v29 = vpop.f32.mrb[22].mxu1  ;;  %v2549_v30 = vpop.f32.mrb[23].mxu0 }
 0x126   : > { %v1540_v31 = vadd.f32 %v2547_v25, %v3376_v36  ;;  %v2550_v32 = vadd.f32 %v2549_v30, %v2548_v27  ;;  %v2661_v33 = vpop.f32.mrb[23].mxu1 }
 0x127   : > { %v2662_v34 = vadd.f32 %v2661_v33, %v2660_v29 }
 0x128   : > { %v3421_v35 = vadd.f32 %v2659_v28, %v1540_v31  ;;  %v1543_v38 = vadd.f32 %v2550_v32, %v3376_v36 }
 0x12a   : > { %v3424_v39 = vadd.f32 %v2662_v34, %v1543_v38  ;;  %v2551_v40 = vpop.f32.mrb[24].mxu0 }
 0x12b   : > { %v2663_v42 = vpop.f32.mrb[24].mxu1  ;;  %v2552_v43 = vpop.f32.mrb[25].mxu0 }
 0x12c   : > { %v2553_v44 = vadd.f32 %v2552_v43, %v2551_v40  ;;  %v2664_v45 = vpop.f32.mrb[25].mxu1  ;;  %v2554_v46 = vpop.f32.mrb[26].mxu0 }
 0x12d   : > { %v2665_v47 = vadd.f32 %v2664_v45, %v2663_v42  ;;  %v2666_v48 = vpop.f32.mrb[26].mxu1  ;;  %v2555_v49 = vpop.f32.mrb[27].mxu0 }
 0x12e   : > { %v1548_v50 = vadd.f32 %v2553_v44, %v3376_v36  ;;  %v2556_v51 = vadd.f32 %v2555_v49, %v2554_v46  ;;  %v2667_v53 = vpop.f32.mrb[27].mxu1 }
 0x12f   : > { %v2668_v54 = vadd.f32 %v2667_v53, %v2666_v48 }
 0x130   : > { %v3427_v55 = vadd.f32 %v2665_v47, %v1548_v50  ;;  %v1551_v57 = vadd.f32 %v2556_v51, %v3376_v36 }
 0x132   : > { %v3430_v58 = vadd.f32 %v2668_v54, %v1551_v57  ;;  %v2557_v59 = vpop.f32.mrb[28].mxu0 }
 0x133   : > { %v2669_v60 = vpop.f32.mrb[28].mxu1  ;;  %v2558_v61 = vpop.f32.mrb[29].mxu0 }
 0x134   : > { %v2559_v62 = vadd.f32 %v2558_v61, %v2557_v59  ;;  %v2670_v0 = vpop.f32.mrb[29].mxu1  ;;  %v2560_v2 = vpop.f32.mrb[30].mxu0 }
 0x135   : > { %v2671_v3 = vadd.f32 %v2670_v0, %v2669_v60  ;;  %v2672_v4 = vpop.f32.mrb[30].mxu1  ;;  %v2561_v5 = vpop.f32.mrb[31].mxu0 }
 0x136   : > { %v1556_v6 = vadd.f32 %v2559_v62, %v3376_v36  ;;  %v2562_v7 = vadd.f32 %v2561_v5, %v2560_v2  ;;  %v2673_v8 = vpop.f32.mrb[31].mxu1 }
 0x137   : > { %v2674_v9 = vadd.f32 %v2673_v8, %v2672_v4 }
 0x138   : > { %v3433_v10 = vadd.f32 %v2671_v3, %v1556_v6  ;;  %v1559_v11 = vadd.f32 %v2562_v7, %v3376_v36 }
 0x13a   : > { %v3436_v13 = vadd.f32 %v2674_v9, %v1559_v11  ;;  %v2563_v14 = vpop.f32.mrb[32].mxu0 }
 0x13b   : > { %v2675_v15 = vpop.f32.mrb[32].mxu1  ;;  %v2564_v17 = vpop.f32.mrb[33].mxu0 }
 0x13c   : > { %v2565_v18 = vadd.f32 %v2564_v17, %v2563_v14  ;;  %v2676_v20 = vpop.f32.mrb[33].mxu1  ;;  %v2566_v22 = vpop.f32.mrb[34].mxu0 }
 0x13d   : > { %v2677_v23 = vadd.f32 %v2676_v20, %v2675_v15  ;;  %v2678_v24 = vpop.f32.mrb[34].mxu1  ;;  %v2567_v25 = vpop.f32.mrb[35].mxu0 }
 0x13e   : > { %v1564_v26 = vadd.f32 %v2565_v18, %v3376_v36  ;;  %v2568_v27 = vadd.f32 %v2567_v25, %v2566_v22  ;;  %v2679_v28 = vpop.f32.mrb[35].mxu1 }
 0x13f   : > { %v2680_v29 = vadd.f32 %v2679_v28, %v2678_v24 }
 0x140   : > { %v3439_v30 = vadd.f32 %v2677_v23, %v1564_v26  ;;  %v1567_v31 = vadd.f32 %v2568_v27, %v3376_v36 }
 0x142   : > { %v3442_v32 = vadd.f32 %v2680_v29, %v1567_v31  ;;  %v2569_v33 = vpop.f32.mrb[36].mxu0 }
 0x143   : > { %v2681_v34 = vpop.f32.mrb[36].mxu1  ;;  %v2570_v38 = vpop.f32.mrb[37].mxu0 }
 0x144   : > { %v2571_v40 = vadd.f32 %v2570_v38, %v2569_v33  ;;  %v2682_v42 = vpop.f32.mrb[37].mxu1  ;;  %v2572_v43 = vpop.f32.mrb[38].mxu0 }
 0x145   : > { %v2683_v44 = vadd.f32 %v2682_v42, %v2681_v34  ;;  %v2684_v45 = vpop.f32.mrb[38].mxu1  ;;  %v2573_v46 = vpop.f32.mrb[39].mxu0 }
 0x146   : > { %v1572_v47 = vadd.f32 %v2571_v40, %v3376_v36  ;;  %v2574_v48 = vadd.f32 %v2573_v46, %v2572_v43  ;;  %v2685_v49 = vpop.f32.mrb[39].mxu1 }
 0x147   : > { %v2686_v50 = vadd.f32 %v2685_v49, %v2684_v45 }
 0x148   : > { %v3445_v51 = vadd.f32 %v2683_v44, %v1572_v47  ;;  %v1575_v53 = vadd.f32 %v2574_v48, %v3376_v36 }
 0x14a   : > { %v3448_v54 = vadd.f32 %v2686_v50, %v1575_v53  ;;  %v2575_v57 = vpop.f32.mrb[40].mxu0 }
 0x14b   : > { %v2687_v59 = vpop.f32.mrb[40].mxu1  ;;  %v2576_v60 = vpop.f32.mrb[41].mxu0 }
 0x14c   : > { %v2577_v61 = vadd.f32 %v2576_v60, %v2575_v57  ;;  %v2688_v62 = vpop.f32.mrb[41].mxu1  ;;  %v2578_v0 = vpop.f32.mrb[42].mxu0 }
 0x14d   : > { %v2689_v2 = vadd.f32 %v2688_v62, %v2687_v59  ;;  %v2690_v3 = vpop.f32.mrb[42].mxu1  ;;  %v2579_v4 = vpop.f32.mrb[43].mxu0 }
 0x14e   : > { %v1580_v5 = vadd.f32 %v2577_v61, %v3376_v36  ;;  %v2580_v6 = vadd.f32 %v2579_v4, %v2578_v0  ;;  %v2691_v7 = vpop.f32.mrb[43].mxu1 }
 0x14f   : > { %v2692_v8 = vadd.f32 %v2691_v7, %v2690_v3 }
 0x150   : > { %v3451_v9 = vadd.f32 %v2689_v2, %v1580_v5  ;;  %v1583_v11 = vadd.f32 %v2580_v6, %v3376_v36 }
 0x152   : > { %v3454_v14 = vadd.f32 %v2692_v8, %v1583_v11  ;;  %v2581_v15 = vpop.f32.mrb[44].mxu0 }
 0x153   : > { %v2693_v17 = vpop.f32.mrb[44].mxu1  ;;  %v2582_v18 = vpop.f32.mrb[45].mxu0 }
 0x154   : > { %v2583_v20 = vadd.f32 %v2582_v18, %v2581_v15  ;;  %v2694_v22 = vpop.f32.mrb[45].mxu1  ;;  %v2584_v23 = vpop.f32.mrb[46].mxu0 }
 0x155   : > { %v2695_v24 = vadd.f32 %v2694_v22, %v2693_v17  ;;  %v2696_v25 = vpop.f32.mrb[46].mxu1  ;;  %v2585_v26 = vpop.f32.mrb[47].mxu0 }
 0x156   : > { %v1588_v27 = vadd.f32 %v2583_v20, %v3376_v36  ;;  %v2586_v28 = vadd.f32 %v2585_v26, %v2584_v23  ;;  %v2697_v29 = vpop.f32.mrb[47].mxu1 }
 0x157   : > { %v2698_v31 = vadd.f32 %v2697_v29, %v2696_v25 }
 0x158   : > { %v3457_v33 = vadd.f32 %v2695_v24, %v1588_v27  ;;  %v1591_v34 = vadd.f32 %v2586_v28, %v3376_v36 }
 0x15a   : > { %v3460_v38 = vadd.f32 %v2698_v31, %v1591_v34  ;;  %v2587_v40 = vpop.f32.mrb[48].mxu0 }
 0x15b   : > { %v2699_v42 = vpop.f32.mrb[48].mxu1  ;;  %v2588_v43 = vpop.f32.mrb[49].mxu0 }
 0x15c   : > { %v2589_v44 = vadd.f32 %v2588_v43, %v2587_v40  ;;  %v2700_v45 = vpop.f32.mrb[49].mxu1  ;;  %v2590_v46 = vpop.f32.mrb[50].mxu0 }
 0x15d   : > { %v2701_v47 = vadd.f32 %v2700_v45, %v2699_v42  ;;  %v2702_v48 = vpop.f32.mrb[50].mxu1  ;;  %v2591_v49 = vpop.f32.mrb[51].mxu0 }
 0x15e   : > { %v1596_v50 = vadd.f32 %v2589_v44, %v3376_v36  ;;  %v2592_v53 = vadd.f32 %v2591_v49, %v2590_v46  ;;  %v2703_v57 = vpop.f32.mrb[51].mxu1 }
 0x15f   : > { %v2704_v59 = vadd.f32 %v2703_v57, %v2702_v48 }
 0x160   : > { %v3463_v60 = vadd.f32 %v2701_v47, %v1596_v50  ;;  %v1599_v61 = vadd.f32 %v2592_v53, %v3376_v36 }
 0x162   : > { %v3466_v62 = vadd.f32 %v2704_v59, %v1599_v61  ;;  %v2593_v0 = vpop.f32.mrb[52].mxu0 }
 0x163   : > { %v2705_v2 = vpop.f32.mrb[52].mxu1  ;;  %v2594_v3 = vpop.f32.mrb[53].mxu0 }
 0x164   : > { %v2595_v4 = vadd.f32 %v2594_v3, %v2593_v0  ;;  %v2706_v5 = vpop.f32.mrb[53].mxu1  ;;  %v2596_v6 = vpop.f32.mrb[54].mxu0 }
 0x165   : > { %v2707_v7 = vadd.f32 %v2706_v5, %v2705_v2  ;;  %v2708_v8 = vpop.f32.mrb[54].mxu1  ;;  %v2597_v11 = vpop.f32.mrb[55].mxu0 }
 0x166   : > { %v1604_v15 = vadd.f32 %v2595_v4, %v3376_v36  ;;  %v2598_v17 = vadd.f32 %v2597_v11, %v2596_v6  ;;  %v2709_v18 = vpop.f32.mrb[55].mxu1 }
 0x167   : > { %v2710_v20 = vadd.f32 %v2709_v18, %v2708_v8 }
 0x168   : > { %v3469_v22 = vadd.f32 %v2707_v7, %v1604_v15  ;;  %v1607_v23 = vadd.f32 %v2598_v17, %v3376_v36 }
 0x16a   : > { %v3472_v24 = vadd.f32 %v2710_v20, %v1607_v23  ;;  %v2599_v25 = vpop.f32.mrb[56].mxu0 }
 0x16b   : > { %v2711_v26 = vpop.f32.mrb[56].mxu1  ;;  %v2600_v27 = vpop.f32.mrb[57].mxu0 }
 0x16c   : > { %v2601_v28 = vadd.f32 %v2600_v27, %v2599_v25  ;;  %v2712_v29 = vpop.f32.mrb[57].mxu1  ;;  %v2602_v31 = vpop.f32.mrb[58].mxu0 }
 0x16d   : > { %v2713_v34 = vadd.f32 %v2712_v29, %v2711_v26  ;;  %v2714_v40 = vpop.f32.mrb[58].mxu1  ;;  %v2603_v42 = vpop.f32.mrb[59].mxu0 }
 0x16e   : > { %v1612_v43 = vadd.f32 %v2601_v28, %v3376_v36  ;;  %v2604_v44 = vadd.f32 %v2603_v42, %v2602_v31  ;;  %v2715_v45 = vpop.f32.mrb[59].mxu1 }
 0x16f   : > { %v2716_v46 = vadd.f32 %v2715_v45, %v2714_v40 }
 0x170   : > { %v3475_v47 = vadd.f32 %v2713_v34, %v1612_v43  ;;  %v1615_v48 = vadd.f32 %v2604_v44, %v3376_v36 }
 0x172   : > { %v3478_v49 = vadd.f32 %v2716_v46, %v1615_v48  ;;  %v2605_v50 = vpop.f32.mrb[60].mxu0 }
 0x173   : > { %v2717_v53 = vpop.f32.mrb[60].mxu1  ;;  %v2606_v57 = vpop.f32.mrb[61].mxu0 }
 0x174   : > { %v2607_v59 = vadd.f32 %v2606_v57, %v2605_v50  ;;  %v2718_v61 = vpop.f32.mrb[61].mxu1  ;;  %v2608_v0 = vpop.f32.mrb[62].mxu0 }
 0x175   : > { %v2719_v2 = vadd.f32 %v2718_v61, %v2717_v53  ;;  %v2720_v3 = vpop.f32.mrb[62].mxu1  ;;  %v2609_v4 = vpop.f32.mrb[63].mxu0 }
 0x176   : > { %v1620_v5 = vadd.f32 %v2607_v59, %v3376_v36  ;;  %v2610_v6 = vadd.f32 %v2609_v4, %v2608_v0  ;;  %v2721_v7 = vpop.f32.mrb[63].mxu1 }
 0x177   : > { %v2722_v8 = vadd.f32 %v2721_v7, %v2720_v3 }
 0x178   : > { %v3481_v11 = vadd.f32 %v2719_v2, %v1620_v5  ;;  %v1623_v15 = vadd.f32 %v2610_v6, %v3376_v36 }
 0x17a   : > { %v3484_v17 = vadd.f32 %v2722_v8, %v1623_v15  ;;  %v2739_v18 = vpop.f32.mrb[64].mxu0 }
 0x17b   : > { %v2851_v20 = vpop.f32.mrb[64].mxu1  ;;  %v2740_v23 = vpop.f32.mrb[65].mxu0 }
 0x17c   : > { %v2741_v25 = vadd.f32 %v2740_v23, %v2739_v18  ;;  %v2852_v26 = vpop.f32.mrb[65].mxu1  ;;  %v2742_v27 = vpop.f32.mrb[66].mxu0 }
 0x17d   : > { %v2853_v28 = vadd.f32 %v2852_v26, %v2851_v20  ;;  %v2854_v29 = vpop.f32.mrb[66].mxu1  ;;  %v2743_v31 = vpop.f32.mrb[67].mxu0 }
 0x17e   : > { %v1822_v34 = vadd.f32 %v2741_v25, %v3379_v52  ;;  %v2744_v40 = vadd.f32 %v2743_v31, %v2742_v27  ;;  %v2855_v42 = vpop.f32.mrb[67].mxu1 }
 0x17f   : > { %v2856_v43 = vadd.f32 %v2855_v42, %v2854_v29 }
 0x180   : > { %v1983_v44 = vadd.f32 %v2853_v28, %v1822_v34  ;;  %v1825_v36 = vadd.f32 %v2744_v40, %v3384_v56 }
 0x182   : > { %vm2109_vm0 = vcmp.gt.f32.partialorder %v1983_v44, 0.0  ;;  %v2141_v45 = vmul.f32 0.1, %v1983_v44  ;;  %v1986_v46 = vadd.f32 %v2856_v43, %v1825_v36  ;;  %v2745_v48 = vpop.f32.mrb[68].mxu0 }
 0x183   : > { %v2857_v50 = vpop.f32.mrb[68].mxu1  ;;  %v2746_v52 = vpop.f32.mrb[69].mxu0 }
 0x184   : > { %v2173_v53 = vsel %vm2109_vm0, %v1983_v44, %v2141_v45  ;;  %vm2110_vm1 = vcmp.gt.f32.partialorder %v1986_v46, 0.0  ;;  %v2142_v57 = vmul.f32 0.1, %v1986_v46  ;;  %v2747_v59 = vadd.f32 %v2746_v52, %v2745_v48  ;;  %v2858_v61 = vpop.f32.mrb[69].mxu1  ;;  %v2748_v0 = vpop.f32.mrb[70].mxu0 }
 0x185   : > { %2205 = vst [vmem:[%s3492_s29] sm:$0xff] %v2173_v53  ;;  %v2859_v56 = vadd.f32 %v2858_v61, %v2857_v50  ;;  %v2860_v2 = vpop.f32.mrb[70].mxu1  ;;  %v2749_v3 = vpop.f32.mrb[71].mxu0 }
 0x186   : > { %v2174_v4 = vsel %vm2110_vm1, %v1986_v46, %v2142_v57  ;;  %v1830_v5 = vadd.f32 %v2747_v59, %v3389_v12  ;;  %v2750_v6 = vadd.f32 %v2749_v3, %v2748_v0  ;;  %v2861_v7 = vpop.f32.mrb[71].mxu1 }
 0x187   : > { %2206 = vst [vmem:[%s3492_s29 + $0x8] sm:$0xff] %v2174_v4  ;;  %v2862_v8 = vadd.f32 %v2861_v7, %v2860_v2 }
 0x188   : > { %v1991_v15 = vadd.f32 %v2859_v56, %v1830_v5  ;;  %v1833_v18 = vadd.f32 %v2750_v6, %v3394_v16 }
 0x18a   : > { %vm2111_vm2 = vcmp.gt.f32.partialorder %v1991_v15, 0.0  ;;  %v2143_v20 = vmul.f32 0.1, %v1991_v15  ;;  %v1994_v23 = vadd.f32 %v2862_v8, %v1833_v18  ;;  %v2751_v25 = vpop.f32.mrb[72].mxu0 }
 0x18b   : > { %v2863_v26 = vpop.f32.mrb[72].mxu1  ;;  %v2752_v27 = vpop.f32.mrb[73].mxu0 }
 0x18c   : > { %v2175_v28 = vsel %vm2111_vm2, %v1991_v15, %v2143_v20  ;;  %vm2112_vm3 = vcmp.gt.f32.partialorder %v1994_v23, 0.0  ;;  %v2144_v29 = vmul.f32 0.1, %v1994_v23  ;;  %v2753_v31 = vadd.f32 %v2752_v27, %v2751_v25  ;;  %v2864_v12 = vpop.f32.mrb[73].mxu1  ;;  %v2754_v34 = vpop.f32.mrb[74].mxu0 }
 0x18d   : > { %2207 = vst [vmem:[%s3492_s29 + $0x10] sm:$0xff] %v2175_v28  ;;  %v2865_v40 = vadd.f32 %v2864_v12, %v2863_v26  ;;  %v2866_v42 = vpop.f32.mrb[74].mxu1  ;;  %v2755_v43 = vpop.f32.mrb[75].mxu0 }
 0x18e   : > { %v2176_v44 = vsel %vm2112_vm3, %v1994_v23, %v2144_v29  ;;  %v1838_v16 = vadd.f32 %v2753_v31, %v3399_v37  ;;  %v2756_v36 = vadd.f32 %v2755_v43, %v2754_v34  ;;  %v2867_v45 = vpop.f32.mrb[75].mxu1 }
 0x18f   : > { %2208 = vst [vmem:[%s3492_s29 + $0x18] sm:$0xff] %v2176_v44  ;;  %v2868_v46 = vadd.f32 %v2867_v45, %v2866_v42 }
 0x190   : > { %v1999_v48 = vadd.f32 %v2865_v40, %v1838_v16  ;;  %v1841_v50 = vadd.f32 %v2756_v36, %v3404_v41 }
 0x192   : > { %vm2113_vm4 = vcmp.gt.f32.partialorder %v1999_v48, 0.0  ;;  %v2145_v52 = vmul.f32 0.1, %v1999_v48  ;;  %v2002_v53 = vadd.f32 %v2868_v46, %v1841_v50  ;;  %v2757_v57 = vpop.f32.mrb[76].mxu0 }
 0x193   : > { %v2869_v59 = vpop.f32.mrb[76].mxu1  ;;  %v2758_v61 = vpop.f32.mrb[77].mxu0 }
 0x194   : > { %v2177_v0 = vsel %vm2113_vm4, %v1999_v48, %v2145_v52  ;;  %vm2114_vm5 = vcmp.gt.f32.partialorder %v2002_v53, 0.0  ;;  %v2146_v56 = vmul.f32 0.1, %v2002_v53  ;;  %v2759_v2 = vadd.f32 %v2758_v61, %v2757_v57  ;;  %v2870_v37 = vpop.f32.mrb[77].mxu1  ;;  %v2760_v3 = vpop.f32.mrb[78].mxu0 }
 0x195   : > { %2209 = vst [vmem:[%s3492_s29 + $0x20] sm:$0xff] %v2177_v0  ;;  %v2871_v4 = vadd.f32 %v2870_v37, %v2869_v59  ;;  %v2872_v5 = vpop.f32.mrb[78].mxu1  ;;  %v2761_v6 = vpop.f32.mrb[79].mxu0 }
 0x196   : > { %v2178_v7 = vsel %vm2114_vm5, %v2002_v53, %v2146_v56  ;;  %v1846_v41 = vadd.f32 %v2759_v2, %v3409_v63  ;;  %v2762_v8 = vadd.f32 %v2761_v6, %v2760_v3  ;;  %v2873_v15 = vpop.f32.mrb[79].mxu1 }
 0x197   : > { %2210 = vst [vmem:[%s3492_s29 + $0x28] sm:$0xff] %v2178_v7  ;;  %v2874_v18 = vadd.f32 %v2873_v15, %v2872_v5 }
 0x198   : > { %v2007_v20 = vadd.f32 %v2871_v4, %v1846_v41  ;;  %v1849_v23 = vadd.f32 %v2762_v8, %v3412_v1 }
 0x19a   : > { %vm2115_vm6 = vcmp.gt.f32.partialorder %v2007_v20, 0.0  ;;  %v2147_v25 = vmul.f32 0.1, %v2007_v20  ;;  %v2010_v26 = vadd.f32 %v2874_v18, %v1849_v23  ;;  %v2763_v27 = vpop.f32.mrb[80].mxu0 }
 0x19b   : > { %v2875_v28 = vpop.f32.mrb[80].mxu1  ;;  %v2764_v29 = vpop.f32.mrb[81].mxu0 }
 0x19c   : > { %v2179_v31 = vsel %vm2115_vm6, %v2007_v20, %v2147_v25  ;;  %vm2116_vm7 = vcmp.gt.f32.partialorder %v2010_v26, 0.0  ;;  %v2148_v12 = vmul.f32 0.1, %v2010_v26  ;;  %v2765_v34 = vadd.f32 %v2764_v29, %v2763_v27  ;;  %v2876_v63 = vpop.f32.mrb[81].mxu1  ;;  %v2766_v40 = vpop.f32.mrb[82].mxu0 }
 0x19d   : > { %2211 = vst [vmem:[%s3492_s29 + $0x30] sm:$0xff] %v2179_v31  ;;  %v2877_v42 = vadd.f32 %v2876_v63, %v2875_v28  ;;  %v2878_v43 = vpop.f32.mrb[82].mxu1  ;;  %v2767_v44 = vpop.f32.mrb[83].mxu0 }
 0x19e   : > { %v2180_v16 = vsel %vm2116_vm7, %v2010_v26, %v2148_v12  ;;  %v1854_v1 = vadd.f32 %v2765_v34, %v3415_v19  ;;  %v2768_v36 = vadd.f32 %v2767_v44, %v2766_v40  ;;  %v2879_v45 = vpop.f32.mrb[83].mxu1 }
 0x19f   : > { %2212 = vst [vmem:[%s3492_s29 + $0x38] sm:$0xff] %v2180_v16  ;;  %v2880_v46 = vadd.f32 %v2879_v45, %v2878_v43 }
 0x1a0   : > { %v2015_v48 = vadd.f32 %v2877_v42, %v1854_v1  ;;  %v1857_v50 = vadd.f32 %v2768_v36, %v3418_v21 }
 0x1a2   : > { %vm2117_vm8 = vcmp.gt.f32.partialorder %v2015_v48, 0.0  ;;  %v2149_v52 = vmul.f32 0.1, %v2015_v48  ;;  %v2018_v53 = vadd.f32 %v2880_v46, %v1857_v50  ;;  %v2769_v57 = vpop.f32.mrb[84].mxu0 }
 0x1a3   : > { %v2881_v59 = vpop.f32.mrb[84].mxu1  ;;  %v2770_v61 = vpop.f32.mrb[85].mxu0 }
 0x1a4   : > { %v2181_v0 = vsel %vm2117_vm8, %v2015_v48, %v2149_v52  ;;  %vm2118_vm9 = vcmp.gt.f32.partialorder %v2018_v53, 0.0  ;;  %v2150_v56 = vmul.f32 0.1, %v2018_v53  ;;  %v2771_v2 = vadd.f32 %v2770_v61, %v2769_v57  ;;  %v2882_v19 = vpop.f32.mrb[85].mxu1  ;;  %v2772_v37 = vpop.f32.mrb[86].mxu0 }
 0x1a5   : > { %2213 = vst [vmem:[%s3492_s29 + $0x40] sm:$0xff] %v2181_v0  ;;  %v2883_v3 = vadd.f32 %v2882_v19, %v2881_v59  ;;  %v2884_v4 = vpop.f32.mrb[86].mxu1  ;;  %v2773_v5 = vpop.f32.mrb[87].mxu0 }
 0x1a6   : > { %v2182_v6 = vsel %vm2118_vm9, %v2018_v53, %v2150_v56  ;;  %v1862_v21 = vadd.f32 %v2771_v2, %v3421_v35  ;;  %v2774_v7 = vadd.f32 %v2773_v5, %v2772_v37  ;;  %v2885_v41 = vpop.f32.mrb[87].mxu1 }
 0x1a7   : > { %2214 = vst [vmem:[%s3492_s29 + $0x48] sm:$0xff] %v2182_v6  ;;  %v2886_v8 = vadd.f32 %v2885_v41, %v2884_v4 }
 0x1a8   : > { %v2023_v15 = vadd.f32 %v2883_v3, %v1862_v21  ;;  %v1865_v18 = vadd.f32 %v2774_v7, %v3424_v39 }
 0x1aa   : > { %vm2119_vm10 = vcmp.gt.f32.partialorder %v2023_v15, 0.0  ;;  %v2151_v20 = vmul.f32 0.1, %v2023_v15  ;;  %v2026_v23 = vadd.f32 %v2886_v8, %v1865_v18  ;;  %v2775_v25 = vpop.f32.mrb[88].mxu0 }
 0x1ab   : > { %v2887_v26 = vpop.f32.mrb[88].mxu1  ;;  %v2776_v27 = vpop.f32.mrb[89].mxu0 }
 0x1ac   : > { %v2183_v28 = vsel %vm2119_vm10, %v2023_v15, %v2151_v20  ;;  %vm2120_vm11 = vcmp.gt.f32.partialorder %v2026_v23, 0.0  ;;  %v2152_v29 = vmul.f32 0.1, %v2026_v23  ;;  %v2777_v31 = vadd.f32 %v2776_v27, %v2775_v25  ;;  %v2888_v35 = vpop.f32.mrb[89].mxu1  ;;  %v2778_v12 = vpop.f32.mrb[90].mxu0 }
 0x1ad   : > { %2215 = vst [vmem:[%s3492_s29 + $0x50] sm:$0xff] %v2183_v28  ;;  %v2889_v34 = vadd.f32 %v2888_v35, %v2887_v26  ;;  %v2890_v63 = vpop.f32.mrb[90].mxu1  ;;  %v2779_v40 = vpop.f32.mrb[91].mxu0 }
 0x1ae   : > { %v2184_v42 = vsel %vm2120_vm11, %v2026_v23, %v2152_v29  ;;  %v1870_v39 = vadd.f32 %v2777_v31, %v3427_v55  ;;  %v2780_v43 = vadd.f32 %v2779_v40, %v2778_v12  ;;  %v2891_v44 = vpop.f32.mrb[91].mxu1 }
 0x1af   : > { %2216 = vst [vmem:[%s3492_s29 + $0x58] sm:$0xff] %v2184_v42  ;;  %v2892_v16 = vadd.f32 %v2891_v44, %v2890_v63 }
 0x1b0   : > { %v2031_v1 = vadd.f32 %v2889_v34, %v1870_v39  ;;  %v1873_v36 = vadd.f32 %v2780_v43, %v3430_v58 }
 0x1b2   : > { %vm2121_vm12 = vcmp.gt.f32.partialorder %v2031_v1, 0.0  ;;  %v2153_v45 = vmul.f32 0.1, %v2031_v1  ;;  %v2034_v46 = vadd.f32 %v2892_v16, %v1873_v36  ;;  %v2781_v48 = vpop.f32.mrb[92].mxu0 }
 0x1b3   : > { %v2893_v50 = vpop.f32.mrb[92].mxu1  ;;  %v2782_v52 = vpop.f32.mrb[93].mxu0 }
 0x1b4   : > { %v2185_v53 = vsel %vm2121_vm12, %v2031_v1, %v2153_v45  ;;  %vm2122_vm13 = vcmp.gt.f32.partialorder %v2034_v46, 0.0  ;;  %v2154_v57 = vmul.f32 0.1, %v2034_v46  ;;  %v2783_v59 = vadd.f32 %v2782_v52, %v2781_v48  ;;  %v2894_v55 = vpop.f32.mrb[93].mxu1  ;;  %v2784_v61 = vpop.f32.mrb[94].mxu0 }
 0x1b5   : > { %2217 = vst [vmem:[%s3492_s29 + $0x60] sm:$0xff] %v2185_v53  ;;  %v2895_v0 = vadd.f32 %v2894_v55, %v2893_v50  ;;  %v2896_v56 = vpop.f32.mrb[94].mxu1  ;;  %v2785_v2 = vpop.f32.mrb[95].mxu0 }
 0x1b6   : > { %v2186_v19 = vsel %vm2122_vm13, %v2034_v46, %v2154_v57  ;;  %v1878_v58 = vadd.f32 %v2783_v59, %v3433_v10  ;;  %v2786_v37 = vadd.f32 %v2785_v2, %v2784_v61  ;;  %v2897_v3 = vpop.f32.mrb[95].mxu1 }
 0x1b7   : > { %2218 = vst [vmem:[%s3492_s29 + $0x68] sm:$0xff] %v2186_v19  ;;  %v2898_v4 = vadd.f32 %v2897_v3, %v2896_v56 }
 0x1b8   : > { %v2039_v5 = vadd.f32 %v2895_v0, %v1878_v58  ;;  %v1881_v6 = vadd.f32 %v2786_v37, %v3436_v13 }
 0x1ba   : > { %vm2123_vm14 = vcmp.gt.f32.partialorder %v2039_v5, 0.0  ;;  %v2155_v21 = vmul.f32 0.1, %v2039_v5  ;;  %v2042_v7 = vadd.f32 %v2898_v4, %v1881_v6  ;;  %v2787_v41 = vpop.f32.mrb[96].mxu0 }
 0x1bb   : > { %v2899_v8 = vpop.f32.mrb[96].mxu1  ;;  %v2788_v15 = vpop.f32.mrb[97].mxu0 }
 0x1bc   : > { %v2187_v18 = vsel %vm2123_vm14, %v2039_v5, %v2155_v21  ;;  %vm2124_vm15 = vcmp.gt.f32.partialorder %v2042_v7, 0.0  ;;  %v2156_v20 = vmul.f32 0.1, %v2042_v7  ;;  %v2789_v23 = vadd.f32 %v2788_v15, %v2787_v41  ;;  %v2900_v10 = vpop.f32.mrb[97].mxu1  ;;  %v2790_v25 = vpop.f32.mrb[98].mxu0 }
 0x1bd   : > { %2219 = vst [vmem:[%s3492_s29 + $0x70] sm:$0xff] %v2187_v18  ;;  %v2901_v26 = vadd.f32 %v2900_v10, %v2899_v8  ;;  %v2902_v27 = vpop.f32.mrb[98].mxu1  ;;  %v2791_v28 = vpop.f32.mrb[99].mxu0 }
 0x1be   : > { %v2188_v29 = vsel %vm2124_vm15, %v2042_v7, %v2156_v20  ;;  %v1886_v13 = vadd.f32 %v2789_v23, %v3439_v30  ;;  %v2792_v31 = vadd.f32 %v2791_v28, %v2790_v25  ;;  %v2903_v35 = vpop.f32.mrb[99].mxu1 }
 0x1bf   : > { %2220 = vst [vmem:[%s3492_s29 + $0x78] sm:$0xff] %v2188_v29  ;;  %v2904_v12 = vadd.f32 %v2903_v35, %v2902_v27 }
 0x1c0   : > { %v2047_v34 = vadd.f32 %v2901_v26, %v1886_v13  ;;  %v1889_v63 = vadd.f32 %v2792_v31, %v3442_v32 }
 0x1c2   : > { %vm2125_vm0 = vcmp.gt.f32.partialorder %v2047_v34, 0.0  ;;  %v2157_v40 = vmul.f32 0.1, %v2047_v34  ;;  %v2050_v42 = vadd.f32 %v2904_v12, %v1889_v63  ;;  %v2793_v39 = vpop.f32.mrb[100].mxu0 }
 0x1c3   : > { %v2905_v43 = vpop.f32.mrb[100].mxu1  ;;  %v2794_v44 = vpop.f32.mrb[101].mxu0 }
 0x1c4   : > { %v2189_v16 = vsel %vm2125_vm0, %v2047_v34, %v2157_v40  ;;  %vm2126_vm1 = vcmp.gt.f32.partialorder %v2050_v42, 0.0  ;;  %v2158_v1 = vmul.f32 0.1, %v2050_v42  ;;  %v2795_v36 = vadd.f32 %v2794_v44, %v2793_v39  ;;  %v2906_v30 = vpop.f32.mrb[101].mxu1  ;;  %v2796_v45 = vpop.f32.mrb[102].mxu0 }
 0x1c5   : > { %2221 = vst [vmem:[%s3492_s29 + $0x80] sm:$0xff] %v2189_v16  ;;  %v2907_v46 = vadd.f32 %v2906_v30, %v2905_v43  ;;  %v2908_v48 = vpop.f32.mrb[102].mxu1  ;;  %v2797_v50 = vpop.f32.mrb[103].mxu0 }
 0x1c6   : > { %v2190_v52 = vsel %vm2126_vm1, %v2050_v42, %v2158_v1  ;;  %v1894_v32 = vadd.f32 %v2795_v36, %v3445_v51  ;;  %v2798_v53 = vadd.f32 %v2797_v50, %v2796_v45  ;;  %v2909_v57 = vpop.f32.mrb[103].mxu1 }
 0x1c7   : > { %2222 = vst [vmem:[%s3492_s29 + $0x88] sm:$0xff] %v2190_v52  ;;  %v2910_v59 = vadd.f32 %v2909_v57, %v2908_v48 }
 0x1c8   : > { %v2055_v55 = vadd.f32 %v2907_v46, %v1894_v32  ;;  %v1897_v61 = vadd.f32 %v2798_v53, %v3448_v54 }
 0x1ca   : > { %vm2127_vm2 = vcmp.gt.f32.partialorder %v2055_v55, 0.0  ;;  %v2159_v0 = vmul.f32 0.1, %v2055_v55  ;;  %v2058_v56 = vadd.f32 %v2910_v59, %v1897_v61  ;;  %v2799_v2 = vpop.f32.mrb[104].mxu0 }
 0x1cb   : > { %v2911_v19 = vpop.f32.mrb[104].mxu1  ;;  %v2800_v58 = vpop.f32.mrb[105].mxu0 }
 0x1cc   : > { %v2191_v37 = vsel %vm2127_vm2, %v2055_v55, %v2159_v0  ;;  %vm2128_vm3 = vcmp.gt.f32.partialorder %v2058_v56, 0.0  ;;  %v2160_v3 = vmul.f32 0.1, %v2058_v56  ;;  %v2801_v4 = vadd.f32 %v2800_v58, %v2799_v2  ;;  %v2912_v51 = vpop.f32.mrb[105].mxu1  ;;  %v2802_v5 = vpop.f32.mrb[106].mxu0 }
 0x1cd   : > { %2223 = vst [vmem:[%s3492_s29 + $0x90] sm:$0xff] %v2191_v37  ;;  %v2913_v6 = vadd.f32 %v2912_v51, %v2911_v19  ;;  %v2914_v21 = vpop.f32.mrb[106].mxu1  ;;  %v2803_v7 = vpop.f32.mrb[107].mxu0 }
 0x1ce   : > { %v2192_v41 = vsel %vm2128_vm3, %v2058_v56, %v2160_v3  ;;  %v1902_v54 = vadd.f32 %v2801_v4, %v3451_v9  ;;  %v2804_v8 = vadd.f32 %v2803_v7, %v2802_v5  ;;  %v2915_v15 = vpop.f32.mrb[107].mxu1 }
 0x1cf   : > { %2224 = vst [vmem:[%s3492_s29 + $0x98] sm:$0xff] %v2192_v41  ;;  %v2916_v18 = vadd.f32 %v2915_v15, %v2914_v21 }
 0x1d0   : > { %v2063_v20 = vadd.f32 %v2913_v6, %v1902_v54  ;;  %v1905_v23 = vadd.f32 %v2804_v8, %v3454_v14 }
 0x1d2   : > { %vm2129_vm4 = vcmp.gt.f32.partialorder %v2063_v20, 0.0  ;;  %v2161_v10 = vmul.f32 0.1, %v2063_v20  ;;  %v2066_v25 = vadd.f32 %v2916_v18, %v1905_v23  ;;  %v2805_v26 = vpop.f32.mrb[108].mxu0 }
 0x1d3   : > { %v2917_v27 = vpop.f32.mrb[108].mxu1  ;;  %v2806_v28 = vpop.f32.mrb[109].mxu0 }
 0x1d4   : > { %v2193_v29 = vsel %vm2129_vm4, %v2063_v20, %v2161_v10  ;;  %vm2130_vm5 = vcmp.gt.f32.partialorder %v2066_v25, 0.0  ;;  %v2162_v13 = vmul.f32 0.1, %v2066_v25  ;;  %v2807_v31 = vadd.f32 %v2806_v28, %v2805_v26  ;;  %v2918_v9 = vpop.f32.mrb[109].mxu1  ;;  %v2808_v35 = vpop.f32.mrb[110].mxu0 }
 0x1d5   : > { %2225 = vst [vmem:[%s3492_s29 + $0xa0] sm:$0xff] %v2193_v29  ;;  %v2919_v12 = vadd.f32 %v2918_v9, %v2917_v27  ;;  %v2920_v34 = vpop.f32.mrb[110].mxu1  ;;  %v2809_v63 = vpop.f32.mrb[111].mxu0 }
 0x1d6   : > { %v2194_v40 = vsel %vm2130_vm5, %v2066_v25, %v2162_v13  ;;  %v1910_v14 = vadd.f32 %v2807_v31, %v3457_v33  ;;  %v2810_v42 = vadd.f32 %v2809_v63, %v2808_v35  ;;  %v2921_v39 = vpop.f32.mrb[111].mxu1 }
 0x1d7   : > { %2226 = vst [vmem:[%s3492_s29 + $0xa8] sm:$0xff] %v2194_v40  ;;  %v2922_v43 = vadd.f32 %v2921_v39, %v2920_v34 }
 0x1d8   : > { %v2071_v44 = vadd.f32 %v2919_v12, %v1910_v14  ;;  %v1913_v16 = vadd.f32 %v2810_v42, %v3460_v38 }
 0x1da   : > { %vm2131_vm6 = vcmp.gt.f32.partialorder %v2071_v44, 0.0  ;;  %v2163_v1 = vmul.f32 0.1, %v2071_v44  ;;  %v2074_v36 = vadd.f32 %v2922_v43, %v1913_v16  ;;  %v2811_v30 = vpop.f32.mrb[112].mxu0 }
 0x1db   : > { %v2923_v45 = vpop.f32.mrb[112].mxu1  ;;  %v2812_v46 = vpop.f32.mrb[113].mxu0 }
 0x1dc   : > { %v2195_v48 = vsel %vm2131_vm6, %v2071_v44, %v2163_v1  ;;  %vm2132_vm7 = vcmp.gt.f32.partialorder %v2074_v36, 0.0  ;;  %v2164_v50 = vmul.f32 0.1, %v2074_v36  ;;  %v2813_v52 = vadd.f32 %v2812_v46, %v2811_v30  ;;  %v2924_v33 = vpop.f32.mrb[113].mxu1  ;;  %v2814_v32 = vpop.f32.mrb[114].mxu0 }
 0x1dd   : > { %2227 = vst [vmem:[%s3492_s29 + $0xb0] sm:$0xff] %v2195_v48  ;;  %v2925_v53 = vadd.f32 %v2924_v33, %v2923_v45  ;;  %v2926_v57 = vpop.f32.mrb[114].mxu1  ;;  %v2815_v59 = vpop.f32.mrb[115].mxu0 }
 0x1de   : > { %v2196_v55 = vsel %vm2132_vm7, %v2074_v36, %v2164_v50  ;;  %v1918_v38 = vadd.f32 %v2813_v52, %v3463_v60  ;;  %v2816_v61 = vadd.f32 %v2815_v59, %v2814_v32  ;;  %v2927_v0 = vpop.f32.mrb[115].mxu1 }
 0x1df   : > { %2228 = vst [vmem:[%s3492_s29 + $0xb8] sm:$0xff] %v2196_v55  ;;  %v2928_v56 = vadd.f32 %v2927_v0, %v2926_v57 }
 0x1e0   : > { %v2079_v2 = vadd.f32 %v2925_v53, %v1918_v38  ;;  %v1921_v19 = vadd.f32 %v2816_v61, %v3466_v62 }
 0x1e2   : > { %vm2133_vm8 = vcmp.gt.f32.partialorder %v2079_v2, 0.0  ;;  %v2165_v58 = vmul.f32 0.1, %v2079_v2  ;;  %v2082_v37 = vadd.f32 %v2928_v56, %v1921_v19  ;;  %v2817_v3 = vpop.f32.mrb[116].mxu0 }
 0x1e3   : > { %v2929_v4 = vpop.f32.mrb[116].mxu1  ;;  %v2818_v51 = vpop.f32.mrb[117].mxu0 }
 0x1e4   : > { %v2197_v5 = vsel %vm2133_vm8, %v2079_v2, %v2165_v58  ;;  %vm2134_vm9 = vcmp.gt.f32.partialorder %v2082_v37, 0.0  ;;  %v2166_v6 = vmul.f32 0.1, %v2082_v37  ;;  %v2819_v21 = vadd.f32 %v2818_v51, %v2817_v3  ;;  %v2930_v60 = vpop.f32.mrb[117].mxu1  ;;  %v2820_v7 = vpop.f32.mrb[118].mxu0 }
 0x1e5   : > { %2229 = vst [vmem:[%s3492_s29 + $0xc0] sm:$0xff] %v2197_v5  ;;  %v2931_v41 = vadd.f32 %v2930_v60, %v2929_v4  ;;  %v2932_v54 = vpop.f32.mrb[118].mxu1  ;;  %v2821_v8 = vpop.f32.mrb[119].mxu0 }
 0x1e6   : > { %v2198_v15 = vsel %vm2134_vm9, %v2082_v37, %v2166_v6  ;;  %v1926_v62 = vadd.f32 %v2819_v21, %v3469_v22  ;;  %v2822_v18 = vadd.f32 %v2821_v8, %v2820_v7  ;;  %v2933_v20 = vpop.f32.mrb[119].mxu1 }
 0x1e7   : > { %2230 = vst [vmem:[%s3492_s29 + $0xc8] sm:$0xff] %v2198_v15  ;;  %v2934_v23 = vadd.f32 %v2933_v20, %v2932_v54 }
 0x1e8   : > { %v2087_v10 = vadd.f32 %v2931_v41, %v1926_v62  ;;  %v1929_v25 = vadd.f32 %v2822_v18, %v3472_v24 }
 0x1ea   : > { %vm2135_vm10 = vcmp.gt.f32.partialorder %v2087_v10, 0.0  ;;  %v2167_v26 = vmul.f32 0.1, %v2087_v10  ;;  %v2090_v27 = vadd.f32 %v2934_v23, %v1929_v25  ;;  %v2823_v28 = vpop.f32.mrb[120].mxu0 }
 0x1eb   : > { %v2935_v29 = vpop.f32.mrb[120].mxu1  ;;  %v2824_v13 = vpop.f32.mrb[121].mxu0 }
 0x1ec   : > { %v2199_v31 = vsel %vm2135_vm10, %v2087_v10, %v2167_v26  ;;  %vm2136_vm11 = vcmp.gt.f32.partialorder %v2090_v27, 0.0  ;;  %v2168_v9 = vmul.f32 0.1, %v2090_v27  ;;  %v2825_v35 = vadd.f32 %v2824_v13, %v2823_v28  ;;  %v2936_v22 = vpop.f32.mrb[121].mxu1  ;;  %v2826_v12 = vpop.f32.mrb[122].mxu0 }
 0x1ed   : > { %2231 = vst [vmem:[%s3492_s29 + $0xd0] sm:$0xff] %v2199_v31  ;;  %v2937_v34 = vadd.f32 %v2936_v22, %v2935_v29  ;;  %v2938_v63 = vpop.f32.mrb[122].mxu1  ;;  %v2827_v40 = vpop.f32.mrb[123].mxu0 }
 0x1ee   : > { %v2200_v14 = vsel %vm2136_vm11, %v2090_v27, %v2168_v9  ;;  %v1934_v24 = vadd.f32 %v2825_v35, %v3475_v47  ;;  %v2828_v42 = vadd.f32 %v2827_v40, %v2826_v12  ;;  %v2939_v39 = vpop.f32.mrb[123].mxu1 }
 0x1ef   : > { %2232 = vst [vmem:[%s3492_s29 + $0xd8] sm:$0xff] %v2200_v14  ;;  %v2940_v43 = vadd.f32 %v2939_v39, %v2938_v63 }
 0x1f0   : > { %v2095_v44 = vadd.f32 %v2937_v34, %v1934_v24  ;;  %v1937_v16 = vadd.f32 %v2828_v42, %v3478_v49 }
 0x1f2   : > { %vm2137_vm12 = vcmp.gt.f32.partialorder %v2095_v44, 0.0  ;;  %v2169_v1 = vmul.f32 0.1, %v2095_v44  ;;  %v2098_v36 = vadd.f32 %v2940_v43, %v1937_v16  ;;  %v2829_v30 = vpop.f32.mrb[124].mxu0 }
 0x1f3   : > { %v2941_v45 = vpop.f32.mrb[124].mxu1  ;;  %v2830_v46 = vpop.f32.mrb[125].mxu0 }
 0x1f4   : > { %v2201_v48 = vsel %vm2137_vm12, %v2095_v44, %v2169_v1  ;;  %vm2138_vm13 = vcmp.gt.f32.partialorder %v2098_v36, 0.0  ;;  %v2170_v50 = vmul.f32 0.1, %v2098_v36  ;;  %v2831_v52 = vadd.f32 %v2830_v46, %v2829_v30  ;;  %v2942_v47 = vpop.f32.mrb[125].mxu1  ;;  %v2832_v33 = vpop.f32.mrb[126].mxu0 }
 0x1f5   : > { %2233 = vst [vmem:[%s3492_s29 + $0xe0] sm:$0xff] %v2201_v48  ;;  %v2943_v32 = vadd.f32 %v2942_v47, %v2941_v45  ;;  %v2944_v53 = vpop.f32.mrb[126].mxu1  ;;  %v2833_v57 = vpop.f32.mrb[127].mxu0 }
 0x1f6   : > { %v2202_v59 = vsel %vm2138_vm13, %v2098_v36, %v2170_v50  ;;  %v1942_v49 = vadd.f32 %v2831_v52, %v3481_v11  ;;  %v2834_v55 = vadd.f32 %v2833_v57, %v2832_v33  ;;  %v2945_v38 = vpop.f32.mrb[127].mxu1 }
 0x1f7   : > { %2234 = vst [vmem:[%s3492_s29 + $0xe8] sm:$0xff] %v2202_v59  ;;  %v2946_v61 = vadd.f32 %v2945_v38, %v2944_v53 }
 0x1f8   : > { %v2103_v0 = vadd.f32 %v2943_v32, %v1942_v49  ;;  %v1945_v56 = vadd.f32 %v2834_v55, %v3484_v17 }
 0x1fa   : > { %vm2139_vm14 = vcmp.gt.f32.partialorder %v2103_v0, 0.0  ;;  %v2171_v2 = vmul.f32 0.1, %v2103_v0  ;;  %v2106_v19 = vadd.f32 %v2946_v61, %v1945_v56 }
 0x1fc   : > { %v2203_v58 = vsel %vm2139_vm14, %v2103_v0, %v2171_v2  ;;  %vm2140_vm15 = vcmp.gt.f32.partialorder %v2106_v19, 0.0  ;;  %v2172_v37 = vmul.f32 0.1, %v2106_v19 }
 0x1fd   : > { %2235 = vst [vmem:[%s3492_s29 + $0xf0] sm:$0xff] %v2203_v58 }
 0x1fe   : > { %v2204_v3 = vsel %vm2140_vm15, %v2106_v19, %v2172_v37 }
 0x1ff   : > { %2236 = vst [vmem:[%s3492_s29 + $0xf8] sm:$0xff] %v2204_v3 }
 0x200 PF: > { %s13_s12 = sadd.s32 1, %s3025_s12  }
 0x201   : > { %p10_p4 = scmp.ge.s32.totalorder %s13_s12, 4  }
 0x203   :  { %12 = sbr.rel (!%p10_p4) target bundleno = 1 (0x1), region = 62 }

// kernel: discriminator_forward.8
= control target key start
LH: loop header
LB: loop body
LE: loop exit
PB: predicated region body
PF: predicated region fallthrough
CT: control target
= control target key end

     0   :  { %s3700_s12 = smov 0   ;;  %s4646_s0 = inlined_call_operand.vmem [shape: bf16[128,2048], index: 0, kind: input, shape index: {}]   ;;  %s4647_s1 = inlined_call_operand.vmem [shape: bf16[2048,256], index: 1, kind: input, shape index: {}]   ;;  %s4648_s2 = inlined_call_operand.vmem [shape: f32[1,256], index: 2, kind: input, shape index: {}]   ;;  %s4649_s3 = inlined_call_operand.vmem [shape: f32[128,256], index: 3, kind: output, shape index: {}]  }
   0x1 LB: > { %s2817_s13 = sadd.s32 4294967295, %s3678_s12   ;;  %p2821_p0 = scmp.ge.s32.totalorder %s3678_s12, 1  ;;  %s3678_s12 = sphi %s3700_s12, %s13_s12  }
   0x2   : > { %p139_p1 = scmp.lt.s32.totalorder %s3678_s12, 3 }
   0x4   : > { %p140_p2 = pnand %p2821_p0, %p139_p1 }
   0x5   : > { %v3288_v0 = vld [vmem:[%s4647_s1 + $0x4] ss:$8 sps:$4 sm:$0xff] (!%p140_p2)   ;;  %v3292_v2 = vld [vmem:[%s4647_s1] ss:$8 sps:$4 sm:$0xff] (!%p140_p2)   ;;  %v3294_v4 = vld [vmem:[%s4647_s1 + $0x14] ss:$8 sps:$4 sm:$0xff] (!%p140_p2)  }
   0x6   : > { %143 = sbr.rel (%p140_p2) target bundleno = 509 (0x1fd), region = 32  ;;  %v3290_v1 = vld [vmem:[%s4647_s1 + $0x404] ss:$8 sps:$4 sm:$0xff] (!%p140_p2)   ;;  %2111 = vmatprep.subr.bf16.mxu1 (!%p140_p2), %v3288_v0  ;;  %v3293_v3 = vld [vmem:[%s4647_s1 + $0x400] ss:$8 sps:$4 sm:$0xff] (!%p140_p2)   ;;  %s2822_s24 = sshll.u32 (!%p140_p2), %s2817_s13, 3 }
   0x7   : > { %2403 = vmatprep.subr.bf16.mxu0 (!%p140_p2), %v3290_v1  ;;  %2112 = vmatpush1.bf16.msra.mxu1 (!%p140_p2), %v3292_v2  ;;  %v3296_v5 = vld [vmem:[%s4647_s1 + $0x414] ss:$8 sps:$4 sm:$0xff] (!%p140_p2)   ;;  %v3298_v6 = vld [vmem:[%s4647_s1 + $0x10] ss:$8 sps:$4 sm:$0xff] (!%p140_p2)   ;;  %v3300_v8 = vld [vmem:[%s4647_s1 + $0x24] ss:$8 sps:$4 sm:$0xff] (!%p140_p2)  }
   0x8   : > { %2404 = vmatpush1.bf16.msra.mxu0 (!%p140_p2), %v3293_v3  ;;  %2113 = vmatprep.subr.bf16.mxu1 (!%p140_p2), %v3294_v4  ;;  %v3299_v7 = vld [vmem:[%s4647_s1 + $0x410] ss:$8 sps:$4 sm:$0xff] (!%p140_p2)   ;;  %v3302_v9 = vld [vmem:[%s4647_s1 + $0x424] ss:$8 sps:$4 sm:$0xff] (!%p140_p2)   ;;  %v3304_v10 = vld [vmem:[%s4647_s1 + $0x20] ss:$8 sps:$4 sm:$0xff] (!%p140_p2)  }
   0x9   : > { %2405 = vmatprep.subr.bf16.mxu0 (!%p140_p2), %v3296_v5  ;;  %v3305_v11 = vld [vmem:[%s4647_s1 + $0x420] ss:$8 sps:$4 sm:$0xff] (!%p140_p2)   ;;  %v3306_v12 = vld [vmem:[%s4647_s1 + $0x34] ss:$8 sps:$4 sm:$0xff] (!%p140_p2)   ;;  %v3310_v14 = vld [vmem:[%s4647_s1 + $0x30] ss:$8 sps:$4 sm:$0xff] (!%p140_p2)  }
   0xa   : > { %v3308_v13 = vld [vmem:[%s4647_s1 + $0x434] ss:$8 sps:$4 sm:$0xff] (!%p140_p2)   ;;  %v3311_v15 = vld [vmem:[%s4647_s1 + $0x430] ss:$8 sps:$4 sm:$0xff] (!%p140_p2)   ;;  %v3312_v16 = vld [vmem:[%s4647_s1 + $0x44] ss:$8 sps:$4 sm:$0xff] (!%p140_p2)  }
   0xb   : > { %2114 = vmatpush1.bf16.msra.mxu1 (!%p140_p2), %v3298_v6  ;;  %v3314_v17 = vld [vmem:[%s4647_s1 + $0x444] ss:$8 sps:$4 sm:$0xff] (!%p140_p2)   ;;  %v3316_v18 = vld [vmem:[%s4647_s1 + $0x40] ss:$8 sps:$4 sm:$0xff] (!%p140_p2)   ;;  %v3318_v20 = vld [vmem:[%s4647_s1 + $0x54] ss:$8 sps:$4 sm:$0xff] (!%p140_p2)  }
   0xc   : > { %2406 = vmatpush1.bf16.msra.mxu0 (!%p140_p2), %v3299_v7  ;;  %2115 = vmatprep.subr.bf16.mxu1 (!%p140_p2), %v3300_v8  ;;  %v3317_v19 = vld [vmem:[%s4647_s1 + $0x440] ss:$8 sps:$4 sm:$0xff] (!%p140_p2)   ;;  %v3320_v21 = vld [vmem:[%s4647_s1 + $0x454] ss:$8 sps:$4 sm:$0xff] (!%p140_p2)   ;;  %v3322_v22 = vld [vmem:[%s4647_s1 + $0x50] ss:$8 sps:$4 sm:$0xff] (!%p140_p2)  }
   0xd   : > { %2407 = vmatprep.subr.bf16.mxu0 %v3302_v9  ;;  %v3323_v23 = vld [vmem:[%s4647_s1 + $0x450] ss:$8 sps:$4 sm:$0xff]   ;;  %v3324_v24 = vld [vmem:[%s4647_s1 + $0x64] ss:$8 sps:$4 sm:$0xff]   ;;  %v3328_v26 = vld [vmem:[%s4647_s1 + $0x60] ss:$8 sps:$4 sm:$0xff]  }
   0xe   : > { %v3326_v25 = vld [vmem:[%s4647_s1 + $0x464] ss:$8 sps:$4 sm:$0xff]   ;;  %v3329_v27 = vld [vmem:[%s4647_s1 + $0x460] ss:$8 sps:$4 sm:$0xff]   ;;  %v3330_v28 = vld [vmem:[%s4647_s1 + $0x74] ss:$8 sps:$4 sm:$0xff]  }
   0xf   : > { %2116 = vmatpush1.bf16.msra.mxu1 %v3304_v10  ;;  %v3332_v29 = vld [vmem:[%s4647_s1 + $0x474] ss:$8 sps:$4 sm:$0xff]   ;;  %v3334_v30 = vld [vmem:[%s4647_s1 + $0x70] ss:$8 sps:$4 sm:$0xff]   ;;  %v3336_v32 = vld [vmem:[%s4647_s1 + $0x84] ss:$8 sps:$4 sm:$0xff]  }
  0x10   : > { %2408 = vmatpush1.bf16.msra.mxu0 %v3305_v11  ;;  %2117 = vmatprep.subr.bf16.mxu1 %v3306_v12  ;;  %v3335_v31 = vld [vmem:[%s4647_s1 + $0x470] ss:$8 sps:$4 sm:$0xff]   ;;  %p166_p3 = scmp.lt.s32.totalorder %s2822_s24, 15  ;;  %v3338_v33 = vld [vmem:[%s4647_s1 + $0x484] ss:$8 sps:$4 sm:$0xff]  }
  0x11   : > { %2409 = vmatprep.subr.bf16.mxu0 %v3308_v13  ;;  %v3340_v34 = vld [vmem:[%s4647_s1 + $0x80] ss:$8 sps:$4 sm:$0xff]   ;;  %v3342_v36 = vld [vmem:[%s4647_s1 + $0x94] ss:$8 sps:$4 sm:$0xff]   ;;  %v3346_v38 = vld [vmem:[%s4647_s1 + $0x90] ss:$8 sps:$4 sm:$0xff]  }
  0x12   : > { %v3341_v35 = vld [vmem:[%s4647_s1 + $0x480] ss:$8 sps:$4 sm:$0xff]   ;;  %s4651_s24 = smov (!%p166_p3, %s2822_s24), 15  ;;  %v3344_v37 = vld [vmem:[%s4647_s1 + $0x494] ss:$8 sps:$4 sm:$0xff]  }
  0x13   : > { %2118 = vmatpush1.bf16.msra.mxu1 %v3310_v14  ;;  %v3347_v39 = vld [vmem:[%s4647_s1 + $0x490] ss:$8 sps:$4 sm:$0xff]   ;;  %v3348_v40 = vld [vmem:[%s4647_s1 + $0xa4] ss:$8 sps:$4 sm:$0xff]   ;;  %s3150_s21 = sshll.u32 %s4651_s24, 6 }
  0x14   : > { %2410 = vmatpush1.bf16.msra.mxu0 %v3311_v15  ;;  %2119 = vmatprep.subr.bf16.mxu1 %v3312_v16  ;;  %v3350_v41 = vld [vmem:[%s4647_s1 + $0x4a4] ss:$8 sps:$4 sm:$0xff]   ;;  %v3352_v42 = vld [vmem:[%s4647_s1 + $0xa0] ss:$8 sps:$4 sm:$0xff]   ;;  %s3848_s4 = scalar_lea.vmem %s4646_s0, %s3150_s21  ;;  %v3354_v44 = vld [vmem:[%s4647_s1 + $0xb4] ss:$8 sps:$4 sm:$0xff]  }
  0x15   : > { %2411 = vmatprep.subr.bf16.mxu0 %v3314_v17  ;;  %v3353_v43 = vld [vmem:[%s4647_s1 + $0x4a0] ss:$8 sps:$4 sm:$0xff]   ;;  %v3356_v45 = vld [vmem:[%s4647_s1 + $0x4b4] ss:$8 sps:$4 sm:$0xff]   ;;  %v3358_v46 = vld [vmem:[%s4647_s1 + $0xb0] ss:$8 sps:$4 sm:$0xff]  }
  0x16   : > { %v3359_v47 = vld [vmem:[%s4647_s1 + $0x4b0] ss:$8 sps:$4 sm:$0xff]   ;;  %v179_v48 = vld [vmem:[%s3848_s4] sm:$0xff]  ;;  %v3366_v58 = vld [vmem:[%s4647_s1 + $0xd4] ss:$8 sps:$4 sm:$0xff]  }
  0x17   : > { %2120 = vmatpush1.bf16.msra.mxu1 %v3316_v18  ;;  %v187_v49 = vld [vmem:[%s3848_s4 + $0x40] sm:$0xff]  ;;  %v3368_v59 = vld [vmem:[%s4647_s1 + $0x4d4] ss:$8 sps:$4 sm:$0xff]   ;;  %v3370_v60 = vld [vmem:[%s4647_s1 + $0xd0] ss:$8 sps:$4 sm:$0xff]  }
  0x18   : > { %2412 = vmatpush1.bf16.msra.mxu0 %v3317_v19  ;;  %2121 = vmatprep.subr.bf16.mxu1 %v3318_v20  ;;  %v3360_v50 = vld [vmem:[%s4647_s1 + $0xc4] ss:$8 sps:$4 sm:$0xff]   ;;  %v2829_v52 = vcombine.high %v179_v48, %v187_v49  ;;  %v3364_v56 = vld [vmem:[%s4647_s1 + $0xc0] ss:$8 sps:$4 sm:$0xff]   ;;  %v3371_v61 = vld [vmem:[%s4647_s1 + $0x4d0] ss:$8 sps:$4 sm:$0xff]   ;;  %v2828_v8 = vcombine.low %v179_v48, %v187_v49 }
  0x19   : > { %2413 = vmatprep.subr.bf16.mxu0 %v3320_v21  ;;  %v3362_v51 = vld [vmem:[%s4647_s1 + $0x4c4] ss:$8 sps:$4 sm:$0xff]   ;;  %v3365_v57 = vld [vmem:[%s4647_s1 + $0x4c0] ss:$8 sps:$4 sm:$0xff]   ;;  %v3378_v2 = vld [vmem:[%s4647_s1 + $0xf4] ss:$8 sps:$4 sm:$0xff]  }
  0x1a   : > { %v183_v53 = vld [vmem:[%s3848_s4 + $0x20] sm:$0xff]  ;;  %2143 = vmatprep.mubr.bf16.mxu1 %v2829_v52  ;;  %v3380_v3 = vld [vmem:[%s4647_s1 + $0x4f4] ss:$8 sps:$4 sm:$0xff]   ;;  %v3382_v4 = vld [vmem:[%s4647_s1 + $0xf0] ss:$8 sps:$4 sm:$0xff]  }
  0x1b   : > { %2122 = vmatpush1.bf16.msra.mxu1 %v3322_v22  ;;  %v191_v54 = vld [vmem:[%s3848_s4 + $0x60] sm:$0xff]  ;;  %v3383_v5 = vld [vmem:[%s4647_s1 + $0x4f0] ss:$8 sps:$4 sm:$0xff]   ;;  %v3392_v12 = vld [vmem:[%s4647_s1 + $0x114] ss:$8 sps:$4 sm:$0xff]  }
  0x1c   : > { %2414 = vmatpush1.bf16.msra.mxu0 %v3323_v23  ;;  %2123 = vmatprep.subr.bf16.mxu1 %v3324_v24  ;;  %v2837_v55 = vcombine.high %v183_v53, %v191_v54  ;;  %v3372_v62 = vld [vmem:[%s4647_s1 + $0xe4] ss:$8 sps:$4 sm:$0xff]   ;;  %v3376_v0 = vld [vmem:[%s4647_s1 + $0xe0] ss:$8 sps:$4 sm:$0xff]   ;;  %v2836_v10 = vcombine.low %v183_v53, %v191_v54  ;;  %v3395_v13 = vld [vmem:[%s4647_s1 + $0x514] ss:$8 sps:$4 sm:$0xff]  }
  0x1d   : > { %2415 = vmatprep.subr.bf16.mxu0 %v3326_v25  ;;  %v3374_v63 = vld [vmem:[%s4647_s1 + $0x4e4] ss:$8 sps:$4 sm:$0xff]   ;;  %v3377_v1 = vld [vmem:[%s4647_s1 + $0x4e0] ss:$8 sps:$4 sm:$0xff]   ;;  %v3390_v14 = vld [vmem:[%s4647_s1 + $0x110] ss:$8 sps:$4 sm:$0xff]  }
  0x1e   : > { %2435 = vmatprep.mubr.bf16.mxu0 %v2837_v55  ;;  %v3386_v6 = vld [vmem:[%s4647_s1 + $0x104] ss:$8 sps:$4 sm:$0xff]   ;;  %v3384_v9 = vld [vmem:[%s4647_s1 + $0x100] ss:$8 sps:$4 sm:$0xff]   ;;  %v3393_v15 = vld [vmem:[%s4647_s1 + $0x510] ss:$8 sps:$4 sm:$0xff]  }
  0x1f   : > { %2124 = vmatpush1.bf16.msra.mxu1 %v3328_v26  ;;  %v3389_v7 = vld [vmem:[%s4647_s1 + $0x504] ss:$8 sps:$4 sm:$0xff]   ;;  %v3387_v11 = vld [vmem:[%s4647_s1 + $0x500] ss:$8 sps:$4 sm:$0xff]   ;;  %v3404_v22 = vld [vmem:[%s4647_s1 + $0x134] ss:$8 sps:$4 sm:$0xff]  }
  0x20   : > { %2416 = vmatpush1.bf16.msra.mxu0 %v3329_v27  ;;  %2125 = vmatprep.subr.bf16.mxu1 %v3330_v28  ;;  %v3398_v16 = vld [vmem:[%s4647_s1 + $0x124] ss:$8 sps:$4 sm:$0xff]   ;;  %v3396_v18 = vld [vmem:[%s4647_s1 + $0x120] ss:$8 sps:$4 sm:$0xff]   ;;  %v3407_v23 = vld [vmem:[%s4647_s1 + $0x534] ss:$8 sps:$4 sm:$0xff]  }
  0x21   : > { %2417 = vmatprep.subr.bf16.mxu0 %v3332_v29  ;;  %v3401_v17 = vld [vmem:[%s4647_s1 + $0x524] ss:$8 sps:$4 sm:$0xff]   ;;  %v3399_v19 = vld [vmem:[%s4647_s1 + $0x520] ss:$8 sps:$4 sm:$0xff]   ;;  %v3402_v29 = vld [vmem:[%s4647_s1 + $0x130] ss:$8 sps:$4 sm:$0xff]  }
  0x22   : > { %v195_v20 = vld [vmem:[%s3848_s4 + $0x80] sm:$0xff] }
  0x23   : > { %2126 = vmatpush1.bf16.msra.mxu1 %v3334_v30  ;;  %v203_v21 = vld [vmem:[%s3848_s4 + $0xc0] sm:$0xff]  ;;  %v3405_v30 = vld [vmem:[%s4647_s1 + $0x530] ss:$8 sps:$4 sm:$0xff]  }
  0x24   : > { %2418 = vmatpush1.bf16.msra.mxu0 %v3335_v31  ;;  %2127 = vmatprep.subr.bf16.mxu1 %v3336_v32  ;;  %v2845_v24 = vcombine.high %v195_v20, %v203_v21  ;;  %v199_v25 = vld [vmem:[%s3848_s4 + $0xa0] sm:$0xff]  ;;  %v2844_v26 = vcombine.low %v195_v20, %v203_v21  ;;  %v3450_v20 = vld [vmem:[%s4647_s1 + $0x1b0] ss:$8 sps:$4 sm:$0xff]  }
  0x25   : > { %2419 = vmatprep.subr.bf16.mxu0 %v3338_v33  ;;  %v207_v27 = vld [vmem:[%s3848_s4 + $0xe0] sm:$0xff]  ;;  %v3453_v21 = vld [vmem:[%s4647_s1 + $0x5b0] ss:$8 sps:$4 sm:$0xff]  }
  0x26   : > { %v2853_v28 = vcombine.high %v199_v25, %v207_v27  ;;  %v2852_v31 = vcombine.low %v199_v25, %v207_v27  ;;  %v3410_v32 = vld [vmem:[%s4647_s1 + $0x144] ss:$8 sps:$4 sm:$0xff]   ;;  %v3420_v55 = vld [vmem:[%s4647_s1 + $0x160] ss:$8 sps:$4 sm:$0xff]   ;;  %v3467_v27 = vld [vmem:[%s4647_s1 + $0x5d4] ss:$8 sps:$4 sm:$0xff]  }
  0x27   : > { %2128 = vmatpush1.bf16.msra.mxu1 %v3340_v34  ;;  %v3413_v33 = vld [vmem:[%s4647_s1 + $0x544] ss:$8 sps:$4 sm:$0xff]   ;;  %v3459_v25 = vld [vmem:[%s4647_s1 + $0x5c0] ss:$8 sps:$4 sm:$0xff]  }
  0x28   : > { %2420 = vmatpush1.bf16.msra.mxu0 %v3341_v35  ;;  %2129 = vmatprep.subr.bf16.mxu1 %v3342_v36  ;;  %v211_v34 = vld [vmem:[%s3848_s4 + $0x100] sm:$0xff] }
  0x29   : > { %2421 = vmatprep.subr.bf16.mxu0 %v3344_v37  ;;  %v219_v35 = vld [vmem:[%s3848_s4 + $0x140] sm:$0xff] }
  0x2a   : > { %v3408_v36 = vld [vmem:[%s4647_s1 + $0x140] ss:$8 sps:$4 sm:$0xff]   ;;  %v2861_v37 = vcombine.high %v211_v34, %v219_v35 }
  0x2b   : > { %2130 = vmatpush1.bf16.msra.mxu1 %v3346_v38  ;;  %v3411_v38 = vld [vmem:[%s4647_s1 + $0x540] ss:$8 sps:$4 sm:$0xff]  }
  0x2c   : > { %2422 = vmatpush1.bf16.msra.mxu0 %v3347_v39  ;;  %2131 = vmatprep.subr.bf16.mxu1 %v3348_v40  ;;  %v215_v39 = vld [vmem:[%s3848_s4 + $0x120] sm:$0xff] }
  0x2d   : > { %2423 = vmatprep.subr.bf16.mxu0 %v3350_v41  ;;  %v223_v40 = vld [vmem:[%s3848_s4 + $0x160] sm:$0xff]  ;;  %v2860_v41 = vcombine.low %v211_v34, %v219_v35  ;;  %v3476_v34 = vld [vmem:[%s4647_s1 + $0x1f4] ss:$8 sps:$4 sm:$0xff]  }
  0x2e   : > { %v227_v48 = vld [vmem:[%s3848_s4 + $0x180] sm:$0xff]  ;;  %v3479_v35 = vld [vmem:[%s4647_s1 + $0x5f4] ss:$8 sps:$4 sm:$0xff]  }
  0x2f   : > { %2132 = vmatpush1.bf16.msra.mxu1 %v3352_v42  ;;  %v3416_v42 = vld [vmem:[%s4647_s1 + $0x154] ss:$8 sps:$4 sm:$0xff]   ;;  %v235_v49 = vld [vmem:[%s3848_s4 + $0x1c0] sm:$0xff] }
  0x30   : > { %2424 = vmatpush1.bf16.msra.mxu0 %v3353_v43  ;;  %2133 = vmatprep.subr.bf16.mxu1 %v3354_v44  ;;  %v2869_v43 = vcombine.high %v215_v39, %v223_v40  ;;  %v3419_v44 = vld [vmem:[%s4647_s1 + $0x554] ss:$8 sps:$4 sm:$0xff]   ;;  %v2877_v52 = vcombine.high %v227_v48, %v235_v49  ;;  %v231_v53 = vld [vmem:[%s3848_s4 + $0x1a0] sm:$0xff] }
  0x31   : > { %2425 = vmatprep.subr.bf16.mxu0 %v3356_v45  ;;  %v3414_v45 = vld [vmem:[%s4647_s1 + $0x150] ss:$8 sps:$4 sm:$0xff]   ;;  %v239_v54 = vld [vmem:[%s3848_s4 + $0x1e0] sm:$0xff] }
  0x33   : > { %2134 = vmatpush1.bf16.msra.mxu1 %v3358_v46  ;;  %v3417_v46 = vld [vmem:[%s4647_s1 + $0x550] ss:$8 sps:$4 sm:$0xff]  }
  0x34   : > { %2426 = vmatpush1.bf16.msra.mxu0 %v3359_v47  ;;  %2135 = vmatprep.subr.bf16.mxu1 %v3360_v50  ;;  %v2868_v47 = vcombine.low %v215_v39, %v223_v40  ;;  %v3422_v50 = vld [vmem:[%s4647_s1 + $0x164] ss:$8 sps:$4 sm:$0xff]   ;;  %v3480_v40 = vld [vmem:[%s4647_s1 + $0x200] ss:$8 sps:$4 sm:$0xff]  }
  0x35   : > { %2427 = vmatprep.subr.bf16.mxu0 %v3362_v51  ;;  %v3425_v51 = vld [vmem:[%s4647_s1 + $0x564] ss:$8 sps:$4 sm:$0xff]  }
  0x36   : > { %v3485_v39 = vld [vmem:[%s4647_s1 + $0x604] ss:$8 sps:$4 sm:$0xff]  }
  0x37   : > { %2136 = vmatpush1.bf16.msra.mxu1 %v3364_v56  ;;  %v3423_v56 = vld [vmem:[%s4647_s1 + $0x560] ss:$8 sps:$4 sm:$0xff]  }
  0x38   : > { %2428 = vmatpush1.bf16.msra.mxu0 %v3365_v57  ;;  %2137 = vmatprep.subr.bf16.mxu1 %v3366_v58  ;;  %v2885_v57 = vcombine.high %v231_v53, %v239_v54  ;;  %v2876_v58 = vcombine.low %v227_v48, %v235_v49  ;;  %v3488_v48 = vld [vmem:[%s4647_s1 + $0x214] ss:$8 sps:$4 sm:$0xff]  }
  0x39   : > { %2429 = vmatprep.subr.bf16.mxu0 %v3368_v59  ;;  %v3428_v59 = vld [vmem:[%s4647_s1 + $0x174] ss:$8 sps:$4 sm:$0xff]  }
  0x3a   : > { %v3491_v49 = vld [vmem:[%s4647_s1 + $0x614] ss:$8 sps:$4 sm:$0xff]  }
  0x3b   : > { %2138 = vmatpush1.bf16.msra.mxu1 %v3370_v60  ;;  %v3431_v60 = vld [vmem:[%s4647_s1 + $0x574] ss:$8 sps:$4 sm:$0xff]  }
  0x3c   : > { %2430 = vmatpush1.bf16.msra.mxu0 %v3371_v61  ;;  %2139 = vmatprep.subr.bf16.mxu1 %v3372_v62  ;;  %v3426_v61 = vld [vmem:[%s4647_s1 + $0x170] ss:$8 sps:$4 sm:$0xff]  }
  0x3d   : > { %2431 = vmatprep.subr.bf16.mxu0 %v3374_v63  ;;  %v3429_v62 = vld [vmem:[%s4647_s1 + $0x570] ss:$8 sps:$4 sm:$0xff]   ;;  %v4023_v63 = vld [vmem:[%s3848_s4 + $0x8] sm:$0xff] }
  0x3f   : > { %2140 = vmatpush1.bf16.msra.mxu1 %v3376_v0  ;;  %v2884_v0 = vcombine.low %v231_v53, %v239_v54  ;;  %v3489_v53 = vld [vmem:[%s4647_s1 + $0x610] ss:$8 sps:$4 sm:$0xff]   ;;  %v3494_v54 = vld [vmem:[%s4647_s1 + $0x224] ss:$8 sps:$4 sm:$0xff]  }
  0x40   : > { %2432 = vmatpush1.bf16.msra.mxu0 %v3377_v1  ;;  %2141 = vmatprep.subr.bf16.mxu1 %v3378_v2  ;;  %v4026_v1 = vld [vmem:[%s3848_s4 + $0x48] sm:$0xff] }
  0x41   : > { %2433 = vmatprep.subr.bf16.mxu0 %v3380_v3  ;;  %v3434_v2 = vld [vmem:[%s4647_s1 + $0x184] ss:$8 sps:$4 sm:$0xff]  }
  0x42   : > { %v3437_v3 = vld [vmem:[%s4647_s1 + $0x584] ss:$8 sps:$4 sm:$0xff]  }
  0x43   : > { %2142 = vmatpush1.bf16.msra.mxu1 %v3382_v4  ;;  %v2831_v4 = vcombine.high %v4023_v63, %v4026_v1 }
  0x44   : > { %2434 = vmatpush1.bf16.msra.mxu0 %v3383_v5  ;;  %2184 = vmatprep.subr.bf16.mxu1 %v3386_v6  ;;  %v4037_v5 = vld [vmem:[%s3848_s4 + $0x28] sm:$0xff] }
  0x45   : > { %2476 = vmatprep.subr.bf16.mxu0 %v3389_v7  ;;  %v4040_v6 = vld [vmem:[%s3848_s4 + $0x68] sm:$0xff] }
  0x46   : > { %2144 = vmatmul.mubr.bf16.vlgmr.msra.gmra.mrb[0].mxu1 %v2828_v8  ;;  %v2839_v7 = vcombine.high %v4037_v5, %v4040_v6  ;;  %v3432_v8 = vld [vmem:[%s4647_s1 + $0x180] ss:$8 sps:$4 sm:$0xff]  }
  0x47   : > { %2436 = vmatmul.mubr.bf16.vlgmr.msra.gmra.mrb[0].mxu0 %v2836_v10  ;;  %2185 = vmatpush1.bf16.msra.mxu1 %v3384_v9  ;;  %v3435_v9 = vld [vmem:[%s4647_s1 + $0x580] ss:$8 sps:$4 sm:$0xff]   ;;  %v3440_v10 = vld [vmem:[%s4647_s1 + $0x194] ss:$8 sps:$4 sm:$0xff]  }
  0x48   : > { %2477 = vmatpush1.bf16.msra.mxu0 %v3387_v11  ;;  %2186 = vmatprep.subr.bf16.mxu1 %v3392_v12  ;;  %v3443_v11 = vld [vmem:[%s4647_s1 + $0x594] ss:$8 sps:$4 sm:$0xff]   ;;  %v3438_v12 = vld [vmem:[%s4647_s1 + $0x190] ss:$8 sps:$4 sm:$0xff]  }
  0x49   : > { %2478 = vmatprep.subr.bf16.mxu0 %v3395_v13  ;;  %2153 = vmatprep.mubr.bf16.mxu1 %v2845_v24  ;;  %v3441_v13 = vld [vmem:[%s4647_s1 + $0x590] ss:$8 sps:$4 sm:$0xff]   ;;  %v3456_v24 = vld [vmem:[%s4647_s1 + $0x1c0] ss:$8 sps:$4 sm:$0xff]  }
  0x4a   : > { %2445 = vmatprep.mubr.bf16.mxu0 %v2853_v28  ;;  %v3462_v28 = vld [vmem:[%s4647_s1 + $0x1d0] ss:$8 sps:$4 sm:$0xff]  }
  0x4b   : > { %2187 = vmatpush1.bf16.msra.mxu1 %v3390_v14  ;;  %v3446_v14 = vld [vmem:[%s4647_s1 + $0x1a4] ss:$8 sps:$4 sm:$0xff]  }
  0x4c   : > { %2479 = vmatpush1.bf16.msra.mxu0 %v3393_v15  ;;  %2188 = vmatprep.subr.bf16.mxu1 %v3398_v16  ;;  %v3449_v15 = vld [vmem:[%s4647_s1 + $0x5a4] ss:$8 sps:$4 sm:$0xff]   ;;  %v3444_v16 = vld [vmem:[%s4647_s1 + $0x1a0] ss:$8 sps:$4 sm:$0xff]  }
  0x4d   : > { %2480 = vmatprep.subr.bf16.mxu0 %v3401_v17  ;;  %v3447_v17 = vld [vmem:[%s4647_s1 + $0x5a0] ss:$8 sps:$4 sm:$0xff]  }
  0x4e   : > { %2154 = vmatmul.mubr.bf16.gmra.mrb[4].mxu1 %v2844_v26  ;;  %v3464_v26 = vld [vmem:[%s4647_s1 + $0x1d4] ss:$8 sps:$4 sm:$0xff]  }
  0x4f   : > { %2189 = vmatpush1.bf16.msra.mxu1 %v3396_v18  ;;  %2446 = vmatmul.mubr.bf16.gmra.mrb[4].mxu0 %v2852_v31  ;;  %v3452_v18 = vld [vmem:[%s4647_s1 + $0x1b4] ss:$8 sps:$4 sm:$0xff]   ;;  %v3473_v31 = vld [vmem:[%s4647_s1 + $0x5e4] ss:$8 sps:$4 sm:$0xff]  }
  0x50   : > { %2481 = vmatpush1.bf16.msra.mxu0 %v3399_v19  ;;  %2190 = vmatprep.subr.bf16.mxu1 %v3404_v22  ;;  %v3455_v19 = vld [vmem:[%s4647_s1 + $0x5b4] ss:$8 sps:$4 sm:$0xff]   ;;  %v3458_v22 = vld [vmem:[%s4647_s1 + $0x1c4] ss:$8 sps:$4 sm:$0xff]  }
  0x51   : > { %2482 = vmatprep.subr.bf16.mxu0 %v3407_v23  ;;  %2163 = vmatprep.mubr.bf16.mxu1 %v2861_v37  ;;  %v3461_v23 = vld [vmem:[%s4647_s1 + $0x5c4] ss:$8 sps:$4 sm:$0xff]   ;;  %v3477_v37 = vld [vmem:[%s4647_s1 + $0x5f0] ss:$8 sps:$4 sm:$0xff]  }
  0x52   : > { %2455 = vmatprep.mubr.bf16.mxu0 %v2869_v43  ;;  %v2830_v43 = vcombine.low %v4023_v63, %v4026_v1  ;;  %v224_v63 = vld [vmem:[%s3848_s4 + $0x168] sm:$0xff]  ;;  %v3503_v1 = vld [vmem:[%s4647_s1 + $0x634] ss:$8 sps:$4 sm:$0xff]  }
  0x53   : > { %2191 = vmatpush1.bf16.msra.mxu1 %v3402_v29  ;;  %v3465_v29 = vld [vmem:[%s4647_s1 + $0x5d0] ss:$8 sps:$4 sm:$0xff]  }
  0x54   : > { %2483 = vmatpush1.bf16.msra.mxu0 %v3405_v30  ;;  %2192 = vmatprep.subr.bf16.mxu1 %v3410_v32  ;;  %v3470_v30 = vld [vmem:[%s4647_s1 + $0x1e4] ss:$8 sps:$4 sm:$0xff]   ;;  %v3468_v32 = vld [vmem:[%s4647_s1 + $0x1e0] ss:$8 sps:$4 sm:$0xff]  }
  0x55   : > { %2484 = vmatprep.subr.bf16.mxu0 %v3413_v33  ;;  %v3471_v33 = vld [vmem:[%s4647_s1 + $0x5e0] ss:$8 sps:$4 sm:$0xff]  }
  0x56   : > { %2164 = vmatmul.mubr.bf16.gmra.mrb[8].mxu1 %v2860_v41  ;;  %v3483_v41 = vld [vmem:[%s4647_s1 + $0x600] ss:$8 sps:$4 sm:$0xff]  }
  0x57   : > { %2193 = vmatpush1.bf16.msra.mxu1 %v3408_v36  ;;  %2456 = vmatmul.mubr.bf16.gmra.mrb[8].mxu0 %v2868_v47  ;;  %v3474_v36 = vld [vmem:[%s4647_s1 + $0x1f0] ss:$8 sps:$4 sm:$0xff]   ;;  %v208_v47 = vld [vmem:[%s3848_s4 + $0xe8] sm:$0xff] }
  0x58   : > { %2485 = vmatpush1.bf16.msra.mxu0 %v3411_v38  ;;  %2194 = vmatprep.subr.bf16.mxu1 %v3416_v42  ;;  %v3482_v38 = vld [vmem:[%s4647_s1 + $0x204] ss:$8 sps:$4 sm:$0xff]  }
  0x59   : > { %2486 = vmatprep.subr.bf16.mxu0 %v3419_v44  ;;  %2173 = vmatprep.mubr.bf16.mxu1 %v2877_v52  ;;  %v196_v42 = vld [vmem:[%s3848_s4 + $0x88] sm:$0xff]  ;;  %v2838_v44 = vcombine.low %v4037_v5, %v4040_v6  ;;  %v3486_v52 = vld [vmem:[%s4647_s1 + $0x210] ss:$8 sps:$4 sm:$0xff]  }
  0x5a   : > { %2465 = vmatprep.mubr.bf16.mxu0 %v2885_v57  ;;  %v3495_v57 = vld [vmem:[%s4647_s1 + $0x620] ss:$8 sps:$4 sm:$0xff]   ;;  %v3501_v5 = vld [vmem:[%s4647_s1 + $0x630] ss:$8 sps:$4 sm:$0xff]   ;;  %v3506_v6 = vld [vmem:[%s4647_s1 + $0x244] ss:$8 sps:$4 sm:$0xff]  }
  0x5b   : > { %2195 = vmatpush1.bf16.msra.mxu1 %v3414_v45  ;;  %v204_v45 = vld [vmem:[%s3848_s4 + $0xc8] sm:$0xff] }
  0x5c   : > { %2487 = vmatpush1.bf16.msra.mxu0 %v3417_v46  ;;  %2196 = vmatprep.subr.bf16.mxu1 %v3422_v50  ;;  %v200_v46 = vld [vmem:[%s3848_s4 + $0xa8] sm:$0xff]  ;;  %v2847_v50 = vcombine.high %v196_v42, %v204_v45 }
  0x5d   : > { %2488 = vmatprep.subr.bf16.mxu0 %v3425_v51  ;;  %v2855_v51 = vcombine.high %v200_v46, %v208_v47 }
  0x5e   : > { %2174 = vmatmul.mubr.bf16.gmra.mrb[12].mxu1 %v2876_v58  ;;  %v212_v58 = vld [vmem:[%s3848_s4 + $0x108] sm:$0xff] }
  0x5f   : > { %2197 = vmatpush1.bf16.msra.mxu1 %v3420_v55  ;;  %2216 = vmatprep.mubr.bf16.mxu1 %v2831_v4  ;;  %v3497_v55 = vld [vmem:[%s4647_s1 + $0x624] ss:$8 sps:$4 sm:$0xff]   ;;  %v3498_v4 = vld [vmem:[%s4647_s1 + $0x230] ss:$8 sps:$4 sm:$0xff]  }
  0x60   : > { %2489 = vmatpush1.bf16.msra.mxu0 %v3423_v56  ;;  %2198 = vmatprep.subr.bf16.mxu1 %v3428_v59  ;;  %v3492_v56 = vld [vmem:[%s4647_s1 + $0x220] ss:$8 sps:$4 sm:$0xff]  }
  0x61   : > { %2490 = vmatprep.subr.bf16.mxu0 %v3431_v60  ;;  %2466 = vmatmul.mubr.bf16.gmra.mrb[12].mxu0 %v2884_v0  ;;  %v220_v59 = vld [vmem:[%s3848_s4 + $0x148] sm:$0xff]  ;;  %v2846_v60 = vcombine.low %v196_v42, %v204_v45  ;;  %v3500_v0 = vld [vmem:[%s4647_s1 + $0x234] ss:$8 sps:$4 sm:$0xff]   ;;  %v3537_v45 = vld [vmem:[%s4647_s1 + $0x690] ss:$8 sps:$4 sm:$0xff]  }
  0x62   : > { %2508 = vmatprep.mubr.bf16.mxu0 %v2839_v7  ;;  %v3509_v7 = vld [vmem:[%s4647_s1 + $0x644] ss:$8 sps:$4 sm:$0xff]   ;;  %v3536_v42 = vld [vmem:[%s4647_s1 + $0x294] ss:$8 sps:$4 sm:$0xff]  }
  0x63   : > { %2199 = vmatpush1.bf16.msra.mxu1 %v3426_v61  ;;  %v2854_v61 = vcombine.low %v200_v46, %v208_v47  ;;  %v3542_v46 = vld [vmem:[%s4647_s1 + $0x2a4] ss:$8 sps:$4 sm:$0xff]  }
  0x64   : > { %2491 = vmatpush1.bf16.msra.mxu0 %v3429_v62  ;;  %2200 = vmatprep.subr.bf16.mxu1 %v3434_v2  ;;  %v216_v62 = vld [vmem:[%s3848_s4 + $0x128] sm:$0xff]  ;;  %v2863_v2 = vcombine.high %v212_v58, %v220_v59 }
  0x65   : > { %2492 = vmatprep.subr.bf16.mxu0 %v3437_v3  ;;  %v2871_v3 = vcombine.high %v216_v62, %v224_v63  ;;  %v3545_v47 = vld [vmem:[%s4647_s1 + $0x6a4] ss:$8 sps:$4 sm:$0xff]  }
  0x67   : > { %2201 = vmatpush1.bf16.msra.mxu1 %v3432_v8  ;;  %v3504_v8 = vld [vmem:[%s4647_s1 + $0x240] ss:$8 sps:$4 sm:$0xff]  }
  0x68   : > { %2493 = vmatpush1.bf16.msra.mxu0 %v3435_v9  ;;  %2202 = vmatprep.subr.bf16.mxu1 %v3440_v10  ;;  %v3507_v9 = vld [vmem:[%s4647_s1 + $0x640] ss:$8 sps:$4 sm:$0xff]  }
  0x69   : > { %2494 = vmatprep.subr.bf16.mxu0 %v3443_v11  ;;  %v228_v10 = vld [vmem:[%s3848_s4 + $0x188] sm:$0xff] }
  0x6a   : > { %v236_v11 = vld [vmem:[%s3848_s4 + $0x1c8] sm:$0xff] }
  0x6b   : > { %2203 = vmatpush1.bf16.msra.mxu1 %v3438_v12  ;;  %v2862_v12 = vcombine.low %v212_v58, %v220_v59  ;;  %v3560_v58 = vld [vmem:[%s4647_s1 + $0x2d4] ss:$8 sps:$4 sm:$0xff]  }
  0x6c   : > { %2495 = vmatpush1.bf16.msra.mxu0 %v3441_v13  ;;  %2204 = vmatprep.subr.bf16.mxu1 %v3446_v14  ;;  %v2870_v13 = vcombine.low %v216_v62, %v224_v63  ;;  %v232_v14 = vld [vmem:[%s3848_s4 + $0x1a8] sm:$0xff]  ;;  %v3563_v59 = vld [vmem:[%s4647_s1 + $0x6d4] ss:$8 sps:$4 sm:$0xff]  }
  0x6d   : > { %2496 = vmatprep.subr.bf16.mxu0 %v3449_v15  ;;  %v240_v15 = vld [vmem:[%s3848_s4 + $0x1e8] sm:$0xff] }
  0x6e   : > { %v3566_v62 = vld [vmem:[%s4647_s1 + $0x2e4] ss:$8 sps:$4 sm:$0xff]  }
  0x6f   : > { %2205 = vmatpush1.bf16.msra.mxu1 %v3444_v16  ;;  %v3512_v16 = vld [vmem:[%s4647_s1 + $0x254] ss:$8 sps:$4 sm:$0xff]   ;;  %v3569_v63 = vld [vmem:[%s4647_s1 + $0x6e4] ss:$8 sps:$4 sm:$0xff]  }
  0x70   : > { %2497 = vmatpush1.bf16.msra.mxu0 %v3447_v17  ;;  %2206 = vmatprep.subr.bf16.mxu1 %v3452_v18  ;;  %v3515_v17 = vld [vmem:[%s4647_s1 + $0x654] ss:$8 sps:$4 sm:$0xff]   ;;  %v2879_v18 = vcombine.high %v228_v10, %v236_v11 }
  0x71   : > { %2498 = vmatprep.subr.bf16.mxu0 %v3455_v19  ;;  %v2887_v19 = vcombine.high %v232_v14, %v240_v15 }
  0x73   : > { %2207 = vmatpush1.bf16.msra.mxu1 %v3450_v20  ;;  %v3510_v20 = vld [vmem:[%s4647_s1 + $0x250] ss:$8 sps:$4 sm:$0xff]  }
  0x74   : > { %2499 = vmatpush1.bf16.msra.mxu0 %v3453_v21  ;;  %2208 = vmatprep.subr.bf16.mxu1 %v3458_v22  ;;  %v3513_v21 = vld [vmem:[%s4647_s1 + $0x650] ss:$8 sps:$4 sm:$0xff]   ;;  %v3518_v22 = vld [vmem:[%s4647_s1 + $0x264] ss:$8 sps:$4 sm:$0xff]  }
  0x75   : > { %2500 = vmatprep.subr.bf16.mxu0 %v3461_v23  ;;  %v3521_v23 = vld [vmem:[%s4647_s1 + $0x664] ss:$8 sps:$4 sm:$0xff]  }
  0x77   : > { %2209 = vmatpush1.bf16.msra.mxu1 %v3456_v24  ;;  %v3516_v24 = vld [vmem:[%s4647_s1 + $0x260] ss:$8 sps:$4 sm:$0xff]  }
  0x78   : > { %2501 = vmatpush1.bf16.msra.mxu0 %v3459_v25  ;;  %2210 = vmatprep.subr.bf16.mxu1 %v3464_v26  ;;  %v3519_v25 = vld [vmem:[%s4647_s1 + $0x660] ss:$8 sps:$4 sm:$0xff]   ;;  %v4235_v26 = vld [vmem:[%s3848_s4 + $0x10] sm:$0xff] }
  0x79   : > { %2502 = vmatprep.subr.bf16.mxu0 %v3467_v27  ;;  %v4238_v27 = vld [vmem:[%s3848_s4 + $0x50] sm:$0xff] }
  0x7b   : > { %2211 = vmatpush1.bf16.msra.mxu1 %v3462_v28  ;;  %v2878_v28 = vcombine.low %v228_v10, %v236_v11  ;;  %v205_v11 = vld [vmem:[%s3848_s4 + $0xd0] sm:$0xff] }
  0x7c   : > { %2503 = vmatpush1.bf16.msra.mxu0 %v3465_v29  ;;  %2212 = vmatprep.subr.bf16.mxu1 %v3470_v30  ;;  %v2886_v29 = vcombine.low %v232_v14, %v240_v15  ;;  %v4241_v30 = vld [vmem:[%s3848_s4 + $0x30] sm:$0xff]  ;;  %v3576_v14 = vld [vmem:[%s4647_s1 + $0x300] ss:$8 sps:$4 sm:$0xff]  }
  0x7d   : > { %2504 = vmatprep.subr.bf16.mxu0 %v3473_v31  ;;  %v4244_v31 = vld [vmem:[%s3848_s4 + $0x70] sm:$0xff]  ;;  %v3579_v15 = vld [vmem:[%s4647_s1 + $0x700] ss:$8 sps:$4 sm:$0xff]  }
  0x7e   : > { %v2840_v10 = vcombine.low %v4241_v30, %v4244_v31 }
  0x7f   : > { %2213 = vmatpush1.bf16.msra.mxu1 %v3468_v32  ;;  %v3524_v32 = vld [vmem:[%s4647_s1 + $0x274] ss:$8 sps:$4 sm:$0xff]  }
  0x80   : > { %2505 = vmatpush1.bf16.msra.mxu0 %v3471_v33  ;;  %2214 = vmatprep.subr.bf16.mxu1 %v3476_v34  ;;  %v3527_v33 = vld [vmem:[%s4647_s1 + $0x674] ss:$8 sps:$4 sm:$0xff]   ;;  %v2833_v34 = vcombine.high %v4235_v26, %v4238_v27 }
  0x81   : > { %2506 = vmatprep.subr.bf16.mxu0 %v3479_v35  ;;  %v2841_v35 = vcombine.high %v4241_v30, %v4244_v31  ;;  %v3588_v30 = vld [vmem:[%s4647_s1 + $0x320] ss:$8 sps:$4 sm:$0xff]  }
  0x82   : > { %v3591_v31 = vld [vmem:[%s4647_s1 + $0x720] ss:$8 sps:$4 sm:$0xff]  }
  0x83   : > { %2215 = vmatpush1.bf16.msra.mxu1 %v3474_v36  ;;  %v3522_v36 = vld [vmem:[%s4647_s1 + $0x270] ss:$8 sps:$4 sm:$0xff]  }
  0x84   : > { %2507 = vmatpush1.bf16.msra.mxu0 %v3477_v37  ;;  %2257 = vmatprep.subr.bf16.mxu1 %v3482_v38  ;;  %v3525_v37 = vld [vmem:[%s4647_s1 + $0x670] ss:$8 sps:$4 sm:$0xff]   ;;  %v3530_v38 = vld [vmem:[%s4647_s1 + $0x284] ss:$8 sps:$4 sm:$0xff]  }
  0x85   : > { %2549 = vmatprep.subr.bf16.mxu0 %v3485_v39  ;;  %v3533_v39 = vld [vmem:[%s4647_s1 + $0x684] ss:$8 sps:$4 sm:$0xff]  }
  0x86   : > { %2217 = vmatmul.mubr.bf16.vlgmr.msra.gmra.mrb[0].mxu1 %v2830_v43  ;;  %v3539_v43 = vld [vmem:[%s4647_s1 + $0x694] ss:$8 sps:$4 sm:$0xff]  }
  0x87   : > { %2509 = vmatmul.mubr.bf16.vlgmr.msra.gmra.mrb[0].mxu0 %v2838_v44  ;;  %2258 = vmatpush1.bf16.msra.mxu1 %v3480_v40  ;;  %v3528_v40 = vld [vmem:[%s4647_s1 + $0x280] ss:$8 sps:$4 sm:$0xff]   ;;  %v3534_v44 = vld [vmem:[%s4647_s1 + $0x290] ss:$8 sps:$4 sm:$0xff]  }
  0x88   : > { %2550 = vmatpush1.bf16.msra.mxu0 %v3483_v41  ;;  %2259 = vmatprep.subr.bf16.mxu1 %v3488_v48  ;;  %v3531_v41 = vld [vmem:[%s4647_s1 + $0x680] ss:$8 sps:$4 sm:$0xff]  }
  0x89   : > { %2551 = vmatprep.subr.bf16.mxu0 %v3491_v49  ;;  %2226 = vmatprep.mubr.bf16.mxu1 %v2847_v50  ;;  %v3540_v48 = vld [vmem:[%s4647_s1 + $0x2a0] ss:$8 sps:$4 sm:$0xff]   ;;  %v3548_v50 = vld [vmem:[%s4647_s1 + $0x2b4] ss:$8 sps:$4 sm:$0xff]  }
  0x8a   : > { %2518 = vmatprep.mubr.bf16.mxu0 %v2855_v51  ;;  %v3543_v49 = vld [vmem:[%s4647_s1 + $0x6a0] ss:$8 sps:$4 sm:$0xff]   ;;  %v3551_v51 = vld [vmem:[%s4647_s1 + $0x6b4] ss:$8 sps:$4 sm:$0xff]  }
  0x8b   : > { %2260 = vmatpush1.bf16.msra.mxu1 %v3486_v52  ;;  %v3546_v52 = vld [vmem:[%s4647_s1 + $0x2b0] ss:$8 sps:$4 sm:$0xff]  }
  0x8c   : > { %2552 = vmatpush1.bf16.msra.mxu0 %v3489_v53  ;;  %2261 = vmatprep.subr.bf16.mxu1 %v3494_v54  ;;  %v3549_v53 = vld [vmem:[%s4647_s1 + $0x6b0] ss:$8 sps:$4 sm:$0xff]   ;;  %v3554_v54 = vld [vmem:[%s4647_s1 + $0x2c4] ss:$8 sps:$4 sm:$0xff]  }
  0x8d   : > { %2553 = vmatprep.subr.bf16.mxu0 %v3497_v55  ;;  %v3557_v55 = vld [vmem:[%s4647_s1 + $0x6c4] ss:$8 sps:$4 sm:$0xff]  }
  0x8e   : > { %2227 = vmatmul.mubr.bf16.gmra.mrb[4].mxu1 %v2846_v60  ;;  %v3558_v60 = vld [vmem:[%s4647_s1 + $0x2d0] ss:$8 sps:$4 sm:$0xff]  }
  0x8f   : > { %2519 = vmatmul.mubr.bf16.gmra.mrb[4].mxu0 %v2854_v61  ;;  %2262 = vmatpush1.bf16.msra.mxu1 %v3492_v56  ;;  %v3552_v56 = vld [vmem:[%s4647_s1 + $0x2c0] ss:$8 sps:$4 sm:$0xff]   ;;  %v3561_v61 = vld [vmem:[%s4647_s1 + $0x6d0] ss:$8 sps:$4 sm:$0xff]  }
  0x90   : > { %2554 = vmatpush1.bf16.msra.mxu0 %v3495_v57  ;;  %2263 = vmatprep.subr.bf16.mxu1 %v3500_v0  ;;  %v3555_v57 = vld [vmem:[%s4647_s1 + $0x6c0] ss:$8 sps:$4 sm:$0xff]  }
  0x91   : > { %2555 = vmatprep.subr.bf16.mxu0 %v3503_v1  ;;  %2236 = vmatprep.mubr.bf16.mxu1 %v2863_v2  ;;  %v3564_v0 = vld [vmem:[%s4647_s1 + $0x2e0] ss:$8 sps:$4 sm:$0xff]   ;;  %v3572_v2 = vld [vmem:[%s4647_s1 + $0x2f4] ss:$8 sps:$4 sm:$0xff]  }
  0x92   : > { %2528 = vmatprep.mubr.bf16.mxu0 %v2871_v3  ;;  %v3567_v1 = vld [vmem:[%s4647_s1 + $0x6e0] ss:$8 sps:$4 sm:$0xff]   ;;  %v3575_v3 = vld [vmem:[%s4647_s1 + $0x6f4] ss:$8 sps:$4 sm:$0xff]  }
  0x93   : > { %2264 = vmatpush1.bf16.msra.mxu1 %v3498_v4  ;;  %v3570_v4 = vld [vmem:[%s4647_s1 + $0x2f0] ss:$8 sps:$4 sm:$0xff]  }
  0x94   : > { %2556 = vmatpush1.bf16.msra.mxu0 %v3501_v5  ;;  %2265 = vmatprep.subr.bf16.mxu1 %v3506_v6  ;;  %v3573_v5 = vld [vmem:[%s4647_s1 + $0x6f0] ss:$8 sps:$4 sm:$0xff]   ;;  %v3578_v6 = vld [vmem:[%s4647_s1 + $0x304] ss:$8 sps:$4 sm:$0xff]  }
  0x95   : > { %2557 = vmatprep.subr.bf16.mxu0 %v3509_v7  ;;  %v3581_v7 = vld [vmem:[%s4647_s1 + $0x704] ss:$8 sps:$4 sm:$0xff]  }
  0x96   : > { %2237 = vmatmul.mubr.bf16.gmra.mrb[8].mxu1 %v2862_v12  ;;  %v201_v12 = vld [vmem:[%s3848_s4 + $0xb0] sm:$0xff] }
  0x97   : > { %2529 = vmatmul.mubr.bf16.gmra.mrb[8].mxu0 %v2870_v13  ;;  %2266 = vmatpush1.bf16.msra.mxu1 %v3504_v8  ;;  %v197_v8 = vld [vmem:[%s3848_s4 + $0x90] sm:$0xff] }
  0x98   : > { %2558 = vmatpush1.bf16.msra.mxu0 %v3507_v9  ;;  %2267 = vmatprep.subr.bf16.mxu1 %v3512_v16  ;;  %v2832_v9 = vcombine.low %v4235_v26, %v4238_v27  ;;  %v209_v13 = vld [vmem:[%s3848_s4 + $0xf0] sm:$0xff] }
  0x99   : > { %2559 = vmatprep.subr.bf16.mxu0 %v3515_v17  ;;  %2246 = vmatprep.mubr.bf16.mxu1 %v2879_v18  ;;  %v3584_v16 = vld [vmem:[%s4647_s1 + $0x314] ss:$8 sps:$4 sm:$0xff]   ;;  %v2849_v18 = vcombine.high %v197_v8, %v205_v11  ;;  %v2856_v26 = vcombine.low %v201_v12, %v209_v13 }
  0x9a   : > { %2538 = vmatprep.mubr.bf16.mxu0 %v2887_v19  ;;  %v3587_v17 = vld [vmem:[%s4647_s1 + $0x714] ss:$8 sps:$4 sm:$0xff]   ;;  %v2857_v19 = vcombine.high %v201_v12, %v209_v13  ;;  %v3630_v12 = vld [vmem:[%s4647_s1 + $0x390] ss:$8 sps:$4 sm:$0xff]  }
  0x9b   : > { %2268 = vmatpush1.bf16.msra.mxu1 %v3510_v20  ;;  %v3582_v20 = vld [vmem:[%s4647_s1 + $0x310] ss:$8 sps:$4 sm:$0xff]  }
  0x9c   : > { %2560 = vmatpush1.bf16.msra.mxu0 %v3513_v21  ;;  %2269 = vmatprep.subr.bf16.mxu1 %v3518_v22  ;;  %v3585_v21 = vld [vmem:[%s4647_s1 + $0x710] ss:$8 sps:$4 sm:$0xff]   ;;  %v3590_v22 = vld [vmem:[%s4647_s1 + $0x324] ss:$8 sps:$4 sm:$0xff]  }
  0x9d   : > { %2561 = vmatprep.subr.bf16.mxu0 %v3521_v23  ;;  %v3593_v23 = vld [vmem:[%s4647_s1 + $0x724] ss:$8 sps:$4 sm:$0xff]   ;;  %v221_v27 = vld [vmem:[%s3848_s4 + $0x150] sm:$0xff] }
  0x9e   : > { %2247 = vmatmul.mubr.bf16.gmra.mrb[12].mxu1 %v2878_v28  ;;  %v217_v28 = vld [vmem:[%s3848_s4 + $0x130] sm:$0xff] }
  0x9f   : > { %2539 = vmatmul.mubr.bf16.gmra.mrb[12].mxu0 %v2886_v29  ;;  %2270 = vmatpush1.bf16.msra.mxu1 %v3516_v24  ;;  %v213_v24 = vld [vmem:[%s3848_s4 + $0x110] sm:$0xff] }
  0xa0   : > { %2562 = vmatpush1.bf16.msra.mxu0 %v3519_v25  ;;  %2271 = vmatprep.subr.bf16.mxu1 %v3524_v32  ;;  %v2848_v25 = vcombine.low %v197_v8, %v205_v11  ;;  %v225_v29 = vld [vmem:[%s3848_s4 + $0x170] sm:$0xff]  ;;  %v3624_v8 = vld [vmem:[%s4647_s1 + $0x380] ss:$8 sps:$4 sm:$0xff]  }
  0xa1   : > { %2563 = vmatprep.subr.bf16.mxu0 %v3527_v33  ;;  %2289 = vmatprep.mubr.bf16.mxu1 %v2833_v34  ;;  %v3596_v32 = vld [vmem:[%s4647_s1 + $0x334] ss:$8 sps:$4 sm:$0xff]   ;;  %v2865_v34 = vcombine.high %v213_v24, %v221_v27  ;;  %v3633_v13 = vld [vmem:[%s4647_s1 + $0x790] ss:$8 sps:$4 sm:$0xff]  }
  0xa2   : > { %2581 = vmatprep.mubr.bf16.mxu0 %v2841_v35  ;;  %v3599_v33 = vld [vmem:[%s4647_s1 + $0x734] ss:$8 sps:$4 sm:$0xff]   ;;  %v2873_v35 = vcombine.high %v217_v28, %v225_v29 }
  0xa3   : > { %2272 = vmatpush1.bf16.msra.mxu1 %v3522_v36  ;;  %v3594_v36 = vld [vmem:[%s4647_s1 + $0x330] ss:$8 sps:$4 sm:$0xff]   ;;  %v3635_v11 = vld [vmem:[%s4647_s1 + $0x794] ss:$8 sps:$4 sm:$0xff]  }
  0xa4   : > { %2564 = vmatpush1.bf16.msra.mxu0 %v3525_v37  ;;  %2273 = vmatprep.subr.bf16.mxu1 %v3530_v38  ;;  %v3597_v37 = vld [vmem:[%s4647_s1 + $0x730] ss:$8 sps:$4 sm:$0xff]   ;;  %v3602_v38 = vld [vmem:[%s4647_s1 + $0x344] ss:$8 sps:$4 sm:$0xff]  }
  0xa5   : > { %2565 = vmatprep.subr.bf16.mxu0 %v3533_v39  ;;  %v3605_v39 = vld [vmem:[%s4647_s1 + $0x744] ss:$8 sps:$4 sm:$0xff]  }
  0xa7   : > { %2274 = vmatpush1.bf16.msra.mxu1 %v3528_v40  ;;  %v229_v40 = vld [vmem:[%s3848_s4 + $0x190] sm:$0xff] }
  0xa8   : > { %2566 = vmatpush1.bf16.msra.mxu0 %v3531_v41  ;;  %2275 = vmatprep.subr.bf16.mxu1 %v3536_v42  ;;  %v2864_v41 = vcombine.low %v213_v24, %v221_v27  ;;  %v2872_v42 = vcombine.low %v217_v28, %v225_v29  ;;  %v3648_v24 = vld [vmem:[%s4647_s1 + $0x3c0] ss:$8 sps:$4 sm:$0xff]   ;;  %v3659_v27 = vld [vmem:[%s4647_s1 + $0x7d4] ss:$8 sps:$4 sm:$0xff]   ;;  %v3654_v28 = vld [vmem:[%s4647_s1 + $0x3d0] ss:$8 sps:$4 sm:$0xff]  }
  0xa9   : > { %2567 = vmatprep.subr.bf16.mxu0 %v3539_v43  ;;  %v237_v43 = vld [vmem:[%s3848_s4 + $0x1d0] sm:$0xff] }
  0xaa   : > { %v3657_v29 = vld [vmem:[%s4647_s1 + $0x7d0] ss:$8 sps:$4 sm:$0xff]  }
  0xab   : > { %2276 = vmatpush1.bf16.msra.mxu1 %v3534_v44  ;;  %v233_v44 = vld [vmem:[%s3848_s4 + $0x1b0] sm:$0xff] }
  0xac   : > { %2568 = vmatpush1.bf16.msra.mxu0 %v3537_v45  ;;  %2277 = vmatprep.subr.bf16.mxu1 %v3542_v46  ;;  %v241_v45 = vld [vmem:[%s3848_s4 + $0x1f0] sm:$0xff]  ;;  %v3600_v46 = vld [vmem:[%s4647_s1 + $0x340] ss:$8 sps:$4 sm:$0xff]  }
  0xad   : > { %2569 = vmatprep.subr.bf16.mxu0 %v3545_v47  ;;  %v3603_v47 = vld [vmem:[%s4647_s1 + $0x740] ss:$8 sps:$4 sm:$0xff]  }
  0xaf   : > { %2278 = vmatpush1.bf16.msra.mxu1 %v3540_v48  ;;  %v3608_v48 = vld [vmem:[%s4647_s1 + $0x354] ss:$8 sps:$4 sm:$0xff]  }
  0xb0   : > { %2570 = vmatpush1.bf16.msra.mxu0 %v3543_v49  ;;  %2279 = vmatprep.subr.bf16.mxu1 %v3548_v50  ;;  %v3611_v49 = vld [vmem:[%s4647_s1 + $0x754] ss:$8 sps:$4 sm:$0xff]   ;;  %v2881_v50 = vcombine.high %v229_v40, %v237_v43 }
  0xb1   : > { %2571 = vmatprep.subr.bf16.mxu0 %v3551_v51  ;;  %v2889_v51 = vcombine.high %v233_v44, %v241_v45 }
  0xb3   : > { %2280 = vmatpush1.bf16.msra.mxu1 %v3546_v52  ;;  %v3606_v52 = vld [vmem:[%s4647_s1 + $0x350] ss:$8 sps:$4 sm:$0xff]  }
  0xb4   : > { %2572 = vmatpush1.bf16.msra.mxu0 %v3549_v53  ;;  %2281 = vmatprep.subr.bf16.mxu1 %v3554_v54  ;;  %v3609_v53 = vld [vmem:[%s4647_s1 + $0x750] ss:$8 sps:$4 sm:$0xff]   ;;  %v3614_v54 = vld [vmem:[%s4647_s1 + $0x364] ss:$8 sps:$4 sm:$0xff]  }
  0xb5   : > { %2573 = vmatprep.subr.bf16.mxu0 %v3557_v55  ;;  %v3617_v55 = vld [vmem:[%s4647_s1 + $0x764] ss:$8 sps:$4 sm:$0xff]  }
  0xb7   : > { %2282 = vmatpush1.bf16.msra.mxu1 %v3552_v56  ;;  %v4453_v56 = vld [vmem:[%s3848_s4 + $0x18] sm:$0xff] }
  0xb8   : > { %2574 = vmatpush1.bf16.msra.mxu0 %v3555_v57  ;;  %2283 = vmatprep.subr.bf16.mxu1 %v3560_v58  ;;  %v2880_v57 = vcombine.low %v229_v40, %v237_v43  ;;  %v2888_v58 = vcombine.low %v233_v44, %v241_v45  ;;  %v202_v40 = vld [vmem:[%s3848_s4 + $0xb8] sm:$0xff] }
  0xb9   : > { %2575 = vmatprep.subr.bf16.mxu0 %v3563_v59  ;;  %v4456_v59 = vld [vmem:[%s3848_s4 + $0x58] sm:$0xff] }
  0xbb   : > { %2284 = vmatpush1.bf16.msra.mxu1 %v3558_v60  ;;  %v4459_v60 = vld [vmem:[%s3848_s4 + $0x38] sm:$0xff] }
  0xbc   : > { %2576 = vmatpush1.bf16.msra.mxu0 %v3561_v61  ;;  %2285 = vmatprep.subr.bf16.mxu1 %v3566_v62  ;;  %v4462_v61 = vld [vmem:[%s3848_s4 + $0x78] sm:$0xff]  ;;  %v3612_v62 = vld [vmem:[%s4647_s1 + $0x360] ss:$8 sps:$4 sm:$0xff]  }
  0xbd   : > { %2577 = vmatprep.subr.bf16.mxu0 %v3569_v63  ;;  %v3615_v63 = vld [vmem:[%s4647_s1 + $0x760] ss:$8 sps:$4 sm:$0xff]   ;;  %v2842_v43 = vcombine.low %v4459_v60, %v4462_v61 }
  0xbf   : > { %2286 = vmatpush1.bf16.msra.mxu1 %v3564_v0  ;;  %v3620_v0 = vld [vmem:[%s4647_s1 + $0x374] ss:$8 sps:$4 sm:$0xff]  }
  0xc0   : > { %2578 = vmatpush1.bf16.msra.mxu0 %v3567_v1  ;;  %2287 = vmatprep.subr.bf16.mxu1 %v3572_v2  ;;  %v3623_v1 = vld [vmem:[%s4647_s1 + $0x774] ss:$8 sps:$4 sm:$0xff]   ;;  %v2835_v2 = vcombine.high %v4453_v56, %v4456_v59 }
  0xc1   : > { %2579 = vmatprep.subr.bf16.mxu0 %v3575_v3  ;;  %v2843_v3 = vcombine.high %v4459_v60, %v4462_v61 }
  0xc3   : > { %2288 = vmatpush1.bf16.msra.mxu1 %v3570_v4  ;;  %v3618_v4 = vld [vmem:[%s4647_s1 + $0x370] ss:$8 sps:$4 sm:$0xff]  }
  0xc4   : > { %2580 = vmatpush1.bf16.msra.mxu0 %v3573_v5  ;;  %2330 = vmatprep.subr.bf16.mxu1 %v3578_v6  ;;  %v3621_v5 = vld [vmem:[%s4647_s1 + $0x770] ss:$8 sps:$4 sm:$0xff]   ;;  %v3626_v6 = vld [vmem:[%s4647_s1 + $0x384] ss:$8 sps:$4 sm:$0xff]  }
  0xc5   : > { %2622 = vmatprep.subr.bf16.mxu0 %v3581_v7  ;;  %v3629_v7 = vld [vmem:[%s4647_s1 + $0x784] ss:$8 sps:$4 sm:$0xff]  }
  0xc6   : > { %2290 = vmatmul.mubr.bf16.vlgmr.msra.gmra.mrb[0].mxu1 %v2832_v9  ;;  %v3627_v9 = vld [vmem:[%s4647_s1 + $0x780] ss:$8 sps:$4 sm:$0xff]  }
  0xc7   : > { %2582 = vmatmul.mubr.bf16.vlgmr.msra.gmra.mrb[0].mxu0 %v2840_v10  ;;  %2331 = vmatpush1.bf16.msra.mxu1 %v3576_v14  ;;  %v3632_v10 = vld [vmem:[%s4647_s1 + $0x394] ss:$8 sps:$4 sm:$0xff]   ;;  %v3638_v14 = vld [vmem:[%s4647_s1 + $0x3a4] ss:$8 sps:$4 sm:$0xff]  }
  0xc8   : > { %2623 = vmatpush1.bf16.msra.mxu0 %v3579_v15  ;;  %2332 = vmatprep.subr.bf16.mxu1 %v3584_v16  ;;  %v3641_v15 = vld [vmem:[%s4647_s1 + $0x7a4] ss:$8 sps:$4 sm:$0xff]   ;;  %v3636_v16 = vld [vmem:[%s4647_s1 + $0x3a0] ss:$8 sps:$4 sm:$0xff]  }
  0xc9   : > { %2624 = vmatprep.subr.bf16.mxu0 %v3587_v17  ;;  %2299 = vmatprep.mubr.bf16.mxu1 %v2849_v18  ;;  %v3639_v17 = vld [vmem:[%s4647_s1 + $0x7a0] ss:$8 sps:$4 sm:$0xff]   ;;  %v3644_v18 = vld [vmem:[%s4647_s1 + $0x3b4] ss:$8 sps:$4 sm:$0xff]  }
  0xca   : > { %2591 = vmatprep.mubr.bf16.mxu0 %v2857_v19  ;;  %v3647_v19 = vld [vmem:[%s4647_s1 + $0x7b4] ss:$8 sps:$4 sm:$0xff]  }
  0xcb   : > { %2333 = vmatpush1.bf16.msra.mxu1 %v3582_v20  ;;  %v3642_v20 = vld [vmem:[%s4647_s1 + $0x3b0] ss:$8 sps:$4 sm:$0xff]  }
  0xcc   : > { %2625 = vmatpush1.bf16.msra.mxu0 %v3585_v21  ;;  %2334 = vmatprep.subr.bf16.mxu1 %v3590_v22  ;;  %v3645_v21 = vld [vmem:[%s4647_s1 + $0x7b0] ss:$8 sps:$4 sm:$0xff]   ;;  %v3650_v22 = vld [vmem:[%s4647_s1 + $0x3c4] ss:$8 sps:$4 sm:$0xff]  }
  0xcd   : > { %2626 = vmatprep.subr.bf16.mxu0 %v3593_v23  ;;  %v3653_v23 = vld [vmem:[%s4647_s1 + $0x7c4] ss:$8 sps:$4 sm:$0xff]  }
  0xce   : > { %2300 = vmatmul.mubr.bf16.gmra.mrb[4].mxu1 %v2848_v25  ;;  %v3651_v25 = vld [vmem:[%s4647_s1 + $0x7c0] ss:$8 sps:$4 sm:$0xff]  }
  0xcf   : > { %2592 = vmatmul.mubr.bf16.gmra.mrb[4].mxu0 %v2856_v26  ;;  %2335 = vmatpush1.bf16.msra.mxu1 %v3588_v30  ;;  %v3656_v26 = vld [vmem:[%s4647_s1 + $0x3d4] ss:$8 sps:$4 sm:$0xff]   ;;  %v3662_v30 = vld [vmem:[%s4647_s1 + $0x3e4] ss:$8 sps:$4 sm:$0xff]  }
  0xd0   : > { %2627 = vmatpush1.bf16.msra.mxu0 %v3591_v31  ;;  %2336 = vmatprep.subr.bf16.mxu1 %v3596_v32  ;;  %v3665_v31 = vld [vmem:[%s4647_s1 + $0x7e4] ss:$8 sps:$4 sm:$0xff]   ;;  %v3660_v32 = vld [vmem:[%s4647_s1 + $0x3e0] ss:$8 sps:$4 sm:$0xff]  }
  0xd1   : > { %2628 = vmatprep.subr.bf16.mxu0 %v3599_v33  ;;  %2309 = vmatprep.mubr.bf16.mxu1 %v2865_v34  ;;  %v3663_v33 = vld [vmem:[%s4647_s1 + $0x7e0] ss:$8 sps:$4 sm:$0xff]   ;;  %v3668_v34 = vld [vmem:[%s4647_s1 + $0x3f4] ss:$8 sps:$4 sm:$0xff]  }
  0xd2   : > { %2601 = vmatprep.mubr.bf16.mxu0 %v2873_v35  ;;  %v3671_v35 = vld [vmem:[%s4647_s1 + $0x7f4] ss:$8 sps:$4 sm:$0xff]  }
  0xd3   : > { %2337 = vmatpush1.bf16.msra.mxu1 %v3594_v36  ;;  %v3666_v36 = vld [vmem:[%s4647_s1 + $0x3f0] ss:$8 sps:$4 sm:$0xff]  }
  0xd4   : > { %2629 = vmatpush1.bf16.msra.mxu0 %v3597_v37  ;;  %2338 = vmatprep.subr.bf16.mxu1 %v3602_v38  ;;  %v3669_v37 = vld [vmem:[%s4647_s1 + $0x7f0] ss:$8 sps:$4 sm:$0xff]  }
  0xd5   : > { %2630 = vmatprep.subr.bf16.mxu0 %v3605_v39  ;;  %v198_v38 = vld [vmem:[%s3848_s4 + $0x98] sm:$0xff] }
  0xd6   : > { %2310 = vmatmul.mubr.bf16.gmra.mrb[8].mxu1 %v2864_v41  ;;  %v206_v39 = vld [vmem:[%s3848_s4 + $0xd8] sm:$0xff] }
  0xd7   : > { %2602 = vmatmul.mubr.bf16.gmra.mrb[8].mxu0 %v2872_v42  ;;  %2339 = vmatpush1.bf16.msra.mxu1 %v3600_v46  ;;  %v210_v41 = vld [vmem:[%s3848_s4 + $0xf8] sm:$0xff]  ;;  %v2834_v42 = vcombine.low %v4453_v56, %v4456_v59  ;;  %v2851_v44 = vcombine.high %v198_v38, %v206_v39 }
  0xd8   : > { %2631 = vmatpush1.bf16.msra.mxu0 %v3603_v47  ;;  %2340 = vmatprep.subr.bf16.mxu1 %v3608_v48  ;;  %v2859_v45 = vcombine.high %v202_v40, %v210_v41  ;;  %v214_v46 = vld [vmem:[%s3848_s4 + $0x118] sm:$0xff] }
  0xd9   : > { %2632 = vmatprep.subr.bf16.mxu0 %v3611_v49  ;;  %2319 = vmatprep.mubr.bf16.mxu1 %v2881_v50  ;;  %v222_v47 = vld [vmem:[%s3848_s4 + $0x158] sm:$0xff]  ;;  %v2850_v50 = vcombine.low %v198_v38, %v206_v39 }
  0xda   : > { %2611 = vmatprep.mubr.bf16.mxu0 %v2889_v51  ;;  %v218_v48 = vld [vmem:[%s3848_s4 + $0x138] sm:$0xff]  ;;  %v2858_v51 = vcombine.low %v202_v40, %v210_v41 }
  0xdb   : > { %2341 = vmatpush1.bf16.msra.mxu1 %v3606_v52  ;;  %v226_v49 = vld [vmem:[%s3848_s4 + $0x178] sm:$0xff]  ;;  %v2867_v52 = vcombine.high %v214_v46, %v222_v47 }
  0xdc   : > { %2633 = vmatpush1.bf16.msra.mxu0 %v3609_v53  ;;  %2342 = vmatprep.subr.bf16.mxu1 %v3614_v54  ;;  %v2875_v53 = vcombine.high %v218_v48, %v226_v49  ;;  %v230_v54 = vld [vmem:[%s3848_s4 + $0x198] sm:$0xff]  ;;  %v2874_v59 = vcombine.low %v218_v48, %v226_v49 }
  0xdd   : > { %2634 = vmatprep.subr.bf16.mxu0 %v3617_v55  ;;  %v238_v55 = vld [vmem:[%s3848_s4 + $0x1d8] sm:$0xff] }
  0xde   : > { %2320 = vmatmul.mubr.bf16.gmra.mrb[12].mxu1 %v2880_v57  ;;  %v234_v56 = vld [vmem:[%s3848_s4 + $0x1b8] sm:$0xff]  ;;  %v2883_v60 = vcombine.high %v230_v54, %v238_v55 }
  0xdf   : > { %2612 = vmatmul.mubr.bf16.gmra.mrb[12].mxu0 %v2888_v58  ;;  %2343 = vmatpush1.bf16.msra.mxu1 %v3612_v62  ;;  %v242_v57 = vld [vmem:[%s3848_s4 + $0x1f8] sm:$0xff]  ;;  %v2866_v58 = vcombine.low %v214_v46, %v222_v47  ;;  %v2882_v62 = vcombine.low %v230_v54, %v238_v55  ;;  %s3151_s4 = sshll.u32 %s4651_s24, 4 }
  0xe0   : > { %2635 = vmatpush1.bf16.msra.mxu0 %v3615_v63  ;;  %2344 = vmatprep.subr.bf16.mxu1 %v3620_v0  ;;  %v2891_v61 = vcombine.high %v234_v56, %v242_v57  ;;  %v2890_v63 = vcombine.low %v234_v56, %v242_v57  ;;  %v501_v0 = vlaneseq  ;;  %s4613_s27 = scalar_lea.vmem %s4649_s3, %s3151_s4 }
  0xe1   : > { %2636 = vmatprep.subr.bf16.mxu0 %v3623_v1  ;;  %2362 = vmatprep.mubr.bf16.mxu1 %v2835_v2 }
  0xe2   : > { %2654 = vmatprep.mubr.bf16.mxu0 %v2843_v3  ;;  %v502_v1 = vshrl.u32 %v501_v0, 7  ;;  %v499_v3 = vld [vmem:[%s4648_s2] sm:$0x3] }
  0xe3   : > { %2345 = vmatpush1.bf16.msra.mxu1 %v3618_v4 }
  0xe4   : > { %2637 = vmatpush1.bf16.msra.mxu0 %v3621_v5  ;;  %2346 = vmatprep.subr.bf16.mxu1 %v3626_v6  ;;  %v503_v2 = vsub.s32 0, %v502_v1  ;;  %v507_v4 = vsub.s32 1, %v502_v1 }
  0xe5   : > { %2638 = vmatprep.subr.bf16.mxu0 %v3629_v7 }
  0xe6   : > { %v4601_v5 = vrot.slane %v499_v3, %v503_v2  ;;  %v4603_v6 = vrot.slane %v499_v3, %v507_v4 }
  0xe7   : > { %2347 = vmatpush1.bf16.msra.mxu1 %v3624_v8 }
  0xe8   : > { %2639 = vmatpush1.bf16.msra.mxu0 %v3627_v9  ;;  %2348 = vmatprep.subr.bf16.mxu1 %v3632_v10 }
  0xe9   : > { %2640 = vmatprep.subr.bf16.mxu0 %v3635_v11 }
  0xeb   : > { %2349 = vmatpush1.bf16.msra.mxu1 %v3630_v12 }
  0xec   : > { %2641 = vmatpush1.bf16.msra.mxu0 %v3633_v13  ;;  %2350 = vmatprep.subr.bf16.mxu1 %v3638_v14 }
  0xed   : > { %2642 = vmatprep.subr.bf16.mxu0 %v3641_v15 }
  0xef   : > { %2351 = vmatpush1.bf16.msra.mxu1 %v3636_v16 }
  0xf0   : > { %2643 = vmatpush1.bf16.msra.mxu0 %v3639_v17  ;;  %2352 = vmatprep.subr.bf16.mxu1 %v3644_v18 }
  0xf1   : > { %2644 = vmatprep.subr.bf16.mxu0 %v3647_v19 }
  0xf3   : > { %2353 = vmatpush1.bf16.msra.mxu1 %v3642_v20 }
  0xf4   : > { %2645 = vmatpush1.bf16.msra.mxu0 %v3645_v21  ;;  %2354 = vmatprep.subr.bf16.mxu1 %v3650_v22 }
  0xf5   : > { %2646 = vmatprep.subr.bf16.mxu0 %v3653_v23 }
  0xf7   : > { %2355 = vmatpush1.bf16.msra.mxu1 %v3648_v24 }
  0xf8   : > { %2647 = vmatpush1.bf16.msra.mxu0 %v3651_v25  ;;  %2356 = vmatprep.subr.bf16.mxu1 %v3656_v26 }
  0xf9   : > { %2648 = vmatprep.subr.bf16.mxu0 %v3659_v27 }
  0xfb   : > { %2357 = vmatpush1.bf16.msra.mxu1 %v3654_v28 }
  0xfc   : > { %2649 = vmatpush1.bf16.msra.mxu0 %v3657_v29  ;;  %2358 = vmatprep.subr.bf16.mxu1 %v3662_v30 }
  0xfd   : > { %2650 = vmatprep.subr.bf16.mxu0 %v3665_v31 }
  0xff   : > { %2359 = vmatpush1.bf16.msra.mxu1 %v3660_v32 }
 0x100   : > { %2651 = vmatpush1.bf16.msra.mxu0 %v3663_v33  ;;  %2360 = vmatprep.subr.bf16.mxu1 %v3668_v34 }
 0x101   : > { %2652 = vmatprep.subr.bf16.mxu0 %v3671_v35 }
 0x103   : > { %2361 = vmatpush1.bf16.msra.mxu1 %v3666_v36 }
 0x104   : > { %2653 = vmatpush1.bf16.msra.mxu0 %v3669_v37 }
 0x106   : > { %2363 = vmatmul.mubr.bf16.vlgmr.msra.gmra.mrb[0].mxu1 %v2834_v42 }
 0x107   : > { %2655 = vmatmul.mubr.bf16.vlgmr.msra.gmra.mrb[0].mxu0 %v2842_v43  ;;  %2372 = vmatprep.mubr.bf16.mxu1 %v2851_v44 }
 0x108   : > { %2664 = vmatprep.mubr.bf16.mxu0 %v2859_v45 }
 0x10e   : > { %2373 = vmatmul.mubr.bf16.gmra.mrb[4].mxu1 %v2850_v50 }
 0x10f   : > { %2665 = vmatmul.mubr.bf16.gmra.mrb[4].mxu0 %v2858_v51  ;;  %2382 = vmatprep.mubr.bf16.mxu1 %v2867_v52 }
 0x110   : > { %2674 = vmatprep.mubr.bf16.mxu0 %v2875_v53 }
 0x116   : > { %2383 = vmatmul.mubr.bf16.gmra.mrb[8].mxu1 %v2866_v58 }
 0x117   : > { %2675 = vmatmul.mubr.bf16.gmra.mrb[8].mxu0 %v2874_v59  ;;  %2392 = vmatprep.mubr.bf16.mxu1 %v2883_v60 }
 0x118   : > { %2684 = vmatprep.mubr.bf16.mxu0 %v2891_v61 }
 0x11e   : > { %2393 = vmatmul.mubr.bf16.gmra.mrb[12].mxu1 %v2882_v62 }
 0x11f   : > { %2685 = vmatmul.mubr.bf16.gmra.mrb[12].mxu0 %v2890_v63 }
 0x1d9   : > { %v2364_v7 = vpop.f32.mrb[0].mxu1 }
 0x1da   : > { %v2656_v8 = vpop.f32.mrb[0].mxu0  ;;  %v3152_v9 = vadd.f32 %v2364_v7, %v4601_v5  ;;  %v2366_v10 = vpop.f32.mrb[1].mxu1 }
 0x1db   : > { %v2658_v11 = vpop.f32.mrb[1].mxu0  ;;  %v3154_v12 = vadd.f32 %v2366_v10, %v4603_v6  ;;  %v2368_v13 = vpop.f32.mrb[2].mxu1 }
 0x1dc   : > { %v2660_v14 = vpop.f32.mrb[2].mxu0  ;;  %v3153_v15 = vadd.f32 %v3152_v9, %v2656_v8  ;;  %v3156_v16 = vadd.f32 %v2368_v13, %v4601_v5  ;;  %v2370_v17 = vpop.f32.mrb[3].mxu1 }
 0x1dd   : > { %v2662_v18 = vpop.f32.mrb[3].mxu0  ;;  %v3155_v19 = vadd.f32 %v3154_v12, %v2658_v11  ;;  %v3158_v20 = vadd.f32 %v2370_v17, %v4603_v6 }
 0x1de   : > { %vm2695_vm0 = vcmp.gt.f32.partialorder %v3153_v15, 0.0  ;;  %v2711_v21 = vmul.f32 0.1, %v3153_v15  ;;  %v3157_v22 = vadd.f32 %v3156_v16, %v2660_v14 }
 0x1df   : > { %vm2696_vm1 = vcmp.gt.f32.partialorder %v3155_v19, 0.0  ;;  %v2712_v23 = vmul.f32 0.1, %v3155_v19  ;;  %v3159_v24 = vadd.f32 %v3158_v20, %v2662_v18 }
 0x1e0   : > { %v2727_v25 = vsel %vm2695_vm0, %v3153_v15, %v2711_v21  ;;  %vm2697_vm2 = vcmp.gt.f32.partialorder %v3157_v22, 0.0  ;;  %v2713_v26 = vmul.f32 0.1, %v3157_v22 }
 0x1e1   : > { %2743 = vst [vmem:[%s4613_s27] sm:$0xff] %v2727_v25  ;;  %v2728_v27 = vsel %vm2696_vm1, %v3155_v19, %v2712_v23  ;;  %vm2698_vm3 = vcmp.gt.f32.partialorder %v3159_v24, 0.0  ;;  %v2714_v28 = vmul.f32 0.1, %v3159_v24  ;;  %v2374_v29 = vpop.f32.mrb[4].mxu1 }
 0x1e2   : > { %v2666_v30 = vpop.f32.mrb[4].mxu0  ;;  %2744 = vst [vmem:[%s4613_s27 + $0x8] sm:$0xff] %v2728_v27  ;;  %v2729_v31 = vsel %vm2697_vm2, %v3157_v22, %v2713_v26  ;;  %v3160_v32 = vadd.f32 %v2374_v29, %v4601_v5  ;;  %v2376_v33 = vpop.f32.mrb[5].mxu1 }
 0x1e3   : > { %v2668_v34 = vpop.f32.mrb[5].mxu0  ;;  %2745 = vst [vmem:[%s4613_s27 + $0x10] sm:$0xff] %v2729_v31  ;;  %v2730_v35 = vsel %vm2698_vm3, %v3159_v24, %v2714_v28  ;;  %v3162_v36 = vadd.f32 %v2376_v33, %v4603_v6  ;;  %v2378_v37 = vpop.f32.mrb[6].mxu1 }
 0x1e4   : > { %v2670_v38 = vpop.f32.mrb[6].mxu0  ;;  %2746 = vst [vmem:[%s4613_s27 + $0x18] sm:$0xff] %v2730_v35  ;;  %v3161_v39 = vadd.f32 %v3160_v32, %v2666_v30  ;;  %v3164_v40 = vadd.f32 %v2378_v37, %v4601_v5  ;;  %v2380_v41 = vpop.f32.mrb[7].mxu1 }
 0x1e5   : > { %v2672_v42 = vpop.f32.mrb[7].mxu0  ;;  %v3163_v43 = vadd.f32 %v3162_v36, %v2668_v34  ;;  %v3166_v44 = vadd.f32 %v2380_v41, %v4603_v6 }
 0x1e6   : > { %vm2699_vm4 = vcmp.gt.f32.partialorder %v3161_v39, 0.0  ;;  %v2715_v45 = vmul.f32 0.1, %v3161_v39  ;;  %v3165_v46 = vadd.f32 %v3164_v40, %v2670_v38 }
 0x1e7   : > { %vm2700_vm5 = vcmp.gt.f32.partialorder %v3163_v43, 0.0  ;;  %v2716_v47 = vmul.f32 0.1, %v3163_v43  ;;  %v3167_v48 = vadd.f32 %v3166_v44, %v2672_v42 }
 0x1e8   : > { %v2731_v49 = vsel %vm2699_vm4, %v3161_v39, %v2715_v45  ;;  %vm2701_vm6 = vcmp.gt.f32.partialorder %v3165_v46, 0.0  ;;  %v2717_v50 = vmul.f32 0.1, %v3165_v46 }
 0x1e9   : > { %2747 = vst [vmem:[%s4613_s27 + $0x20] sm:$0xff] %v2731_v49  ;;  %v2732_v51 = vsel %vm2700_vm5, %v3163_v43, %v2716_v47  ;;  %vm2702_vm7 = vcmp.gt.f32.partialorder %v3167_v48, 0.0  ;;  %v2718_v52 = vmul.f32 0.1, %v3167_v48  ;;  %v2384_v53 = vpop.f32.mrb[8].mxu1 }
 0x1ea   : > { %v2676_v54 = vpop.f32.mrb[8].mxu0  ;;  %2748 = vst [vmem:[%s4613_s27 + $0x28] sm:$0xff] %v2732_v51  ;;  %v2733_v55 = vsel %vm2701_vm6, %v3165_v46, %v2717_v50  ;;  %v3168_v56 = vadd.f32 %v2384_v53, %v4601_v5  ;;  %v2386_v57 = vpop.f32.mrb[9].mxu1 }
 0x1eb   : > { %v2678_v58 = vpop.f32.mrb[9].mxu0  ;;  %2749 = vst [vmem:[%s4613_s27 + $0x30] sm:$0xff] %v2733_v55  ;;  %v2734_v59 = vsel %vm2702_vm7, %v3167_v48, %v2718_v52  ;;  %v3170_v60 = vadd.f32 %v2386_v57, %v4603_v6  ;;  %v2388_v61 = vpop.f32.mrb[10].mxu1 }
 0x1ec   : > { %v2680_v62 = vpop.f32.mrb[10].mxu0  ;;  %2750 = vst [vmem:[%s4613_s27 + $0x38] sm:$0xff] %v2734_v59  ;;  %v3169_v63 = vadd.f32 %v3168_v56, %v2676_v54  ;;  %v3172_v0 = vadd.f32 %v2388_v61, %v4601_v5  ;;  %v2390_v1 = vpop.f32.mrb[11].mxu1 }
 0x1ed   : > { %v2682_v2 = vpop.f32.mrb[11].mxu0  ;;  %v3171_v3 = vadd.f32 %v3170_v60, %v2678_v58  ;;  %v3174_v4 = vadd.f32 %v2390_v1, %v4603_v6 }
 0x1ee   : > { %vm2703_vm8 = vcmp.gt.f32.partialorder %v3169_v63, 0.0  ;;  %v2719_v7 = vmul.f32 0.1, %v3169_v63  ;;  %v3173_v8 = vadd.f32 %v3172_v0, %v2680_v62 }
 0x1ef   : > { %vm2704_vm9 = vcmp.gt.f32.partialorder %v3171_v3, 0.0  ;;  %v2720_v9 = vmul.f32 0.1, %v3171_v3  ;;  %v3175_v10 = vadd.f32 %v3174_v4, %v2682_v2 }
 0x1f0   : > { %v2735_v11 = vsel %vm2703_vm8, %v3169_v63, %v2719_v7  ;;  %vm2705_vm10 = vcmp.gt.f32.partialorder %v3173_v8, 0.0  ;;  %v2721_v12 = vmul.f32 0.1, %v3173_v8 }
 0x1f1   : > { %2751 = vst [vmem:[%s4613_s27 + $0x40] sm:$0xff] %v2735_v11  ;;  %v2736_v13 = vsel %vm2704_vm9, %v3171_v3, %v2720_v9  ;;  %vm2706_vm11 = vcmp.gt.f32.partialorder %v3175_v10, 0.0  ;;  %v2722_v14 = vmul.f32 0.1, %v3175_v10  ;;  %v2394_v15 = vpop.f32.mrb[12].mxu1 }
 0x1f2   : > { %v2686_v16 = vpop.f32.mrb[12].mxu0  ;;  %2752 = vst [vmem:[%s4613_s27 + $0x48] sm:$0xff] %v2736_v13  ;;  %v2737_v17 = vsel %vm2705_vm10, %v3173_v8, %v2721_v12  ;;  %v3176_v18 = vadd.f32 %v2394_v15, %v4601_v5  ;;  %v2396_v19 = vpop.f32.mrb[13].mxu1 }
 0x1f3   : > { %v2688_v20 = vpop.f32.mrb[13].mxu0  ;;  %2753 = vst [vmem:[%s4613_s27 + $0x50] sm:$0xff] %v2737_v17  ;;  %v2738_v21 = vsel %vm2706_vm11, %v3175_v10, %v2722_v14  ;;  %v3178_v22 = vadd.f32 %v2396_v19, %v4603_v6  ;;  %v2398_v23 = vpop.f32.mrb[14].mxu1 }
 0x1f4   : > { %v2690_v24 = vpop.f32.mrb[14].mxu0  ;;  %2754 = vst [vmem:[%s4613_s27 + $0x58] sm:$0xff] %v2738_v21  ;;  %v3177_v25 = vadd.f32 %v3176_v18, %v2686_v16  ;;  %v3180_v26 = vadd.f32 %v2398_v23, %v4601_v5  ;;  %v2400_v27 = vpop.f32.mrb[15].mxu1 }
 0x1f5   : > { %v2692_v28 = vpop.f32.mrb[15].mxu0  ;;  %v3179_v29 = vadd.f32 %v3178_v22, %v2688_v20  ;;  %v3182_v30 = vadd.f32 %v2400_v27, %v4603_v6 }
 0x1f6   : > { %vm2707_vm12 = vcmp.gt.f32.partialorder %v3177_v25, 0.0  ;;  %v2723_v31 = vmul.f32 0.1, %v3177_v25  ;;  %v3181_v32 = vadd.f32 %v3180_v26, %v2690_v24 }
 0x1f7   : > { %vm2708_vm13 = vcmp.gt.f32.partialorder %v3179_v29, 0.0  ;;  %v2724_v33 = vmul.f32 0.1, %v3179_v29  ;;  %v3183_v34 = vadd.f32 %v3182_v30, %v2692_v28 }
 0x1f8   : > { %v2739_v35 = vsel %vm2707_vm12, %v3177_v25, %v2723_v31  ;;  %vm2709_vm14 = vcmp.gt.f32.partialorder %v3181_v32, 0.0  ;;  %v2725_v36 = vmul.f32 0.1, %v3181_v32 }
 0x1f9   : > { %2755 = vst [vmem:[%s4613_s27 + $0x60] sm:$0xff] %v2739_v35  ;;  %v2740_v37 = vsel %vm2708_vm13, %v3179_v29, %v2724_v33  ;;  %vm2710_vm15 = vcmp.gt.f32.partialorder %v3183_v34, 0.0  ;;  %v2726_v5 = vmul.f32 0.1, %v3183_v34 }
 0x1fa   : > { %2756 = vst [vmem:[%s4613_s27 + $0x68] sm:$0xff] %v2740_v37  ;;  %v2741_v38 = vsel %vm2709_vm14, %v3181_v32, %v2725_v36 }
 0x1fb   : > { %2757 = vst [vmem:[%s4613_s27 + $0x70] sm:$0xff] %v2741_v38  ;;  %v2742_v39 = vsel %vm2710_vm15, %v3183_v34, %v2726_v5 }
 0x1fc   : > { %2758 = vst [vmem:[%s4613_s27 + $0x78] sm:$0xff] %v2742_v39 }
 0x1fd PF: > { %s13_s12 = sadd.s32 1, %s3678_s12  }
 0x1fe   : > { %p10_p4 = scmp.ge.s32.totalorder %s13_s12, 4  }
 0x200   :  { %12 = sbr.rel (!%p10_p4) target bundleno = 1 (0x1), region = 62 }

// kernel: discriminator_forward.9
= control target key start
LH: loop header
LB: loop body
LE: loop exit
PB: predicated region body
PF: predicated region fallthrough
CT: control target
= control target key end

     0   :  { %s1939_s29 = smov 0   ;;  %s2411_s0 = inlined_call_operand.vmem [shape: f32[2,64,256], index: 0, kind: input, shape index: {}]   ;;  %s2412_s1 = inlined_call_operand.vmem [shape: bf16[256,32], index: 1, kind: input, shape index: {}]   ;;  %s2413_s2 = inlined_call_operand.vmem [shape: f32[1,32], index: 2, kind: input, shape index: {}]   ;;  %s2414_s3 = inlined_call_operand.vmem [shape: bf16[256,32], index: 3, kind: input, shape index: {}]   ;;  %s2415_s4 = inlined_call_operand.vmem [shape: f32[1,32], index: 4, kind: input, shape index: {}]   ;;  %s2416_s5 = inlined_call_operand.vmem [shape: bf16[256,256], index: 5, kind: input, shape index: {}]   ;;  %s2417_s6 = inlined_call_operand.vmem [shape: f32[1,256], index: 6, kind: input, shape index: {}]   ;;  %s2418_s7 = inlined_call_operand.<no memory space> [shape: f32[1], index: 7, kind: input, shape index: {}]   ;;  %s2419_s8 = inlined_call_operand.vmem [shape: f32[2,64,256], index: 8, kind: output, shape index: {}]  }
   0x1   :  { %13 = sst [smem:[#allocation2]] %s2418_s7 }
   0x2 LB: > { %s1494_s30 = sadd.s32 4294967295, %s1888_s29   ;;  %p1498_p0 = scmp.ge.s32.totalorder %s1888_s29, 1  ;;  %s1888_s29 = sphi %s1939_s29, %s19_s29  }
   0x3   : > { %p263_p1 = scmp.lt.s32.totalorder %s1888_s29, 3 }
   0x5   : > { %p264_p2 = pnand %p1498_p0, %p263_p1 }
   0x6   : > { %v1770_v0 = vld [vmem:[%s2414_s3 + $0x40] sm:$0xff] (!%p264_p2)   ;;  %v1772_v2 = vld [vmem:[%s2414_s3 + $0x48] sm:$0xff] (!%p264_p2)   ;;  %v1774_v4 = vld [vmem:[%s2414_s3 + $0x50] sm:$0xff] (!%p264_p2)   ;;  %p297_p3 = scmp.lt.s32.totalorder (!%p264_p2), %s1494_s30, 1  ;;  %vm1009_vm0 = vcmask (!%p264_p2), 261120   ;;  %vm1163_vm2 = vcmask (!%p264_p2), 523264  }
   0x7   : > { %267 = sbr.rel (%p264_p2) target bundleno = 1065 (0x429), region = 52  ;;  %v1771_v1 = vld [vmem:[%s2414_s3] sm:$0xff] (!%p264_p2)   ;;  %1637 = vmatprep.subr.bf16.mxu1 (!%p264_p2), %v1770_v0  ;;  %v1773_v3 = vld [vmem:[%s2414_s3 + $0x8] sm:$0xff] (!%p264_p2)   ;;  %v1775_v5 = vld [vmem:[%s2414_s3 + $0x10] sm:$0xff] (!%p264_p2)   ;;  %s1389_s26 = sld [smem:[#allocation2]] (!%p264_p2) }
   0x8   : > { %1638 = vmatpush3.bf16.msra.mxu1 (!%p264_p2), %v1771_v1  ;;  %v1776_v6 = vld [vmem:[%s2414_s3 + $0x58] sm:$0xff] (!%p264_p2)   ;;  %v1778_v8 = vld [vmem:[%s2414_s3 + $0x60] sm:$0xff] (!%p264_p2)   ;;  %v1780_v12 = vld [vmem:[%s2414_s3 + $0x68] sm:$0xff] (!%p264_p2)  }
   0x9   : > { %1639 = vmatprep.subr.bf16.mxu1 (!%p264_p2), %v1772_v2  ;;  %v1777_v7 = vld [vmem:[%s2414_s3 + $0x18] sm:$0xff] (!%p264_p2)   ;;  %v1782_v9 = vld [vmem:[%s2412_s1 + $0x40] sm:$0xff] (!%p264_p2)   ;;  %v1786_v13 = vld [vmem:[%s2412_s1 + $0x48] sm:$0xff] (!%p264_p2)  }
   0xa   : > { %v1783_v10 = vld [vmem:[%s2412_s1] sm:$0xff] (!%p264_p2)   ;;  %1597 = vmatprep.subr.bf16.mxu0 (!%p264_p2), %v1782_v9  ;;  %v1787_v14 = vld [vmem:[%s2412_s1 + $0x8] sm:$0xff] (!%p264_p2)   ;;  %v1784_v16 = vld [vmem:[%s2414_s3 + $0x70] sm:$0xff] (!%p264_p2)  }
   0xb   : > { %v1779_v11 = vld [vmem:[%s2414_s3 + $0x20] sm:$0xff] (!%p264_p2)   ;;  %1598 = vmatpush3.bf16.msra.mxu0 (!%p264_p2), %v1783_v10  ;;  %v1781_v15 = vld [vmem:[%s2414_s3 + $0x28] sm:$0xff] (!%p264_p2)   ;;  %v1790_v17 = vld [vmem:[%s2412_s1 + $0x50] sm:$0xff] (!%p264_p2)  }
   0xc   : > { %1640 = vmatpush3.bf16.msra.mxu1 (!%p264_p2), %v1773_v3  ;;  %1599 = vmatprep.subr.bf16.mxu0 (!%p264_p2), %v1786_v13  ;;  %v1791_v18 = vld [vmem:[%s2412_s1 + $0x10] sm:$0xff] (!%p264_p2)   ;;  %v1788_v22 = vld [vmem:[%s2414_s3 + $0x78] sm:$0xff] (!%p264_p2)   ;;  %v1794_v27 = vld [vmem:[%s2412_s1 + $0x60] sm:$0xff] (!%p264_p2)  }
   0xd   : > { %1641 = vmatprep.subr.bf16.mxu1 (!%p264_p2), %v1774_v4  ;;  %v1785_v19 = vld [vmem:[%s2414_s3 + $0x30] sm:$0xff] (!%p264_p2)   ;;  %v1792_v24 = vld [vmem:[%s2412_s1 + $0x58] sm:$0xff] (!%p264_p2)   ;;  %v1795_v30 = vld [vmem:[%s2412_s1 + $0x20] sm:$0xff] (!%p264_p2)  }
   0xe   : > { %s2423_s30 = smov (!%p297_p3, %s1494_s30), 1  ;;  %v1789_v25 = vld [vmem:[%s2414_s3 + $0x38] sm:$0xff]   ;;  %v1796_v33 = vld [vmem:[%s2412_s1 + $0x68] sm:$0xff]   ;;  %v1798_v37 = vld [vmem:[%s2412_s1 + $0x70] sm:$0xff]  }
   0xf   : > { %s1595_s15 = sshll.u32 %s2423_s30, 7  ;;  %1600 = vmatpush3.bf16.msra.mxu0 %v1787_v14  ;;  %v1793_v26 = vld [vmem:[%s2412_s1 + $0x18] sm:$0xff]   ;;  %v1797_v36 = vld [vmem:[%s2412_s1 + $0x28] sm:$0xff]   ;;  %v1799_v40 = vld [vmem:[%s2412_s1 + $0x30] sm:$0xff]  }
  0x10   : > { %1642 = vmatpush3.bf16.msra.mxu1 %v1775_v5  ;;  %s2006_s24 = scalar_lea.vmem %s2411_s0, %s1595_s15  ;;  %1601 = vmatprep.subr.bf16.mxu0 %v1790_v17  ;;  %v1800_v43 = vld [vmem:[%s2412_s1 + $0x78] sm:$0xff]   ;;  %v1520_v60 = vld [vmem:[%s2415_s4] ss:$0 sm:$0xff]  ;;  %vm2150_vm1 = vmpackc.low %vm1009_vm0, %vm1009_vm0  ;;  %s2374_s9 = scalar_lea.vmem %s2419_s8, %s1595_s15 }
  0x11   : > { %1643 = vmatprep.subr.bf16.mxu1 %v1776_v6  ;;  %v2018_v20 = vld [vmem:[%s2006_s24 + $0x8] sm:$0xff]  ;;  %v2021_v21 = vld [vmem:[%s2006_s24 + $0x18] sm:$0xff]  ;;  %v2041_v28 = vld [vmem:[%s2006_s24] sm:$0xff] }
  0x12   : > { %v325_v23 = vpack.c.bf16 %v2021_v21, %v2018_v20  ;;  %v2044_v29 = vld [vmem:[%s2006_s24 + $0x10] sm:$0xff]  ;;  %v2050_v31 = vld [vmem:[%s2006_s24 + $0x28] sm:$0xff]  ;;  %v2053_v32 = vld [vmem:[%s2006_s24 + $0x38] sm:$0xff] }
  0x13   : > { %1602 = vmatpush3.bf16.msra.mxu0 %v1791_v18  ;;  %v2060_v34 = vpack.c.bf16 %v2044_v29, %v2041_v28  ;;  %v2064_v35 = vpack.c.bf16 %v2053_v32, %v2050_v31  ;;  %v2073_v38 = vld [vmem:[%s2006_s24 + $0x20] sm:$0xff]  ;;  %v2077_v39 = vld [vmem:[%s2006_s24 + $0x30] sm:$0xff]  ;;  %v2084_v41 = vld [vmem:[%s2006_s24 + $0x48] sm:$0xff] }
  0x14   : > { %1644 = vmatpush3.bf16.msra.mxu1 %v1777_v7  ;;  %699 = vmatprep.mubr.bf16.mxu1 %v325_v23  ;;  %v2087_v42 = vld [vmem:[%s2006_s24 + $0x58] sm:$0xff]  ;;  %v2097_v45 = vpack.c.bf16 %v2077_v39, %v2073_v38  ;;  %v2104_v47 = vld [vmem:[%s2006_s24 + $0x40] sm:$0xff]  ;;  %v2107_v48 = vld [vmem:[%s2006_s24 + $0x50] sm:$0xff] }
  0x15   : > { %1645 = vmatprep.subr.bf16.mxu1 %v1778_v8  ;;  %499 = vmatprep.mubr.bf16.mxu0 %v325_v23  ;;  %v1801_v44 = vld [vmem:[%s2412_s1 + $0x38] sm:$0xff]   ;;  %v2101_v46 = vpack.c.bf16 %v2087_v42, %v2084_v41  ;;  %v2111_v49 = vld [vmem:[%s2006_s24 + $0x68] sm:$0xff]  ;;  %v2119_v51 = vpack.c.bf16 %v2107_v48, %v2104_v47  ;;  %v2130_v53 = vld [vmem:[%s2006_s24 + $0x60] sm:$0xff] }
  0x16   : > { %1603 = vmatprep.subr.bf16.mxu0 %v1792_v24  ;;  %v2114_v50 = vld [vmem:[%s2006_s24 + $0x78] sm:$0xff]  ;;  %v2133_v54 = vld [vmem:[%s2006_s24 + $0x70] sm:$0xff]  ;;  %v2161_v10 = vld [vmem:[%s2413_s2] ss:$0 sm:$0xff] }
  0x17   : > { %1604 = vmatpush3.bf16.msra.mxu0 %v1793_v26  ;;  %v2124_v52 = vpack.c.bf16 %v2114_v50, %v2111_v49  ;;  %v2137_v55 = vpack.c.bf16 %v2133_v54, %v2130_v53 }
  0x18   : > { %1646 = vmatpush3.bf16.msra.mxu1 %v1779_v11  ;;  %1605 = vmatprep.subr.bf16.mxu0 %v1794_v27 }
  0x19   : > { %1647 = vmatprep.subr.bf16.mxu1 %v1780_v12 }
  0x1b   : > { %1606 = vmatpush3.bf16.msra.mxu0 %v1795_v30 }
  0x1c   : > { %1648 = vmatpush3.bf16.msra.mxu1 %v1781_v15  ;;  %1607 = vmatprep.subr.bf16.mxu0 %v1796_v33 }
  0x1d   : > { %1649 = vmatprep.subr.bf16.mxu1 %v1784_v16 }
  0x1f   : > { %1608 = vmatpush3.bf16.msra.mxu0 %v1797_v36 }
  0x20   : > { %1650 = vmatpush3.bf16.msra.mxu1 %v1785_v19  ;;  %1609 = vmatprep.subr.bf16.mxu0 %v1798_v37 }
  0x21   : > { %1651 = vmatprep.subr.bf16.mxu1 %v1788_v22 }
  0x23   : > { %1610 = vmatpush3.bf16.msra.mxu0 %v1799_v40 }
  0x24   : > { %1652 = vmatpush3.bf16.msra.mxu1 %v1789_v25  ;;  %1611 = vmatprep.subr.bf16.mxu0 %v1800_v43 }
  0x27   : > { %700 = vmatmul.mubr.bf16.vlgmr.msra.gmra.mrb[0].mxu1 %v2060_v34  ;;  %1612 = vmatpush3.bf16.msra.mxu0 %v1801_v44 }
  0x28   : > { %707 = vmatprep.mubr.bf16.mxu1 %v2064_v35 }
  0x2a   : > { %500 = vmatmul.mubr.bf16.vlgmr.msra.gmra.mrb[0].mxu0 %v2060_v34 }
  0x2b   : > { %507 = vmatprep.mubr.bf16.mxu0 %v2064_v35 }
  0x2f   : > { %708 = vmatmul.mubr.bf16.gmra.mrb[4].mxu1 %v2097_v45 }
  0x30   : > { %715 = vmatprep.mubr.bf16.mxu1 %v2101_v46 }
  0x32   : > { %508 = vmatmul.mubr.bf16.gmra.mrb[4].mxu0 %v2097_v45 }
  0x33   : > { %515 = vmatprep.mubr.bf16.mxu0 %v2101_v46 }
  0x37   : > { %716 = vmatmul.mubr.bf16.gmra.mrb[8].mxu1 %v2119_v51 }
  0x38   : > { %723 = vmatprep.mubr.bf16.mxu1 %v2124_v52 }
  0x3a   : > { %516 = vmatmul.mubr.bf16.gmra.mrb[8].mxu0 %v2119_v51 }
  0x3b   : > { %523 = vmatprep.mubr.bf16.mxu0 %v2124_v52 }
  0x3f   : > { %724 = vmatmul.mubr.bf16.gmra.mrb[12].mxu1 %v2137_v55 }
  0x42   : > { %524 = vmatmul.mubr.bf16.gmra.mrb[12].mxu0 %v2137_v55 }
  0x43   : > { %968 = vmatprep.mubr.bf16.mxu0 %v325_v23 }
  0xfa   : > { %v1653_v56 = vpop.f32.mrb[0].mxu1 }
  0xfb   : > { %v1654_v57 = vpop.f32.mrb[1].mxu1 }
  0xfc   : > { %v1655_v58 = vadd.f32 %v1654_v57, %v1653_v56  ;;  %v1656_v59 = vpop.f32.mrb[2].mxu1 }
  0xfd   : > { %v1657_v61 = vpop.f32.mrb[3].mxu1  ;;  %v1613_v9 = vpop.f32.mrb[0].mxu0 }
  0xfe   : > { %v1658_v62 = vadd.f32 %v1657_v61, %v1656_v59  ;;  %v702_v63 = vadd.f32 %v1655_v58, %v1520_v60  ;;  %v1614_v11 = vpop.f32.mrb[1].mxu0 }
  0xff   : > { %v1615_v14 = vadd.f32 %v1614_v11, %v1613_v9  ;;  %v1616_v15 = vpop.f32.mrb[2].mxu0 }
 0x100   : > { %v705_v0 = vadd.f32 %v1658_v62, %v1520_v60  ;;  %v1617_v16 = vpop.f32.mrb[3].mxu0 }
 0x101   : > { %v502_v19 = vadd.f32 %v1615_v14, %v2161_v10  ;;  %v1618_v22 = vadd.f32 %v1617_v16, %v1616_v15 }
 0x102   : > { %v1721_v2 = vpack.c.bf16 %v705_v0, %v702_v63  ;;  %v1659_v3 = vpop.f32.mrb[4].mxu1 }
 0x103   : > { %v1660_v4 = vpop.f32.mrb[5].mxu1  ;;  %1709 = vmatprep.mubr.msk.f32.mxu1 %vm1009_vm0, %v502_v19 }
 0x104   : > { %v1661_v5 = vadd.f32 %v1660_v4, %v1659_v3  ;;  %v1662_v6 = vpop.f32.mrb[6].mxu1  ;;  %1723 = vmatprep.subr.msk.bf16.mxu1 %vm2150_vm1, %v1721_v2 }
 0x105   : > { %v1663_v7 = vpop.f32.mrb[7].mxu1  ;;  %1726 = vmatpush3.bf16.xpose.msk.msra.mxu1 %vm2150_vm1, %v1721_v2  ;;  %v1619_v30 = vpop.f32.mrb[4].mxu0 }
 0x106   : > { %v1664_v8 = vadd.f32 %v1663_v7, %v1662_v6  ;;  %v710_v12 = vadd.f32 %v1661_v5, %v1520_v60  ;;  %v1620_v33 = vpop.f32.mrb[5].mxu0 }
 0x107   : > { %v1621_v40 = vadd.f32 %v1620_v33, %v1619_v30  ;;  %v1622_v43 = vpop.f32.mrb[6].mxu0  ;;  %v1810_v30 = vld [vmem:[%s2416_s5 + $0x24] ss:$8 sps:$4 sm:$0xff]   ;;  %v1808_v33 = vld [vmem:[%s2416_s5 + $0x20] ss:$8 sps:$4 sm:$0xff]  }
 0x108   : > { %v713_v13 = vadd.f32 %v1664_v8, %v1520_v60  ;;  %v1623_v44 = vpop.f32.mrb[7].mxu0 }
 0x109   : > { %v1624_v58 = vadd.f32 %v1623_v44, %v1622_v43  ;;  %v510_v16 = vadd.f32 %v1621_v40, %v2161_v10  ;;  %v1814_v40 = vld [vmem:[%s2416_s5 + $0x40] ss:$8 sps:$4 sm:$0xff]   ;;  %v1816_v43 = vld [vmem:[%s2416_s5 + $0x44] ss:$8 sps:$4 sm:$0xff]   ;;  %v1817_v44 = vld [vmem:[%s2416_s5 + $0x50] ss:$8 sps:$4 sm:$0xff]  }
 0x10a   : > { %v1727_v17 = vpack.c.bf16 %v713_v13, %v710_v12  ;;  %v1665_v18 = vpop.f32.mrb[8].mxu1 }
 0x10b   : > { %v1666_v23 = vpop.f32.mrb[9].mxu1  ;;  %v513_v19 = vadd.f32 %v1624_v58, %v2161_v10  ;;  %v1820_v58 = vld [vmem:[%s2416_s5 + $0x60] ss:$8 sps:$4 sm:$0xff]  }
 0x10c   : > { %v1667_v24 = vadd.f32 %v1666_v23, %v1665_v18  ;;  %v1668_v25 = vpop.f32.mrb[10].mxu1  ;;  %1729 = vmatprep.subr.msk.bf16.mxu1 %vm2150_vm1, %v1727_v17 }
 0x10d   : > { %v1669_v26 = vpop.f32.mrb[11].mxu1  ;;  %1732 = vmatpush3.bf16.xpose.msk.msra.mxu1 %vm2150_vm1, %v1727_v17  ;;  %v1625_v2 = vpop.f32.mrb[8].mxu0 }
 0x10e   : > { %v1670_v27 = vadd.f32 %v1669_v26, %v1668_v25  ;;  %v718_v36 = vadd.f32 %v1667_v24, %v1520_v60  ;;  %v1626_v3 = vpop.f32.mrb[9].mxu0  ;;  %v1802_v26 = vld [vmem:[%s2416_s5] ss:$8 sps:$4 sm:$0xff]  }
 0x10f   : > { %v1627_v6 = vadd.f32 %v1626_v3, %v1625_v2  ;;  %v1628_v7 = vpop.f32.mrb[10].mxu0  ;;  %v1829_v2 = vld [vmem:[%s2416_s5 + $0x90] ss:$8 sps:$4 sm:$0xff]   ;;  %v1834_v3 = vld [vmem:[%s2416_s5 + $0xa4] ss:$8 sps:$4 sm:$0xff]  }
 0x110   : > { %v721_v37 = vadd.f32 %v1670_v27, %v1520_v60  ;;  %v1629_v8 = vpop.f32.mrb[11].mxu0  ;;  %v1805_v27 = vld [vmem:[%s2416_s5 + $0x10] ss:$8 sps:$4 sm:$0xff]  }
 0x111   : > { %v1630_v11 = vadd.f32 %v1629_v8, %v1628_v7  ;;  %v518_v23 = vadd.f32 %v1627_v6, %v2161_v10  ;;  %v1835_v6 = vld [vmem:[%s2416_s5 + $0xb0] ss:$8 sps:$4 sm:$0xff]   ;;  %v1840_v7 = vld [vmem:[%s2416_s5 + $0xc4] ss:$8 sps:$4 sm:$0xff]   ;;  %v1838_v8 = vld [vmem:[%s2416_s5 + $0xc0] ss:$8 sps:$4 sm:$0xff]  }
 0x112   : > { %v1733_v56 = vpack.c.bf16 %v721_v37, %v718_v36  ;;  %v1671_v57 = vpop.f32.mrb[12].mxu1  ;;  %v1813_v36 = vld [vmem:[%s2416_s5 + $0x34] ss:$8 sps:$4 sm:$0xff]   ;;  %v1811_v37 = vld [vmem:[%s2416_s5 + $0x30] ss:$8 sps:$4 sm:$0xff]  }
 0x113   : > { %v1672_v59 = vpop.f32.mrb[13].mxu1  ;;  %v521_v1 = vadd.f32 %v1630_v11, %v2161_v10  ;;  %v1841_v11 = vld [vmem:[%s2416_s5 + $0xd0] ss:$8 sps:$4 sm:$0xff]  }
 0x114   : > { %v1673_v61 = vadd.f32 %v1672_v59, %v1671_v57  ;;  %v1674_v62 = vpop.f32.mrb[14].mxu1  ;;  %1735 = vmatprep.subr.msk.bf16.mxu1 %vm2150_vm1, %v1733_v56  ;;  %v1822_v57 = vld [vmem:[%s2416_s5 + $0x64] ss:$8 sps:$4 sm:$0xff]   ;;  %v1825_v59 = vld [vmem:[%s2416_s5 + $0x74] ss:$8 sps:$4 sm:$0xff]  }
 0x115   : > { %v1675_v63 = vpop.f32.mrb[15].mxu1  ;;  %1738 = vmatpush3.bf16.xpose.msk.msra.mxu1 %vm2150_vm1, %v1733_v56  ;;  %v1631_v12 = vpop.f32.mrb[12].mxu0  ;;  %v1819_v56 = vld [vmem:[%s2416_s5 + $0x54] ss:$8 sps:$4 sm:$0xff]  }
 0x116   : > { %v1676_v0 = vadd.f32 %v1675_v63, %v1674_v62  ;;  %v726_v4 = vadd.f32 %v1673_v61, %v1520_v60  ;;  %v1632_v13 = vpop.f32.mrb[13].mxu0  ;;  %v1823_v61 = vld [vmem:[%s2416_s5 + $0x70] ss:$8 sps:$4 sm:$0xff]   ;;  %v1828_v62 = vld [vmem:[%s2416_s5 + $0x84] ss:$8 sps:$4 sm:$0xff]  }
 0x117   : > { %v1633_v14 = vadd.f32 %v1632_v13, %v1631_v12  ;;  %v1634_v15 = vpop.f32.mrb[14].mxu0  ;;  %v1826_v63 = vld [vmem:[%s2416_s5 + $0x80] ss:$8 sps:$4 sm:$0xff]   ;;  %v1846_v12 = vld [vmem:[%s2416_s5 + $0xe4] ss:$8 sps:$4 sm:$0xff]  }
 0x118   : > { %v729_v5 = vadd.f32 %v1676_v0, %v1520_v60  ;;  %v1635_v17 = vpop.f32.mrb[15].mxu0  ;;  %v505_v60 = vadd.f32 %v1618_v22, %v2161_v10  ;;  %v1804_v22 = vld [vmem:[%s2416_s5 + $0x4] ss:$8 sps:$4 sm:$0xff]   ;;  %v1831_v0 = vld [vmem:[%s2416_s5 + $0x94] ss:$8 sps:$4 sm:$0xff]  }
 0x119   : > { %v1636_v18 = vadd.f32 %v1635_v17, %v1634_v15  ;;  %v526_v24 = vadd.f32 %v1633_v14, %v2161_v10  ;;  %936 = vmatprep.subr.bf16.mxu0 %v1804_v22  ;;  %v1844_v13 = vld [vmem:[%s2416_s5 + $0xe0] ss:$8 sps:$4 sm:$0xff]   ;;  %v1849_v14 = vld [vmem:[%s2416_s5 + $0xf4] ss:$8 sps:$4 sm:$0xff]   ;;  %v1847_v15 = vld [vmem:[%s2416_s5 + $0xf0] ss:$8 sps:$4 sm:$0xff]   ;;  %v766_v22 = vlaneseq }
 0x11a   : > { %v1739_v9 = vpack.c.bf16 %v729_v5, %v726_v4  ;;  %937 = vmatpush1.bf16.msra.mxu0 %v1802_v26  ;;  %v1832_v4 = vld [vmem:[%s2416_s5 + $0xa0] ss:$8 sps:$4 sm:$0xff]   ;;  %v1837_v5 = vld [vmem:[%s2416_s5 + $0xb4] ss:$8 sps:$4 sm:$0xff]  }
 0x11b   : > { %v529_v25 = vadd.f32 %v1636_v18, %v2161_v10  ;;  %v1807_v10 = vld [vmem:[%s2416_s5 + $0x14] ss:$8 sps:$4 sm:$0xff]   ;;  %v767_v26 = vshrl.u32 %v766_v22, 7 }
 0x11c   : > { %1741 = vmatprep.subr.msk.bf16.mxu1 %vm2150_vm1, %v1739_v9  ;;  %938 = vmatprep.subr.bf16.mxu0 %v1807_v10 }
 0x11d   : > { %1744 = vmatpush3.bf16.xpose.msk.msra.mxu1 %vm2150_vm1, %v1739_v9  ;;  %v1843_v9 = vld [vmem:[%s2416_s5 + $0xd4] ss:$8 sps:$4 sm:$0xff]   ;;  %v768_v10 = vsub.s32 0, %v767_v26 }
 0x11e   : > { %939 = vmatpush1.bf16.msra.mxu0 %v1805_v27  ;;  %v764_v27 = vld [vmem:[%s2417_s6] sm:$0x3] }
 0x11f   : > { %940 = vmatprep.subr.bf16.mxu0 %v1810_v30 }
 0x122   : > { %941 = vmatpush1.bf16.msra.mxu0 %v1808_v33  ;;  %v772_v33 = vsub.s32 1, %v767_v26 }
 0x123   : > { %942 = vmatprep.subr.bf16.mxu0 %v1813_v36 }
 0x124   : > { %1710 = vmatmul.mubr.msk.f32.vlgmr.msra.gmra.mrb[16].mxu1 %vm1009_vm0, %v505_v60 }
 0x125   : > { %1712 = vmatprep.mubr.msk.f32.mxu1 %vm1009_vm0, %v510_v16 }
 0x126   : > { %943 = vmatpush1.bf16.msra.mxu0 %v1811_v37  ;;  %v2308_v37 = vrot.slane %v764_v27, %v768_v10 }
 0x127   : > { %944 = vmatprep.subr.bf16.mxu0 %v1816_v43 }
 0x128   : > { %1713 = vmatmul.mubr.msk.f32.gmra.mrb[18].mxu1 %vm1009_vm0, %v513_v19 }
 0x129   : > { %1715 = vmatprep.mubr.msk.f32.mxu1 %vm1009_vm0, %v518_v23 }
 0x12a   : > { %945 = vmatpush1.bf16.msra.mxu0 %v1814_v40 }
 0x12b   : > { %946 = vmatprep.subr.bf16.mxu0 %v1819_v56  ;;  %v2310_v56 = vrot.slane %v764_v27, %v772_v33 }
 0x12c   : > { %1716 = vmatmul.mubr.msk.f32.gmra.mrb[20].mxu1 %vm1009_vm0, %v521_v1 }
 0x12d   : > { %1718 = vmatprep.mubr.msk.f32.mxu1 %vm1009_vm0, %v526_v24 }
 0x12e   : > { %947 = vmatpush1.bf16.msra.mxu0 %v1817_v44 }
 0x12f   : > { %948 = vmatprep.subr.bf16.mxu0 %v1822_v57 }
 0x130   : > { %1719 = vmatmul.mubr.msk.f32.gmra.mrb[22].mxu1 %vm1009_vm0, %v529_v25 }
 0x132   : > { %949 = vmatpush1.bf16.msra.mxu0 %v1820_v58 }
 0x133   : > { %950 = vmatprep.subr.bf16.mxu0 %v1825_v59 }
 0x136   : > { %951 = vmatpush1.bf16.msra.mxu0 %v1823_v61 }
 0x137   : > { %952 = vmatprep.subr.bf16.mxu0 %v1828_v62 }
 0x13a   : > { %953 = vmatpush1.bf16.msra.mxu0 %v1826_v63 }
 0x13b   : > { %954 = vmatprep.subr.bf16.mxu0 %v1831_v0 }
 0x13e   : > { %955 = vmatpush1.bf16.msra.mxu0 %v1829_v2 }
 0x13f   : > { %956 = vmatprep.subr.bf16.mxu0 %v1834_v3 }
 0x142   : > { %957 = vmatpush1.bf16.msra.mxu0 %v1832_v4 }
 0x143   : > { %958 = vmatprep.subr.bf16.mxu0 %v1837_v5 }
 0x146   : > { %959 = vmatpush1.bf16.msra.mxu0 %v1835_v6 }
 0x147   : > { %960 = vmatprep.subr.bf16.mxu0 %v1840_v7 }
 0x14a   : > { %961 = vmatpush1.bf16.msra.mxu0 %v1838_v8 }
 0x14b   : > { %962 = vmatprep.subr.bf16.mxu0 %v1843_v9 }
 0x14e   : > { %963 = vmatpush1.bf16.msra.mxu0 %v1841_v11 }
 0x14f   : > { %964 = vmatprep.subr.bf16.mxu0 %v1846_v12 }
 0x152   : > { %965 = vmatpush1.bf16.msra.mxu0 %v1844_v13 }
 0x153   : > { %966 = vmatprep.subr.bf16.mxu0 %v1849_v14 }
 0x156   : > { %967 = vmatpush1.bf16.msra.mxu0 %v1847_v15 }
 0x159   : > { %969 = vmatmul.mubr.bf16.vlgmr.msra.gmra.mrb[16].mxu0 %v2060_v34 }
 0x15a   : > { %978 = vmatprep.mubr.bf16.mxu0 %v2064_v35 }
 0x161   : > { %979 = vmatmul.mubr.bf16.gmra.mrb[20].mxu0 %v2097_v45 }
 0x162   : > { %988 = vmatprep.mubr.bf16.mxu0 %v2101_v46 }
 0x169   : > { %989 = vmatmul.mubr.bf16.gmra.mrb[24].mxu0 %v2119_v51 }
 0x16a   : > { %998 = vmatprep.mubr.bf16.mxu0 %v2124_v52 }
 0x171   : > { %999 = vmatmul.mubr.bf16.gmra.mrb[28].mxu0 %v2137_v55 }
 0x1f7   : > { %v1711_v16 = vpop.f32.mrb[16].mxu1 }
 0x1f8   : > { %v1124_v17 = vpop.f32.mrb[17].mxu1  ;;  %v1167_v35 = vsel %vm1163_vm2, %v1711_v16, -inf }
 0x1f9   : > { %v1164_v60 = vsel %vm1163_vm2, %v1124_v17, -inf }
 0x1fa   : > { %1165 = vmax.xlane.f32.xlu0 %v1164_v60 }
 0x1fb   : > { %v1714_v18 = vpop.f32.mrb[18].mxu1 }
 0x1fc   : > { %v1134_v34 = vpop.f32.mrb[19].mxu1  ;;  %v1173_v52 = vsel %vm1163_vm2, %v1714_v18, -inf }
 0x1fd   : > { %v1170_v45 = vsel %vm1163_vm2, %v1134_v34, -inf }
 0x1fe   : > { %1168 = vmax.xlane.f32.xlu0 %v1167_v35  ;;  %1171 = vmax.xlane.f32.xlu1 %v1170_v45 }
 0x1ff   : > { %v1717_v46 = vpop.f32.mrb[20].mxu1 }
 0x200   : > { %v1144_v51 = vpop.f32.mrb[21].mxu1  ;;  %v1179_v23 = vsel %vm1163_vm2, %v1717_v46, -inf }
 0x201   : > { %v1176_v55 = vsel %vm1163_vm2, %v1144_v51, -inf }
 0x202   : > { %1174 = vmax.xlane.f32.xlu1 %v1173_v52  ;;  %1177 = vmax.xlane.f32.xlu0 %v1176_v55 }
 0x203   : > { %v2299_v19 = vpop.f32.mrb[22].mxu1 }
 0x204   : > { %v1154_v1 = vpop.f32.mrb[23].mxu1  ;;  %v1185_v25 = vsel %vm1163_vm2, %v2299_v19, -inf }
 0x205   : > { %v1182_v24 = vsel %vm1163_vm2, %v1154_v1, -inf }
 0x206   : > { %1180 = vmax.xlane.f32.xlu1 %v1179_v23  ;;  %1183 = vmax.xlane.f32.xlu0 %v1182_v24 }
 0x20a   : > { %1186 = vmax.xlane.f32.xlu1 %v1185_v25 }
 0x22c   : > { %v970_v59 = vpop.f32.mrb[16].mxu0 }
 0x22d   : > { %v971_v61 = vadd.f32 %v970_v59, %v2308_v37  ;;  %v972_v62 = vpop.f32.mrb[17].mxu0 }
 0x22e   : > { %v974_v2 = vpop.f32.mrb[18].mxu0  ;;  %v973_v5 = vadd.f32 %v972_v62, %v2310_v56 }
 0x22f   : > { %v975_v6 = vadd.f32 %v974_v2, %v2308_v37  ;;  %v976_v9 = vpop.f32.mrb[19].mxu0 }
 0x230   : > { %v977_v12 = vadd.f32 %v976_v9, %v2310_v56 }
 0x231   : > { %v1747_v11 = vpack.c.bf16 %v975_v6, %v971_v61 }
 0x234   : > { %v980_v35 = vpop.f32.mrb[20].mxu0 }
 0x235   : > { %v981_v45 = vadd.f32 %v980_v35, %v2308_v37 }
 0x287   : > { %v1166_v30 = vpop.xlane.xlu0 %1165 }
 0x288   : > { %v1188_v36 = vsub.f32 %v1124_v17, %v1166_v30  ;;  %v1745_v17 = vpack.c.bf16 %v977_v12, %v973_v5 }
 0x28a   : > { %v1196_v40 = vmul.f32 1.442695, %v1188_v36  ;;  %1746 = vmatprep.subr.bf16.mxu1 %v1745_v17 }
 0x28b   : > { %v1169_v43 = vpop.xlane.xlu0 %1168  ;;  %v1172_v44 = vpop.xlane.xlu1 %1171  ;;  %1748 = vmatpush1.bf16.msra.mxu1 %v1747_v11 }
 0x28c   : > { %1850 = vpow2.f32 %v1196_v40  ;;  %v1189_v57 = vsub.f32 %v1711_v16, %v1169_v43  ;;  %v1190_v58 = vsub.f32 %v1134_v34, %v1172_v44 }
 0x28e   : > { %v1198_v63 = vmul.f32 1.442695, %v1189_v57  ;;  %v1200_v0 = vmul.f32 1.442695, %v1190_v58 }
 0x28f   : > { %v1175_v3 = vpop.xlane.xlu1 %1174  ;;  %v1178_v4 = vpop.xlane.xlu0 %1177 }
 0x290   : > { %1852 = vpow2.f32 %v1198_v63  ;;  %v1191_v7 = vsub.f32 %v1714_v18, %v1175_v3  ;;  %v1192_v8 = vsub.f32 %v1144_v51, %v1178_v4  ;;  %v982_v18 = vpop.f32.mrb[21].mxu0 }
 0x291   : > { %1854 = vpow2.f32 %v1200_v0  ;;  %v983_v23 = vadd.f32 %v982_v18, %v2310_v56  ;;  %v984_v24 = vpop.f32.mrb[22].mxu0 }
 0x292   : > { %v1202_v13 = vmul.f32 1.442695, %v1191_v7  ;;  %v1204_v14 = vmul.f32 1.442695, %v1192_v8 }
 0x293   : > { %v1181_v15 = vpop.xlane.xlu1 %1180  ;;  %v1184_v16 = vpop.xlane.xlu0 %1183 }
 0x294   : > { %1856 = vpow2.f32 %v1202_v13  ;;  %v1193_v60 = vsub.f32 %v1717_v46, %v1181_v15  ;;  %v1194_v34 = vsub.f32 %v1154_v1, %v1184_v16  ;;  %v985_v46 = vadd.f32 %v984_v24, %v2308_v37  ;;  %v986_v1 = vpop.f32.mrb[23].mxu0 }
 0x295   : > { %1858 = vpow2.f32 %v1204_v14  ;;  %v987_v10 = vadd.f32 %v986_v1, %v2310_v56  ;;  %v990_v44 = vpop.f32.mrb[24].mxu0 }
 0x296   : > { %v2317_v51 = vpop.eup %1850  ;;  %v1206_v52 = vmul.f32 1.442695, %v1193_v60  ;;  %v1208_v55 = vmul.f32 1.442695, %v1194_v34  ;;  %v1751_v27 = vpack.c.bf16 %v985_v46, %v981_v45  ;;  %v991_v57 = vadd.f32 %v990_v44, %v2308_v37  ;;  %v992_v58 = vpop.f32.mrb[25].mxu0 }
 0x297   : > { %v1187_v25 = vpop.xlane.xlu1 %1186  ;;  %v1212_v22 = vsel %vm1163_vm2, %v2317_v51, 0.0  ;;  %v1749_v36 = vpack.c.bf16 %v987_v10, %v983_v23  ;;  %v993_v59 = vadd.f32 %v992_v58, %v2310_v56  ;;  %v994_v61 = vpop.f32.mrb[26].mxu0  ;;  %v1890_v23 = vmov 0.0  }
 0x298   : > { %1860 = vpow2.f32 %v1206_v52  ;;  %v1195_v26 = vsub.f32 %v2299_v19, %v1187_v25  ;;  %1213 = vadd.xlane.f32.xlu0 %v1212_v22  ;;  %v995_v63 = vadd.f32 %v994_v61, %v2308_v37  ;;  %v996_v0 = vpop.f32.mrb[27].mxu0  ;;  %1340 = vmatprep.mubr.f32.mxu1 %v1890_v23 }
 0x299   : > { %1862 = vpow2.f32 %v1208_v55  ;;  %1750 = vmatprep.subr.bf16.mxu1 %v1749_v36  ;;  %v997_v4 = vadd.f32 %v996_v0, %v2310_v56  ;;  %v1000_v12 = vpop.f32.mrb[28].mxu0  ;;  %v1390_v0 = vstv %s1389_s26 }
 0x29a   : > { %v2325_v30 = vpop.eup %1852  ;;  %v1210_v33 = vmul.f32 1.442695, %v1195_v26  ;;  %1752 = vmatpush1.bf16.msra.mxu1 %v1751_v27  ;;  %v1755_v6 = vpack.c.bf16 %v995_v63, %v991_v57  ;;  %v1001_v14 = vadd.f32 %v1000_v12, %v2308_v37  ;;  %v1002_v15 = vpop.f32.mrb[29].mxu0 }
 0x29b   : > { %v2327_v40 = vpop.eup %1854  ;;  %v1215_v43 = vsel %vm1163_vm2, %v2325_v30, 0.0  ;;  %v1753_v7 = vpack.c.bf16 %v997_v4, %v993_v59  ;;  %v1004_v16 = vpop.f32.mrb[30].mxu0  ;;  %v1003_v60 = vadd.f32 %v1002_v15, %v2310_v56 }
 0x29c   : > { %1864 = vpow2.f32 %v1210_v33  ;;  %1216 = vadd.xlane.f32.xlu1 %v1215_v43  ;;  %v1218_v19 = vsel %vm1163_vm2, %v2327_v40, 0.0  ;;  %v1005_v34 = vadd.f32 %v1004_v16, %v2308_v37  ;;  %v1006_v45 = vpop.f32.mrb[31].mxu0 }
 0x29d   : > { %1219 = vadd.xlane.f32.xlu0 %v1218_v19  ;;  %1754 = vmatprep.subr.bf16.mxu1 %v1753_v7  ;;  %v1007_v52 = vadd.f32 %v1006_v45, %v2310_v56 }
 0x29e   : > { %v2335_v62 = vpop.eup %1856  ;;  %1756 = vmatpush1.bf16.msra.mxu1 %v1755_v6  ;;  %v1759_v18 = vpack.c.bf16 %v1005_v34, %v1001_v14 }
 0x29f   : > { %v2338_v2 = vpop.eup %1858  ;;  %v1221_v3 = vsel %vm1163_vm2, %v2335_v62, 0.0  ;;  %v1757_v55 = vpack.c.bf16 %v1007_v52, %v1003_v60 }
 0x2a0   : > { %1222 = vadd.xlane.f32.xlu1 %v1221_v3  ;;  %v1224_v5 = vsel %vm1163_vm2, %v2338_v2, 0.0 }
 0x2a1   : > { %1225 = vadd.xlane.f32.xlu0 %v1224_v5  ;;  %1758 = vmatprep.subr.bf16.mxu1 %v1757_v55 }
 0x2a2   : > { %v1861_v8 = vpop.eup %1860  ;;  %1760 = vmatpush1.bf16.msra.mxu1 %v1759_v18 }
 0x2a3   : > { %v2345_v9 = vpop.eup %1862  ;;  %v1227_v11 = vsel %vm1163_vm2, %v1861_v8, 0.0 }
 0x2a4   : > { %1228 = vadd.xlane.f32.xlu1 %v1227_v11  ;;  %v1230_v13 = vsel %vm1163_vm2, %v2345_v9, 0.0 }
 0x2a5   : > { %1231 = vadd.xlane.f32.xlu0 %v1230_v13 }
 0x2a6   : > { %v1865_v17 = vpop.eup %1864 }
 0x2a7   : > { %v1233_v35 = vsel %vm1163_vm2, %v1865_v17, 0.0 }
 0x2a8   : > { %1234 = vadd.xlane.f32.xlu1 %v1233_v35 }
 0x325   : > { %v1214_v24 = vpop.xlane.xlu0 %1213 }
 0x326   : > { %1866 = vrcp.f32 %v1214_v24 }
 0x329   : > { %v1217_v25 = vpop.xlane.xlu1 %1216 }
 0x32a   : > { %1868 = vrcp.f32 %v1217_v25  ;;  %v1220_v22 = vpop.xlane.xlu0 %1219 }
 0x32b   : > { %1870 = vrcp.f32 %v1220_v22 }
 0x32d   : > { %v1223_v46 = vpop.xlane.xlu1 %1222 }
 0x32e   : > { %1872 = vrcp.f32 %v1223_v46  ;;  %v1226_v26 = vpop.xlane.xlu0 %1225 }
 0x32f   : > { %1874 = vrcp.f32 %v1226_v26 }
 0x330   : > { %v1867_v37 = vpop.eup %1866 }
 0x331   : > { %v1244_v1 = vmul.f32 %v1867_v37, %v2317_v51  ;;  %v1229_v10 = vpop.xlane.xlu1 %1228 }
 0x332   : > { %1876 = vrcp.f32 %v1229_v10  ;;  %v1232_v36 = vpop.xlane.xlu0 %1231 }
 0x333   : > { %1585 = vmatmul.mubr.msk.f32.vlgmr.msra.gmra.mrb[24].mxu1 %vm1163_vm2, %v1244_v1  ;;  %1878 = vrcp.f32 %v1232_v36 }
 0x334   : > { %v1869_v56 = vpop.eup %1868  ;;  %1346 = vmatprep.mubr.f32.mxu1 %v1890_v23 }
 0x335   : > { %v1245_v27 = vmul.f32 %v1869_v56, %v2325_v30  ;;  %v1871_v33 = vpop.eup %1870  ;;  %v1235_v51 = vpop.xlane.xlu1 %1234 }
 0x336   : > { %v1246_v43 = vmul.f32 %v1871_v33, %v2327_v40  ;;  %1880 = vrcp.f32 %v1235_v51 }
 0x337   : > { %1586 = vmatmul.mubr.msk.f32.gmra.mrb[26].mxu1 %vm1163_vm2, %v1245_v27 }
 0x338   : > { %1352 = vmatprep.mubr.f32.mxu1 %v1890_v23  ;;  %v1873_v44 = vpop.eup %1872 }
 0x339   : > { %v1247_v19 = vmul.f32 %v1873_v44, %v2335_v62  ;;  %v1875_v57 = vpop.eup %1874 }
 0x33a   : > { %v1248_v30 = vmul.f32 %v1875_v57, %v2338_v2 }
 0x33b   : > { %1587 = vmatmul.mubr.msk.f32.gmra.mrb[28].mxu1 %vm1163_vm2, %v1246_v43 }
 0x33c   : > { %1358 = vmatprep.mubr.f32.mxu1 %v1890_v23  ;;  %v1877_v58 = vpop.eup %1876 }
 0x33d   : > { %v1249_v40 = vmul.f32 %v1877_v58, %v1861_v8  ;;  %v1879_v59 = vpop.eup %1878 }
 0x33e   : > { %v1250_v61 = vmul.f32 %v1879_v59, %v2345_v9 }
 0x33f   : > { %1588 = vmatmul.mubr.msk.f32.gmra.mrb[30].mxu1 %vm1163_vm2, %v1247_v19 }
 0x340   : > { %1364 = vmatprep.mubr.f32.mxu1 %v1890_v23  ;;  %v1881_v62 = vpop.eup %1880 }
 0x341   : > { %v1251_v63 = vmul.f32 %v1881_v62, %v1865_v17 }
 0x343   : > { %1589 = vmatmul.mubr.msk.f32.gmra.mrb[32].mxu1 %vm1163_vm2, %v1248_v30 }
 0x344   : > { %1370 = vmatprep.mubr.f32.mxu1 %v1890_v23 }
 0x347   : > { %1590 = vmatmul.mubr.msk.f32.gmra.mrb[34].mxu1 %vm1163_vm2, %v1249_v40 }
 0x348   : > { %1376 = vmatprep.mubr.f32.mxu1 %v1890_v23 }
 0x34b   : > { %1591 = vmatmul.mubr.msk.f32.gmra.mrb[36].mxu1 %vm1163_vm2, %v1250_v61 }
 0x34c   : > { %1382 = vmatprep.mubr.f32.mxu1 %v1890_v23 }
 0x34f   : > { %1592 = vmatmul.mubr.msk.f32.gmra.mrb[38].mxu1 %vm1163_vm2, %v1251_v63 }
 0x406   : > { %v1342_v2 = vpop.f32.mrb[24].mxu1 }
 0x407   : > { %v1391_v3 = vmul.f32 %v1390_v0, %v1342_v2  ;;  %v1344_v4 = vpop.f32.mrb[25].mxu1 }
 0x408   : > { %v1392_v5 = vmul.f32 %v1390_v0, %v1344_v4 }
 0x409   : > { %v1407_v6 = vadd.f32 %v1391_v3, %v2041_v28 }
 0x40a   : > { %v1408_v7 = vadd.f32 %v1392_v5, %v2018_v20  ;;  %v1348_v8 = vpop.f32.mrb[26].mxu1 }
 0x40b   : > { %1423 = vst [vmem:[%s2374_s9] sm:$0xff] %v1407_v6  ;;  %v1393_v9 = vmul.f32 %v1390_v0, %v1348_v8  ;;  %v1350_v11 = vpop.f32.mrb[27].mxu1 }
 0x40c   : > { %1424 = vst [vmem:[%s2374_s9 + $0x8] sm:$0xff] %v1408_v7  ;;  %v1394_v12 = vmul.f32 %v1390_v0, %v1350_v11 }
 0x40d   : > { %v1409_v13 = vadd.f32 %v1393_v9, %v2044_v29 }
 0x40e   : > { %v1410_v14 = vadd.f32 %v1394_v12, %v2021_v21  ;;  %v1354_v15 = vpop.f32.mrb[28].mxu1 }
 0x40f   : > { %1425 = vst [vmem:[%s2374_s9 + $0x10] sm:$0xff] %v1409_v13  ;;  %v1395_v16 = vmul.f32 %v1390_v0, %v1354_v15  ;;  %v1356_v17 = vpop.f32.mrb[29].mxu1 }
 0x410   : > { %1426 = vst [vmem:[%s2374_s9 + $0x18] sm:$0xff] %v1410_v14  ;;  %v1396_v20 = vmul.f32 %v1390_v0, %v1356_v17 }
 0x411   : > { %v1411_v28 = vadd.f32 %v1395_v16, %v2073_v38 }
 0x412   : > { %v1412_v60 = vadd.f32 %v1396_v20, %v2050_v31  ;;  %v1360_v34 = vpop.f32.mrb[30].mxu1 }
 0x413   : > { %1427 = vst [vmem:[%s2374_s9 + $0x20] sm:$0xff] %v1411_v28  ;;  %v1397_v35 = vmul.f32 %v1390_v0, %v1360_v34  ;;  %v1362_v45 = vpop.f32.mrb[31].mxu1 }
 0x414   : > { %1428 = vst [vmem:[%s2374_s9 + $0x28] sm:$0xff] %v1412_v60  ;;  %v1398_v21 = vmul.f32 %v1390_v0, %v1362_v45 }
 0x415   : > { %v1413_v29 = vadd.f32 %v1397_v35, %v2077_v39 }
 0x416   : > { %v1414_v18 = vadd.f32 %v1398_v21, %v2053_v32  ;;  %v1366_v52 = vpop.f32.mrb[32].mxu1 }
 0x417   : > { %1429 = vst [vmem:[%s2374_s9 + $0x30] sm:$0xff] %v1413_v29  ;;  %v1399_v55 = vmul.f32 %v1390_v0, %v1366_v52  ;;  %v1368_v23 = vpop.f32.mrb[33].mxu1 }
 0x418   : > { %1430 = vst [vmem:[%s2374_s9 + $0x38] sm:$0xff] %v1414_v18  ;;  %v1400_v31 = vmul.f32 %v1390_v0, %v1368_v23 }
 0x419   : > { %v1415_v38 = vadd.f32 %v1399_v55, %v2104_v47 }
 0x41a   : > { %v1416_v24 = vadd.f32 %v1400_v31, %v2084_v41  ;;  %v1372_v25 = vpop.f32.mrb[34].mxu1 }
 0x41b   : > { %1431 = vst [vmem:[%s2374_s9 + $0x40] sm:$0xff] %v1415_v38  ;;  %v1401_v22 = vmul.f32 %v1390_v0, %v1372_v25  ;;  %v1374_v46 = vpop.f32.mrb[35].mxu1 }
 0x41c   : > { %1432 = vst [vmem:[%s2374_s9 + $0x48] sm:$0xff] %v1416_v24  ;;  %v1402_v32 = vmul.f32 %v1390_v0, %v1374_v46 }
 0x41d   : > { %v1417_v39 = vadd.f32 %v1401_v22, %v2107_v48 }
 0x41e   : > { %v1418_v37 = vadd.f32 %v1402_v32, %v2087_v42  ;;  %v1378_v1 = vpop.f32.mrb[36].mxu1 }
 0x41f   : > { %1433 = vst [vmem:[%s2374_s9 + $0x50] sm:$0xff] %v1417_v39  ;;  %v1403_v26 = vmul.f32 %v1390_v0, %v1378_v1  ;;  %v1380_v47 = vpop.f32.mrb[37].mxu1 }
 0x420   : > { %1434 = vst [vmem:[%s2374_s9 + $0x58] sm:$0xff] %v1418_v37  ;;  %v1404_v41 = vmul.f32 %v1390_v0, %v1380_v47 }
 0x421   : > { %v1419_v56 = vadd.f32 %v1403_v26, %v2130_v53 }
 0x422   : > { %v1420_v10 = vadd.f32 %v1404_v41, %v2111_v49  ;;  %v1384_v27 = vpop.f32.mrb[38].mxu1 }
 0x423   : > { %1435 = vst [vmem:[%s2374_s9 + $0x60] sm:$0xff] %v1419_v56  ;;  %v1405_v33 = vmul.f32 %v1390_v0, %v1384_v27  ;;  %v1386_v36 = vpop.f32.mrb[39].mxu1 }
 0x424   : > { %1436 = vst [vmem:[%s2374_s9 + $0x68] sm:$0xff] %v1420_v10  ;;  %v1406_v48 = vmul.f32 %v1390_v0, %v1386_v36 }
 0x425   : > { %v1421_v42 = vadd.f32 %v1405_v33, %v2133_v54 }
 0x426   : > { %v1422_v43 = vadd.f32 %v1406_v48, %v2114_v50 }
 0x427   : > { %1437 = vst [vmem:[%s2374_s9 + $0x70] sm:$0xff] %v1421_v42 }
 0x428   : > { %1438 = vst [vmem:[%s2374_s9 + $0x78] sm:$0xff] %v1422_v43 }
 0x429 PF: > { %s19_s29 = sadd.s32 1, %s1888_s29  }
 0x42a   : > { %p16_p4 = scmp.ge.s32.totalorder %s19_s29, 4  }
 0x42c   :  { %18 = sbr.rel (!%p16_p4) target bundleno = 2 (0x2), region = 82 }

// kernel: discriminator_forward.11
= control target key start
LH: loop header
LB: loop body
LE: loop exit
PB: predicated region body
PF: predicated region fallthrough
CT: control target
= control target key end

     0   :  { %s3006_s29 = smov 0   ;;  %s3686_s0 = inlined_call_operand.vmem [shape: f32[2,16,512], index: 0, kind: input, shape index: {}]   ;;  %s3687_s1 = inlined_call_operand.vmem [shape: bf16[512,64], index: 1, kind: input, shape index: {}]   ;;  %s3688_s2 = inlined_call_operand.vmem [shape: f32[1,64], index: 2, kind: input, shape index: {}]   ;;  %s3689_s3 = inlined_call_operand.vmem [shape: bf16[512,64], index: 3, kind: input, shape index: {}]   ;;  %s3690_s4 = inlined_call_operand.vmem [shape: f32[1,64], index: 4, kind: input, shape index: {}]   ;;  %s3691_s5 = inlined_call_operand.vmem [shape: bf16[512,512], index: 5, kind: input, shape index: {}]   ;;  %s3692_s6 = inlined_call_operand.vmem [shape: f32[1,512], index: 6, kind: input, shape index: {}]   ;;  %s3693_s7 = inlined_call_operand.<no memory space> [shape: f32[1], index: 7, kind: input, shape index: {}]   ;;  %s3694_s8 = inlined_call_operand.vmem [shape: f32[2,16,512], index: 8, kind: output, shape index: {}]  }
   0x1   :  { %13 = sst [smem:[#allocation2]] %s3693_s7 }
   0x2 LB: > { %s2324_s30 = sadd.s32 4294967295, %s2955_s29   ;;  %p2328_p0 = scmp.ge.s32.totalorder %s2955_s29, 1  ;;  %s2955_s29 = sphi %s3006_s29, %s19_s29  }
   0x3   : > { %p263_p1 = scmp.lt.s32.totalorder %s2955_s29, 3 }
   0x5   : > { %p264_p2 = pnand %p2328_p0, %p263_p1 }
   0x6   : > { %v2677_v0 = vld [vmem:[%s3687_s1 + $0x40] sm:$0xff] (!%p264_p2)   ;;  %v2681_v4 = vld [vmem:[%s3687_s1 + $0x48] sm:$0xff] (!%p264_p2)   ;;  %v2685_v8 = vld [vmem:[%s3687_s1 + $0x50] sm:$0xff] (!%p264_p2)   ;;  %p297_p3 = scmp.lt.s32.totalorder (!%p264_p2), %s2324_s30, 1  ;;  %vm1972_vm0 = vcmask (!%p264_p2), 523264   ;;  %vm2060_vm2 = vcmask (!%p264_p2), 130048  }
   0x7   : > { %267 = sbr.rel (%p264_p2) target bundleno = 1053 (0x41d), region = 52  ;;  %v2678_v1 = vld [vmem:[%s3687_s1 + $0xc0] sm:$0xff] (!%p264_p2)   ;;  %2539 = vmatprep.subr.bf16.mxu0 (!%p264_p2), %v2677_v0  ;;  %v2682_v5 = vld [vmem:[%s3687_s1 + $0xc8] sm:$0xff] (!%p264_p2)   ;;  %v2686_v9 = vld [vmem:[%s3687_s1 + $0xd0] sm:$0xff] (!%p264_p2)   ;;  %s2243_s16 = sld [smem:[#allocation2]] (!%p264_p2) }
   0x8   : > { %v2679_v2 = vld [vmem:[%s3687_s1] sm:$0xff] (!%p264_p2)   ;;  %2561 = vmatprep.subr.bf16.mxu1 (!%p264_p2), %v2678_v1  ;;  %v2683_v6 = vld [vmem:[%s3687_s1 + $0x8] sm:$0xff] (!%p264_p2)   ;;  %v2687_v10 = vld [vmem:[%s3687_s1 + $0x10] sm:$0xff] (!%p264_p2)  }
   0x9   : > { %v2680_v3 = vld [vmem:[%s3687_s1 + $0x80] sm:$0xff] (!%p264_p2)   ;;  %2540 = vmatpush3.bf16.msra.mxu0 (!%p264_p2), %v2679_v2  ;;  %v2684_v7 = vld [vmem:[%s3687_s1 + $0x88] sm:$0xff] (!%p264_p2)   ;;  %v2688_v11 = vld [vmem:[%s3687_s1 + $0x90] sm:$0xff] (!%p264_p2)  }
   0xa   : > { %2562 = vmatpush3.bf16.msra.mxu1 (!%p264_p2), %v2680_v3  ;;  %2541 = vmatprep.subr.bf16.mxu0 (!%p264_p2), %v2681_v4  ;;  %v2689_v12 = vld [vmem:[%s3687_s1 + $0x58] sm:$0xff] (!%p264_p2)   ;;  %v2693_v16 = vld [vmem:[%s3687_s1 + $0x60] sm:$0xff] (!%p264_p2)   ;;  %v2697_v20 = vld [vmem:[%s3687_s1 + $0x68] sm:$0xff] (!%p264_p2)  }
   0xb   : > { %2563 = vmatprep.subr.bf16.mxu1 (!%p264_p2), %v2682_v5  ;;  %v2690_v13 = vld [vmem:[%s3687_s1 + $0xd8] sm:$0xff] (!%p264_p2)   ;;  %v2694_v17 = vld [vmem:[%s3687_s1 + $0xe0] sm:$0xff] (!%p264_p2)   ;;  %v2698_v21 = vld [vmem:[%s3687_s1 + $0xe8] sm:$0xff] (!%p264_p2)  }
   0xc   : > { %v2691_v14 = vld [vmem:[%s3687_s1 + $0x18] sm:$0xff] (!%p264_p2)   ;;  %v2695_v18 = vld [vmem:[%s3687_s1 + $0x20] sm:$0xff] (!%p264_p2)   ;;  %v2699_v22 = vld [vmem:[%s3687_s1 + $0x28] sm:$0xff] (!%p264_p2)  }
   0xd   : > { %2542 = vmatpush3.bf16.msra.mxu0 (!%p264_p2), %v2683_v6  ;;  %v2692_v15 = vld [vmem:[%s3687_s1 + $0x98] sm:$0xff] (!%p264_p2)   ;;  %v2696_v19 = vld [vmem:[%s3687_s1 + $0xa0] sm:$0xff] (!%p264_p2)   ;;  %v2700_v23 = vld [vmem:[%s3687_s1 + $0xa8] sm:$0xff] (!%p264_p2)  }
   0xe   : > { %2564 = vmatpush3.bf16.msra.mxu1 %v2684_v7  ;;  %2543 = vmatprep.subr.bf16.mxu0 %v2685_v8  ;;  %s3696_s30 = smov (!%p297_p3, %s2324_s30), 1  ;;  %v2701_v24 = vld [vmem:[%s3687_s1 + $0x70] sm:$0xff]   ;;  %v2705_v28 = vld [vmem:[%s3687_s1 + $0x78] sm:$0xff]   ;;  %v2709_v44 = vld [vmem:[%s3689_s3 + $0x40] sm:$0xff]  }
   0xf   : > { %2565 = vmatprep.subr.bf16.mxu1 %v2686_v9  ;;  %v2702_v25 = vld [vmem:[%s3687_s1 + $0xf0] sm:$0xff]   ;;  %s2537_s20 = sshll.u32 %s3696_s30, 6  ;;  %v2706_v29 = vld [vmem:[%s3687_s1 + $0xf8] sm:$0xff]   ;;  %v2710_v45 = vld [vmem:[%s3689_s3 + $0xc0] sm:$0xff]  }
  0x10   : > { %v2703_v26 = vld [vmem:[%s3687_s1 + $0x30] sm:$0xff]   ;;  %s3116_s9 = scalar_lea.vmem %s3686_s0, %s2537_s20  ;;  %v2707_v30 = vld [vmem:[%s3687_s1 + $0x38] sm:$0xff]   ;;  %v2711_v46 = vld [vmem:[%s3689_s3] sm:$0xff]   ;;  %s3665_s19 = scalar_lea.vmem %s3694_s8, %s2537_s20 }
  0x11   : > { %2544 = vmatpush3.bf16.msra.mxu0 %v2687_v10  ;;  %v2704_v27 = vld [vmem:[%s3687_s1 + $0xb0] sm:$0xff]   ;;  %v2708_v31 = vld [vmem:[%s3687_s1 + $0xb8] sm:$0xff]   ;;  %v309_v32 = vld [vmem:[%s3116_s9 + $0x8] sm:$0xff] }
  0x12   : > { %2566 = vmatpush3.bf16.msra.mxu1 %v2688_v11  ;;  %2545 = vmatprep.subr.bf16.mxu0 %v2689_v12  ;;  %v313_v33 = vld [vmem:[%s3116_s9 + $0x28] sm:$0xff]  ;;  %v311_v34 = vld [vmem:[%s3116_s9 + $0x18] sm:$0xff]  ;;  %v308_v37 = vld [vmem:[%s3116_s9] sm:$0xff] }
  0x13   : > { %2567 = vmatprep.subr.bf16.mxu1 %v2690_v13  ;;  %v3127_v35 = vpack.c.bf16 %v313_v33, %v309_v32  ;;  %v315_v36 = vld [vmem:[%s3116_s9 + $0x38] sm:$0xff]  ;;  %v312_v38 = vld [vmem:[%s3116_s9 + $0x20] sm:$0xff]  ;;  %v310_v41 = vld [vmem:[%s3116_s9 + $0x10] sm:$0xff] }
  0x14   : > { %v3132_v39 = vpack.c.bf16 %v315_v36, %v311_v34  ;;  %v3134_v40 = vpack.c.bf16 %v312_v38, %v308_v37  ;;  %v314_v42 = vld [vmem:[%s3116_s9 + $0x30] sm:$0xff]  ;;  %v2712_v47 = vld [vmem:[%s3689_s3 + $0x80] sm:$0xff]   ;;  %v2713_v48 = vld [vmem:[%s3689_s3 + $0x48] sm:$0xff]  }
  0x15   : > { %2546 = vmatpush3.bf16.msra.mxu0 %v2691_v14  ;;  %615 = vmatprep.mubr.bf16.mxu0 %v3127_v35  ;;  %v3139_v43 = vpack.c.bf16 %v314_v42, %v310_v41  ;;  %v2714_v49 = vld [vmem:[%s3689_s3 + $0xc8] sm:$0xff]   ;;  %v2717_v52 = vld [vmem:[%s3689_s3 + $0x50] sm:$0xff]   ;;  %v2721_v56 = vld [vmem:[%s3689_s3 + $0x58] sm:$0xff]  }
  0x16   : > { %2568 = vmatpush3.bf16.msra.mxu1 %v2692_v15  ;;  %2547 = vmatprep.subr.bf16.mxu0 %v2693_v16  ;;  %v2715_v50 = vld [vmem:[%s3689_s3 + $0x8] sm:$0xff]   ;;  %v2718_v53 = vld [vmem:[%s3689_s3 + $0xd0] sm:$0xff]   ;;  %v2722_v57 = vld [vmem:[%s3689_s3 + $0xd8] sm:$0xff]  }
  0x17   : > { %2569 = vmatprep.subr.bf16.mxu1 %v2694_v17  ;;  %656 = vmatprep.mubr.bf16.mxu1 %v3132_v39  ;;  %v2716_v51 = vld [vmem:[%s3689_s3 + $0x88] sm:$0xff]   ;;  %v2719_v54 = vld [vmem:[%s3689_s3 + $0x10] sm:$0xff]   ;;  %v2723_v58 = vld [vmem:[%s3689_s3 + $0x18] sm:$0xff]  }
  0x18   : > { %v2720_v55 = vld [vmem:[%s3689_s3 + $0x90] sm:$0xff]   ;;  %v2724_v59 = vld [vmem:[%s3689_s3 + $0x98] sm:$0xff]   ;;  %v2725_v60 = vld [vmem:[%s3689_s3 + $0x60] sm:$0xff]  }
  0x19   : > { %2548 = vmatpush3.bf16.msra.mxu0 %v2695_v18  ;;  %v2726_v61 = vld [vmem:[%s3689_s3 + $0xe0] sm:$0xff]   ;;  %v2729_v0 = vld [vmem:[%s3689_s3 + $0x68] sm:$0xff]   ;;  %v2733_v4 = vld [vmem:[%s3689_s3 + $0x70] sm:$0xff]  }
  0x1a   : > { %2570 = vmatpush3.bf16.msra.mxu1 %v2696_v19  ;;  %2549 = vmatprep.subr.bf16.mxu0 %v2697_v20  ;;  %v2727_v62 = vld [vmem:[%s3689_s3 + $0x20] sm:$0xff]   ;;  %v2730_v1 = vld [vmem:[%s3689_s3 + $0xe8] sm:$0xff]   ;;  %v2734_v5 = vld [vmem:[%s3689_s3 + $0xf0] sm:$0xff]  }
  0x1b   : > { %2571 = vmatprep.subr.bf16.mxu1 %v2698_v21  ;;  %v2728_v63 = vld [vmem:[%s3689_s3 + $0xa0] sm:$0xff]   ;;  %v2731_v2 = vld [vmem:[%s3689_s3 + $0x28] sm:$0xff]   ;;  %v2735_v6 = vld [vmem:[%s3689_s3 + $0x30] sm:$0xff]  }
  0x1c   : > { %v2732_v3 = vld [vmem:[%s3689_s3 + $0xa8] sm:$0xff]   ;;  %v2736_v7 = vld [vmem:[%s3689_s3 + $0xb0] sm:$0xff]   ;;  %v2737_v8 = vld [vmem:[%s3689_s3 + $0x78] sm:$0xff]  }
  0x1d   : > { %2550 = vmatpush3.bf16.msra.mxu0 %v2699_v22  ;;  %v2738_v9 = vld [vmem:[%s3689_s3 + $0xf8] sm:$0xff]   ;;  %v2741_v12 = vld [vmem:[%s3691_s5] ss:$16 sps:$4 sm:$0xff]   ;;  %v2743_v13 = vld [vmem:[%s3691_s5 + $0x4] ss:$16 sps:$4 sm:$0xff]  }
  0x1e   : > { %2572 = vmatpush3.bf16.msra.mxu1 %v2700_v23  ;;  %2551 = vmatprep.subr.bf16.mxu0 %v2701_v24  ;;  %v2739_v10 = vld [vmem:[%s3689_s3 + $0x38] sm:$0xff]   ;;  %v2746_v14 = vld [vmem:[%s3691_s5 + $0x24] ss:$16 sps:$4 sm:$0xff]   ;;  %v2744_v15 = vld [vmem:[%s3691_s5 + $0x20] ss:$16 sps:$4 sm:$0xff]  }
  0x1f   : > { %2573 = vmatprep.subr.bf16.mxu1 %v2702_v25  ;;  %v2740_v11 = vld [vmem:[%s3689_s3 + $0xb8] sm:$0xff]   ;;  %v2749_v16 = vld [vmem:[%s3691_s5 + $0x44] ss:$16 sps:$4 sm:$0xff]   ;;  %v2747_v17 = vld [vmem:[%s3691_s5 + $0x40] ss:$16 sps:$4 sm:$0xff]  }
  0x20   : > { %v2752_v18 = vld [vmem:[%s3691_s5 + $0x64] ss:$16 sps:$4 sm:$0xff]   ;;  %v2750_v19 = vld [vmem:[%s3691_s5 + $0x60] ss:$16 sps:$4 sm:$0xff]   ;;  %vm2639_vm1 = vmpackc.low %vm1972_vm0, %vm1972_vm0 }
  0x21   : > { %2552 = vmatpush3.bf16.msra.mxu0 %v2703_v26  ;;  %v2755_v20 = vld [vmem:[%s3691_s5 + $0x84] ss:$16 sps:$4 sm:$0xff]   ;;  %v2753_v21 = vld [vmem:[%s3691_s5 + $0x80] ss:$16 sps:$4 sm:$0xff]  }
  0x22   : > { %2574 = vmatpush3.bf16.msra.mxu1 %v2704_v27  ;;  %2553 = vmatprep.subr.bf16.mxu0 %v2705_v28  ;;  %v2758_v22 = vld [vmem:[%s3691_s5 + $0xa4] ss:$16 sps:$4 sm:$0xff]   ;;  %v2756_v23 = vld [vmem:[%s3691_s5 + $0xa0] ss:$16 sps:$4 sm:$0xff]  }
  0x23   : > { %2575 = vmatprep.subr.bf16.mxu1 %v2706_v29  ;;  %v2761_v24 = vld [vmem:[%s3691_s5 + $0xc4] ss:$16 sps:$4 sm:$0xff]   ;;  %v2759_v25 = vld [vmem:[%s3691_s5 + $0xc0] ss:$16 sps:$4 sm:$0xff]  }
  0x24   : > { %v2764_v26 = vld [vmem:[%s3691_s5 + $0xe4] ss:$16 sps:$4 sm:$0xff]   ;;  %v2762_v27 = vld [vmem:[%s3691_s5 + $0xe0] ss:$16 sps:$4 sm:$0xff]  }
  0x25   : > { %2554 = vmatpush3.bf16.msra.mxu0 %v2707_v30  ;;  %v2767_v28 = vld [vmem:[%s3691_s5 + $0x104] ss:$16 sps:$4 sm:$0xff]   ;;  %v2765_v29 = vld [vmem:[%s3691_s5 + $0x100] ss:$16 sps:$4 sm:$0xff]  }
  0x26   : > { %2576 = vmatpush3.bf16.msra.mxu1 %v2708_v31  ;;  %2583 = vmatprep.subr.bf16.mxu0 %v2709_v44  ;;  %v2770_v30 = vld [vmem:[%s3691_s5 + $0x124] ss:$16 sps:$4 sm:$0xff]   ;;  %v2768_v31 = vld [vmem:[%s3691_s5 + $0x120] ss:$16 sps:$4 sm:$0xff]  }
  0x27   : > { %2605 = vmatprep.subr.bf16.mxu1 %v2710_v45  ;;  %v2773_v32 = vld [vmem:[%s3691_s5 + $0x144] ss:$16 sps:$4 sm:$0xff]   ;;  %v2771_v33 = vld [vmem:[%s3691_s5 + $0x140] ss:$16 sps:$4 sm:$0xff]  }
  0x28   : > { %616 = vmatmul.mubr.bf16.vlgmr.msra.gmra.mrb[0].mxu0 %v3134_v40  ;;  %v2776_v34 = vld [vmem:[%s3691_s5 + $0x164] ss:$16 sps:$4 sm:$0xff]   ;;  %v2777_v37 = vld [vmem:[%s3691_s5 + $0x180] ss:$16 sps:$4 sm:$0xff]  }
  0x29   : > { %657 = vmatmul.mubr.bf16.vlgmr.msra.gmra.mrb[0].mxu1 %v3139_v43  ;;  %960 = vmatprep.mubr.bf16.mxu0 %v3127_v35  ;;  %v2779_v36 = vld [vmem:[%s3691_s5 + $0x184] ss:$16 sps:$4 sm:$0xff]   ;;  %v2780_v41 = vld [vmem:[%s3691_s5 + $0x1a0] ss:$16 sps:$4 sm:$0xff]  }
  0x2a   : > { %2584 = vmatpush3.bf16.msra.mxu0 %v2711_v46  ;;  %1001 = vmatprep.mubr.bf16.mxu1 %v3132_v39  ;;  %v2782_v38 = vld [vmem:[%s3691_s5 + $0x1a4] ss:$16 sps:$4 sm:$0xff]   ;;  %v2783_v44 = vld [vmem:[%s3691_s5 + $0x1c0] ss:$16 sps:$4 sm:$0xff]  }
  0x2b   : > { %2606 = vmatpush3.bf16.msra.mxu1 %v2712_v47  ;;  %2585 = vmatprep.subr.bf16.mxu0 %v2713_v48  ;;  %v2785_v42 = vld [vmem:[%s3691_s5 + $0x1c4] ss:$16 sps:$4 sm:$0xff]   ;;  %v2786_v46 = vld [vmem:[%s3691_s5 + $0x1e0] ss:$16 sps:$4 sm:$0xff]  }
  0x2c   : > { %2607 = vmatprep.subr.bf16.mxu1 %v2714_v49  ;;  %v2788_v45 = vld [vmem:[%s3691_s5 + $0x1e4] ss:$16 sps:$4 sm:$0xff]   ;;  %v2789_v48 = vld [vmem:[%s3691_s5 + $0x200] ss:$16 sps:$4 sm:$0xff]  }
  0x2d   : > { %v2791_v47 = vld [vmem:[%s3691_s5 + $0x204] ss:$16 sps:$4 sm:$0xff]  }
  0x2e   : > { %2586 = vmatpush3.bf16.msra.mxu0 %v2715_v50  ;;  %v2794_v49 = vld [vmem:[%s3691_s5 + $0x224] ss:$16 sps:$4 sm:$0xff]   ;;  %v2792_v50 = vld [vmem:[%s3691_s5 + $0x220] ss:$16 sps:$4 sm:$0xff]  }
  0x2f   : > { %2608 = vmatpush3.bf16.msra.mxu1 %v2716_v51  ;;  %2587 = vmatprep.subr.bf16.mxu0 %v2717_v52  ;;  %v2797_v51 = vld [vmem:[%s3691_s5 + $0x244] ss:$16 sps:$4 sm:$0xff]   ;;  %v2795_v52 = vld [vmem:[%s3691_s5 + $0x240] ss:$16 sps:$4 sm:$0xff]  }
  0x30   : > { %2609 = vmatprep.subr.bf16.mxu1 %v2718_v53  ;;  %v2800_v53 = vld [vmem:[%s3691_s5 + $0x264] ss:$16 sps:$4 sm:$0xff]  }
  0x32   : > { %2588 = vmatpush3.bf16.msra.mxu0 %v2719_v54  ;;  %v2798_v54 = vld [vmem:[%s3691_s5 + $0x260] ss:$16 sps:$4 sm:$0xff]  }
  0x33   : > { %2610 = vmatpush3.bf16.msra.mxu1 %v2720_v55  ;;  %2589 = vmatprep.subr.bf16.mxu0 %v2721_v56  ;;  %v2803_v55 = vld [vmem:[%s3691_s5 + $0x284] ss:$16 sps:$4 sm:$0xff]   ;;  %v2801_v56 = vld [vmem:[%s3691_s5 + $0x280] ss:$16 sps:$4 sm:$0xff]  }
  0x34   : > { %2611 = vmatprep.subr.bf16.mxu1 %v2722_v57  ;;  %v2806_v57 = vld [vmem:[%s3691_s5 + $0x2a4] ss:$16 sps:$4 sm:$0xff]  }
  0x36   : > { %2590 = vmatpush3.bf16.msra.mxu0 %v2723_v58  ;;  %v2804_v58 = vld [vmem:[%s3691_s5 + $0x2a0] ss:$16 sps:$4 sm:$0xff]  }
  0x37   : > { %2612 = vmatpush3.bf16.msra.mxu1 %v2724_v59  ;;  %2591 = vmatprep.subr.bf16.mxu0 %v2725_v60  ;;  %v2809_v59 = vld [vmem:[%s3691_s5 + $0x2c4] ss:$16 sps:$4 sm:$0xff]   ;;  %v2807_v60 = vld [vmem:[%s3691_s5 + $0x2c0] ss:$16 sps:$4 sm:$0xff]  }
  0x38   : > { %2613 = vmatprep.subr.bf16.mxu1 %v2726_v61  ;;  %v2812_v61 = vld [vmem:[%s3691_s5 + $0x2e4] ss:$16 sps:$4 sm:$0xff]  }
  0x3a   : > { %2592 = vmatpush3.bf16.msra.mxu0 %v2727_v62  ;;  %v2810_v62 = vld [vmem:[%s3691_s5 + $0x2e0] ss:$16 sps:$4 sm:$0xff]  }
  0x3b   : > { %2614 = vmatpush3.bf16.msra.mxu1 %v2728_v63  ;;  %2593 = vmatprep.subr.bf16.mxu0 %v2729_v0  ;;  %v2815_v63 = vld [vmem:[%s3691_s5 + $0x304] ss:$16 sps:$4 sm:$0xff]   ;;  %v2813_v0 = vld [vmem:[%s3691_s5 + $0x300] ss:$16 sps:$4 sm:$0xff]  }
  0x3c   : > { %2615 = vmatprep.subr.bf16.mxu1 %v2730_v1  ;;  %v2818_v1 = vld [vmem:[%s3691_s5 + $0x324] ss:$16 sps:$4 sm:$0xff]  }
  0x3e   : > { %2594 = vmatpush3.bf16.msra.mxu0 %v2731_v2  ;;  %v2816_v2 = vld [vmem:[%s3691_s5 + $0x320] ss:$16 sps:$4 sm:$0xff]  }
  0x3f   : > { %2616 = vmatpush3.bf16.msra.mxu1 %v2732_v3  ;;  %2595 = vmatprep.subr.bf16.mxu0 %v2733_v4  ;;  %v2821_v3 = vld [vmem:[%s3691_s5 + $0x344] ss:$16 sps:$4 sm:$0xff]   ;;  %v2819_v4 = vld [vmem:[%s3691_s5 + $0x340] ss:$16 sps:$4 sm:$0xff]  }
  0x40   : > { %2617 = vmatprep.subr.bf16.mxu1 %v2734_v5  ;;  %v2824_v5 = vld [vmem:[%s3691_s5 + $0x364] ss:$16 sps:$4 sm:$0xff]  }
  0x42   : > { %2596 = vmatpush3.bf16.msra.mxu0 %v2735_v6  ;;  %v2837_v6 = vld [vmem:[%s3691_s5 + $0x8] ss:$16 sps:$4 sm:$0xff]  }
  0x43   : > { %2618 = vmatpush3.bf16.msra.mxu1 %v2736_v7  ;;  %2597 = vmatprep.subr.bf16.mxu0 %v2737_v8  ;;  %v2839_v7 = vld [vmem:[%s3691_s5 + $0xc] ss:$16 sps:$4 sm:$0xff]  }
  0x44   : > { %2619 = vmatprep.subr.bf16.mxu1 %v2738_v9  ;;  %v2842_v8 = vld [vmem:[%s3691_s5 + $0x2c] ss:$16 sps:$4 sm:$0xff]   ;;  %v2822_v9 = vld [vmem:[%s3691_s5 + $0x360] ss:$16 sps:$4 sm:$0xff]  }
  0x46   : > { %2598 = vmatpush3.bf16.msra.mxu0 %v2739_v10  ;;  %v2827_v10 = vld [vmem:[%s3691_s5 + $0x384] ss:$16 sps:$4 sm:$0xff]  }
  0x47   : > { %2620 = vmatpush3.bf16.msra.mxu1 %v2740_v11  ;;  %1800 = vmatprep.subr.bf16.mxu0 %v2743_v13  ;;  %v2840_v11 = vld [vmem:[%s3691_s5 + $0x28] ss:$16 sps:$4 sm:$0xff]   ;;  %v2825_v13 = vld [vmem:[%s3691_s5 + $0x380] ss:$16 sps:$4 sm:$0xff]  }
  0x48   : > { %1886 = vmatprep.subr.bf16.mxu1 %v2839_v7  ;;  %v2897_v7 = vld [vmem:[%s3691_s5 + $0x288] ss:$16 sps:$4 sm:$0xff]  }
  0x49   : > { %961 = vmatmul.mubr.bf16.vlgmr.msra.gmra.mrb[4].mxu0 %v3134_v40 }
  0x4a   : > { %1002 = vmatmul.mubr.bf16.vlgmr.msra.gmra.mrb[4].mxu1 %v3139_v43  ;;  %1801 = vmatpush1.bf16.msra.mxu0 %v2741_v12  ;;  %v2845_v12 = vld [vmem:[%s3691_s5 + $0x4c] ss:$16 sps:$4 sm:$0xff]  }
  0x4b   : > { %1802 = vmatprep.subr.bf16.mxu0 %v2746_v14  ;;  %1832 = vmatprep.mubr.bf16.mxu0 %v3127_v35  ;;  %v2830_v14 = vld [vmem:[%s3691_s5 + $0x3a4] ss:$16 sps:$4 sm:$0xff]  }
  0x4c   : > { %1918 = vmatprep.mubr.bf16.mxu1 %v3127_v35  ;;  %v2774_v35 = vld [vmem:[%s3691_s5 + $0x160] ss:$16 sps:$4 sm:$0xff]   ;;  %1887 = vmatpush1.bf16.msra.mxu1 %v2837_v6 }
  0x4d   : > { %1888 = vmatprep.subr.bf16.mxu1 %v2842_v8 }
  0x4e   : > { %1803 = vmatpush1.bf16.msra.mxu0 %v2744_v15  ;;  %v2843_v15 = vld [vmem:[%s3691_s5 + $0x48] ss:$16 sps:$4 sm:$0xff]  }
  0x4f   : > { %1804 = vmatprep.subr.bf16.mxu0 %v2749_v16  ;;  %v2848_v16 = vld [vmem:[%s3691_s5 + $0x6c] ss:$16 sps:$4 sm:$0xff]  }
  0x50   : > { %1889 = vmatpush1.bf16.msra.mxu1 %v2840_v11 }
  0x51   : > { %1890 = vmatprep.subr.bf16.mxu1 %v2845_v12  ;;  %v2900_v12 = vld [vmem:[%s3691_s5 + $0x2a8] ss:$16 sps:$4 sm:$0xff]  }
  0x52   : > { %1805 = vmatpush1.bf16.msra.mxu0 %v2747_v17  ;;  %v2828_v17 = vld [vmem:[%s3691_s5 + $0x3a0] ss:$16 sps:$4 sm:$0xff]  }
  0x53   : > { %1806 = vmatprep.subr.bf16.mxu0 %v2752_v18  ;;  %v2833_v18 = vld [vmem:[%s3691_s5 + $0x3c4] ss:$16 sps:$4 sm:$0xff]  }
  0x54   : > { %1891 = vmatpush1.bf16.msra.mxu1 %v2843_v15  ;;  %v2908_v15 = vld [vmem:[%s3691_s5 + $0x2ec] ss:$16 sps:$4 sm:$0xff]  }
  0x55   : > { %1892 = vmatprep.subr.bf16.mxu1 %v2848_v16  ;;  %v2906_v16 = vld [vmem:[%s3691_s5 + $0x2e8] ss:$16 sps:$4 sm:$0xff]  }
  0x56   : > { %1807 = vmatpush1.bf16.msra.mxu0 %v2750_v19  ;;  %v2846_v19 = vld [vmem:[%s3691_s5 + $0x68] ss:$16 sps:$4 sm:$0xff]  }
  0x57   : > { %1808 = vmatprep.subr.bf16.mxu0 %v2755_v20  ;;  %v2851_v20 = vld [vmem:[%s3691_s5 + $0x8c] ss:$16 sps:$4 sm:$0xff]  }
  0x58   : > { %1893 = vmatpush1.bf16.msra.mxu1 %v2846_v19  ;;  %v2914_v19 = vld [vmem:[%s3691_s5 + $0x32c] ss:$16 sps:$4 sm:$0xff]  }
  0x59   : > { %1894 = vmatprep.subr.bf16.mxu1 %v2851_v20  ;;  %v2912_v20 = vld [vmem:[%s3691_s5 + $0x328] ss:$16 sps:$4 sm:$0xff]  }
  0x5a   : > { %1809 = vmatpush1.bf16.msra.mxu0 %v2753_v21  ;;  %v2831_v21 = vld [vmem:[%s3691_s5 + $0x3c0] ss:$16 sps:$4 sm:$0xff]  }
  0x5b   : > { %1810 = vmatprep.subr.bf16.mxu0 %v2758_v22  ;;  %v2836_v22 = vld [vmem:[%s3691_s5 + $0x3e4] ss:$16 sps:$4 sm:$0xff]  }
  0x5e   : > { %1811 = vmatpush1.bf16.msra.mxu0 %v2756_v23  ;;  %v2849_v23 = vld [vmem:[%s3691_s5 + $0x88] ss:$16 sps:$4 sm:$0xff]  }
  0x5f   : > { %1812 = vmatprep.subr.bf16.mxu0 %v2761_v24  ;;  %v2854_v24 = vld [vmem:[%s3691_s5 + $0xac] ss:$16 sps:$4 sm:$0xff]   ;;  %1895 = vmatpush1.bf16.msra.mxu1 %v2849_v23 }
  0x60   : > { %1896 = vmatprep.subr.bf16.mxu1 %v2854_v24  ;;  %v2920_v23 = vld [vmem:[%s3691_s5 + $0x36c] ss:$16 sps:$4 sm:$0xff]   ;;  %v2918_v24 = vld [vmem:[%s3691_s5 + $0x368] ss:$16 sps:$4 sm:$0xff]  }
  0x62   : > { %1813 = vmatpush1.bf16.msra.mxu0 %v2759_v25  ;;  %v2834_v25 = vld [vmem:[%s3691_s5 + $0x3e0] ss:$16 sps:$4 sm:$0xff]  }
  0x63   : > { %1814 = vmatprep.subr.bf16.mxu0 %v2764_v26  ;;  %v2852_v26 = vld [vmem:[%s3691_s5 + $0xa8] ss:$16 sps:$4 sm:$0xff]  }
  0x64   : > { %1897 = vmatpush1.bf16.msra.mxu1 %v2852_v26  ;;  %v2923_v26 = vld [vmem:[%s3691_s5 + $0x38c] ss:$16 sps:$4 sm:$0xff]  }
  0x66   : > { %1815 = vmatpush1.bf16.msra.mxu0 %v2762_v27  ;;  %v2857_v27 = vld [vmem:[%s3691_s5 + $0xcc] ss:$16 sps:$4 sm:$0xff]  }
  0x67   : > { %1816 = vmatprep.subr.bf16.mxu0 %v2767_v28  ;;  %v2855_v28 = vld [vmem:[%s3691_s5 + $0xc8] ss:$16 sps:$4 sm:$0xff]   ;;  %1898 = vmatprep.subr.bf16.mxu1 %v2857_v27 }
  0x68   : > { %1899 = vmatpush1.bf16.msra.mxu1 %v2855_v28  ;;  %v2366_v28 = vld [vmem:[%s3690_s4] ss:$0 sm:$0xff] }
  0x6a   : > { %1817 = vmatpush1.bf16.msra.mxu0 %v2765_v29  ;;  %v2860_v29 = vld [vmem:[%s3691_s5 + $0xec] ss:$16 sps:$4 sm:$0xff]  }
  0x6b   : > { %1818 = vmatprep.subr.bf16.mxu0 %v2770_v30  ;;  %v2858_v30 = vld [vmem:[%s3691_s5 + $0xe8] ss:$16 sps:$4 sm:$0xff]   ;;  %1900 = vmatprep.subr.bf16.mxu1 %v2860_v29 }
  0x6c   : > { %1901 = vmatpush1.bf16.msra.mxu1 %v2858_v30 }
  0x6e   : > { %1819 = vmatpush1.bf16.msra.mxu0 %v2768_v31  ;;  %v2863_v31 = vld [vmem:[%s3691_s5 + $0x10c] ss:$16 sps:$4 sm:$0xff]  }
  0x6f   : > { %1820 = vmatprep.subr.bf16.mxu0 %v2773_v32  ;;  %v2861_v32 = vld [vmem:[%s3691_s5 + $0x108] ss:$16 sps:$4 sm:$0xff]   ;;  %1902 = vmatprep.subr.bf16.mxu1 %v2863_v31 }
  0x70   : > { %1903 = vmatpush1.bf16.msra.mxu1 %v2861_v32 }
  0x72   : > { %1821 = vmatpush1.bf16.msra.mxu0 %v2771_v33  ;;  %v2866_v33 = vld [vmem:[%s3691_s5 + $0x12c] ss:$16 sps:$4 sm:$0xff]  }
  0x73   : > { %1822 = vmatprep.subr.bf16.mxu0 %v2776_v34  ;;  %v2864_v34 = vld [vmem:[%s3691_s5 + $0x128] ss:$16 sps:$4 sm:$0xff]   ;;  %1904 = vmatprep.subr.bf16.mxu1 %v2866_v33 }
  0x74   : > { %1905 = vmatpush1.bf16.msra.mxu1 %v2864_v34 }
  0x76   : > { %1823 = vmatpush1.bf16.msra.mxu0 %v2774_v35  ;;  %v2869_v35 = vld [vmem:[%s3691_s5 + $0x14c] ss:$16 sps:$4 sm:$0xff]  }
  0x77   : > { %1824 = vmatprep.subr.bf16.mxu0 %v2779_v36  ;;  %v2867_v36 = vld [vmem:[%s3691_s5 + $0x148] ss:$16 sps:$4 sm:$0xff]   ;;  %1906 = vmatprep.subr.bf16.mxu1 %v2869_v35 }
  0x78   : > { %1907 = vmatpush1.bf16.msra.mxu1 %v2867_v36  ;;  %v2921_v36 = vld [vmem:[%s3691_s5 + $0x388] ss:$16 sps:$4 sm:$0xff]  }
  0x7a   : > { %1825 = vmatpush1.bf16.msra.mxu0 %v2777_v37  ;;  %v2872_v37 = vld [vmem:[%s3691_s5 + $0x16c] ss:$16 sps:$4 sm:$0xff]  }
  0x7b   : > { %1826 = vmatprep.subr.bf16.mxu0 %v2782_v38  ;;  %v2870_v38 = vld [vmem:[%s3691_s5 + $0x168] ss:$16 sps:$4 sm:$0xff]   ;;  %1908 = vmatprep.subr.bf16.mxu1 %v2872_v37 }
  0x7c   : > { %1909 = vmatpush1.bf16.msra.mxu1 %v2870_v38 }
  0x7e   : > { %1827 = vmatpush1.bf16.msra.mxu0 %v2780_v41  ;;  %v2875_v41 = vld [vmem:[%s3691_s5 + $0x18c] ss:$16 sps:$4 sm:$0xff]  }
  0x7f   : > { %1828 = vmatprep.subr.bf16.mxu0 %v2785_v42  ;;  %v2873_v42 = vld [vmem:[%s3691_s5 + $0x188] ss:$16 sps:$4 sm:$0xff]   ;;  %1910 = vmatprep.subr.bf16.mxu1 %v2875_v41 }
  0x80   : > { %1911 = vmatpush1.bf16.msra.mxu1 %v2873_v42  ;;  %v2926_v42 = vld [vmem:[%s3691_s5 + $0x3ac] ss:$16 sps:$4 sm:$0xff]  }
  0x82   : > { %1829 = vmatpush1.bf16.msra.mxu0 %v2783_v44  ;;  %v2878_v44 = vld [vmem:[%s3691_s5 + $0x1ac] ss:$16 sps:$4 sm:$0xff]  }
  0x83   : > { %1830 = vmatprep.subr.bf16.mxu0 %v2788_v45  ;;  %v2876_v45 = vld [vmem:[%s3691_s5 + $0x1a8] ss:$16 sps:$4 sm:$0xff]   ;;  %1912 = vmatprep.subr.bf16.mxu1 %v2878_v44 }
  0x84   : > { %1913 = vmatpush1.bf16.msra.mxu1 %v2876_v45 }
  0x86   : > { %1831 = vmatpush1.bf16.msra.mxu0 %v2786_v46  ;;  %v2881_v46 = vld [vmem:[%s3691_s5 + $0x1cc] ss:$16 sps:$4 sm:$0xff]  }
  0x87   : > { %1843 = vmatprep.subr.bf16.mxu0 %v2791_v47  ;;  %v2879_v47 = vld [vmem:[%s3691_s5 + $0x1c8] ss:$16 sps:$4 sm:$0xff]   ;;  %1914 = vmatprep.subr.bf16.mxu1 %v2881_v46 }
  0x88   : > { %1915 = vmatpush1.bf16.msra.mxu1 %v2879_v47  ;;  %v2924_v47 = vld [vmem:[%s3691_s5 + $0x3a8] ss:$16 sps:$4 sm:$0xff]  }
  0x89   : > { %1833 = vmatmul.mubr.bf16.vlgmr.msra.gmra.mrb[8].mxu0 %v3134_v40 }
  0x8a   : > { %1844 = vmatpush1.bf16.msra.mxu0 %v2789_v48  ;;  %1875 = vmatprep.mubr.bf16.mxu0 %v3132_v39  ;;  %v2884_v48 = vld [vmem:[%s3691_s5 + $0x1ec] ss:$16 sps:$4 sm:$0xff]  }
  0x8b   : > { %1845 = vmatprep.subr.bf16.mxu0 %v2794_v49  ;;  %v2882_v49 = vld [vmem:[%s3691_s5 + $0x1e8] ss:$16 sps:$4 sm:$0xff]   ;;  %1916 = vmatprep.subr.bf16.mxu1 %v2884_v48 }
  0x8c   : > { %1917 = vmatpush1.bf16.msra.mxu1 %v2882_v49  ;;  %v2929_v49 = vld [vmem:[%s3691_s5 + $0x3cc] ss:$16 sps:$4 sm:$0xff]  }
  0x8e   : > { %1846 = vmatpush1.bf16.msra.mxu0 %v2792_v50  ;;  %v2887_v50 = vld [vmem:[%s3691_s5 + $0x20c] ss:$16 sps:$4 sm:$0xff]  }
  0x8f   : > { %1847 = vmatprep.subr.bf16.mxu0 %v2797_v51  ;;  %v2885_v51 = vld [vmem:[%s3691_s5 + $0x208] ss:$16 sps:$4 sm:$0xff]   ;;  %1929 = vmatprep.subr.bf16.mxu1 %v2887_v50 }
  0x90   : > { %1919 = vmatmul.mubr.bf16.vlgmr.msra.gmra.mrb[8].mxu1 %v3134_v40  ;;  %v2896_v40 = vld [vmem:[%s3691_s5 + $0x26c] ss:$16 sps:$4 sm:$0xff]  }
  0x91   : > { %1930 = vmatpush1.bf16.msra.mxu1 %v2885_v51  ;;  %1961 = vmatprep.mubr.bf16.mxu1 %v3132_v39  ;;  %v2333_v39 = vld [vmem:[%s3688_s2] ss:$0 sm:$0xff]  ;;  %v2927_v51 = vld [vmem:[%s3691_s5 + $0x3c8] ss:$16 sps:$4 sm:$0xff]  }
  0x92   : > { %1848 = vmatpush1.bf16.msra.mxu0 %v2795_v52  ;;  %v2890_v52 = vld [vmem:[%s3691_s5 + $0x22c] ss:$16 sps:$4 sm:$0xff]  }
  0x93   : > { %1849 = vmatprep.subr.bf16.mxu0 %v2800_v53  ;;  %v2888_v53 = vld [vmem:[%s3691_s5 + $0x228] ss:$16 sps:$4 sm:$0xff]   ;;  %1931 = vmatprep.subr.bf16.mxu1 %v2890_v52  ;;  %v2932_v52 = vld [vmem:[%s3691_s5 + $0x3ec] ss:$16 sps:$4 sm:$0xff]  }
  0x95   : > { %1932 = vmatpush1.bf16.msra.mxu1 %v2888_v53  ;;  %v2930_v53 = vld [vmem:[%s3691_s5 + $0x3e8] ss:$16 sps:$4 sm:$0xff]  }
  0x96   : > { %1850 = vmatpush1.bf16.msra.mxu0 %v2798_v54  ;;  %v2893_v54 = vld [vmem:[%s3691_s5 + $0x24c] ss:$16 sps:$4 sm:$0xff]  }
  0x97   : > { %1851 = vmatprep.subr.bf16.mxu0 %v2803_v55  ;;  %v2891_v55 = vld [vmem:[%s3691_s5 + $0x248] ss:$16 sps:$4 sm:$0xff]   ;;  %1933 = vmatprep.subr.bf16.mxu1 %v2893_v54  ;;  %v1140_v54 = vlaneseq }
  0x99   : > { %1934 = vmatpush1.bf16.msra.mxu1 %v2891_v55  ;;  %v1141_v55 = vshrl.u32 %v1140_v54, 7 }
  0x9a   : > { %1852 = vmatpush1.bf16.msra.mxu0 %v2801_v56  ;;  %1935 = vmatprep.subr.bf16.mxu1 %v2896_v40 }
  0x9b   : > { %1853 = vmatprep.subr.bf16.mxu0 %v2806_v57  ;;  %v1142_v40 = vsub.s32 0, %v1141_v55 }
  0x9e   : > { %1854 = vmatpush1.bf16.msra.mxu0 %v2804_v58 }
  0x9f   : > { %1855 = vmatprep.subr.bf16.mxu0 %v2809_v59  ;;  %v2894_v59 = vld [vmem:[%s3691_s5 + $0x268] ss:$16 sps:$4 sm:$0xff]  }
  0xa0   : > { %1936 = vmatpush1.bf16.msra.mxu1 %v2894_v59 }
  0xa2   : > { %1856 = vmatpush1.bf16.msra.mxu0 %v2807_v60 }
  0xa3   : > { %1857 = vmatprep.subr.bf16.mxu0 %v2812_v61 }
  0xa6   : > { %1858 = vmatpush1.bf16.msra.mxu0 %v2810_v62 }
  0xa7   : > { %1859 = vmatprep.subr.bf16.mxu0 %v2815_v63  ;;  %v2899_v63 = vld [vmem:[%s3691_s5 + $0x28c] ss:$16 sps:$4 sm:$0xff]  }
  0xa8   : > { %1937 = vmatprep.subr.bf16.mxu1 %v2899_v63 }
  0xa9   : > { %1938 = vmatpush1.bf16.msra.mxu1 %v2897_v7 }
  0xaa   : > { %1860 = vmatpush1.bf16.msra.mxu0 %v2813_v0 }
  0xab   : > { %1861 = vmatprep.subr.bf16.mxu0 %v2818_v1 }
  0xae   : > { %1862 = vmatpush1.bf16.msra.mxu0 %v2816_v2 }
  0xaf   : > { %1863 = vmatprep.subr.bf16.mxu0 %v2821_v3 }
  0xb2   : > { %1864 = vmatpush1.bf16.msra.mxu0 %v2819_v4 }
  0xb3   : > { %1865 = vmatprep.subr.bf16.mxu0 %v2824_v5 }
  0xb6   : > { %1866 = vmatpush1.bf16.msra.mxu0 %v2822_v9 }
  0xb7   : > { %1867 = vmatprep.subr.bf16.mxu0 %v2827_v10  ;;  %v2902_v10 = vld [vmem:[%s3691_s5 + $0x2ac] ss:$16 sps:$4 sm:$0xff]  }
  0xb8   : > { %1939 = vmatprep.subr.bf16.mxu1 %v2902_v10  ;;  %v1154_v10 = vsub.s32 3, %v1141_v55 }
  0xb9   : > { %1940 = vmatpush1.bf16.msra.mxu1 %v2900_v12 }
  0xba   : > { %1868 = vmatpush1.bf16.msra.mxu0 %v2825_v13  ;;  %v2905_v13 = vld [vmem:[%s3691_s5 + $0x2cc] ss:$16 sps:$4 sm:$0xff]  }
  0xbb   : > { %1869 = vmatprep.subr.bf16.mxu0 %v2830_v14  ;;  %v2903_v14 = vld [vmem:[%s3691_s5 + $0x2c8] ss:$16 sps:$4 sm:$0xff]   ;;  %1941 = vmatprep.subr.bf16.mxu1 %v2905_v13 }
  0xbd   : > { %1942 = vmatpush1.bf16.msra.mxu1 %v2903_v14 }
  0xbe   : > { %1870 = vmatpush1.bf16.msra.mxu0 %v2828_v17  ;;  %1943 = vmatprep.subr.bf16.mxu1 %v2908_v15  ;;  %v2911_v17 = vld [vmem:[%s3691_s5 + $0x30c] ss:$16 sps:$4 sm:$0xff]  }
  0xbf   : > { %1871 = vmatprep.subr.bf16.mxu0 %v2833_v18  ;;  %v2909_v18 = vld [vmem:[%s3691_s5 + $0x308] ss:$16 sps:$4 sm:$0xff]  }
  0xc1   : > { %1944 = vmatpush1.bf16.msra.mxu1 %v2906_v16 }
  0xc2   : > { %1872 = vmatpush1.bf16.msra.mxu0 %v2831_v21  ;;  %1945 = vmatprep.subr.bf16.mxu1 %v2911_v17  ;;  %v2917_v21 = vld [vmem:[%s3691_s5 + $0x34c] ss:$16 sps:$4 sm:$0xff]  }
  0xc3   : > { %1873 = vmatprep.subr.bf16.mxu0 %v2836_v22  ;;  %v2915_v22 = vld [vmem:[%s3691_s5 + $0x348] ss:$16 sps:$4 sm:$0xff]  }
  0xc5   : > { %1946 = vmatpush1.bf16.msra.mxu1 %v2909_v18 }
  0xc6   : > { %1874 = vmatpush1.bf16.msra.mxu0 %v2834_v25  ;;  %1947 = vmatprep.subr.bf16.mxu1 %v2914_v19 }
  0xc9   : > { %1876 = vmatmul.mubr.bf16.vlgmr.msra.gmra.mrb[8].mxu0 %v3139_v43  ;;  %1948 = vmatpush1.bf16.msra.mxu1 %v2912_v20 }
  0xca   : > { %1949 = vmatprep.subr.bf16.mxu1 %v2917_v21 }
  0xcd   : > { %1950 = vmatpush1.bf16.msra.mxu1 %v2915_v22 }
  0xce   : > { %1951 = vmatprep.subr.bf16.mxu1 %v2920_v23 }
  0xd1   : > { %1952 = vmatpush1.bf16.msra.mxu1 %v2918_v24 }
  0xd2   : > { %1953 = vmatprep.subr.bf16.mxu1 %v2923_v26 }
  0xd5   : > { %1954 = vmatpush1.bf16.msra.mxu1 %v2921_v36 }
  0xd6   : > { %1955 = vmatprep.subr.bf16.mxu1 %v2926_v42 }
  0xd9   : > { %1956 = vmatpush1.bf16.msra.mxu1 %v2924_v47 }
  0xda   : > { %1957 = vmatprep.subr.bf16.mxu1 %v2929_v49 }
  0xdd   : > { %1958 = vmatpush1.bf16.msra.mxu1 %v2927_v51  ;;  %v2941_v51 = vld [vmem:[%s3116_s9] sm:$0xff] }
  0xde   : > { %1959 = vmatprep.subr.bf16.mxu1 %v2932_v52 }
  0xe1   : > { %1960 = vmatpush1.bf16.msra.mxu1 %v2930_v53  ;;  %v2942_v53 = vld [vmem:[%s3116_s9 + $0x10] sm:$0xff] }
  0xe4   : > { %1962 = vmatmul.mubr.bf16.vlgmr.msra.gmra.mrb[8].mxu1 %v3139_v43 }
  0xfb   : > { %v2555_v56 = vpop.f32.mrb[0].mxu0 }
  0xfc   : > { %v2577_v57 = vpop.f32.mrb[0].mxu1  ;;  %v2556_v58 = vpop.f32.mrb[1].mxu0 }
  0xfd   : > { %v2557_v60 = vadd.f32 %v2556_v58, %v2555_v56  ;;  %v2578_v61 = vpop.f32.mrb[1].mxu1  ;;  %v2558_v62 = vpop.f32.mrb[2].mxu0  ;;  %v1138_v56 = vld [vmem:[%s3692_s6] sm:$0xf] }
  0xfe   : > { %v2579_v0 = vadd.f32 %v2578_v61, %v2577_v57  ;;  %v2580_v1 = vpop.f32.mrb[2].mxu1  ;;  %v2559_v2 = vpop.f32.mrb[3].mxu0  ;;  %v1146_v57 = vsub.s32 1, %v1141_v55  ;;  %v1155_v13 = vrot.slane %v1138_v56, %v1154_v10 }
  0xff   : > { %v618_v3 = vadd.f32 %v2557_v60, %v2333_v39  ;;  %v2560_v4 = vadd.f32 %v2559_v2, %v2558_v62  ;;  %v2581_v5 = vpop.f32.mrb[3].mxu1 }
 0x100   : > { %v2582_v6 = vadd.f32 %v2581_v5, %v2580_v1  ;;  %v1147_v58 = vrot.slane %v1138_v56, %v1146_v57 }
 0x101   : > { %v659_v8 = vadd.f32 %v2579_v0, %v618_v3  ;;  %v621_v9 = vadd.f32 %v2560_v4, %v2333_v39  ;;  %v1143_v39 = vrot.slane %v1138_v56, %v1142_v40 }
 0x103   : > { %v3575_v11 = vadd.f32 %v2582_v6, %v621_v9  ;;  %2635 = vmatprep.mubr.msk.f32.mxu0 %vm1972_vm0, %v659_v8  ;;  %v1150_v8 = vsub.s32 2, %v1141_v55  ;;  %v2943_v55 = vld [vmem:[%s3116_s9 + $0x8] sm:$0xff] }
 0x105   : > { %v1151_v12 = vrot.slane %v1138_v56, %v1150_v8  ;;  %v2944_v56 = vld [vmem:[%s3116_s9 + $0x18] sm:$0xff] }
 0x11c   : > { %v2599_v25 = vpop.f32.mrb[4].mxu0 }
 0x11d   : > { %v2621_v27 = vpop.f32.mrb[4].mxu1  ;;  %v2600_v29 = vpop.f32.mrb[5].mxu0 }
 0x11e   : > { %v2601_v30 = vadd.f32 %v2600_v29, %v2599_v25  ;;  %v2622_v31 = vpop.f32.mrb[5].mxu1  ;;  %v2602_v32 = vpop.f32.mrb[6].mxu0 }
 0x11f   : > { %v2623_v33 = vadd.f32 %v2622_v31, %v2621_v27  ;;  %v2624_v34 = vpop.f32.mrb[6].mxu1  ;;  %v2603_v35 = vpop.f32.mrb[7].mxu0 }
 0x120   : > { %v963_v37 = vadd.f32 %v2601_v30, %v2366_v28  ;;  %v2604_v38 = vadd.f32 %v2603_v35, %v2602_v32  ;;  %v2625_v41 = vpop.f32.mrb[7].mxu1  ;;  %v2957_v32 = vmov 0.0  }
 0x121   : > { %v2626_v44 = vadd.f32 %v2625_v41, %v2624_v34  ;;  %2153 = vmatprep.mubr.f32.mxu1 %v2957_v32  ;;  %v2244_v41 = vstv %s2243_s16 }
 0x122   : > { %v1004_v45 = vadd.f32 %v2623_v33, %v963_v37  ;;  %v966_v46 = vadd.f32 %v2604_v38, %v2366_v28 }
 0x124   : > { %v1007_v48 = vadd.f32 %v2626_v44, %v966_v46 }
 0x126   : > { %v2638_v50 = vpack.c.bf16 %v1007_v48, %v1004_v45 }
 0x128   : > { %2640 = vmatprep.subr.msk.bf16.mxu0 %vm2639_vm1, %v2638_v50 }
 0x129   : > { %2643 = vmatpush3.bf16.xpose.msk.msra.mxu0 %vm2639_vm1, %v2638_v50 }
 0x130   : > { %2636 = vmatmul.mubr.msk.f32.vlgmr.msra.gmra.mrb[12].mxu0 %vm1972_vm0, %v3575_v11 }
 0x131   : > { %2230 = vmatprep.mubr.f32.mxu0 %v2957_v32 }
 0x19c   : > { %v1877_v59 = vpop.f32.mrb[8].mxu0 }
 0x19d   : > { %v2652_v60 = vadd.f32 %v1877_v59, %v1143_v39  ;;  %v1879_v61 = vpop.f32.mrb[9].mxu0 }
 0x19e   : > { %v2653_v62 = vadd.f32 %v1879_v61, %v1147_v58  ;;  %v1881_v63 = vpop.f32.mrb[10].mxu0 }
 0x19f   : > { %v2654_v0 = vadd.f32 %v1881_v63, %v1143_v39  ;;  %v1883_v1 = vpop.f32.mrb[11].mxu0 }
 0x1a0   : > { %v2655_v2 = vadd.f32 %v1883_v1, %v1147_v58  ;;  %v2945_v1 = vld [vmem:[%s3116_s9 + $0x20] sm:$0xff] }
 0x1a1   : > { %v2646_v3 = vpack.c.bf16 %v2654_v0, %v2652_v60 }
 0x1a2   : > { %v2644_v43 = vpack.c.bf16 %v2655_v2, %v2653_v62 }
 0x1a4   : > { %2645 = vmatprep.subr.bf16.mxu1 %v2644_v43 }
 0x1a5   : > { %2647 = vmatpush1.bf16.msra.mxu1 %v2646_v3  ;;  %v2946_v3 = vld [vmem:[%s3116_s9 + $0x30] sm:$0xff] }
 0x1b7   : > { %v1963_v9 = vpop.f32.mrb[8].mxu1 }
 0x1b8   : > { %v1965_v11 = vpop.f32.mrb[9].mxu1  ;;  %v2656_v16 = vadd.f32 %v1963_v9, %v1151_v12 }
 0x1b9   : > { %v1967_v14 = vpop.f32.mrb[10].mxu1  ;;  %v2657_v17 = vadd.f32 %v1965_v11, %v1155_v13 }
 0x1ba   : > { %v1969_v15 = vpop.f32.mrb[11].mxu1  ;;  %v2658_v18 = vadd.f32 %v1967_v14, %v1151_v12 }
 0x1bb   : > { %v2659_v19 = vadd.f32 %v1969_v15, %v1155_v13 }
 0x1bc   : > { %v2650_v20 = vpack.c.bf16 %v2658_v18, %v2656_v16 }
 0x1bd   : > { %v2648_v21 = vpack.c.bf16 %v2659_v19, %v2657_v17 }
 0x1bf   : > { %2649 = vmatprep.subr.bf16.mxu0 %v2648_v21 }
 0x1c0   : > { %2651 = vmatpush1.bf16.msra.mxu0 %v2650_v20 }
 0x203   : > { %v2637_v4 = vpop.f32.mrb[12].mxu0 }
 0x204   : > { %v2051_v5 = vpop.f32.mrb[13].mxu0  ;;  %v2064_v7 = vsel %vm2060_vm2, %v2637_v4, -inf }
 0x205   : > { %v2061_v6 = vsel %vm2060_vm2, %v2051_v5, -inf }
 0x206   : > { %2062 = vmax.xlane.f32.xlu0 %v2061_v6  ;;  %v2948_v6 = vld [vmem:[%s3116_s9 + $0x38] sm:$0xff] }
 0x20a   : > { %2065 = vmax.xlane.f32.xlu0 %v2064_v7 }
 0x293   : > { %v2063_v22 = vpop.xlane.xlu0 %2062 }
 0x294   : > { %v2067_v23 = vsub.f32 %v2051_v5, %v2063_v22 }
 0x296   : > { %v2069_v24 = vmul.f32 1.442695, %v2067_v23 }
 0x297   : > { %v2066_v25 = vpop.xlane.xlu0 %2065 }
 0x298   : > { %2933 = vpow2.f32 %v2069_v24  ;;  %v2068_v26 = vsub.f32 %v2637_v4, %v2066_v25  ;;  %v2947_v4 = vld [vmem:[%s3116_s9 + $0x28] sm:$0xff] }
 0x29a   : > { %v2071_v27 = vmul.f32 1.442695, %v2068_v26 }
 0x29c   : > { %2935 = vpow2.f32 %v2071_v27 }
 0x2a2   : > { %v2934_v28 = vpop.eup %2933 }
 0x2a3   : > { %v2073_v29 = vsel %vm2060_vm2, %v2934_v28, 0.0 }
 0x2a4   : > { %2074 = vadd.xlane.f32.xlu1 %v2073_v29 }
 0x2a6   : > { %v2936_v30 = vpop.eup %2935 }
 0x2a7   : > { %v2076_v31 = vsel %vm2060_vm2, %v2936_v30, 0.0 }
 0x2a8   : > { %2077 = vadd.xlane.f32.xlu1 %v2076_v31 }
 0x331   : > { %v2075_v33 = vpop.xlane.xlu1 %2074 }
 0x332   : > { %2937 = vrcp.f32 %v2075_v33 }
 0x335   : > { %v2078_v34 = vpop.xlane.xlu1 %2077 }
 0x336   : > { %2939 = vrcp.f32 %v2078_v34 }
 0x33c   : > { %v2938_v35 = vpop.eup %2937 }
 0x33d   : > { %v2081_v36 = vmul.f32 %v2938_v35, %v2934_v28 }
 0x33f   : > { %2531 = vmatmul.mubr.msk.f32.vlgmr.msra.gmra.mrb[12].mxu1 %vm2060_vm2, %v2081_v36  ;;  %2533 = vmatmul.mubr.msk.f32.vlgmr.msra.gmra.mrb[14].mxu0 %vm2060_vm2, %v2081_v36 }
 0x340   : > { %v2940_v37 = vpop.eup %2939  ;;  %2159 = vmatprep.mubr.f32.mxu1 %v2957_v32  ;;  %2236 = vmatprep.mubr.f32.mxu0 %v2957_v32 }
 0x341   : > { %v2082_v38 = vmul.f32 %v2940_v37, %v2936_v30 }
 0x343   : > { %2532 = vmatmul.mubr.msk.f32.gmra.mrb[14].mxu1 %vm2060_vm2, %v2082_v38  ;;  %2534 = vmatmul.mubr.msk.f32.gmra.mrb[16].mxu0 %vm2060_vm2, %v2082_v38 }
 0x412   : > { %v2155_v42 = vpop.f32.mrb[12].mxu1  ;;  %v2232_v44 = vpop.f32.mrb[14].mxu0 }
 0x413   : > { %v2245_v45 = vmul.f32 %v2244_v41, %v2155_v42  ;;  %v2247_v46 = vmul.f32 %v2244_v41, %v2232_v44  ;;  %v2157_v47 = vpop.f32.mrb[13].mxu1  ;;  %v2234_v48 = vpop.f32.mrb[15].mxu0 }
 0x414   : > { %v2246_v49 = vmul.f32 %v2244_v41, %v2157_v47  ;;  %v2248_v50 = vmul.f32 %v2244_v41, %v2234_v48 }
 0x415   : > { %v2253_v52 = vadd.f32 %v2941_v51, %v2245_v45  ;;  %v2255_v54 = vadd.f32 %v2942_v53, %v2247_v46 }
 0x416   : > { %v2254_v40 = vadd.f32 %v2943_v55, %v2246_v49  ;;  %v2256_v57 = vadd.f32 %v2944_v56, %v2248_v50  ;;  %v2161_v39 = vpop.f32.mrb[14].mxu1  ;;  %v2238_v58 = vpop.f32.mrb[16].mxu0 }
 0x417   : > { %2261 = vst [vmem:[%s3665_s19] sm:$0xff] %v2253_v52  ;;  %2263 = vst [vmem:[%s3665_s19 + $0x10] sm:$0xff] %v2255_v54  ;;  %v2249_v59 = vmul.f32 %v2244_v41, %v2161_v39  ;;  %v2251_v60 = vmul.f32 %v2244_v41, %v2238_v58  ;;  %v2163_v61 = vpop.f32.mrb[15].mxu1  ;;  %v2240_v62 = vpop.f32.mrb[17].mxu0 }
 0x418   : > { %2262 = vst [vmem:[%s3665_s19 + $0x8] sm:$0xff] %v2254_v40  ;;  %2264 = vst [vmem:[%s3665_s19 + $0x18] sm:$0xff] %v2256_v57  ;;  %v2250_v63 = vmul.f32 %v2244_v41, %v2163_v61  ;;  %v2252_v0 = vmul.f32 %v2244_v41, %v2240_v62 }
 0x419   : > { %v2257_v2 = vadd.f32 %v2945_v1, %v2249_v59  ;;  %v2259_v43 = vadd.f32 %v2946_v3, %v2251_v60 }
 0x41a   : > { %v2258_v5 = vadd.f32 %v2947_v4, %v2250_v63  ;;  %v2260_v7 = vadd.f32 %v2948_v6, %v2252_v0 }
 0x41b   : > { %2265 = vst [vmem:[%s3665_s19 + $0x20] sm:$0xff] %v2257_v2  ;;  %2267 = vst [vmem:[%s3665_s19 + $0x30] sm:$0xff] %v2259_v43 }
 0x41c   : > { %2266 = vst [vmem:[%s3665_s19 + $0x28] sm:$0xff] %v2258_v5  ;;  %2268 = vst [vmem:[%s3665_s19 + $0x38] sm:$0xff] %v2260_v7 }
 0x41d PF: > { %s19_s29 = sadd.s32 1, %s2955_s29  }
 0x41e   : > { %p16_p4 = scmp.ge.s32.totalorder %s19_s29, 4  }
 0x420   :  { %18 = sbr.rel (!%p16_p4) target bundleno = 2 (0x2), region = 82 }

// kernel: discriminator_forward.10
= control target key start
LH: loop header
LB: loop body
LE: loop exit
PB: predicated region body
PF: predicated region fallthrough
CT: control target
= control target key end

     0   :  { %s10774_s12 = smov 0   ;;  %s14036_s0 = inlined_call_operand.vmem [shape: bf16[32,4096], index: 0, kind: input, shape index: {}]   ;;  %s14037_s1 = inlined_call_operand.vmem [shape: bf16[4096,512], index: 1, kind: input, shape index: {}]   ;;  %s14038_s2 = inlined_call_operand.vmem [shape: f32[1,512], index: 2, kind: input, shape index: {}]   ;;  %s14039_s3 = inlined_call_operand.vmem [shape: f32[32,512], index: 3, kind: output, shape index: {}]  }
   0x1 LB: > { %s8003_s13 = sadd.s32 4294967295, %s10752_s12   ;;  %p8007_p0 = scmp.ge.s32.totalorder %s10752_s12, 1  ;;  %s10752_s12 = sphi %s10774_s12, %s13_s12  }
   0x2   : > { %p139_p1 = scmp.lt.s32.totalorder %s10752_s12, 3 }
   0x4   : > { %p140_p2 = pnand %p8007_p0, %p139_p1 }
   0x5   : > { %v9210_v0 = vld [vmem:[%s14037_s1 + $0x4] ss:$16 sps:$4 sm:$0xff] (!%p140_p2)   ;;  %v9212_v1 = vld [vmem:[%s14037_s1 + $0xc] ss:$16 sps:$4 sm:$0xff] (!%p140_p2)   ;;  %v9214_v2 = vld [vmem:[%s14037_s1] ss:$16 sps:$4 sm:$0xff] (!%p140_p2)  }
   0x6   : > { %143 = sbr.rel (%p140_p2) target bundleno = 1254 (0x4e6), region = 32  ;;  %6537 = vmatprep.subr.bf16.mxu0 (!%p140_p2), %v9210_v0  ;;  %v9215_v3 = vld [vmem:[%s14037_s1 + $0x8] ss:$16 sps:$4 sm:$0xff] (!%p140_p2)   ;;  %7225 = vmatprep.subr.bf16.mxu1 (!%p140_p2), %v9212_v1  ;;  %v9216_v4 = vld [vmem:[%s14037_s1 + $0x24] ss:$16 sps:$4 sm:$0xff] (!%p140_p2)   ;;  %s8008_s24 = sshll.u32 (!%p140_p2), %s8003_s13, 1 }
   0x7   : > { %6538 = vmatpush1.bf16.msra.mxu0 (!%p140_p2), %v9214_v2  ;;  %7226 = vmatpush1.bf16.msra.mxu1 (!%p140_p2), %v9215_v3  ;;  %v9218_v5 = vld [vmem:[%s14037_s1 + $0x2c] ss:$16 sps:$4 sm:$0xff] (!%p140_p2)   ;;  %v9220_v6 = vld [vmem:[%s14037_s1 + $0x20] ss:$16 sps:$4 sm:$0xff] (!%p140_p2)   ;;  %v9221_v7 = vld [vmem:[%s14037_s1 + $0x28] ss:$16 sps:$4 sm:$0xff] (!%p140_p2)  }
   0x8   : > { %6539 = vmatprep.subr.bf16.mxu0 (!%p140_p2), %v9216_v4  ;;  %7227 = vmatprep.subr.bf16.mxu1 (!%p140_p2), %v9218_v5  ;;  %v9222_v8 = vld [vmem:[%s14037_s1 + $0x44] ss:$16 sps:$4 sm:$0xff] (!%p140_p2)   ;;  %v9224_v9 = vld [vmem:[%s14037_s1 + $0x4c] ss:$16 sps:$4 sm:$0xff] (!%p140_p2)   ;;  %v9226_v10 = vld [vmem:[%s14037_s1 + $0x40] ss:$16 sps:$4 sm:$0xff] (!%p140_p2)  }
   0x9   : > { %v9227_v11 = vld [vmem:[%s14037_s1 + $0x48] ss:$16 sps:$4 sm:$0xff] (!%p140_p2)   ;;  %v9228_v12 = vld [vmem:[%s14037_s1 + $0x64] ss:$16 sps:$4 sm:$0xff] (!%p140_p2)   ;;  %v9230_v13 = vld [vmem:[%s14037_s1 + $0x6c] ss:$16 sps:$4 sm:$0xff] (!%p140_p2)  }
   0xa   : > { %v9232_v14 = vld [vmem:[%s14037_s1 + $0x60] ss:$16 sps:$4 sm:$0xff] (!%p140_p2)   ;;  %v9233_v15 = vld [vmem:[%s14037_s1 + $0x68] ss:$16 sps:$4 sm:$0xff] (!%p140_p2)   ;;  %v9234_v16 = vld [vmem:[%s14037_s1 + $0x84] ss:$16 sps:$4 sm:$0xff] (!%p140_p2)  }
   0xb   : > { %6540 = vmatpush1.bf16.msra.mxu0 (!%p140_p2), %v9220_v6  ;;  %7228 = vmatpush1.bf16.msra.mxu1 (!%p140_p2), %v9221_v7  ;;  %v9236_v17 = vld [vmem:[%s14037_s1 + $0x8c] ss:$16 sps:$4 sm:$0xff] (!%p140_p2)   ;;  %v9238_v18 = vld [vmem:[%s14037_s1 + $0x80] ss:$16 sps:$4 sm:$0xff] (!%p140_p2)   ;;  %v9239_v19 = vld [vmem:[%s14037_s1 + $0x88] ss:$16 sps:$4 sm:$0xff] (!%p140_p2)  }
   0xc   : > { %6541 = vmatprep.subr.bf16.mxu0 (!%p140_p2), %v9222_v8  ;;  %7229 = vmatprep.subr.bf16.mxu1 (!%p140_p2), %v9224_v9  ;;  %v9240_v20 = vld [vmem:[%s14037_s1 + $0xa4] ss:$16 sps:$4 sm:$0xff] (!%p140_p2)   ;;  %v9242_v21 = vld [vmem:[%s14037_s1 + $0xac] ss:$16 sps:$4 sm:$0xff] (!%p140_p2)   ;;  %v9244_v22 = vld [vmem:[%s14037_s1 + $0xa0] ss:$16 sps:$4 sm:$0xff] (!%p140_p2)  }
   0xd   : > { %v9245_v23 = vld [vmem:[%s14037_s1 + $0xa8] ss:$16 sps:$4 sm:$0xff]   ;;  %v9246_v24 = vld [vmem:[%s14037_s1 + $0xc4] ss:$16 sps:$4 sm:$0xff]   ;;  %v9248_v25 = vld [vmem:[%s14037_s1 + $0xcc] ss:$16 sps:$4 sm:$0xff]  }
   0xe   : > { %v9250_v26 = vld [vmem:[%s14037_s1 + $0xc0] ss:$16 sps:$4 sm:$0xff]   ;;  %v9251_v27 = vld [vmem:[%s14037_s1 + $0xc8] ss:$16 sps:$4 sm:$0xff]   ;;  %v9252_v28 = vld [vmem:[%s14037_s1 + $0xe4] ss:$16 sps:$4 sm:$0xff]  }
   0xf   : > { %6542 = vmatpush1.bf16.msra.mxu0 %v9226_v10  ;;  %7230 = vmatpush1.bf16.msra.mxu1 %v9227_v11  ;;  %v9254_v29 = vld [vmem:[%s14037_s1 + $0xec] ss:$16 sps:$4 sm:$0xff]   ;;  %v9256_v30 = vld [vmem:[%s14037_s1 + $0xe0] ss:$16 sps:$4 sm:$0xff]   ;;  %v9257_v31 = vld [vmem:[%s14037_s1 + $0xe8] ss:$16 sps:$4 sm:$0xff]  }
  0x10   : > { %6543 = vmatprep.subr.bf16.mxu0 %v9228_v12  ;;  %7231 = vmatprep.subr.bf16.mxu1 %v9230_v13  ;;  %v9258_v32 = vld [vmem:[%s14037_s1 + $0x104] ss:$16 sps:$4 sm:$0xff]   ;;  %p166_p3 = scmp.lt.s32.totalorder %s8008_s24, 3  ;;  %v9260_v33 = vld [vmem:[%s14037_s1 + $0x10c] ss:$16 sps:$4 sm:$0xff]  }
  0x11   : > { %v9262_v34 = vld [vmem:[%s14037_s1 + $0x100] ss:$16 sps:$4 sm:$0xff]   ;;  %v9263_v35 = vld [vmem:[%s14037_s1 + $0x108] ss:$16 sps:$4 sm:$0xff]   ;;  %v9264_v36 = vld [vmem:[%s14037_s1 + $0x124] ss:$16 sps:$4 sm:$0xff]  }
  0x12   : > { %s14041_s24 = smov (!%p166_p3, %s8008_s24), 3  ;;  %v9266_v37 = vld [vmem:[%s14037_s1 + $0x12c] ss:$16 sps:$4 sm:$0xff]   ;;  %v9268_v38 = vld [vmem:[%s14037_s1 + $0x120] ss:$16 sps:$4 sm:$0xff]  }
  0x13   : > { %6544 = vmatpush1.bf16.msra.mxu0 %v9232_v14  ;;  %7232 = vmatpush1.bf16.msra.mxu1 %v9233_v15  ;;  %v9269_v39 = vld [vmem:[%s14037_s1 + $0x128] ss:$16 sps:$4 sm:$0xff]   ;;  %v9270_v40 = vld [vmem:[%s14037_s1 + $0x144] ss:$16 sps:$4 sm:$0xff]   ;;  %s9072_s21 = sshll.u32 %s14041_s24, 7  ;;  %s9073_s19 = sshll.u32 %s14041_s24, 5 }
  0x14   : > { %6545 = vmatprep.subr.bf16.mxu0 %v9234_v16  ;;  %7233 = vmatprep.subr.bf16.mxu1 %v9236_v17  ;;  %v9272_v41 = vld [vmem:[%s14037_s1 + $0x14c] ss:$16 sps:$4 sm:$0xff]   ;;  %v9274_v42 = vld [vmem:[%s14037_s1 + $0x140] ss:$16 sps:$4 sm:$0xff]   ;;  %v9275_v43 = vld [vmem:[%s14037_s1 + $0x148] ss:$16 sps:$4 sm:$0xff]   ;;  %s10922_s4 = scalar_lea.vmem %s14036_s0, %s9072_s21  ;;  %s14023_s22 = scalar_lea.vmem %s14039_s3, %s9073_s19 }
  0x15   : > { %v9276_v44 = vld [vmem:[%s14037_s1 + $0x164] ss:$16 sps:$4 sm:$0xff]   ;;  %v9278_v45 = vld [vmem:[%s14037_s1 + $0x16c] ss:$16 sps:$4 sm:$0xff]   ;;  %v9280_v48 = vld [vmem:[%s14037_s1 + $0x160] ss:$16 sps:$4 sm:$0xff]  }
  0x16   : > { %v179_v46 = vld [vmem:[%s10922_s4] sm:$0xff]  ;;  %v9281_v49 = vld [vmem:[%s14037_s1 + $0x168] ss:$16 sps:$4 sm:$0xff]   ;;  %v9284_v52 = vld [vmem:[%s14037_s1 + $0x18c] ss:$16 sps:$4 sm:$0xff]  }
  0x17   : > { %6546 = vmatpush1.bf16.msra.mxu0 %v9238_v18  ;;  %7234 = vmatpush1.bf16.msra.mxu1 %v9239_v19  ;;  %v195_v47 = vld [vmem:[%s10922_s4 + $0x80] sm:$0xff]  ;;  %v9287_v54 = vld [vmem:[%s14037_s1 + $0x188] ss:$16 sps:$4 sm:$0xff]   ;;  %v9290_v56 = vld [vmem:[%s14037_s1 + $0x1ac] ss:$16 sps:$4 sm:$0xff]  }
  0x18   : > { %6547 = vmatprep.subr.bf16.mxu0 %v9240_v20  ;;  %7235 = vmatprep.subr.bf16.mxu1 %v9242_v21  ;;  %v8015_v50 = vcombine.high %v179_v46, %v195_v47  ;;  %v9282_v51 = vld [vmem:[%s14037_s1 + $0x184] ss:$16 sps:$4 sm:$0xff]   ;;  %v9286_v53 = vld [vmem:[%s14037_s1 + $0x180] ss:$16 sps:$4 sm:$0xff]   ;;  %v9293_v58 = vld [vmem:[%s14037_s1 + $0x1a8] ss:$16 sps:$4 sm:$0xff]   ;;  %v8014_v5 = vcombine.low %v179_v46, %v195_v47 }
  0x19   : > { %v9288_v55 = vld [vmem:[%s14037_s1 + $0x1a4] ss:$16 sps:$4 sm:$0xff]   ;;  %v9292_v57 = vld [vmem:[%s14037_s1 + $0x1a0] ss:$16 sps:$4 sm:$0xff]   ;;  %v9296_v60 = vld [vmem:[%s14037_s1 + $0x1cc] ss:$16 sps:$4 sm:$0xff]  }
  0x1a   : > { %6569 = vmatprep.mubr.bf16.mxu0 %v8015_v50  ;;  %7257 = vmatprep.mubr.bf16.mxu1 %v8015_v50  ;;  %v9294_v59 = vld [vmem:[%s14037_s1 + $0x1c4] ss:$16 sps:$4 sm:$0xff]   ;;  %v9298_v61 = vld [vmem:[%s14037_s1 + $0x1c0] ss:$16 sps:$4 sm:$0xff]   ;;  %v9299_v62 = vld [vmem:[%s14037_s1 + $0x1c8] ss:$16 sps:$4 sm:$0xff]  }
  0x1b   : > { %6548 = vmatpush1.bf16.msra.mxu0 %v9244_v22  ;;  %7236 = vmatpush1.bf16.msra.mxu1 %v9245_v23  ;;  %v9300_v63 = vld [vmem:[%s14037_s1 + $0x1e4] ss:$16 sps:$4 sm:$0xff]   ;;  %v9302_v0 = vld [vmem:[%s14037_s1 + $0x1ec] ss:$16 sps:$4 sm:$0xff]   ;;  %v9304_v1 = vld [vmem:[%s14037_s1 + $0x1e0] ss:$16 sps:$4 sm:$0xff]  }
  0x1c   : > { %6549 = vmatprep.subr.bf16.mxu0 %v9246_v24  ;;  %7237 = vmatprep.subr.bf16.mxu1 %v9248_v25  ;;  %v9305_v2 = vld [vmem:[%s14037_s1 + $0x1e8] ss:$16 sps:$4 sm:$0xff]   ;;  %v9308_v3 = vld [vmem:[%s14037_s1 + $0x204] ss:$16 sps:$4 sm:$0xff]   ;;  %v9311_v4 = vld [vmem:[%s14037_s1 + $0x20c] ss:$16 sps:$4 sm:$0xff]  }
  0x1d   : > { %v9306_v6 = vld [vmem:[%s14037_s1 + $0x200] ss:$16 sps:$4 sm:$0xff]   ;;  %v9309_v7 = vld [vmem:[%s14037_s1 + $0x208] ss:$16 sps:$4 sm:$0xff]   ;;  %v9314_v8 = vld [vmem:[%s14037_s1 + $0x224] ss:$16 sps:$4 sm:$0xff]  }
  0x1e   : > { %v9317_v9 = vld [vmem:[%s14037_s1 + $0x22c] ss:$16 sps:$4 sm:$0xff]   ;;  %v9312_v10 = vld [vmem:[%s14037_s1 + $0x220] ss:$16 sps:$4 sm:$0xff]   ;;  %v9315_v11 = vld [vmem:[%s14037_s1 + $0x228] ss:$16 sps:$4 sm:$0xff]  }
  0x1f   : > { %6550 = vmatpush1.bf16.msra.mxu0 %v9250_v26  ;;  %7238 = vmatpush1.bf16.msra.mxu1 %v9251_v27  ;;  %v9320_v12 = vld [vmem:[%s14037_s1 + $0x244] ss:$16 sps:$4 sm:$0xff]   ;;  %v9323_v13 = vld [vmem:[%s14037_s1 + $0x24c] ss:$16 sps:$4 sm:$0xff]   ;;  %v9318_v14 = vld [vmem:[%s14037_s1 + $0x240] ss:$16 sps:$4 sm:$0xff]  }
  0x20   : > { %6551 = vmatprep.subr.bf16.mxu0 %v9252_v28  ;;  %7239 = vmatprep.subr.bf16.mxu1 %v9254_v29  ;;  %v9321_v15 = vld [vmem:[%s14037_s1 + $0x248] ss:$16 sps:$4 sm:$0xff]   ;;  %v9326_v16 = vld [vmem:[%s14037_s1 + $0x264] ss:$16 sps:$4 sm:$0xff]   ;;  %v9329_v17 = vld [vmem:[%s14037_s1 + $0x26c] ss:$16 sps:$4 sm:$0xff]  }
  0x21   : > { %v9324_v18 = vld [vmem:[%s14037_s1 + $0x260] ss:$16 sps:$4 sm:$0xff]   ;;  %v9327_v19 = vld [vmem:[%s14037_s1 + $0x268] ss:$16 sps:$4 sm:$0xff]   ;;  %v9332_v20 = vld [vmem:[%s14037_s1 + $0x284] ss:$16 sps:$4 sm:$0xff]  }
  0x22   : > { %v9335_v21 = vld [vmem:[%s14037_s1 + $0x28c] ss:$16 sps:$4 sm:$0xff]   ;;  %v9330_v22 = vld [vmem:[%s14037_s1 + $0x280] ss:$16 sps:$4 sm:$0xff]   ;;  %v9333_v23 = vld [vmem:[%s14037_s1 + $0x288] ss:$16 sps:$4 sm:$0xff]  }
  0x23   : > { %6552 = vmatpush1.bf16.msra.mxu0 %v9256_v30  ;;  %7240 = vmatpush1.bf16.msra.mxu1 %v9257_v31  ;;  %v9338_v24 = vld [vmem:[%s14037_s1 + $0x2a4] ss:$16 sps:$4 sm:$0xff]   ;;  %v9341_v25 = vld [vmem:[%s14037_s1 + $0x2ac] ss:$16 sps:$4 sm:$0xff]   ;;  %v9336_v26 = vld [vmem:[%s14037_s1 + $0x2a0] ss:$16 sps:$4 sm:$0xff]  }
  0x24   : > { %6553 = vmatprep.subr.bf16.mxu0 %v9258_v32  ;;  %7241 = vmatprep.subr.bf16.mxu1 %v9260_v33  ;;  %v9339_v27 = vld [vmem:[%s14037_s1 + $0x2a8] ss:$16 sps:$4 sm:$0xff]   ;;  %v9344_v28 = vld [vmem:[%s14037_s1 + $0x2c4] ss:$16 sps:$4 sm:$0xff]   ;;  %v9347_v29 = vld [vmem:[%s14037_s1 + $0x2cc] ss:$16 sps:$4 sm:$0xff]  }
  0x25   : > { %v11065_v30 = vld [vmem:[%s10922_s4 + $0x8] sm:$0xff]  ;;  %v9342_v32 = vld [vmem:[%s14037_s1 + $0x2c0] ss:$16 sps:$4 sm:$0xff]   ;;  %v9368_v47 = vld [vmem:[%s14037_s1 + $0x344] ss:$16 sps:$4 sm:$0xff]  }
  0x26   : > { %v11068_v31 = vld [vmem:[%s10922_s4 + $0x88] sm:$0xff] }
  0x27   : > { %6554 = vmatpush1.bf16.msra.mxu0 %v9262_v34  ;;  %7242 = vmatpush1.bf16.msra.mxu1 %v9263_v35  ;;  %v9345_v33 = vld [vmem:[%s14037_s1 + $0x2c8] ss:$16 sps:$4 sm:$0xff]   ;;  %v8017_v34 = vcombine.high %v11065_v30, %v11068_v31  ;;  %v9350_v35 = vld [vmem:[%s14037_s1 + $0x2e4] ss:$16 sps:$4 sm:$0xff]  }
  0x28   : > { %6555 = vmatprep.subr.bf16.mxu0 %v9264_v36  ;;  %7243 = vmatprep.subr.bf16.mxu1 %v9266_v37  ;;  %v9353_v36 = vld [vmem:[%s14037_s1 + $0x2ec] ss:$16 sps:$4 sm:$0xff]   ;;  %v9348_v37 = vld [vmem:[%s14037_s1 + $0x2e0] ss:$16 sps:$4 sm:$0xff]   ;;  %v9363_v46 = vld [vmem:[%s14037_s1 + $0x328] ss:$16 sps:$4 sm:$0xff]  }
  0x29   : > { %v9369_v50 = vld [vmem:[%s14037_s1 + $0x348] ss:$16 sps:$4 sm:$0xff]  }
  0x2b   : > { %6556 = vmatpush1.bf16.msra.mxu0 %v9268_v38  ;;  %7244 = vmatpush1.bf16.msra.mxu1 %v9269_v39  ;;  %v9351_v38 = vld [vmem:[%s14037_s1 + $0x2e8] ss:$16 sps:$4 sm:$0xff]   ;;  %v9356_v39 = vld [vmem:[%s14037_s1 + $0x304] ss:$16 sps:$4 sm:$0xff]  }
  0x2c   : > { %6557 = vmatprep.subr.bf16.mxu0 %v9270_v40  ;;  %7245 = vmatprep.subr.bf16.mxu1 %v9272_v41  ;;  %v9359_v40 = vld [vmem:[%s14037_s1 + $0x30c] ss:$16 sps:$4 sm:$0xff]   ;;  %v9354_v41 = vld [vmem:[%s14037_s1 + $0x300] ss:$16 sps:$4 sm:$0xff]  }
  0x2f   : > { %6558 = vmatpush1.bf16.msra.mxu0 %v9274_v42  ;;  %7246 = vmatpush1.bf16.msra.mxu1 %v9275_v43  ;;  %v9357_v42 = vld [vmem:[%s14037_s1 + $0x308] ss:$16 sps:$4 sm:$0xff]   ;;  %v9362_v43 = vld [vmem:[%s14037_s1 + $0x324] ss:$16 sps:$4 sm:$0xff]  }
  0x30   : > { %6559 = vmatprep.subr.bf16.mxu0 %v9276_v44  ;;  %7247 = vmatprep.subr.bf16.mxu1 %v9278_v45  ;;  %v9365_v44 = vld [vmem:[%s14037_s1 + $0x32c] ss:$16 sps:$4 sm:$0xff]   ;;  %v9360_v45 = vld [vmem:[%s14037_s1 + $0x320] ss:$16 sps:$4 sm:$0xff]  }
  0x33   : > { %6560 = vmatpush1.bf16.msra.mxu0 %v9280_v48  ;;  %7248 = vmatpush1.bf16.msra.mxu1 %v9281_v49  ;;  %v9371_v48 = vld [vmem:[%s14037_s1 + $0x34c] ss:$16 sps:$4 sm:$0xff]   ;;  %v9366_v49 = vld [vmem:[%s14037_s1 + $0x340] ss:$16 sps:$4 sm:$0xff]  }
  0x34   : > { %6561 = vmatprep.subr.bf16.mxu0 %v9282_v51  ;;  %7249 = vmatprep.subr.bf16.mxu1 %v9284_v52  ;;  %v9374_v51 = vld [vmem:[%s14037_s1 + $0x364] ss:$16 sps:$4 sm:$0xff]   ;;  %v9377_v52 = vld [vmem:[%s14037_s1 + $0x36c] ss:$16 sps:$4 sm:$0xff]  }
  0x37   : > { %6562 = vmatpush1.bf16.msra.mxu0 %v9286_v53  ;;  %7250 = vmatpush1.bf16.msra.mxu1 %v9287_v54  ;;  %v9372_v53 = vld [vmem:[%s14037_s1 + $0x360] ss:$16 sps:$4 sm:$0xff]   ;;  %v9375_v54 = vld [vmem:[%s14037_s1 + $0x368] ss:$16 sps:$4 sm:$0xff]  }
  0x38   : > { %6563 = vmatprep.subr.bf16.mxu0 %v9288_v55  ;;  %7251 = vmatprep.subr.bf16.mxu1 %v9290_v56  ;;  %v9380_v55 = vld [vmem:[%s14037_s1 + $0x384] ss:$16 sps:$4 sm:$0xff]   ;;  %v9383_v56 = vld [vmem:[%s14037_s1 + $0x38c] ss:$16 sps:$4 sm:$0xff]  }
  0x3b   : > { %6564 = vmatpush1.bf16.msra.mxu0 %v9292_v57  ;;  %7252 = vmatpush1.bf16.msra.mxu1 %v9293_v58  ;;  %v9378_v57 = vld [vmem:[%s14037_s1 + $0x380] ss:$16 sps:$4 sm:$0xff]   ;;  %v9381_v58 = vld [vmem:[%s14037_s1 + $0x388] ss:$16 sps:$4 sm:$0xff]  }
  0x3c   : > { %6565 = vmatprep.subr.bf16.mxu0 %v9294_v59  ;;  %7253 = vmatprep.subr.bf16.mxu1 %v9296_v60  ;;  %v9386_v59 = vld [vmem:[%s14037_s1 + $0x3a4] ss:$16 sps:$4 sm:$0xff]   ;;  %v9389_v60 = vld [vmem:[%s14037_s1 + $0x3ac] ss:$16 sps:$4 sm:$0xff]  }
  0x3f   : > { %6566 = vmatpush1.bf16.msra.mxu0 %v9298_v61  ;;  %7254 = vmatpush1.bf16.msra.mxu1 %v9299_v62  ;;  %v9384_v61 = vld [vmem:[%s14037_s1 + $0x3a0] ss:$16 sps:$4 sm:$0xff]   ;;  %v9387_v62 = vld [vmem:[%s14037_s1 + $0x3a8] ss:$16 sps:$4 sm:$0xff]  }
  0x40   : > { %6567 = vmatprep.subr.bf16.mxu0 %v9300_v63  ;;  %7255 = vmatprep.subr.bf16.mxu1 %v9302_v0  ;;  %v9392_v63 = vld [vmem:[%s14037_s1 + $0x3c4] ss:$16 sps:$4 sm:$0xff]   ;;  %v9395_v0 = vld [vmem:[%s14037_s1 + $0x3cc] ss:$16 sps:$4 sm:$0xff]  }
  0x43   : > { %6568 = vmatpush1.bf16.msra.mxu0 %v9304_v1  ;;  %7256 = vmatpush1.bf16.msra.mxu1 %v9305_v2  ;;  %v9390_v1 = vld [vmem:[%s14037_s1 + $0x3c0] ss:$16 sps:$4 sm:$0xff]   ;;  %v9393_v2 = vld [vmem:[%s14037_s1 + $0x3c8] ss:$16 sps:$4 sm:$0xff]  }
  0x44   : > { %6580 = vmatprep.subr.bf16.mxu0 %v9308_v3  ;;  %7268 = vmatprep.subr.bf16.mxu1 %v9311_v4  ;;  %v9398_v3 = vld [vmem:[%s14037_s1 + $0x3e4] ss:$16 sps:$4 sm:$0xff]   ;;  %v9401_v4 = vld [vmem:[%s14037_s1 + $0x3ec] ss:$16 sps:$4 sm:$0xff]  }
  0x46   : > { %6570 = vmatmul.mubr.bf16.vlgmr.msra.gmra.mrb[0].mxu0 %v8014_v5  ;;  %7258 = vmatmul.mubr.bf16.vlgmr.msra.gmra.mrb[0].mxu1 %v8014_v5  ;;  %v9396_v5 = vld [vmem:[%s14037_s1 + $0x3e0] ss:$16 sps:$4 sm:$0xff]  }
  0x47   : > { %6581 = vmatpush1.bf16.msra.mxu0 %v9306_v6  ;;  %7269 = vmatpush1.bf16.msra.mxu1 %v9309_v7  ;;  %v9399_v6 = vld [vmem:[%s14037_s1 + $0x3e8] ss:$16 sps:$4 sm:$0xff]   ;;  %v9404_v7 = vld [vmem:[%s14037_s1 + $0x404] ss:$16 sps:$4 sm:$0xff]  }
  0x48   : > { %6582 = vmatprep.subr.bf16.mxu0 %v9314_v8  ;;  %7270 = vmatprep.subr.bf16.mxu1 %v9317_v9  ;;  %v9407_v8 = vld [vmem:[%s14037_s1 + $0x40c] ss:$16 sps:$4 sm:$0xff]   ;;  %v8016_v9 = vcombine.low %v11065_v30, %v11068_v31  ;;  %v9429_v30 = vld [vmem:[%s14037_s1 + $0x488] ss:$16 sps:$4 sm:$0xff]   ;;  %v9434_v31 = vld [vmem:[%s14037_s1 + $0x4a4] ss:$16 sps:$4 sm:$0xff]  }
  0x49   : > { %6612 = vmatprep.mubr.bf16.mxu0 %v8017_v34  ;;  %7300 = vmatprep.mubr.bf16.mxu1 %v8017_v34  ;;  %v9435_v34 = vld [vmem:[%s14037_s1 + $0x4a8] ss:$16 sps:$4 sm:$0xff]  }
  0x4b   : > { %6583 = vmatpush1.bf16.msra.mxu0 %v9312_v10  ;;  %7271 = vmatpush1.bf16.msra.mxu1 %v9315_v11  ;;  %v9402_v10 = vld [vmem:[%s14037_s1 + $0x400] ss:$16 sps:$4 sm:$0xff]   ;;  %v9405_v11 = vld [vmem:[%s14037_s1 + $0x408] ss:$16 sps:$4 sm:$0xff]  }
  0x4c   : > { %6584 = vmatprep.subr.bf16.mxu0 %v9320_v12  ;;  %7272 = vmatprep.subr.bf16.mxu1 %v9323_v13  ;;  %v9410_v12 = vld [vmem:[%s14037_s1 + $0x424] ss:$16 sps:$4 sm:$0xff]   ;;  %v9413_v13 = vld [vmem:[%s14037_s1 + $0x42c] ss:$16 sps:$4 sm:$0xff]  }
  0x4f   : > { %6585 = vmatpush1.bf16.msra.mxu0 %v9318_v14  ;;  %7273 = vmatpush1.bf16.msra.mxu1 %v9321_v15  ;;  %v11207_v14 = vld [vmem:[%s10922_s4 + $0x10] sm:$0xff] }
  0x50   : > { %6586 = vmatprep.subr.bf16.mxu0 %v9326_v16  ;;  %7274 = vmatprep.subr.bf16.mxu1 %v9329_v17  ;;  %v11210_v15 = vld [vmem:[%s10922_s4 + $0x90] sm:$0xff] }
  0x51   : > { %v8019_v16 = vcombine.high %v11207_v14, %v11210_v15  ;;  %v9408_v17 = vld [vmem:[%s14037_s1 + $0x420] ss:$16 sps:$4 sm:$0xff]  }
  0x53   : > { %6587 = vmatpush1.bf16.msra.mxu0 %v9324_v18  ;;  %7275 = vmatpush1.bf16.msra.mxu1 %v9327_v19  ;;  %v9411_v18 = vld [vmem:[%s14037_s1 + $0x428] ss:$16 sps:$4 sm:$0xff]   ;;  %v9416_v19 = vld [vmem:[%s14037_s1 + $0x444] ss:$16 sps:$4 sm:$0xff]  }
  0x54   : > { %6588 = vmatprep.subr.bf16.mxu0 %v9332_v20  ;;  %7276 = vmatprep.subr.bf16.mxu1 %v9335_v21  ;;  %v9419_v20 = vld [vmem:[%s14037_s1 + $0x44c] ss:$16 sps:$4 sm:$0xff]   ;;  %v9414_v21 = vld [vmem:[%s14037_s1 + $0x440] ss:$16 sps:$4 sm:$0xff]  }
  0x57   : > { %6589 = vmatpush1.bf16.msra.mxu0 %v9330_v22  ;;  %7277 = vmatpush1.bf16.msra.mxu1 %v9333_v23  ;;  %v9417_v22 = vld [vmem:[%s14037_s1 + $0x448] ss:$16 sps:$4 sm:$0xff]   ;;  %v9422_v23 = vld [vmem:[%s14037_s1 + $0x464] ss:$16 sps:$4 sm:$0xff]  }
  0x58   : > { %6590 = vmatprep.subr.bf16.mxu0 %v9338_v24  ;;  %7278 = vmatprep.subr.bf16.mxu1 %v9341_v25  ;;  %v9425_v24 = vld [vmem:[%s14037_s1 + $0x46c] ss:$16 sps:$4 sm:$0xff]   ;;  %v9420_v25 = vld [vmem:[%s14037_s1 + $0x460] ss:$16 sps:$4 sm:$0xff]  }
  0x5b   : > { %6591 = vmatpush1.bf16.msra.mxu0 %v9336_v26  ;;  %7279 = vmatpush1.bf16.msra.mxu1 %v9339_v27  ;;  %v9423_v26 = vld [vmem:[%s14037_s1 + $0x468] ss:$16 sps:$4 sm:$0xff]   ;;  %v9428_v27 = vld [vmem:[%s14037_s1 + $0x484] ss:$16 sps:$4 sm:$0xff]  }
  0x5c   : > { %6592 = vmatprep.subr.bf16.mxu0 %v9344_v28  ;;  %7280 = vmatprep.subr.bf16.mxu1 %v9347_v29  ;;  %v9431_v28 = vld [vmem:[%s14037_s1 + $0x48c] ss:$16 sps:$4 sm:$0xff]   ;;  %v9426_v29 = vld [vmem:[%s14037_s1 + $0x480] ss:$16 sps:$4 sm:$0xff]  }
  0x5f   : > { %6593 = vmatpush1.bf16.msra.mxu0 %v9342_v32  ;;  %7281 = vmatpush1.bf16.msra.mxu1 %v9345_v33  ;;  %v9437_v32 = vld [vmem:[%s14037_s1 + $0x4ac] ss:$16 sps:$4 sm:$0xff]   ;;  %v9432_v33 = vld [vmem:[%s14037_s1 + $0x4a0] ss:$16 sps:$4 sm:$0xff]  }
  0x60   : > { %6594 = vmatprep.subr.bf16.mxu0 %v9350_v35  ;;  %7282 = vmatprep.subr.bf16.mxu1 %v9353_v36  ;;  %v9440_v35 = vld [vmem:[%s14037_s1 + $0x4c4] ss:$16 sps:$4 sm:$0xff]   ;;  %v9443_v36 = vld [vmem:[%s14037_s1 + $0x4cc] ss:$16 sps:$4 sm:$0xff]  }
  0x63   : > { %6595 = vmatpush1.bf16.msra.mxu0 %v9348_v37  ;;  %7283 = vmatpush1.bf16.msra.mxu1 %v9351_v38  ;;  %v9438_v37 = vld [vmem:[%s14037_s1 + $0x4c0] ss:$16 sps:$4 sm:$0xff]   ;;  %v9441_v38 = vld [vmem:[%s14037_s1 + $0x4c8] ss:$16 sps:$4 sm:$0xff]  }
  0x64   : > { %6596 = vmatprep.subr.bf16.mxu0 %v9356_v39  ;;  %7284 = vmatprep.subr.bf16.mxu1 %v9359_v40  ;;  %v9446_v39 = vld [vmem:[%s14037_s1 + $0x4e4] ss:$16 sps:$4 sm:$0xff]   ;;  %v9449_v40 = vld [vmem:[%s14037_s1 + $0x4ec] ss:$16 sps:$4 sm:$0xff]  }
  0x67   : > { %6597 = vmatpush1.bf16.msra.mxu0 %v9354_v41  ;;  %7285 = vmatpush1.bf16.msra.mxu1 %v9357_v42  ;;  %v9444_v41 = vld [vmem:[%s14037_s1 + $0x4e0] ss:$16 sps:$4 sm:$0xff]   ;;  %v9447_v42 = vld [vmem:[%s14037_s1 + $0x4e8] ss:$16 sps:$4 sm:$0xff]  }
  0x68   : > { %6598 = vmatprep.subr.bf16.mxu0 %v9362_v43  ;;  %7286 = vmatprep.subr.bf16.mxu1 %v9365_v44  ;;  %v9452_v43 = vld [vmem:[%s14037_s1 + $0x504] ss:$16 sps:$4 sm:$0xff]   ;;  %v9455_v44 = vld [vmem:[%s14037_s1 + $0x50c] ss:$16 sps:$4 sm:$0xff]  }
  0x6b   : > { %6599 = vmatpush1.bf16.msra.mxu0 %v9360_v45  ;;  %7287 = vmatpush1.bf16.msra.mxu1 %v9363_v46  ;;  %v9450_v45 = vld [vmem:[%s14037_s1 + $0x500] ss:$16 sps:$4 sm:$0xff]   ;;  %v9453_v46 = vld [vmem:[%s14037_s1 + $0x508] ss:$16 sps:$4 sm:$0xff]  }
  0x6c   : > { %6600 = vmatprep.subr.bf16.mxu0 %v9368_v47  ;;  %7288 = vmatprep.subr.bf16.mxu1 %v9371_v48  ;;  %v9458_v47 = vld [vmem:[%s14037_s1 + $0x524] ss:$16 sps:$4 sm:$0xff]   ;;  %v9461_v48 = vld [vmem:[%s14037_s1 + $0x52c] ss:$16 sps:$4 sm:$0xff]  }
  0x6f   : > { %6601 = vmatpush1.bf16.msra.mxu0 %v9366_v49  ;;  %7289 = vmatpush1.bf16.msra.mxu1 %v9369_v50  ;;  %v9456_v49 = vld [vmem:[%s14037_s1 + $0x520] ss:$16 sps:$4 sm:$0xff]   ;;  %v9459_v50 = vld [vmem:[%s14037_s1 + $0x528] ss:$16 sps:$4 sm:$0xff]  }
  0x70   : > { %6602 = vmatprep.subr.bf16.mxu0 %v9374_v51  ;;  %7290 = vmatprep.subr.bf16.mxu1 %v9377_v52  ;;  %v9464_v51 = vld [vmem:[%s14037_s1 + $0x544] ss:$16 sps:$4 sm:$0xff]   ;;  %v9467_v52 = vld [vmem:[%s14037_s1 + $0x54c] ss:$16 sps:$4 sm:$0xff]  }
  0x73   : > { %6603 = vmatpush1.bf16.msra.mxu0 %v9372_v53  ;;  %7291 = vmatpush1.bf16.msra.mxu1 %v9375_v54  ;;  %v9462_v53 = vld [vmem:[%s14037_s1 + $0x540] ss:$16 sps:$4 sm:$0xff]   ;;  %v9465_v54 = vld [vmem:[%s14037_s1 + $0x548] ss:$16 sps:$4 sm:$0xff]  }
  0x74   : > { %6604 = vmatprep.subr.bf16.mxu0 %v9380_v55  ;;  %7292 = vmatprep.subr.bf16.mxu1 %v9383_v56  ;;  %v9470_v55 = vld [vmem:[%s14037_s1 + $0x564] ss:$16 sps:$4 sm:$0xff]   ;;  %v9473_v56 = vld [vmem:[%s14037_s1 + $0x56c] ss:$16 sps:$4 sm:$0xff]  }
  0x77   : > { %6605 = vmatpush1.bf16.msra.mxu0 %v9378_v57  ;;  %7293 = vmatpush1.bf16.msra.mxu1 %v9381_v58  ;;  %v9468_v57 = vld [vmem:[%s14037_s1 + $0x560] ss:$16 sps:$4 sm:$0xff]   ;;  %v9471_v58 = vld [vmem:[%s14037_s1 + $0x568] ss:$16 sps:$4 sm:$0xff]  }
  0x78   : > { %6606 = vmatprep.subr.bf16.mxu0 %v9386_v59  ;;  %7294 = vmatprep.subr.bf16.mxu1 %v9389_v60  ;;  %v9476_v59 = vld [vmem:[%s14037_s1 + $0x584] ss:$16 sps:$4 sm:$0xff]   ;;  %v9479_v60 = vld [vmem:[%s14037_s1 + $0x58c] ss:$16 sps:$4 sm:$0xff]  }
  0x7b   : > { %6607 = vmatpush1.bf16.msra.mxu0 %v9384_v61  ;;  %7295 = vmatpush1.bf16.msra.mxu1 %v9387_v62  ;;  %v9474_v61 = vld [vmem:[%s14037_s1 + $0x580] ss:$16 sps:$4 sm:$0xff]   ;;  %v9477_v62 = vld [vmem:[%s14037_s1 + $0x588] ss:$16 sps:$4 sm:$0xff]  }
  0x7c   : > { %6608 = vmatprep.subr.bf16.mxu0 %v9392_v63  ;;  %7296 = vmatprep.subr.bf16.mxu1 %v9395_v0  ;;  %v9482_v63 = vld [vmem:[%s14037_s1 + $0x5a4] ss:$16 sps:$4 sm:$0xff]   ;;  %v9485_v0 = vld [vmem:[%s14037_s1 + $0x5ac] ss:$16 sps:$4 sm:$0xff]  }
  0x7f   : > { %6609 = vmatpush1.bf16.msra.mxu0 %v9390_v1  ;;  %7297 = vmatpush1.bf16.msra.mxu1 %v9393_v2  ;;  %v9480_v1 = vld [vmem:[%s14037_s1 + $0x5a0] ss:$16 sps:$4 sm:$0xff]   ;;  %v9483_v2 = vld [vmem:[%s14037_s1 + $0x5a8] ss:$16 sps:$4 sm:$0xff]  }
  0x80   : > { %6610 = vmatprep.subr.bf16.mxu0 %v9398_v3  ;;  %7298 = vmatprep.subr.bf16.mxu1 %v9401_v4  ;;  %v9488_v3 = vld [vmem:[%s14037_s1 + $0x5c4] ss:$16 sps:$4 sm:$0xff]   ;;  %v9491_v4 = vld [vmem:[%s14037_s1 + $0x5cc] ss:$16 sps:$4 sm:$0xff]  }
  0x83   : > { %6611 = vmatpush1.bf16.msra.mxu0 %v9396_v5  ;;  %7299 = vmatpush1.bf16.msra.mxu1 %v9399_v6  ;;  %v9486_v5 = vld [vmem:[%s14037_s1 + $0x5c0] ss:$16 sps:$4 sm:$0xff]   ;;  %v9489_v6 = vld [vmem:[%s14037_s1 + $0x5c8] ss:$16 sps:$4 sm:$0xff]  }
  0x84   : > { %6623 = vmatprep.subr.bf16.mxu0 %v9404_v7  ;;  %7311 = vmatprep.subr.bf16.mxu1 %v9407_v8  ;;  %v9494_v7 = vld [vmem:[%s14037_s1 + $0x5e4] ss:$16 sps:$4 sm:$0xff]   ;;  %v9497_v8 = vld [vmem:[%s14037_s1 + $0x5ec] ss:$16 sps:$4 sm:$0xff]  }
  0x86   : > { %6613 = vmatmul.mubr.bf16.vlgmr.msra.gmra.mrb[0].mxu0 %v8016_v9  ;;  %7301 = vmatmul.mubr.bf16.vlgmr.msra.gmra.mrb[0].mxu1 %v8016_v9  ;;  %v9492_v9 = vld [vmem:[%s14037_s1 + $0x5e0] ss:$16 sps:$4 sm:$0xff]  }
  0x87   : > { %6624 = vmatpush1.bf16.msra.mxu0 %v9402_v10  ;;  %7312 = vmatpush1.bf16.msra.mxu1 %v9405_v11  ;;  %v9495_v10 = vld [vmem:[%s14037_s1 + $0x5e8] ss:$16 sps:$4 sm:$0xff]   ;;  %v9500_v11 = vld [vmem:[%s14037_s1 + $0x604] ss:$16 sps:$4 sm:$0xff]  }
  0x88   : > { %6625 = vmatprep.subr.bf16.mxu0 %v9410_v12  ;;  %7313 = vmatprep.subr.bf16.mxu1 %v9413_v13  ;;  %v9503_v12 = vld [vmem:[%s14037_s1 + $0x60c] ss:$16 sps:$4 sm:$0xff]   ;;  %v9498_v13 = vld [vmem:[%s14037_s1 + $0x600] ss:$16 sps:$4 sm:$0xff]  }
  0x89   : > { %6655 = vmatprep.mubr.bf16.mxu0 %v8019_v16  ;;  %7343 = vmatprep.mubr.bf16.mxu1 %v8019_v16  ;;  %v9501_v16 = vld [vmem:[%s14037_s1 + $0x608] ss:$16 sps:$4 sm:$0xff]  }
  0x8b   : > { %6626 = vmatpush1.bf16.msra.mxu0 %v9408_v17  ;;  %7314 = vmatpush1.bf16.msra.mxu1 %v9411_v18  ;;  %v8018_v17 = vcombine.low %v11207_v14, %v11210_v15  ;;  %v11403_v18 = vld [vmem:[%s10922_s4 + $0x18] sm:$0xff]  ;;  %v9504_v14 = vld [vmem:[%s14037_s1 + $0x620] ss:$16 sps:$4 sm:$0xff]  }
  0x8c   : > { %6627 = vmatprep.subr.bf16.mxu0 %v9416_v19  ;;  %7315 = vmatprep.subr.bf16.mxu1 %v9419_v20  ;;  %v11406_v19 = vld [vmem:[%s10922_s4 + $0x98] sm:$0xff]  ;;  %v9506_v20 = vld [vmem:[%s14037_s1 + $0x624] ss:$16 sps:$4 sm:$0xff]  }
  0x8d   : > { %v9507_v15 = vld [vmem:[%s14037_s1 + $0x628] ss:$16 sps:$4 sm:$0xff]  }
  0x8f   : > { %6628 = vmatpush1.bf16.msra.mxu0 %v9414_v21  ;;  %7316 = vmatpush1.bf16.msra.mxu1 %v9417_v22  ;;  %v9509_v21 = vld [vmem:[%s14037_s1 + $0x62c] ss:$16 sps:$4 sm:$0xff]   ;;  %v8021_v22 = vcombine.high %v11403_v18, %v11406_v19 }
  0x90   : > { %6629 = vmatprep.subr.bf16.mxu0 %v9422_v23  ;;  %7317 = vmatprep.subr.bf16.mxu1 %v9425_v24  ;;  %v9512_v23 = vld [vmem:[%s14037_s1 + $0x644] ss:$16 sps:$4 sm:$0xff]   ;;  %v9515_v24 = vld [vmem:[%s14037_s1 + $0x64c] ss:$16 sps:$4 sm:$0xff]  }
  0x93   : > { %6630 = vmatpush1.bf16.msra.mxu0 %v9420_v25  ;;  %7318 = vmatpush1.bf16.msra.mxu1 %v9423_v26  ;;  %v9510_v25 = vld [vmem:[%s14037_s1 + $0x640] ss:$16 sps:$4 sm:$0xff]   ;;  %v9513_v26 = vld [vmem:[%s14037_s1 + $0x648] ss:$16 sps:$4 sm:$0xff]  }
  0x94   : > { %6631 = vmatprep.subr.bf16.mxu0 %v9428_v27  ;;  %7319 = vmatprep.subr.bf16.mxu1 %v9431_v28  ;;  %v9518_v27 = vld [vmem:[%s14037_s1 + $0x664] ss:$16 sps:$4 sm:$0xff]   ;;  %v9521_v28 = vld [vmem:[%s14037_s1 + $0x66c] ss:$16 sps:$4 sm:$0xff]  }
  0x97   : > { %6632 = vmatpush1.bf16.msra.mxu0 %v9426_v29  ;;  %7320 = vmatpush1.bf16.msra.mxu1 %v9429_v30  ;;  %v9516_v29 = vld [vmem:[%s14037_s1 + $0x660] ss:$16 sps:$4 sm:$0xff]   ;;  %v9519_v30 = vld [vmem:[%s14037_s1 + $0x668] ss:$16 sps:$4 sm:$0xff]  }
  0x98   : > { %6633 = vmatprep.subr.bf16.mxu0 %v9434_v31  ;;  %7321 = vmatprep.subr.bf16.mxu1 %v9437_v32  ;;  %v9524_v31 = vld [vmem:[%s14037_s1 + $0x684] ss:$16 sps:$4 sm:$0xff]   ;;  %v9527_v32 = vld [vmem:[%s14037_s1 + $0x68c] ss:$16 sps:$4 sm:$0xff]  }
  0x9b   : > { %6634 = vmatpush1.bf16.msra.mxu0 %v9432_v33  ;;  %7322 = vmatpush1.bf16.msra.mxu1 %v9435_v34  ;;  %v9522_v33 = vld [vmem:[%s14037_s1 + $0x680] ss:$16 sps:$4 sm:$0xff]   ;;  %v9525_v34 = vld [vmem:[%s14037_s1 + $0x688] ss:$16 sps:$4 sm:$0xff]  }
  0x9c   : > { %6635 = vmatprep.subr.bf16.mxu0 %v9440_v35  ;;  %7323 = vmatprep.subr.bf16.mxu1 %v9443_v36  ;;  %v9530_v35 = vld [vmem:[%s14037_s1 + $0x6a4] ss:$16 sps:$4 sm:$0xff]   ;;  %v9533_v36 = vld [vmem:[%s14037_s1 + $0x6ac] ss:$16 sps:$4 sm:$0xff]  }
  0x9f   : > { %6636 = vmatpush1.bf16.msra.mxu0 %v9438_v37  ;;  %7324 = vmatpush1.bf16.msra.mxu1 %v9441_v38  ;;  %v9528_v37 = vld [vmem:[%s14037_s1 + $0x6a0] ss:$16 sps:$4 sm:$0xff]   ;;  %v9531_v38 = vld [vmem:[%s14037_s1 + $0x6a8] ss:$16 sps:$4 sm:$0xff]  }
  0xa0   : > { %6637 = vmatprep.subr.bf16.mxu0 %v9446_v39  ;;  %7325 = vmatprep.subr.bf16.mxu1 %v9449_v40  ;;  %v9536_v39 = vld [vmem:[%s14037_s1 + $0x6c4] ss:$16 sps:$4 sm:$0xff]   ;;  %v9539_v40 = vld [vmem:[%s14037_s1 + $0x6cc] ss:$16 sps:$4 sm:$0xff]  }
  0xa3   : > { %6638 = vmatpush1.bf16.msra.mxu0 %v9444_v41  ;;  %7326 = vmatpush1.bf16.msra.mxu1 %v9447_v42  ;;  %v9534_v41 = vld [vmem:[%s14037_s1 + $0x6c0] ss:$16 sps:$4 sm:$0xff]   ;;  %v9537_v42 = vld [vmem:[%s14037_s1 + $0x6c8] ss:$16 sps:$4 sm:$0xff]  }
  0xa4   : > { %6639 = vmatprep.subr.bf16.mxu0 %v9452_v43  ;;  %7327 = vmatprep.subr.bf16.mxu1 %v9455_v44  ;;  %v9542_v43 = vld [vmem:[%s14037_s1 + $0x6e4] ss:$16 sps:$4 sm:$0xff]   ;;  %v9545_v44 = vld [vmem:[%s14037_s1 + $0x6ec] ss:$16 sps:$4 sm:$0xff]  }
  0xa7   : > { %6640 = vmatpush1.bf16.msra.mxu0 %v9450_v45  ;;  %7328 = vmatpush1.bf16.msra.mxu1 %v9453_v46  ;;  %v9540_v45 = vld [vmem:[%s14037_s1 + $0x6e0] ss:$16 sps:$4 sm:$0xff]   ;;  %v9543_v46 = vld [vmem:[%s14037_s1 + $0x6e8] ss:$16 sps:$4 sm:$0xff]  }
  0xa8   : > { %6641 = vmatprep.subr.bf16.mxu0 %v9458_v47  ;;  %7329 = vmatprep.subr.bf16.mxu1 %v9461_v48  ;;  %v9548_v47 = vld [vmem:[%s14037_s1 + $0x704] ss:$16 sps:$4 sm:$0xff]   ;;  %v9551_v48 = vld [vmem:[%s14037_s1 + $0x70c] ss:$16 sps:$4 sm:$0xff]  }
  0xab   : > { %6642 = vmatpush1.bf16.msra.mxu0 %v9456_v49  ;;  %7330 = vmatpush1.bf16.msra.mxu1 %v9459_v50  ;;  %v9546_v49 = vld [vmem:[%s14037_s1 + $0x700] ss:$16 sps:$4 sm:$0xff]   ;;  %v9549_v50 = vld [vmem:[%s14037_s1 + $0x708] ss:$16 sps:$4 sm:$0xff]  }
  0xac   : > { %6643 = vmatprep.subr.bf16.mxu0 %v9464_v51  ;;  %7331 = vmatprep.subr.bf16.mxu1 %v9467_v52  ;;  %v9554_v51 = vld [vmem:[%s14037_s1 + $0x724] ss:$16 sps:$4 sm:$0xff]   ;;  %v9557_v52 = vld [vmem:[%s14037_s1 + $0x72c] ss:$16 sps:$4 sm:$0xff]  }
  0xaf   : > { %6644 = vmatpush1.bf16.msra.mxu0 %v9462_v53  ;;  %7332 = vmatpush1.bf16.msra.mxu1 %v9465_v54  ;;  %v9552_v53 = vld [vmem:[%s14037_s1 + $0x720] ss:$16 sps:$4 sm:$0xff]   ;;  %v9555_v54 = vld [vmem:[%s14037_s1 + $0x728] ss:$16 sps:$4 sm:$0xff]  }
  0xb0   : > { %6645 = vmatprep.subr.bf16.mxu0 %v9470_v55  ;;  %7333 = vmatprep.subr.bf16.mxu1 %v9473_v56  ;;  %v9560_v55 = vld [vmem:[%s14037_s1 + $0x744] ss:$16 sps:$4 sm:$0xff]   ;;  %v9563_v56 = vld [vmem:[%s14037_s1 + $0x74c] ss:$16 sps:$4 sm:$0xff]  }
  0xb3   : > { %6646 = vmatpush1.bf16.msra.mxu0 %v9468_v57  ;;  %7334 = vmatpush1.bf16.msra.mxu1 %v9471_v58  ;;  %v9558_v57 = vld [vmem:[%s14037_s1 + $0x740] ss:$16 sps:$4 sm:$0xff]   ;;  %v9561_v58 = vld [vmem:[%s14037_s1 + $0x748] ss:$16 sps:$4 sm:$0xff]  }
  0xb4   : > { %6647 = vmatprep.subr.bf16.mxu0 %v9476_v59  ;;  %7335 = vmatprep.subr.bf16.mxu1 %v9479_v60  ;;  %v9566_v59 = vld [vmem:[%s14037_s1 + $0x764] ss:$16 sps:$4 sm:$0xff]   ;;  %v9569_v60 = vld [vmem:[%s14037_s1 + $0x76c] ss:$16 sps:$4 sm:$0xff]  }
  0xb7   : > { %6648 = vmatpush1.bf16.msra.mxu0 %v9474_v61  ;;  %7336 = vmatpush1.bf16.msra.mxu1 %v9477_v62  ;;  %v9564_v61 = vld [vmem:[%s14037_s1 + $0x760] ss:$16 sps:$4 sm:$0xff]   ;;  %v9567_v62 = vld [vmem:[%s14037_s1 + $0x768] ss:$16 sps:$4 sm:$0xff]  }
  0xb8   : > { %6649 = vmatprep.subr.bf16.mxu0 %v9482_v63  ;;  %7337 = vmatprep.subr.bf16.mxu1 %v9485_v0  ;;  %v9572_v63 = vld [vmem:[%s14037_s1 + $0x784] ss:$16 sps:$4 sm:$0xff]   ;;  %v9575_v0 = vld [vmem:[%s14037_s1 + $0x78c] ss:$16 sps:$4 sm:$0xff]  }
  0xbb   : > { %6650 = vmatpush1.bf16.msra.mxu0 %v9480_v1  ;;  %7338 = vmatpush1.bf16.msra.mxu1 %v9483_v2  ;;  %v9570_v1 = vld [vmem:[%s14037_s1 + $0x780] ss:$16 sps:$4 sm:$0xff]   ;;  %v9573_v2 = vld [vmem:[%s14037_s1 + $0x788] ss:$16 sps:$4 sm:$0xff]  }
  0xbc   : > { %6651 = vmatprep.subr.bf16.mxu0 %v9488_v3  ;;  %7339 = vmatprep.subr.bf16.mxu1 %v9491_v4  ;;  %v9578_v3 = vld [vmem:[%s14037_s1 + $0x7a4] ss:$16 sps:$4 sm:$0xff]   ;;  %v9581_v4 = vld [vmem:[%s14037_s1 + $0x7ac] ss:$16 sps:$4 sm:$0xff]  }
  0xbf   : > { %6652 = vmatpush1.bf16.msra.mxu0 %v9486_v5  ;;  %7340 = vmatpush1.bf16.msra.mxu1 %v9489_v6  ;;  %v9576_v5 = vld [vmem:[%s14037_s1 + $0x7a0] ss:$16 sps:$4 sm:$0xff]   ;;  %v9579_v6 = vld [vmem:[%s14037_s1 + $0x7a8] ss:$16 sps:$4 sm:$0xff]  }
  0xc0   : > { %6653 = vmatprep.subr.bf16.mxu0 %v9494_v7  ;;  %7341 = vmatprep.subr.bf16.mxu1 %v9497_v8  ;;  %v9584_v7 = vld [vmem:[%s14037_s1 + $0x7c4] ss:$16 sps:$4 sm:$0xff]   ;;  %v9587_v8 = vld [vmem:[%s14037_s1 + $0x7cc] ss:$16 sps:$4 sm:$0xff]  }
  0xc3   : > { %6654 = vmatpush1.bf16.msra.mxu0 %v9492_v9  ;;  %7342 = vmatpush1.bf16.msra.mxu1 %v9495_v10  ;;  %v9582_v9 = vld [vmem:[%s14037_s1 + $0x7c0] ss:$16 sps:$4 sm:$0xff]   ;;  %v9585_v10 = vld [vmem:[%s14037_s1 + $0x7c8] ss:$16 sps:$4 sm:$0xff]  }
  0xc4   : > { %6666 = vmatprep.subr.bf16.mxu0 %v9500_v11  ;;  %7354 = vmatprep.subr.bf16.mxu1 %v9503_v12  ;;  %v9590_v11 = vld [vmem:[%s14037_s1 + $0x7e4] ss:$16 sps:$4 sm:$0xff]   ;;  %v9593_v12 = vld [vmem:[%s14037_s1 + $0x7ec] ss:$16 sps:$4 sm:$0xff]  }
  0xc6   : > { %6656 = vmatmul.mubr.bf16.vlgmr.msra.gmra.mrb[0].mxu0 %v8018_v17  ;;  %7344 = vmatmul.mubr.bf16.vlgmr.msra.gmra.mrb[0].mxu1 %v8018_v17  ;;  %v9596_v17 = vld [vmem:[%s14037_s1 + $0x804] ss:$16 sps:$4 sm:$0xff]  }
  0xc7   : > { %6667 = vmatpush1.bf16.msra.mxu0 %v9498_v13  ;;  %7355 = vmatpush1.bf16.msra.mxu1 %v9501_v16  ;;  %v9588_v13 = vld [vmem:[%s14037_s1 + $0x7e0] ss:$16 sps:$4 sm:$0xff]   ;;  %v9591_v16 = vld [vmem:[%s14037_s1 + $0x7e8] ss:$16 sps:$4 sm:$0xff]  }
  0xc8   : > { %6668 = vmatprep.subr.bf16.mxu0 %v9506_v20  ;;  %7356 = vmatprep.subr.bf16.mxu1 %v9509_v21  ;;  %v9599_v20 = vld [vmem:[%s14037_s1 + $0x80c] ss:$16 sps:$4 sm:$0xff]   ;;  %v11597_v21 = vld [vmem:[%s10922_s4 + $0x20] sm:$0xff] }
  0xc9   : > { %6698 = vmatprep.mubr.bf16.mxu0 %v8021_v22  ;;  %7386 = vmatprep.mubr.bf16.mxu1 %v8021_v22  ;;  %v8020_v22 = vcombine.low %v11403_v18, %v11406_v19  ;;  %v9605_v18 = vld [vmem:[%s14037_s1 + $0x82c] ss:$16 sps:$4 sm:$0xff]  }
  0xcb   : > { %6669 = vmatpush1.bf16.msra.mxu0 %v9504_v14  ;;  %7357 = vmatpush1.bf16.msra.mxu1 %v9507_v15  ;;  %v11602_v14 = vld [vmem:[%s10922_s4 + $0xa0] sm:$0xff] }
  0xcc   : > { %6670 = vmatprep.subr.bf16.mxu0 %v9512_v23  ;;  %7358 = vmatprep.subr.bf16.mxu1 %v9515_v24  ;;  %v9594_v15 = vld [vmem:[%s14037_s1 + $0x800] ss:$16 sps:$4 sm:$0xff]   ;;  %v9597_v23 = vld [vmem:[%s14037_s1 + $0x808] ss:$16 sps:$4 sm:$0xff]   ;;  %v9602_v24 = vld [vmem:[%s14037_s1 + $0x824] ss:$16 sps:$4 sm:$0xff]   ;;  %v8023_v19 = vcombine.high %v11597_v21, %v11602_v14 }
  0xcf   : > { %6671 = vmatpush1.bf16.msra.mxu0 %v9510_v25  ;;  %7359 = vmatpush1.bf16.msra.mxu1 %v9513_v26  ;;  %v9600_v25 = vld [vmem:[%s14037_s1 + $0x820] ss:$16 sps:$4 sm:$0xff]   ;;  %v9603_v26 = vld [vmem:[%s14037_s1 + $0x828] ss:$16 sps:$4 sm:$0xff]  }
  0xd0   : > { %6672 = vmatprep.subr.bf16.mxu0 %v9518_v27  ;;  %7360 = vmatprep.subr.bf16.mxu1 %v9521_v28  ;;  %v9608_v27 = vld [vmem:[%s14037_s1 + $0x844] ss:$16 sps:$4 sm:$0xff]   ;;  %v9611_v28 = vld [vmem:[%s14037_s1 + $0x84c] ss:$16 sps:$4 sm:$0xff]  }
  0xd3   : > { %6673 = vmatpush1.bf16.msra.mxu0 %v9516_v29  ;;  %7361 = vmatpush1.bf16.msra.mxu1 %v9519_v30  ;;  %v9606_v29 = vld [vmem:[%s14037_s1 + $0x840] ss:$16 sps:$4 sm:$0xff]   ;;  %v9609_v30 = vld [vmem:[%s14037_s1 + $0x848] ss:$16 sps:$4 sm:$0xff]  }
  0xd4   : > { %6674 = vmatprep.subr.bf16.mxu0 %v9524_v31  ;;  %7362 = vmatprep.subr.bf16.mxu1 %v9527_v32  ;;  %v9614_v31 = vld [vmem:[%s14037_s1 + $0x864] ss:$16 sps:$4 sm:$0xff]   ;;  %v9617_v32 = vld [vmem:[%s14037_s1 + $0x86c] ss:$16 sps:$4 sm:$0xff]  }
  0xd7   : > { %6675 = vmatpush1.bf16.msra.mxu0 %v9522_v33  ;;  %7363 = vmatpush1.bf16.msra.mxu1 %v9525_v34  ;;  %v9612_v33 = vld [vmem:[%s14037_s1 + $0x860] ss:$16 sps:$4 sm:$0xff]   ;;  %v9615_v34 = vld [vmem:[%s14037_s1 + $0x868] ss:$16 sps:$4 sm:$0xff]  }
  0xd8   : > { %6676 = vmatprep.subr.bf16.mxu0 %v9530_v35  ;;  %7364 = vmatprep.subr.bf16.mxu1 %v9533_v36  ;;  %v9620_v35 = vld [vmem:[%s14037_s1 + $0x884] ss:$16 sps:$4 sm:$0xff]   ;;  %v9623_v36 = vld [vmem:[%s14037_s1 + $0x88c] ss:$16 sps:$4 sm:$0xff]  }
  0xdb   : > { %6677 = vmatpush1.bf16.msra.mxu0 %v9528_v37  ;;  %7365 = vmatpush1.bf16.msra.mxu1 %v9531_v38  ;;  %v9618_v37 = vld [vmem:[%s14037_s1 + $0x880] ss:$16 sps:$4 sm:$0xff]   ;;  %v9621_v38 = vld [vmem:[%s14037_s1 + $0x888] ss:$16 sps:$4 sm:$0xff]  }
  0xdc   : > { %6678 = vmatprep.subr.bf16.mxu0 %v9536_v39  ;;  %7366 = vmatprep.subr.bf16.mxu1 %v9539_v40  ;;  %v9626_v39 = vld [vmem:[%s14037_s1 + $0x8a4] ss:$16 sps:$4 sm:$0xff]   ;;  %v9629_v40 = vld [vmem:[%s14037_s1 + $0x8ac] ss:$16 sps:$4 sm:$0xff]  }
  0xdf   : > { %6679 = vmatpush1.bf16.msra.mxu0 %v9534_v41  ;;  %7367 = vmatpush1.bf16.msra.mxu1 %v9537_v42  ;;  %v9624_v41 = vld [vmem:[%s14037_s1 + $0x8a0] ss:$16 sps:$4 sm:$0xff]   ;;  %v9627_v42 = vld [vmem:[%s14037_s1 + $0x8a8] ss:$16 sps:$4 sm:$0xff]  }
  0xe0   : > { %6680 = vmatprep.subr.bf16.mxu0 %v9542_v43  ;;  %7368 = vmatprep.subr.bf16.mxu1 %v9545_v44  ;;  %v9632_v43 = vld [vmem:[%s14037_s1 + $0x8c4] ss:$16 sps:$4 sm:$0xff]   ;;  %v9635_v44 = vld [vmem:[%s14037_s1 + $0x8cc] ss:$16 sps:$4 sm:$0xff]  }
  0xe3   : > { %6681 = vmatpush1.bf16.msra.mxu0 %v9540_v45  ;;  %7369 = vmatpush1.bf16.msra.mxu1 %v9543_v46  ;;  %v9630_v45 = vld [vmem:[%s14037_s1 + $0x8c0] ss:$16 sps:$4 sm:$0xff]   ;;  %v9633_v46 = vld [vmem:[%s14037_s1 + $0x8c8] ss:$16 sps:$4 sm:$0xff]  }
  0xe4   : > { %6682 = vmatprep.subr.bf16.mxu0 %v9548_v47  ;;  %7370 = vmatprep.subr.bf16.mxu1 %v9551_v48  ;;  %v9638_v47 = vld [vmem:[%s14037_s1 + $0x8e4] ss:$16 sps:$4 sm:$0xff]   ;;  %v9641_v48 = vld [vmem:[%s14037_s1 + $0x8ec] ss:$16 sps:$4 sm:$0xff]  }
  0xe7   : > { %6683 = vmatpush1.bf16.msra.mxu0 %v9546_v49  ;;  %7371 = vmatpush1.bf16.msra.mxu1 %v9549_v50  ;;  %v9636_v49 = vld [vmem:[%s14037_s1 + $0x8e0] ss:$16 sps:$4 sm:$0xff]   ;;  %v9639_v50 = vld [vmem:[%s14037_s1 + $0x8e8] ss:$16 sps:$4 sm:$0xff]  }
  0xe8   : > { %6684 = vmatprep.subr.bf16.mxu0 %v9554_v51  ;;  %7372 = vmatprep.subr.bf16.mxu1 %v9557_v52  ;;  %v9644_v51 = vld [vmem:[%s14037_s1 + $0x904] ss:$16 sps:$4 sm:$0xff]   ;;  %v9647_v52 = vld [vmem:[%s14037_s1 + $0x90c] ss:$16 sps:$4 sm:$0xff]  }
  0xeb   : > { %6685 = vmatpush1.bf16.msra.mxu0 %v9552_v53  ;;  %7373 = vmatpush1.bf16.msra.mxu1 %v9555_v54  ;;  %v9642_v53 = vld [vmem:[%s14037_s1 + $0x900] ss:$16 sps:$4 sm:$0xff]   ;;  %v9645_v54 = vld [vmem:[%s14037_s1 + $0x908] ss:$16 sps:$4 sm:$0xff]  }
  0xec   : > { %6686 = vmatprep.subr.bf16.mxu0 %v9560_v55  ;;  %7374 = vmatprep.subr.bf16.mxu1 %v9563_v56  ;;  %v9650_v55 = vld [vmem:[%s14037_s1 + $0x924] ss:$16 sps:$4 sm:$0xff]   ;;  %v9653_v56 = vld [vmem:[%s14037_s1 + $0x92c] ss:$16 sps:$4 sm:$0xff]  }
  0xef   : > { %6687 = vmatpush1.bf16.msra.mxu0 %v9558_v57  ;;  %7375 = vmatpush1.bf16.msra.mxu1 %v9561_v58  ;;  %v9648_v57 = vld [vmem:[%s14037_s1 + $0x920] ss:$16 sps:$4 sm:$0xff]   ;;  %v9651_v58 = vld [vmem:[%s14037_s1 + $0x928] ss:$16 sps:$4 sm:$0xff]  }
  0xf0   : > { %6688 = vmatprep.subr.bf16.mxu0 %v9566_v59  ;;  %7376 = vmatprep.subr.bf16.mxu1 %v9569_v60  ;;  %v9656_v59 = vld [vmem:[%s14037_s1 + $0x944] ss:$16 sps:$4 sm:$0xff]   ;;  %v9659_v60 = vld [vmem:[%s14037_s1 + $0x94c] ss:$16 sps:$4 sm:$0xff]  }
  0xf3   : > { %6689 = vmatpush1.bf16.msra.mxu0 %v9564_v61  ;;  %7377 = vmatpush1.bf16.msra.mxu1 %v9567_v62  ;;  %v9654_v61 = vld [vmem:[%s14037_s1 + $0x940] ss:$16 sps:$4 sm:$0xff]   ;;  %v9657_v62 = vld [vmem:[%s14037_s1 + $0x948] ss:$16 sps:$4 sm:$0xff]  }
  0xf4   : > { %6690 = vmatprep.subr.bf16.mxu0 %v9572_v63  ;;  %7378 = vmatprep.subr.bf16.mxu1 %v9575_v0  ;;  %v9662_v63 = vld [vmem:[%s14037_s1 + $0x964] ss:$16 sps:$4 sm:$0xff]   ;;  %v9665_v0 = vld [vmem:[%s14037_s1 + $0x96c] ss:$16 sps:$4 sm:$0xff]  }
  0xf7   : > { %6691 = vmatpush1.bf16.msra.mxu0 %v9570_v1  ;;  %7379 = vmatpush1.bf16.msra.mxu1 %v9573_v2  ;;  %v9660_v1 = vld [vmem:[%s14037_s1 + $0x960] ss:$16 sps:$4 sm:$0xff]   ;;  %v9663_v2 = vld [vmem:[%s14037_s1 + $0x968] ss:$16 sps:$4 sm:$0xff]  }
  0xf8   : > { %6692 = vmatprep.subr.bf16.mxu0 %v9578_v3  ;;  %7380 = vmatprep.subr.bf16.mxu1 %v9581_v4  ;;  %v9668_v3 = vld [vmem:[%s14037_s1 + $0x984] ss:$16 sps:$4 sm:$0xff]   ;;  %v9671_v4 = vld [vmem:[%s14037_s1 + $0x98c] ss:$16 sps:$4 sm:$0xff]  }
  0xfb   : > { %6693 = vmatpush1.bf16.msra.mxu0 %v9576_v5  ;;  %7381 = vmatpush1.bf16.msra.mxu1 %v9579_v6  ;;  %v9666_v5 = vld [vmem:[%s14037_s1 + $0x980] ss:$16 sps:$4 sm:$0xff]   ;;  %v9669_v6 = vld [vmem:[%s14037_s1 + $0x988] ss:$16 sps:$4 sm:$0xff]  }
  0xfc   : > { %6694 = vmatprep.subr.bf16.mxu0 %v9584_v7  ;;  %7382 = vmatprep.subr.bf16.mxu1 %v9587_v8  ;;  %v9674_v7 = vld [vmem:[%s14037_s1 + $0x9a4] ss:$16 sps:$4 sm:$0xff]   ;;  %v9677_v8 = vld [vmem:[%s14037_s1 + $0x9ac] ss:$16 sps:$4 sm:$0xff]  }
  0xff   : > { %6695 = vmatpush1.bf16.msra.mxu0 %v9582_v9  ;;  %7383 = vmatpush1.bf16.msra.mxu1 %v9585_v10  ;;  %v9672_v9 = vld [vmem:[%s14037_s1 + $0x9a0] ss:$16 sps:$4 sm:$0xff]   ;;  %v9675_v10 = vld [vmem:[%s14037_s1 + $0x9a8] ss:$16 sps:$4 sm:$0xff]  }
 0x100   : > { %6696 = vmatprep.subr.bf16.mxu0 %v9590_v11  ;;  %7384 = vmatprep.subr.bf16.mxu1 %v9593_v12  ;;  %v9680_v11 = vld [vmem:[%s14037_s1 + $0x9c4] ss:$16 sps:$4 sm:$0xff]   ;;  %v9683_v12 = vld [vmem:[%s14037_s1 + $0x9cc] ss:$16 sps:$4 sm:$0xff]  }
 0x103   : > { %6697 = vmatpush1.bf16.msra.mxu0 %v9588_v13  ;;  %7385 = vmatpush1.bf16.msra.mxu1 %v9591_v16  ;;  %v9678_v13 = vld [vmem:[%s14037_s1 + $0x9c0] ss:$16 sps:$4 sm:$0xff]   ;;  %v9681_v16 = vld [vmem:[%s14037_s1 + $0x9c8] ss:$16 sps:$4 sm:$0xff]  }
 0x104   : > { %6709 = vmatprep.subr.bf16.mxu0 %v9596_v17  ;;  %7397 = vmatprep.subr.bf16.mxu1 %v9599_v20  ;;  %v9686_v17 = vld [vmem:[%s14037_s1 + $0x9e4] ss:$16 sps:$4 sm:$0xff]   ;;  %v9689_v20 = vld [vmem:[%s14037_s1 + $0x9ec] ss:$16 sps:$4 sm:$0xff]  }
 0x106   : > { %6699 = vmatmul.mubr.bf16.vlgmr.msra.gmra.mrb[0].mxu0 %v8020_v22  ;;  %7387 = vmatmul.mubr.bf16.vlgmr.msra.gmra.mrb[0].mxu1 %v8020_v22  ;;  %v9684_v22 = vld [vmem:[%s14037_s1 + $0x9e0] ss:$16 sps:$4 sm:$0xff]  }
 0x107   : > { %6710 = vmatpush1.bf16.msra.mxu0 %v9594_v15  ;;  %7398 = vmatpush1.bf16.msra.mxu1 %v9597_v23  ;;  %v9687_v15 = vld [vmem:[%s14037_s1 + $0x9e8] ss:$16 sps:$4 sm:$0xff]   ;;  %v9692_v23 = vld [vmem:[%s14037_s1 + $0xa04] ss:$16 sps:$4 sm:$0xff]  }
 0x108   : > { %6711 = vmatprep.subr.bf16.mxu0 %v9602_v24  ;;  %7399 = vmatprep.subr.bf16.mxu1 %v9605_v18  ;;  %v9695_v24 = vld [vmem:[%s14037_s1 + $0xa0c] ss:$16 sps:$4 sm:$0xff]  }
 0x109   : > { %6741 = vmatprep.mubr.bf16.mxu0 %v8023_v19  ;;  %7429 = vmatprep.mubr.bf16.mxu1 %v8023_v19  ;;  %v11799_v18 = vld [vmem:[%s10922_s4 + $0x28] sm:$0xff] }
 0x10a   : > { %v11802_v19 = vld [vmem:[%s10922_s4 + $0xa8] sm:$0xff] }
 0x10b   : > { %6712 = vmatpush1.bf16.msra.mxu0 %v9600_v25  ;;  %7400 = vmatpush1.bf16.msra.mxu1 %v9603_v26  ;;  %v8022_v25 = vcombine.low %v11597_v21, %v11602_v14  ;;  %v9690_v26 = vld [vmem:[%s14037_s1 + $0xa00] ss:$16 sps:$4 sm:$0xff]   ;;  %v9701_v21 = vld [vmem:[%s14037_s1 + $0xa2c] ss:$16 sps:$4 sm:$0xff]   ;;  %v8025_v14 = vcombine.high %v11799_v18, %v11802_v19 }
 0x10c   : > { %6713 = vmatprep.subr.bf16.mxu0 %v9608_v27  ;;  %7401 = vmatprep.subr.bf16.mxu1 %v9611_v28  ;;  %v9693_v27 = vld [vmem:[%s14037_s1 + $0xa08] ss:$16 sps:$4 sm:$0xff]   ;;  %v9698_v28 = vld [vmem:[%s14037_s1 + $0xa24] ss:$16 sps:$4 sm:$0xff]  }
 0x10f   : > { %6714 = vmatpush1.bf16.msra.mxu0 %v9606_v29  ;;  %7402 = vmatpush1.bf16.msra.mxu1 %v9609_v30  ;;  %v9696_v29 = vld [vmem:[%s14037_s1 + $0xa20] ss:$16 sps:$4 sm:$0xff]   ;;  %v9699_v30 = vld [vmem:[%s14037_s1 + $0xa28] ss:$16 sps:$4 sm:$0xff]  }
 0x110   : > { %6715 = vmatprep.subr.bf16.mxu0 %v9614_v31  ;;  %7403 = vmatprep.subr.bf16.mxu1 %v9617_v32  ;;  %v9704_v31 = vld [vmem:[%s14037_s1 + $0xa44] ss:$16 sps:$4 sm:$0xff]   ;;  %v9707_v32 = vld [vmem:[%s14037_s1 + $0xa4c] ss:$16 sps:$4 sm:$0xff]  }
 0x113   : > { %6716 = vmatpush1.bf16.msra.mxu0 %v9612_v33  ;;  %7404 = vmatpush1.bf16.msra.mxu1 %v9615_v34  ;;  %v9702_v33 = vld [vmem:[%s14037_s1 + $0xa40] ss:$16 sps:$4 sm:$0xff]   ;;  %v9705_v34 = vld [vmem:[%s14037_s1 + $0xa48] ss:$16 sps:$4 sm:$0xff]  }
 0x114   : > { %6717 = vmatprep.subr.bf16.mxu0 %v9620_v35  ;;  %7405 = vmatprep.subr.bf16.mxu1 %v9623_v36  ;;  %v9710_v35 = vld [vmem:[%s14037_s1 + $0xa64] ss:$16 sps:$4 sm:$0xff]   ;;  %v9713_v36 = vld [vmem:[%s14037_s1 + $0xa6c] ss:$16 sps:$4 sm:$0xff]  }
 0x117   : > { %6718 = vmatpush1.bf16.msra.mxu0 %v9618_v37  ;;  %7406 = vmatpush1.bf16.msra.mxu1 %v9621_v38  ;;  %v9708_v37 = vld [vmem:[%s14037_s1 + $0xa60] ss:$16 sps:$4 sm:$0xff]   ;;  %v9711_v38 = vld [vmem:[%s14037_s1 + $0xa68] ss:$16 sps:$4 sm:$0xff]  }
 0x118   : > { %6719 = vmatprep.subr.bf16.mxu0 %v9626_v39  ;;  %7407 = vmatprep.subr.bf16.mxu1 %v9629_v40  ;;  %v9716_v39 = vld [vmem:[%s14037_s1 + $0xa84] ss:$16 sps:$4 sm:$0xff]   ;;  %v9719_v40 = vld [vmem:[%s14037_s1 + $0xa8c] ss:$16 sps:$4 sm:$0xff]  }
 0x11b   : > { %6720 = vmatpush1.bf16.msra.mxu0 %v9624_v41  ;;  %7408 = vmatpush1.bf16.msra.mxu1 %v9627_v42  ;;  %v9714_v41 = vld [vmem:[%s14037_s1 + $0xa80] ss:$16 sps:$4 sm:$0xff]   ;;  %v9717_v42 = vld [vmem:[%s14037_s1 + $0xa88] ss:$16 sps:$4 sm:$0xff]  }
 0x11c   : > { %6721 = vmatprep.subr.bf16.mxu0 %v9632_v43  ;;  %7409 = vmatprep.subr.bf16.mxu1 %v9635_v44  ;;  %v9722_v43 = vld [vmem:[%s14037_s1 + $0xaa4] ss:$16 sps:$4 sm:$0xff]   ;;  %v9725_v44 = vld [vmem:[%s14037_s1 + $0xaac] ss:$16 sps:$4 sm:$0xff]  }
 0x11f   : > { %6722 = vmatpush1.bf16.msra.mxu0 %v9630_v45  ;;  %7410 = vmatpush1.bf16.msra.mxu1 %v9633_v46  ;;  %v9720_v45 = vld [vmem:[%s14037_s1 + $0xaa0] ss:$16 sps:$4 sm:$0xff]   ;;  %v9723_v46 = vld [vmem:[%s14037_s1 + $0xaa8] ss:$16 sps:$4 sm:$0xff]  }
 0x120   : > { %6723 = vmatprep.subr.bf16.mxu0 %v9638_v47  ;;  %7411 = vmatprep.subr.bf16.mxu1 %v9641_v48  ;;  %v9728_v47 = vld [vmem:[%s14037_s1 + $0xac4] ss:$16 sps:$4 sm:$0xff]   ;;  %v9731_v48 = vld [vmem:[%s14037_s1 + $0xacc] ss:$16 sps:$4 sm:$0xff]  }
 0x123   : > { %6724 = vmatpush1.bf16.msra.mxu0 %v9636_v49  ;;  %7412 = vmatpush1.bf16.msra.mxu1 %v9639_v50  ;;  %v9726_v49 = vld [vmem:[%s14037_s1 + $0xac0] ss:$16 sps:$4 sm:$0xff]   ;;  %v9729_v50 = vld [vmem:[%s14037_s1 + $0xac8] ss:$16 sps:$4 sm:$0xff]  }
 0x124   : > { %6725 = vmatprep.subr.bf16.mxu0 %v9644_v51  ;;  %7413 = vmatprep.subr.bf16.mxu1 %v9647_v52  ;;  %v9734_v51 = vld [vmem:[%s14037_s1 + $0xae4] ss:$16 sps:$4 sm:$0xff]   ;;  %v9737_v52 = vld [vmem:[%s14037_s1 + $0xaec] ss:$16 sps:$4 sm:$0xff]  }
 0x127   : > { %6726 = vmatpush1.bf16.msra.mxu0 %v9642_v53  ;;  %7414 = vmatpush1.bf16.msra.mxu1 %v9645_v54  ;;  %v9732_v53 = vld [vmem:[%s14037_s1 + $0xae0] ss:$16 sps:$4 sm:$0xff]   ;;  %v9735_v54 = vld [vmem:[%s14037_s1 + $0xae8] ss:$16 sps:$4 sm:$0xff]  }
 0x128   : > { %6727 = vmatprep.subr.bf16.mxu0 %v9650_v55  ;;  %7415 = vmatprep.subr.bf16.mxu1 %v9653_v56  ;;  %v9740_v55 = vld [vmem:[%s14037_s1 + $0xb04] ss:$16 sps:$4 sm:$0xff]   ;;  %v9743_v56 = vld [vmem:[%s14037_s1 + $0xb0c] ss:$16 sps:$4 sm:$0xff]  }
 0x12b   : > { %6728 = vmatpush1.bf16.msra.mxu0 %v9648_v57  ;;  %7416 = vmatpush1.bf16.msra.mxu1 %v9651_v58  ;;  %v9738_v57 = vld [vmem:[%s14037_s1 + $0xb00] ss:$16 sps:$4 sm:$0xff]   ;;  %v9741_v58 = vld [vmem:[%s14037_s1 + $0xb08] ss:$16 sps:$4 sm:$0xff]  }
 0x12c   : > { %6729 = vmatprep.subr.bf16.mxu0 %v9656_v59  ;;  %7417 = vmatprep.subr.bf16.mxu1 %v9659_v60  ;;  %v9746_v59 = vld [vmem:[%s14037_s1 + $0xb24] ss:$16 sps:$4 sm:$0xff]   ;;  %v9749_v60 = vld [vmem:[%s14037_s1 + $0xb2c] ss:$16 sps:$4 sm:$0xff]  }
 0x12f   : > { %6730 = vmatpush1.bf16.msra.mxu0 %v9654_v61  ;;  %7418 = vmatpush1.bf16.msra.mxu1 %v9657_v62  ;;  %v9744_v61 = vld [vmem:[%s14037_s1 + $0xb20] ss:$16 sps:$4 sm:$0xff]   ;;  %v9747_v62 = vld [vmem:[%s14037_s1 + $0xb28] ss:$16 sps:$4 sm:$0xff]  }
 0x130   : > { %6731 = vmatprep.subr.bf16.mxu0 %v9662_v63  ;;  %7419 = vmatprep.subr.bf16.mxu1 %v9665_v0  ;;  %v9752_v63 = vld [vmem:[%s14037_s1 + $0xb44] ss:$16 sps:$4 sm:$0xff]   ;;  %v9755_v0 = vld [vmem:[%s14037_s1 + $0xb4c] ss:$16 sps:$4 sm:$0xff]  }
 0x133   : > { %6732 = vmatpush1.bf16.msra.mxu0 %v9660_v1  ;;  %7420 = vmatpush1.bf16.msra.mxu1 %v9663_v2  ;;  %v9750_v1 = vld [vmem:[%s14037_s1 + $0xb40] ss:$16 sps:$4 sm:$0xff]   ;;  %v9753_v2 = vld [vmem:[%s14037_s1 + $0xb48] ss:$16 sps:$4 sm:$0xff]  }
 0x134   : > { %6733 = vmatprep.subr.bf16.mxu0 %v9668_v3  ;;  %7421 = vmatprep.subr.bf16.mxu1 %v9671_v4  ;;  %v9758_v3 = vld [vmem:[%s14037_s1 + $0xb64] ss:$16 sps:$4 sm:$0xff]   ;;  %v9761_v4 = vld [vmem:[%s14037_s1 + $0xb6c] ss:$16 sps:$4 sm:$0xff]  }
 0x137   : > { %6734 = vmatpush1.bf16.msra.mxu0 %v9666_v5  ;;  %7422 = vmatpush1.bf16.msra.mxu1 %v9669_v6  ;;  %v9756_v5 = vld [vmem:[%s14037_s1 + $0xb60] ss:$16 sps:$4 sm:$0xff]   ;;  %v9759_v6 = vld [vmem:[%s14037_s1 + $0xb68] ss:$16 sps:$4 sm:$0xff]  }
 0x138   : > { %6735 = vmatprep.subr.bf16.mxu0 %v9674_v7  ;;  %7423 = vmatprep.subr.bf16.mxu1 %v9677_v8  ;;  %v9764_v7 = vld [vmem:[%s14037_s1 + $0xb84] ss:$16 sps:$4 sm:$0xff]   ;;  %v9767_v8 = vld [vmem:[%s14037_s1 + $0xb8c] ss:$16 sps:$4 sm:$0xff]  }
 0x13b   : > { %6736 = vmatpush1.bf16.msra.mxu0 %v9672_v9  ;;  %7424 = vmatpush1.bf16.msra.mxu1 %v9675_v10  ;;  %v9762_v9 = vld [vmem:[%s14037_s1 + $0xb80] ss:$16 sps:$4 sm:$0xff]   ;;  %v9765_v10 = vld [vmem:[%s14037_s1 + $0xb88] ss:$16 sps:$4 sm:$0xff]  }
 0x13c   : > { %6737 = vmatprep.subr.bf16.mxu0 %v9680_v11  ;;  %7425 = vmatprep.subr.bf16.mxu1 %v9683_v12  ;;  %v9770_v11 = vld [vmem:[%s14037_s1 + $0xba4] ss:$16 sps:$4 sm:$0xff]   ;;  %v9773_v12 = vld [vmem:[%s14037_s1 + $0xbac] ss:$16 sps:$4 sm:$0xff]  }
 0x13f   : > { %6738 = vmatpush1.bf16.msra.mxu0 %v9678_v13  ;;  %7426 = vmatpush1.bf16.msra.mxu1 %v9681_v16  ;;  %v9768_v13 = vld [vmem:[%s14037_s1 + $0xba0] ss:$16 sps:$4 sm:$0xff]   ;;  %v9771_v16 = vld [vmem:[%s14037_s1 + $0xba8] ss:$16 sps:$4 sm:$0xff]  }
 0x140   : > { %6739 = vmatprep.subr.bf16.mxu0 %v9686_v17  ;;  %7427 = vmatprep.subr.bf16.mxu1 %v9689_v20  ;;  %v9776_v17 = vld [vmem:[%s14037_s1 + $0xbc4] ss:$16 sps:$4 sm:$0xff]   ;;  %v9779_v20 = vld [vmem:[%s14037_s1 + $0xbcc] ss:$16 sps:$4 sm:$0xff]  }
 0x143   : > { %6740 = vmatpush1.bf16.msra.mxu0 %v9684_v22  ;;  %7428 = vmatpush1.bf16.msra.mxu1 %v9687_v15  ;;  %v9774_v22 = vld [vmem:[%s14037_s1 + $0xbc0] ss:$16 sps:$4 sm:$0xff]   ;;  %v9777_v15 = vld [vmem:[%s14037_s1 + $0xbc8] ss:$16 sps:$4 sm:$0xff]  }
 0x144   : > { %6752 = vmatprep.subr.bf16.mxu0 %v9692_v23  ;;  %7440 = vmatprep.subr.bf16.mxu1 %v9695_v24  ;;  %v9782_v23 = vld [vmem:[%s14037_s1 + $0xbe4] ss:$16 sps:$4 sm:$0xff]   ;;  %v9785_v24 = vld [vmem:[%s14037_s1 + $0xbec] ss:$16 sps:$4 sm:$0xff]  }
 0x146   : > { %6742 = vmatmul.mubr.bf16.vlgmr.msra.gmra.mrb[0].mxu0 %v8022_v25  ;;  %7430 = vmatmul.mubr.bf16.vlgmr.msra.gmra.mrb[0].mxu1 %v8022_v25  ;;  %v9780_v25 = vld [vmem:[%s14037_s1 + $0xbe0] ss:$16 sps:$4 sm:$0xff]  }
 0x147   : > { %6753 = vmatpush1.bf16.msra.mxu0 %v9690_v26  ;;  %7441 = vmatpush1.bf16.msra.mxu1 %v9693_v27  ;;  %v9783_v26 = vld [vmem:[%s14037_s1 + $0xbe8] ss:$16 sps:$4 sm:$0xff]   ;;  %v9788_v27 = vld [vmem:[%s14037_s1 + $0xc04] ss:$16 sps:$4 sm:$0xff]  }
 0x148   : > { %6754 = vmatprep.subr.bf16.mxu0 %v9698_v28  ;;  %7442 = vmatprep.subr.bf16.mxu1 %v9701_v21  ;;  %v9791_v28 = vld [vmem:[%s14037_s1 + $0xc0c] ss:$16 sps:$4 sm:$0xff]   ;;  %v12001_v21 = vld [vmem:[%s10922_s4 + $0x30] sm:$0xff] }
 0x149   : > { %6784 = vmatprep.mubr.bf16.mxu0 %v8025_v14  ;;  %7472 = vmatprep.mubr.bf16.mxu1 %v8025_v14  ;;  %v12004_v14 = vld [vmem:[%s10922_s4 + $0xb0] sm:$0xff] }
 0x14b   : > { %6755 = vmatpush1.bf16.msra.mxu0 %v9696_v29  ;;  %7443 = vmatpush1.bf16.msra.mxu1 %v9699_v30  ;;  %v8024_v29 = vcombine.low %v11799_v18, %v11802_v19  ;;  %v9786_v30 = vld [vmem:[%s14037_s1 + $0xc00] ss:$16 sps:$4 sm:$0xff]   ;;  %v9797_v18 = vld [vmem:[%s14037_s1 + $0xc2c] ss:$16 sps:$4 sm:$0xff]   ;;  %v8027_v19 = vcombine.high %v12001_v21, %v12004_v14 }
 0x14c   : > { %6756 = vmatprep.subr.bf16.mxu0 %v9704_v31  ;;  %7444 = vmatprep.subr.bf16.mxu1 %v9707_v32  ;;  %v9789_v31 = vld [vmem:[%s14037_s1 + $0xc08] ss:$16 sps:$4 sm:$0xff]   ;;  %v9794_v32 = vld [vmem:[%s14037_s1 + $0xc24] ss:$16 sps:$4 sm:$0xff]  }
 0x14f   : > { %6757 = vmatpush1.bf16.msra.mxu0 %v9702_v33  ;;  %7445 = vmatpush1.bf16.msra.mxu1 %v9705_v34  ;;  %v9792_v33 = vld [vmem:[%s14037_s1 + $0xc20] ss:$16 sps:$4 sm:$0xff]   ;;  %v9795_v34 = vld [vmem:[%s14037_s1 + $0xc28] ss:$16 sps:$4 sm:$0xff]  }
 0x150   : > { %6758 = vmatprep.subr.bf16.mxu0 %v9710_v35  ;;  %7446 = vmatprep.subr.bf16.mxu1 %v9713_v36  ;;  %v9800_v35 = vld [vmem:[%s14037_s1 + $0xc44] ss:$16 sps:$4 sm:$0xff]   ;;  %v9803_v36 = vld [vmem:[%s14037_s1 + $0xc4c] ss:$16 sps:$4 sm:$0xff]  }
 0x153   : > { %6759 = vmatpush1.bf16.msra.mxu0 %v9708_v37  ;;  %7447 = vmatpush1.bf16.msra.mxu1 %v9711_v38  ;;  %v9798_v37 = vld [vmem:[%s14037_s1 + $0xc40] ss:$16 sps:$4 sm:$0xff]   ;;  %v9801_v38 = vld [vmem:[%s14037_s1 + $0xc48] ss:$16 sps:$4 sm:$0xff]  }
 0x154   : > { %6760 = vmatprep.subr.bf16.mxu0 %v9716_v39  ;;  %7448 = vmatprep.subr.bf16.mxu1 %v9719_v40  ;;  %v9806_v39 = vld [vmem:[%s14037_s1 + $0xc64] ss:$16 sps:$4 sm:$0xff]   ;;  %v9809_v40 = vld [vmem:[%s14037_s1 + $0xc6c] ss:$16 sps:$4 sm:$0xff]  }
 0x157   : > { %6761 = vmatpush1.bf16.msra.mxu0 %v9714_v41  ;;  %7449 = vmatpush1.bf16.msra.mxu1 %v9717_v42  ;;  %v9804_v41 = vld [vmem:[%s14037_s1 + $0xc60] ss:$16 sps:$4 sm:$0xff]   ;;  %v9807_v42 = vld [vmem:[%s14037_s1 + $0xc68] ss:$16 sps:$4 sm:$0xff]  }
 0x158   : > { %6762 = vmatprep.subr.bf16.mxu0 %v9722_v43  ;;  %7450 = vmatprep.subr.bf16.mxu1 %v9725_v44  ;;  %v9812_v43 = vld [vmem:[%s14037_s1 + $0xc84] ss:$16 sps:$4 sm:$0xff]   ;;  %v9815_v44 = vld [vmem:[%s14037_s1 + $0xc8c] ss:$16 sps:$4 sm:$0xff]  }
 0x15b   : > { %6763 = vmatpush1.bf16.msra.mxu0 %v9720_v45  ;;  %7451 = vmatpush1.bf16.msra.mxu1 %v9723_v46  ;;  %v9810_v45 = vld [vmem:[%s14037_s1 + $0xc80] ss:$16 sps:$4 sm:$0xff]   ;;  %v9813_v46 = vld [vmem:[%s14037_s1 + $0xc88] ss:$16 sps:$4 sm:$0xff]  }
 0x15c   : > { %6764 = vmatprep.subr.bf16.mxu0 %v9728_v47  ;;  %7452 = vmatprep.subr.bf16.mxu1 %v9731_v48  ;;  %v9818_v47 = vld [vmem:[%s14037_s1 + $0xca4] ss:$16 sps:$4 sm:$0xff]   ;;  %v9821_v48 = vld [vmem:[%s14037_s1 + $0xcac] ss:$16 sps:$4 sm:$0xff]  }
 0x15f   : > { %6765 = vmatpush1.bf16.msra.mxu0 %v9726_v49  ;;  %7453 = vmatpush1.bf16.msra.mxu1 %v9729_v50  ;;  %v9816_v49 = vld [vmem:[%s14037_s1 + $0xca0] ss:$16 sps:$4 sm:$0xff]   ;;  %v9819_v50 = vld [vmem:[%s14037_s1 + $0xca8] ss:$16 sps:$4 sm:$0xff]  }
 0x160   : > { %6766 = vmatprep.subr.bf16.mxu0 %v9734_v51  ;;  %7454 = vmatprep.subr.bf16.mxu1 %v9737_v52  ;;  %v9824_v51 = vld [vmem:[%s14037_s1 + $0xcc4] ss:$16 sps:$4 sm:$0xff]   ;;  %v9827_v52 = vld [vmem:[%s14037_s1 + $0xccc] ss:$16 sps:$4 sm:$0xff]  }
 0x163   : > { %6767 = vmatpush1.bf16.msra.mxu0 %v9732_v53  ;;  %7455 = vmatpush1.bf16.msra.mxu1 %v9735_v54  ;;  %v9822_v53 = vld [vmem:[%s14037_s1 + $0xcc0] ss:$16 sps:$4 sm:$0xff]   ;;  %v9825_v54 = vld [vmem:[%s14037_s1 + $0xcc8] ss:$16 sps:$4 sm:$0xff]  }
 0x164   : > { %6768 = vmatprep.subr.bf16.mxu0 %v9740_v55  ;;  %7456 = vmatprep.subr.bf16.mxu1 %v9743_v56  ;;  %v9830_v55 = vld [vmem:[%s14037_s1 + $0xce4] ss:$16 sps:$4 sm:$0xff]   ;;  %v9833_v56 = vld [vmem:[%s14037_s1 + $0xcec] ss:$16 sps:$4 sm:$0xff]  }
 0x167   : > { %6769 = vmatpush1.bf16.msra.mxu0 %v9738_v57  ;;  %7457 = vmatpush1.bf16.msra.mxu1 %v9741_v58  ;;  %v9828_v57 = vld [vmem:[%s14037_s1 + $0xce0] ss:$16 sps:$4 sm:$0xff]   ;;  %v9831_v58 = vld [vmem:[%s14037_s1 + $0xce8] ss:$16 sps:$4 sm:$0xff]  }
 0x168   : > { %6770 = vmatprep.subr.bf16.mxu0 %v9746_v59  ;;  %7458 = vmatprep.subr.bf16.mxu1 %v9749_v60  ;;  %v9836_v59 = vld [vmem:[%s14037_s1 + $0xd04] ss:$16 sps:$4 sm:$0xff]   ;;  %v9839_v60 = vld [vmem:[%s14037_s1 + $0xd0c] ss:$16 sps:$4 sm:$0xff]  }
 0x16b   : > { %6771 = vmatpush1.bf16.msra.mxu0 %v9744_v61  ;;  %7459 = vmatpush1.bf16.msra.mxu1 %v9747_v62  ;;  %v9834_v61 = vld [vmem:[%s14037_s1 + $0xd00] ss:$16 sps:$4 sm:$0xff]   ;;  %v9837_v62 = vld [vmem:[%s14037_s1 + $0xd08] ss:$16 sps:$4 sm:$0xff]  }
 0x16c   : > { %6772 = vmatprep.subr.bf16.mxu0 %v9752_v63  ;;  %7460 = vmatprep.subr.bf16.mxu1 %v9755_v0  ;;  %v9842_v63 = vld [vmem:[%s14037_s1 + $0xd24] ss:$16 sps:$4 sm:$0xff]   ;;  %v9845_v0 = vld [vmem:[%s14037_s1 + $0xd2c] ss:$16 sps:$4 sm:$0xff]  }
 0x16f   : > { %6773 = vmatpush1.bf16.msra.mxu0 %v9750_v1  ;;  %7461 = vmatpush1.bf16.msra.mxu1 %v9753_v2  ;;  %v9840_v1 = vld [vmem:[%s14037_s1 + $0xd20] ss:$16 sps:$4 sm:$0xff]   ;;  %v9843_v2 = vld [vmem:[%s14037_s1 + $0xd28] ss:$16 sps:$4 sm:$0xff]  }
 0x170   : > { %6774 = vmatprep.subr.bf16.mxu0 %v9758_v3  ;;  %7462 = vmatprep.subr.bf16.mxu1 %v9761_v4  ;;  %v9848_v3 = vld [vmem:[%s14037_s1 + $0xd44] ss:$16 sps:$4 sm:$0xff]   ;;  %v9851_v4 = vld [vmem:[%s14037_s1 + $0xd4c] ss:$16 sps:$4 sm:$0xff]  }
 0x173   : > { %6775 = vmatpush1.bf16.msra.mxu0 %v9756_v5  ;;  %7463 = vmatpush1.bf16.msra.mxu1 %v9759_v6  ;;  %v9846_v5 = vld [vmem:[%s14037_s1 + $0xd40] ss:$16 sps:$4 sm:$0xff]   ;;  %v9849_v6 = vld [vmem:[%s14037_s1 + $0xd48] ss:$16 sps:$4 sm:$0xff]  }
 0x174   : > { %6776 = vmatprep.subr.bf16.mxu0 %v9764_v7  ;;  %7464 = vmatprep.subr.bf16.mxu1 %v9767_v8  ;;  %v9854_v7 = vld [vmem:[%s14037_s1 + $0xd64] ss:$16 sps:$4 sm:$0xff]   ;;  %v9857_v8 = vld [vmem:[%s14037_s1 + $0xd6c] ss:$16 sps:$4 sm:$0xff]  }
 0x177   : > { %6777 = vmatpush1.bf16.msra.mxu0 %v9762_v9  ;;  %7465 = vmatpush1.bf16.msra.mxu1 %v9765_v10  ;;  %v9852_v9 = vld [vmem:[%s14037_s1 + $0xd60] ss:$16 sps:$4 sm:$0xff]   ;;  %v9855_v10 = vld [vmem:[%s14037_s1 + $0xd68] ss:$16 sps:$4 sm:$0xff]  }
 0x178   : > { %6778 = vmatprep.subr.bf16.mxu0 %v9770_v11  ;;  %7466 = vmatprep.subr.bf16.mxu1 %v9773_v12  ;;  %v9860_v11 = vld [vmem:[%s14037_s1 + $0xd84] ss:$16 sps:$4 sm:$0xff]   ;;  %v9863_v12 = vld [vmem:[%s14037_s1 + $0xd8c] ss:$16 sps:$4 sm:$0xff]  }
 0x17b   : > { %6779 = vmatpush1.bf16.msra.mxu0 %v9768_v13  ;;  %7467 = vmatpush1.bf16.msra.mxu1 %v9771_v16  ;;  %v9858_v13 = vld [vmem:[%s14037_s1 + $0xd80] ss:$16 sps:$4 sm:$0xff]   ;;  %v9861_v16 = vld [vmem:[%s14037_s1 + $0xd88] ss:$16 sps:$4 sm:$0xff]  }
 0x17c   : > { %6780 = vmatprep.subr.bf16.mxu0 %v9776_v17  ;;  %7468 = vmatprep.subr.bf16.mxu1 %v9779_v20  ;;  %v9866_v17 = vld [vmem:[%s14037_s1 + $0xda4] ss:$16 sps:$4 sm:$0xff]   ;;  %v9869_v20 = vld [vmem:[%s14037_s1 + $0xdac] ss:$16 sps:$4 sm:$0xff]  }
 0x17f   : > { %6781 = vmatpush1.bf16.msra.mxu0 %v9774_v22  ;;  %7469 = vmatpush1.bf16.msra.mxu1 %v9777_v15  ;;  %v9864_v22 = vld [vmem:[%s14037_s1 + $0xda0] ss:$16 sps:$4 sm:$0xff]   ;;  %v9867_v15 = vld [vmem:[%s14037_s1 + $0xda8] ss:$16 sps:$4 sm:$0xff]  }
 0x180   : > { %6782 = vmatprep.subr.bf16.mxu0 %v9782_v23  ;;  %7470 = vmatprep.subr.bf16.mxu1 %v9785_v24  ;;  %v9872_v23 = vld [vmem:[%s14037_s1 + $0xdc4] ss:$16 sps:$4 sm:$0xff]   ;;  %v9875_v24 = vld [vmem:[%s14037_s1 + $0xdcc] ss:$16 sps:$4 sm:$0xff]  }
 0x183   : > { %6783 = vmatpush1.bf16.msra.mxu0 %v9780_v25  ;;  %7471 = vmatpush1.bf16.msra.mxu1 %v9783_v26  ;;  %v9870_v25 = vld [vmem:[%s14037_s1 + $0xdc0] ss:$16 sps:$4 sm:$0xff]   ;;  %v9873_v26 = vld [vmem:[%s14037_s1 + $0xdc8] ss:$16 sps:$4 sm:$0xff]  }
 0x184   : > { %6795 = vmatprep.subr.bf16.mxu0 %v9788_v27  ;;  %7483 = vmatprep.subr.bf16.mxu1 %v9791_v28  ;;  %v9878_v27 = vld [vmem:[%s14037_s1 + $0xde4] ss:$16 sps:$4 sm:$0xff]   ;;  %v9881_v28 = vld [vmem:[%s14037_s1 + $0xdec] ss:$16 sps:$4 sm:$0xff]  }
 0x186   : > { %6785 = vmatmul.mubr.bf16.vlgmr.msra.gmra.mrb[0].mxu0 %v8024_v29  ;;  %7473 = vmatmul.mubr.bf16.vlgmr.msra.gmra.mrb[0].mxu1 %v8024_v29  ;;  %v9876_v29 = vld [vmem:[%s14037_s1 + $0xde0] ss:$16 sps:$4 sm:$0xff]  }
 0x187   : > { %6796 = vmatpush1.bf16.msra.mxu0 %v9786_v30  ;;  %7484 = vmatpush1.bf16.msra.mxu1 %v9789_v31  ;;  %v9879_v30 = vld [vmem:[%s14037_s1 + $0xde8] ss:$16 sps:$4 sm:$0xff]   ;;  %v9884_v31 = vld [vmem:[%s14037_s1 + $0xe04] ss:$16 sps:$4 sm:$0xff]  }
 0x188   : > { %6797 = vmatprep.subr.bf16.mxu0 %v9794_v32  ;;  %7485 = vmatprep.subr.bf16.mxu1 %v9797_v18  ;;  %v9887_v32 = vld [vmem:[%s14037_s1 + $0xe0c] ss:$16 sps:$4 sm:$0xff]  }
 0x189   : > { %6827 = vmatprep.mubr.bf16.mxu0 %v8027_v19  ;;  %7515 = vmatprep.mubr.bf16.mxu1 %v8027_v19  ;;  %v12203_v18 = vld [vmem:[%s10922_s4 + $0x38] sm:$0xff] }
 0x18a   : > { %v12206_v19 = vld [vmem:[%s10922_s4 + $0xb8] sm:$0xff] }
 0x18b   : > { %6798 = vmatpush1.bf16.msra.mxu0 %v9792_v33  ;;  %7486 = vmatpush1.bf16.msra.mxu1 %v9795_v34  ;;  %v8026_v33 = vcombine.low %v12001_v21, %v12004_v14  ;;  %v9882_v34 = vld [vmem:[%s14037_s1 + $0xe00] ss:$16 sps:$4 sm:$0xff]   ;;  %v9893_v21 = vld [vmem:[%s14037_s1 + $0xe2c] ss:$16 sps:$4 sm:$0xff]   ;;  %v8029_v14 = vcombine.high %v12203_v18, %v12206_v19 }
 0x18c   : > { %6799 = vmatprep.subr.bf16.mxu0 %v9800_v35  ;;  %7487 = vmatprep.subr.bf16.mxu1 %v9803_v36  ;;  %v9885_v35 = vld [vmem:[%s14037_s1 + $0xe08] ss:$16 sps:$4 sm:$0xff]   ;;  %v9890_v36 = vld [vmem:[%s14037_s1 + $0xe24] ss:$16 sps:$4 sm:$0xff]  }
 0x18f   : > { %6800 = vmatpush1.bf16.msra.mxu0 %v9798_v37  ;;  %7488 = vmatpush1.bf16.msra.mxu1 %v9801_v38  ;;  %v9888_v37 = vld [vmem:[%s14037_s1 + $0xe20] ss:$16 sps:$4 sm:$0xff]   ;;  %v9891_v38 = vld [vmem:[%s14037_s1 + $0xe28] ss:$16 sps:$4 sm:$0xff]  }
 0x190   : > { %6801 = vmatprep.subr.bf16.mxu0 %v9806_v39  ;;  %7489 = vmatprep.subr.bf16.mxu1 %v9809_v40  ;;  %v9896_v39 = vld [vmem:[%s14037_s1 + $0xe44] ss:$16 sps:$4 sm:$0xff]   ;;  %v9899_v40 = vld [vmem:[%s14037_s1 + $0xe4c] ss:$16 sps:$4 sm:$0xff]  }
 0x193   : > { %6802 = vmatpush1.bf16.msra.mxu0 %v9804_v41  ;;  %7490 = vmatpush1.bf16.msra.mxu1 %v9807_v42  ;;  %v9894_v41 = vld [vmem:[%s14037_s1 + $0xe40] ss:$16 sps:$4 sm:$0xff]   ;;  %v9897_v42 = vld [vmem:[%s14037_s1 + $0xe48] ss:$16 sps:$4 sm:$0xff]  }
 0x194   : > { %6803 = vmatprep.subr.bf16.mxu0 %v9812_v43  ;;  %7491 = vmatprep.subr.bf16.mxu1 %v9815_v44  ;;  %v9902_v43 = vld [vmem:[%s14037_s1 + $0xe64] ss:$16 sps:$4 sm:$0xff]   ;;  %v9905_v44 = vld [vmem:[%s14037_s1 + $0xe6c] ss:$16 sps:$4 sm:$0xff]  }
 0x197   : > { %6804 = vmatpush1.bf16.msra.mxu0 %v9810_v45  ;;  %7492 = vmatpush1.bf16.msra.mxu1 %v9813_v46  ;;  %v9900_v45 = vld [vmem:[%s14037_s1 + $0xe60] ss:$16 sps:$4 sm:$0xff]   ;;  %v9903_v46 = vld [vmem:[%s14037_s1 + $0xe68] ss:$16 sps:$4 sm:$0xff]  }
 0x198   : > { %6805 = vmatprep.subr.bf16.mxu0 %v9818_v47  ;;  %7493 = vmatprep.subr.bf16.mxu1 %v9821_v48  ;;  %v9908_v47 = vld [vmem:[%s14037_s1 + $0xe84] ss:$16 sps:$4 sm:$0xff]   ;;  %v9911_v48 = vld [vmem:[%s14037_s1 + $0xe8c] ss:$16 sps:$4 sm:$0xff]  }
 0x19b   : > { %6806 = vmatpush1.bf16.msra.mxu0 %v9816_v49  ;;  %7494 = vmatpush1.bf16.msra.mxu1 %v9819_v50  ;;  %v9906_v49 = vld [vmem:[%s14037_s1 + $0xe80] ss:$16 sps:$4 sm:$0xff]   ;;  %v9909_v50 = vld [vmem:[%s14037_s1 + $0xe88] ss:$16 sps:$4 sm:$0xff]  }
 0x19c   : > { %6807 = vmatprep.subr.bf16.mxu0 %v9824_v51  ;;  %7495 = vmatprep.subr.bf16.mxu1 %v9827_v52  ;;  %v9914_v51 = vld [vmem:[%s14037_s1 + $0xea4] ss:$16 sps:$4 sm:$0xff]   ;;  %v9917_v52 = vld [vmem:[%s14037_s1 + $0xeac] ss:$16 sps:$4 sm:$0xff]  }
 0x19f   : > { %6808 = vmatpush1.bf16.msra.mxu0 %v9822_v53  ;;  %7496 = vmatpush1.bf16.msra.mxu1 %v9825_v54  ;;  %v9912_v53 = vld [vmem:[%s14037_s1 + $0xea0] ss:$16 sps:$4 sm:$0xff]   ;;  %v9915_v54 = vld [vmem:[%s14037_s1 + $0xea8] ss:$16 sps:$4 sm:$0xff]  }
 0x1a0   : > { %6809 = vmatprep.subr.bf16.mxu0 %v9830_v55  ;;  %7497 = vmatprep.subr.bf16.mxu1 %v9833_v56  ;;  %v9920_v55 = vld [vmem:[%s14037_s1 + $0xec4] ss:$16 sps:$4 sm:$0xff]   ;;  %v9923_v56 = vld [vmem:[%s14037_s1 + $0xecc] ss:$16 sps:$4 sm:$0xff]  }
 0x1a3   : > { %6810 = vmatpush1.bf16.msra.mxu0 %v9828_v57  ;;  %7498 = vmatpush1.bf16.msra.mxu1 %v9831_v58  ;;  %v9918_v57 = vld [vmem:[%s14037_s1 + $0xec0] ss:$16 sps:$4 sm:$0xff]   ;;  %v9921_v58 = vld [vmem:[%s14037_s1 + $0xec8] ss:$16 sps:$4 sm:$0xff]  }
 0x1a4   : > { %6811 = vmatprep.subr.bf16.mxu0 %v9836_v59  ;;  %7499 = vmatprep.subr.bf16.mxu1 %v9839_v60  ;;  %v9926_v59 = vld [vmem:[%s14037_s1 + $0xee4] ss:$16 sps:$4 sm:$0xff]   ;;  %v9929_v60 = vld [vmem:[%s14037_s1 + $0xeec] ss:$16 sps:$4 sm:$0xff]  }
 0x1a7   : > { %6812 = vmatpush1.bf16.msra.mxu0 %v9834_v61  ;;  %7500 = vmatpush1.bf16.msra.mxu1 %v9837_v62  ;;  %v9924_v61 = vld [vmem:[%s14037_s1 + $0xee0] ss:$16 sps:$4 sm:$0xff]   ;;  %v9927_v62 = vld [vmem:[%s14037_s1 + $0xee8] ss:$16 sps:$4 sm:$0xff]  }
 0x1a8   : > { %6813 = vmatprep.subr.bf16.mxu0 %v9842_v63  ;;  %7501 = vmatprep.subr.bf16.mxu1 %v9845_v0  ;;  %v9932_v63 = vld [vmem:[%s14037_s1 + $0xf04] ss:$16 sps:$4 sm:$0xff]   ;;  %v9935_v0 = vld [vmem:[%s14037_s1 + $0xf0c] ss:$16 sps:$4 sm:$0xff]  }
 0x1ab   : > { %6814 = vmatpush1.bf16.msra.mxu0 %v9840_v1  ;;  %7502 = vmatpush1.bf16.msra.mxu1 %v9843_v2  ;;  %v9930_v1 = vld [vmem:[%s14037_s1 + $0xf00] ss:$16 sps:$4 sm:$0xff]   ;;  %v9933_v2 = vld [vmem:[%s14037_s1 + $0xf08] ss:$16 sps:$4 sm:$0xff]  }
 0x1ac   : > { %6815 = vmatprep.subr.bf16.mxu0 %v9848_v3  ;;  %7503 = vmatprep.subr.bf16.mxu1 %v9851_v4  ;;  %v9938_v3 = vld [vmem:[%s14037_s1 + $0xf24] ss:$16 sps:$4 sm:$0xff]   ;;  %v9941_v4 = vld [vmem:[%s14037_s1 + $0xf2c] ss:$16 sps:$4 sm:$0xff]  }
 0x1af   : > { %6816 = vmatpush1.bf16.msra.mxu0 %v9846_v5  ;;  %7504 = vmatpush1.bf16.msra.mxu1 %v9849_v6  ;;  %v9936_v5 = vld [vmem:[%s14037_s1 + $0xf20] ss:$16 sps:$4 sm:$0xff]   ;;  %v9939_v6 = vld [vmem:[%s14037_s1 + $0xf28] ss:$16 sps:$4 sm:$0xff]  }
 0x1b0   : > { %6817 = vmatprep.subr.bf16.mxu0 %v9854_v7  ;;  %7505 = vmatprep.subr.bf16.mxu1 %v9857_v8  ;;  %v9944_v7 = vld [vmem:[%s14037_s1 + $0xf44] ss:$16 sps:$4 sm:$0xff]   ;;  %v9947_v8 = vld [vmem:[%s14037_s1 + $0xf4c] ss:$16 sps:$4 sm:$0xff]  }
 0x1b3   : > { %6818 = vmatpush1.bf16.msra.mxu0 %v9852_v9  ;;  %7506 = vmatpush1.bf16.msra.mxu1 %v9855_v10  ;;  %v9942_v9 = vld [vmem:[%s14037_s1 + $0xf40] ss:$16 sps:$4 sm:$0xff]   ;;  %v9945_v10 = vld [vmem:[%s14037_s1 + $0xf48] ss:$16 sps:$4 sm:$0xff]  }
 0x1b4   : > { %6819 = vmatprep.subr.bf16.mxu0 %v9860_v11  ;;  %7507 = vmatprep.subr.bf16.mxu1 %v9863_v12  ;;  %v9950_v11 = vld [vmem:[%s14037_s1 + $0xf64] ss:$16 sps:$4 sm:$0xff]   ;;  %v9953_v12 = vld [vmem:[%s14037_s1 + $0xf6c] ss:$16 sps:$4 sm:$0xff]  }
 0x1b7   : > { %6820 = vmatpush1.bf16.msra.mxu0 %v9858_v13  ;;  %7508 = vmatpush1.bf16.msra.mxu1 %v9861_v16  ;;  %v9948_v13 = vld [vmem:[%s14037_s1 + $0xf60] ss:$16 sps:$4 sm:$0xff]   ;;  %v9951_v16 = vld [vmem:[%s14037_s1 + $0xf68] ss:$16 sps:$4 sm:$0xff]  }
 0x1b8   : > { %6821 = vmatprep.subr.bf16.mxu0 %v9866_v17  ;;  %7509 = vmatprep.subr.bf16.mxu1 %v9869_v20  ;;  %v9956_v17 = vld [vmem:[%s14037_s1 + $0xf84] ss:$16 sps:$4 sm:$0xff]   ;;  %v9959_v20 = vld [vmem:[%s14037_s1 + $0xf8c] ss:$16 sps:$4 sm:$0xff]  }
 0x1bb   : > { %6822 = vmatpush1.bf16.msra.mxu0 %v9864_v22  ;;  %7510 = vmatpush1.bf16.msra.mxu1 %v9867_v15  ;;  %v9954_v22 = vld [vmem:[%s14037_s1 + $0xf80] ss:$16 sps:$4 sm:$0xff]   ;;  %v9957_v15 = vld [vmem:[%s14037_s1 + $0xf88] ss:$16 sps:$4 sm:$0xff]  }
 0x1bc   : > { %6823 = vmatprep.subr.bf16.mxu0 %v9872_v23  ;;  %7511 = vmatprep.subr.bf16.mxu1 %v9875_v24  ;;  %v9962_v23 = vld [vmem:[%s14037_s1 + $0xfa4] ss:$16 sps:$4 sm:$0xff]   ;;  %v9965_v24 = vld [vmem:[%s14037_s1 + $0xfac] ss:$16 sps:$4 sm:$0xff]  }
 0x1bf   : > { %6824 = vmatpush1.bf16.msra.mxu0 %v9870_v25  ;;  %7512 = vmatpush1.bf16.msra.mxu1 %v9873_v26  ;;  %v9960_v25 = vld [vmem:[%s14037_s1 + $0xfa0] ss:$16 sps:$4 sm:$0xff]   ;;  %v9963_v26 = vld [vmem:[%s14037_s1 + $0xfa8] ss:$16 sps:$4 sm:$0xff]  }
 0x1c0   : > { %6825 = vmatprep.subr.bf16.mxu0 %v9878_v27  ;;  %7513 = vmatprep.subr.bf16.mxu1 %v9881_v28  ;;  %v9968_v27 = vld [vmem:[%s14037_s1 + $0xfc4] ss:$16 sps:$4 sm:$0xff]   ;;  %v9971_v28 = vld [vmem:[%s14037_s1 + $0xfcc] ss:$16 sps:$4 sm:$0xff]  }
 0x1c3   : > { %6826 = vmatpush1.bf16.msra.mxu0 %v9876_v29  ;;  %7514 = vmatpush1.bf16.msra.mxu1 %v9879_v30  ;;  %v9966_v29 = vld [vmem:[%s14037_s1 + $0xfc0] ss:$16 sps:$4 sm:$0xff]   ;;  %v9969_v30 = vld [vmem:[%s14037_s1 + $0xfc8] ss:$16 sps:$4 sm:$0xff]  }
 0x1c4   : > { %6838 = vmatprep.subr.bf16.mxu0 %v9884_v31  ;;  %7526 = vmatprep.subr.bf16.mxu1 %v9887_v32  ;;  %v9974_v31 = vld [vmem:[%s14037_s1 + $0xfe4] ss:$16 sps:$4 sm:$0xff]   ;;  %v9977_v32 = vld [vmem:[%s14037_s1 + $0xfec] ss:$16 sps:$4 sm:$0xff]  }
 0x1c6   : > { %6828 = vmatmul.mubr.bf16.vlgmr.msra.gmra.mrb[0].mxu0 %v8026_v33  ;;  %7516 = vmatmul.mubr.bf16.vlgmr.msra.gmra.mrb[0].mxu1 %v8026_v33  ;;  %v9972_v33 = vld [vmem:[%s14037_s1 + $0xfe0] ss:$16 sps:$4 sm:$0xff]  }
 0x1c7   : > { %6839 = vmatpush1.bf16.msra.mxu0 %v9882_v34  ;;  %7527 = vmatpush1.bf16.msra.mxu1 %v9885_v35  ;;  %v9975_v34 = vld [vmem:[%s14037_s1 + $0xfe8] ss:$16 sps:$4 sm:$0xff]   ;;  %v9980_v35 = vld [vmem:[%s14037_s1 + $0x1004] ss:$16 sps:$4 sm:$0xff]  }
 0x1c8   : > { %6840 = vmatprep.subr.bf16.mxu0 %v9890_v36  ;;  %7528 = vmatprep.subr.bf16.mxu1 %v9893_v21  ;;  %v9983_v36 = vld [vmem:[%s14037_s1 + $0x100c] ss:$16 sps:$4 sm:$0xff]   ;;  %v12405_v21 = vld [vmem:[%s10922_s4 + $0x40] sm:$0xff] }
 0x1c9   : > { %6870 = vmatprep.mubr.bf16.mxu0 %v8029_v14  ;;  %7558 = vmatprep.mubr.bf16.mxu1 %v8029_v14  ;;  %v12408_v14 = vld [vmem:[%s10922_s4 + $0xc0] sm:$0xff] }
 0x1cb   : > { %6841 = vmatpush1.bf16.msra.mxu0 %v9888_v37  ;;  %7529 = vmatpush1.bf16.msra.mxu1 %v9891_v38  ;;  %v8028_v37 = vcombine.low %v12203_v18, %v12206_v19  ;;  %v9978_v38 = vld [vmem:[%s14037_s1 + $0x1000] ss:$16 sps:$4 sm:$0xff]   ;;  %v9989_v18 = vld [vmem:[%s14037_s1 + $0x102c] ss:$16 sps:$4 sm:$0xff]   ;;  %v8031_v19 = vcombine.high %v12405_v21, %v12408_v14 }
 0x1cc   : > { %6842 = vmatprep.subr.bf16.mxu0 %v9896_v39  ;;  %7530 = vmatprep.subr.bf16.mxu1 %v9899_v40  ;;  %v9981_v39 = vld [vmem:[%s14037_s1 + $0x1008] ss:$16 sps:$4 sm:$0xff]   ;;  %v9986_v40 = vld [vmem:[%s14037_s1 + $0x1024] ss:$16 sps:$4 sm:$0xff]  }
 0x1cf   : > { %6843 = vmatpush1.bf16.msra.mxu0 %v9894_v41  ;;  %7531 = vmatpush1.bf16.msra.mxu1 %v9897_v42  ;;  %v9984_v41 = vld [vmem:[%s14037_s1 + $0x1020] ss:$16 sps:$4 sm:$0xff]   ;;  %v9987_v42 = vld [vmem:[%s14037_s1 + $0x1028] ss:$16 sps:$4 sm:$0xff]  }
 0x1d0   : > { %6844 = vmatprep.subr.bf16.mxu0 %v9902_v43  ;;  %7532 = vmatprep.subr.bf16.mxu1 %v9905_v44  ;;  %v9992_v43 = vld [vmem:[%s14037_s1 + $0x1044] ss:$16 sps:$4 sm:$0xff]   ;;  %v9995_v44 = vld [vmem:[%s14037_s1 + $0x104c] ss:$16 sps:$4 sm:$0xff]  }
 0x1d3   : > { %6845 = vmatpush1.bf16.msra.mxu0 %v9900_v45  ;;  %7533 = vmatpush1.bf16.msra.mxu1 %v9903_v46  ;;  %v9990_v45 = vld [vmem:[%s14037_s1 + $0x1040] ss:$16 sps:$4 sm:$0xff]   ;;  %v9993_v46 = vld [vmem:[%s14037_s1 + $0x1048] ss:$16 sps:$4 sm:$0xff]  }
 0x1d4   : > { %6846 = vmatprep.subr.bf16.mxu0 %v9908_v47  ;;  %7534 = vmatprep.subr.bf16.mxu1 %v9911_v48  ;;  %v9998_v47 = vld [vmem:[%s14037_s1 + $0x1064] ss:$16 sps:$4 sm:$0xff]   ;;  %v10001_v48 = vld [vmem:[%s14037_s1 + $0x106c] ss:$16 sps:$4 sm:$0xff]  }
 0x1d7   : > { %6847 = vmatpush1.bf16.msra.mxu0 %v9906_v49  ;;  %7535 = vmatpush1.bf16.msra.mxu1 %v9909_v50  ;;  %v9996_v49 = vld [vmem:[%s14037_s1 + $0x1060] ss:$16 sps:$4 sm:$0xff]   ;;  %v9999_v50 = vld [vmem:[%s14037_s1 + $0x1068] ss:$16 sps:$4 sm:$0xff]  }
 0x1d8   : > { %6848 = vmatprep.subr.bf16.mxu0 %v9914_v51  ;;  %7536 = vmatprep.subr.bf16.mxu1 %v9917_v52  ;;  %v10004_v51 = vld [vmem:[%s14037_s1 + $0x1084] ss:$16 sps:$4 sm:$0xff]   ;;  %v10007_v52 = vld [vmem:[%s14037_s1 + $0x108c] ss:$16 sps:$4 sm:$0xff]  }
 0x1db   : > { %6849 = vmatpush1.bf16.msra.mxu0 %v9912_v53  ;;  %7537 = vmatpush1.bf16.msra.mxu1 %v9915_v54  ;;  %v10002_v53 = vld [vmem:[%s14037_s1 + $0x1080] ss:$16 sps:$4 sm:$0xff]   ;;  %v10005_v54 = vld [vmem:[%s14037_s1 + $0x1088] ss:$16 sps:$4 sm:$0xff]  }
 0x1dc   : > { %6850 = vmatprep.subr.bf16.mxu0 %v9920_v55  ;;  %7538 = vmatprep.subr.bf16.mxu1 %v9923_v56  ;;  %v10010_v55 = vld [vmem:[%s14037_s1 + $0x10a4] ss:$16 sps:$4 sm:$0xff]   ;;  %v10013_v56 = vld [vmem:[%s14037_s1 + $0x10ac] ss:$16 sps:$4 sm:$0xff]  }
 0x1df   : > { %6851 = vmatpush1.bf16.msra.mxu0 %v9918_v57  ;;  %7539 = vmatpush1.bf16.msra.mxu1 %v9921_v58  ;;  %v10008_v57 = vld [vmem:[%s14037_s1 + $0x10a0] ss:$16 sps:$4 sm:$0xff]   ;;  %v10011_v58 = vld [vmem:[%s14037_s1 + $0x10a8] ss:$16 sps:$4 sm:$0xff]  }
 0x1e0   : > { %6852 = vmatprep.subr.bf16.mxu0 %v9926_v59  ;;  %7540 = vmatprep.subr.bf16.mxu1 %v9929_v60  ;;  %v10016_v59 = vld [vmem:[%s14037_s1 + $0x10c4] ss:$16 sps:$4 sm:$0xff]   ;;  %v10019_v60 = vld [vmem:[%s14037_s1 + $0x10cc] ss:$16 sps:$4 sm:$0xff]  }
 0x1e3   : > { %6853 = vmatpush1.bf16.msra.mxu0 %v9924_v61  ;;  %7541 = vmatpush1.bf16.msra.mxu1 %v9927_v62  ;;  %v10014_v61 = vld [vmem:[%s14037_s1 + $0x10c0] ss:$16 sps:$4 sm:$0xff]   ;;  %v10017_v62 = vld [vmem:[%s14037_s1 + $0x10c8] ss:$16 sps:$4 sm:$0xff]  }
 0x1e4   : > { %6854 = vmatprep.subr.bf16.mxu0 %v9932_v63  ;;  %7542 = vmatprep.subr.bf16.mxu1 %v9935_v0  ;;  %v10022_v63 = vld [vmem:[%s14037_s1 + $0x10e4] ss:$16 sps:$4 sm:$0xff]   ;;  %v10025_v0 = vld [vmem:[%s14037_s1 + $0x10ec] ss:$16 sps:$4 sm:$0xff]  }
 0x1e7   : > { %6855 = vmatpush1.bf16.msra.mxu0 %v9930_v1  ;;  %7543 = vmatpush1.bf16.msra.mxu1 %v9933_v2  ;;  %v10020_v1 = vld [vmem:[%s14037_s1 + $0x10e0] ss:$16 sps:$4 sm:$0xff]   ;;  %v10023_v2 = vld [vmem:[%s14037_s1 + $0x10e8] ss:$16 sps:$4 sm:$0xff]  }
 0x1e8   : > { %6856 = vmatprep.subr.bf16.mxu0 %v9938_v3  ;;  %7544 = vmatprep.subr.bf16.mxu1 %v9941_v4  ;;  %v10028_v3 = vld [vmem:[%s14037_s1 + $0x1104] ss:$16 sps:$4 sm:$0xff]   ;;  %v10031_v4 = vld [vmem:[%s14037_s1 + $0x110c] ss:$16 sps:$4 sm:$0xff]  }
 0x1eb   : > { %6857 = vmatpush1.bf16.msra.mxu0 %v9936_v5  ;;  %7545 = vmatpush1.bf16.msra.mxu1 %v9939_v6  ;;  %v10026_v5 = vld [vmem:[%s14037_s1 + $0x1100] ss:$16 sps:$4 sm:$0xff]   ;;  %v10029_v6 = vld [vmem:[%s14037_s1 + $0x1108] ss:$16 sps:$4 sm:$0xff]  }
 0x1ec   : > { %6858 = vmatprep.subr.bf16.mxu0 %v9944_v7  ;;  %7546 = vmatprep.subr.bf16.mxu1 %v9947_v8  ;;  %v10034_v7 = vld [vmem:[%s14037_s1 + $0x1124] ss:$16 sps:$4 sm:$0xff]   ;;  %v10037_v8 = vld [vmem:[%s14037_s1 + $0x112c] ss:$16 sps:$4 sm:$0xff]  }
 0x1ef   : > { %6859 = vmatpush1.bf16.msra.mxu0 %v9942_v9  ;;  %7547 = vmatpush1.bf16.msra.mxu1 %v9945_v10  ;;  %v10032_v9 = vld [vmem:[%s14037_s1 + $0x1120] ss:$16 sps:$4 sm:$0xff]   ;;  %v10035_v10 = vld [vmem:[%s14037_s1 + $0x1128] ss:$16 sps:$4 sm:$0xff]  }
 0x1f0   : > { %6860 = vmatprep.subr.bf16.mxu0 %v9950_v11  ;;  %7548 = vmatprep.subr.bf16.mxu1 %v9953_v12  ;;  %v10040_v11 = vld [vmem:[%s14037_s1 + $0x1144] ss:$16 sps:$4 sm:$0xff]   ;;  %v10043_v12 = vld [vmem:[%s14037_s1 + $0x114c] ss:$16 sps:$4 sm:$0xff]  }
 0x1f3   : > { %6861 = vmatpush1.bf16.msra.mxu0 %v9948_v13  ;;  %7549 = vmatpush1.bf16.msra.mxu1 %v9951_v16  ;;  %v10038_v13 = vld [vmem:[%s14037_s1 + $0x1140] ss:$16 sps:$4 sm:$0xff]   ;;  %v10041_v16 = vld [vmem:[%s14037_s1 + $0x1148] ss:$16 sps:$4 sm:$0xff]  }
 0x1f4   : > { %6862 = vmatprep.subr.bf16.mxu0 %v9956_v17  ;;  %7550 = vmatprep.subr.bf16.mxu1 %v9959_v20  ;;  %v10046_v17 = vld [vmem:[%s14037_s1 + $0x1164] ss:$16 sps:$4 sm:$0xff]   ;;  %v10049_v20 = vld [vmem:[%s14037_s1 + $0x116c] ss:$16 sps:$4 sm:$0xff]  }
 0x1f7   : > { %6863 = vmatpush1.bf16.msra.mxu0 %v9954_v22  ;;  %7551 = vmatpush1.bf16.msra.mxu1 %v9957_v15  ;;  %v10044_v22 = vld [vmem:[%s14037_s1 + $0x1160] ss:$16 sps:$4 sm:$0xff]   ;;  %v10047_v15 = vld [vmem:[%s14037_s1 + $0x1168] ss:$16 sps:$4 sm:$0xff]  }
 0x1f8   : > { %6864 = vmatprep.subr.bf16.mxu0 %v9962_v23  ;;  %7552 = vmatprep.subr.bf16.mxu1 %v9965_v24  ;;  %v10052_v23 = vld [vmem:[%s14037_s1 + $0x1184] ss:$16 sps:$4 sm:$0xff]   ;;  %v10055_v24 = vld [vmem:[%s14037_s1 + $0x118c] ss:$16 sps:$4 sm:$0xff]  }
 0x1fb   : > { %6865 = vmatpush1.bf16.msra.mxu0 %v9960_v25  ;;  %7553 = vmatpush1.bf16.msra.mxu1 %v9963_v26  ;;  %v10050_v25 = vld [vmem:[%s14037_s1 + $0x1180] ss:$16 sps:$4 sm:$0xff]   ;;  %v10053_v26 = vld [vmem:[%s14037_s1 + $0x1188] ss:$16 sps:$4 sm:$0xff]  }
 0x1fc   : > { %6866 = vmatprep.subr.bf16.mxu0 %v9968_v27  ;;  %7554 = vmatprep.subr.bf16.mxu1 %v9971_v28  ;;  %v10058_v27 = vld [vmem:[%s14037_s1 + $0x11a4] ss:$16 sps:$4 sm:$0xff]   ;;  %v10061_v28 = vld [vmem:[%s14037_s1 + $0x11ac] ss:$16 sps:$4 sm:$0xff]  }
 0x1ff   : > { %6867 = vmatpush1.bf16.msra.mxu0 %v9966_v29  ;;  %7555 = vmatpush1.bf16.msra.mxu1 %v9969_v30  ;;  %v10056_v29 = vld [vmem:[%s14037_s1 + $0x11a0] ss:$16 sps:$4 sm:$0xff]   ;;  %v10059_v30 = vld [vmem:[%s14037_s1 + $0x11a8] ss:$16 sps:$4 sm:$0xff]  }
 0x200   : > { %6868 = vmatprep.subr.bf16.mxu0 %v9974_v31  ;;  %7556 = vmatprep.subr.bf16.mxu1 %v9977_v32  ;;  %v10064_v31 = vld [vmem:[%s14037_s1 + $0x11c4] ss:$16 sps:$4 sm:$0xff]   ;;  %v10067_v32 = vld [vmem:[%s14037_s1 + $0x11cc] ss:$16 sps:$4 sm:$0xff]  }
 0x203   : > { %6869 = vmatpush1.bf16.msra.mxu0 %v9972_v33  ;;  %7557 = vmatpush1.bf16.msra.mxu1 %v9975_v34  ;;  %v10062_v33 = vld [vmem:[%s14037_s1 + $0x11c0] ss:$16 sps:$4 sm:$0xff]   ;;  %v10065_v34 = vld [vmem:[%s14037_s1 + $0x11c8] ss:$16 sps:$4 sm:$0xff]  }
 0x204   : > { %6881 = vmatprep.subr.bf16.mxu0 %v9980_v35  ;;  %7569 = vmatprep.subr.bf16.mxu1 %v9983_v36  ;;  %v10070_v35 = vld [vmem:[%s14037_s1 + $0x11e4] ss:$16 sps:$4 sm:$0xff]   ;;  %v10073_v36 = vld [vmem:[%s14037_s1 + $0x11ec] ss:$16 sps:$4 sm:$0xff]  }
 0x206   : > { %6871 = vmatmul.mubr.bf16.vlgmr.msra.gmra.mrb[0].mxu0 %v8028_v37  ;;  %7559 = vmatmul.mubr.bf16.vlgmr.msra.gmra.mrb[0].mxu1 %v8028_v37  ;;  %v10068_v37 = vld [vmem:[%s14037_s1 + $0x11e0] ss:$16 sps:$4 sm:$0xff]  }
 0x207   : > { %6882 = vmatpush1.bf16.msra.mxu0 %v9978_v38  ;;  %7570 = vmatpush1.bf16.msra.mxu1 %v9981_v39  ;;  %v10071_v38 = vld [vmem:[%s14037_s1 + $0x11e8] ss:$16 sps:$4 sm:$0xff]   ;;  %v10076_v39 = vld [vmem:[%s14037_s1 + $0x1204] ss:$16 sps:$4 sm:$0xff]  }
 0x208   : > { %6883 = vmatprep.subr.bf16.mxu0 %v9986_v40  ;;  %7571 = vmatprep.subr.bf16.mxu1 %v9989_v18  ;;  %v10079_v40 = vld [vmem:[%s14037_s1 + $0x120c] ss:$16 sps:$4 sm:$0xff]  }
 0x209   : > { %6913 = vmatprep.mubr.bf16.mxu0 %v8031_v19  ;;  %7601 = vmatprep.mubr.bf16.mxu1 %v8031_v19  ;;  %v12607_v18 = vld [vmem:[%s10922_s4 + $0x48] sm:$0xff] }
 0x20a   : > { %v12610_v19 = vld [vmem:[%s10922_s4 + $0xc8] sm:$0xff] }
 0x20b   : > { %6884 = vmatpush1.bf16.msra.mxu0 %v9984_v41  ;;  %7572 = vmatpush1.bf16.msra.mxu1 %v9987_v42  ;;  %v8030_v41 = vcombine.low %v12405_v21, %v12408_v14  ;;  %v10074_v42 = vld [vmem:[%s14037_s1 + $0x1200] ss:$16 sps:$4 sm:$0xff]   ;;  %v10085_v21 = vld [vmem:[%s14037_s1 + $0x122c] ss:$16 sps:$4 sm:$0xff]   ;;  %v8033_v14 = vcombine.high %v12607_v18, %v12610_v19 }
 0x20c   : > { %6885 = vmatprep.subr.bf16.mxu0 %v9992_v43  ;;  %7573 = vmatprep.subr.bf16.mxu1 %v9995_v44  ;;  %v10077_v43 = vld [vmem:[%s14037_s1 + $0x1208] ss:$16 sps:$4 sm:$0xff]   ;;  %v10082_v44 = vld [vmem:[%s14037_s1 + $0x1224] ss:$16 sps:$4 sm:$0xff]  }
 0x20f   : > { %6886 = vmatpush1.bf16.msra.mxu0 %v9990_v45  ;;  %7574 = vmatpush1.bf16.msra.mxu1 %v9993_v46  ;;  %v10080_v45 = vld [vmem:[%s14037_s1 + $0x1220] ss:$16 sps:$4 sm:$0xff]   ;;  %v10083_v46 = vld [vmem:[%s14037_s1 + $0x1228] ss:$16 sps:$4 sm:$0xff]  }
 0x210   : > { %6887 = vmatprep.subr.bf16.mxu0 %v9998_v47  ;;  %7575 = vmatprep.subr.bf16.mxu1 %v10001_v48  ;;  %v10088_v47 = vld [vmem:[%s14037_s1 + $0x1244] ss:$16 sps:$4 sm:$0xff]   ;;  %v10091_v48 = vld [vmem:[%s14037_s1 + $0x124c] ss:$16 sps:$4 sm:$0xff]  }
 0x213   : > { %6888 = vmatpush1.bf16.msra.mxu0 %v9996_v49  ;;  %7576 = vmatpush1.bf16.msra.mxu1 %v9999_v50  ;;  %v10086_v49 = vld [vmem:[%s14037_s1 + $0x1240] ss:$16 sps:$4 sm:$0xff]   ;;  %v10089_v50 = vld [vmem:[%s14037_s1 + $0x1248] ss:$16 sps:$4 sm:$0xff]  }
 0x214   : > { %6889 = vmatprep.subr.bf16.mxu0 %v10004_v51  ;;  %7577 = vmatprep.subr.bf16.mxu1 %v10007_v52  ;;  %v10094_v51 = vld [vmem:[%s14037_s1 + $0x1264] ss:$16 sps:$4 sm:$0xff]   ;;  %v10097_v52 = vld [vmem:[%s14037_s1 + $0x126c] ss:$16 sps:$4 sm:$0xff]  }
 0x217   : > { %6890 = vmatpush1.bf16.msra.mxu0 %v10002_v53  ;;  %7578 = vmatpush1.bf16.msra.mxu1 %v10005_v54  ;;  %v10092_v53 = vld [vmem:[%s14037_s1 + $0x1260] ss:$16 sps:$4 sm:$0xff]   ;;  %v10095_v54 = vld [vmem:[%s14037_s1 + $0x1268] ss:$16 sps:$4 sm:$0xff]  }
 0x218   : > { %6891 = vmatprep.subr.bf16.mxu0 %v10010_v55  ;;  %7579 = vmatprep.subr.bf16.mxu1 %v10013_v56  ;;  %v10100_v55 = vld [vmem:[%s14037_s1 + $0x1284] ss:$16 sps:$4 sm:$0xff]   ;;  %v10103_v56 = vld [vmem:[%s14037_s1 + $0x128c] ss:$16 sps:$4 sm:$0xff]  }
 0x21b   : > { %6892 = vmatpush1.bf16.msra.mxu0 %v10008_v57  ;;  %7580 = vmatpush1.bf16.msra.mxu1 %v10011_v58  ;;  %v10098_v57 = vld [vmem:[%s14037_s1 + $0x1280] ss:$16 sps:$4 sm:$0xff]   ;;  %v10101_v58 = vld [vmem:[%s14037_s1 + $0x1288] ss:$16 sps:$4 sm:$0xff]  }
 0x21c   : > { %6893 = vmatprep.subr.bf16.mxu0 %v10016_v59  ;;  %7581 = vmatprep.subr.bf16.mxu1 %v10019_v60  ;;  %v10106_v59 = vld [vmem:[%s14037_s1 + $0x12a4] ss:$16 sps:$4 sm:$0xff]   ;;  %v10109_v60 = vld [vmem:[%s14037_s1 + $0x12ac] ss:$16 sps:$4 sm:$0xff]  }
 0x21f   : > { %6894 = vmatpush1.bf16.msra.mxu0 %v10014_v61  ;;  %7582 = vmatpush1.bf16.msra.mxu1 %v10017_v62  ;;  %v10104_v61 = vld [vmem:[%s14037_s1 + $0x12a0] ss:$16 sps:$4 sm:$0xff]   ;;  %v10107_v62 = vld [vmem:[%s14037_s1 + $0x12a8] ss:$16 sps:$4 sm:$0xff]  }
 0x220   : > { %6895 = vmatprep.subr.bf16.mxu0 %v10022_v63  ;;  %7583 = vmatprep.subr.bf16.mxu1 %v10025_v0  ;;  %v10112_v63 = vld [vmem:[%s14037_s1 + $0x12c4] ss:$16 sps:$4 sm:$0xff]   ;;  %v10115_v0 = vld [vmem:[%s14037_s1 + $0x12cc] ss:$16 sps:$4 sm:$0xff]  }
 0x223   : > { %6896 = vmatpush1.bf16.msra.mxu0 %v10020_v1  ;;  %7584 = vmatpush1.bf16.msra.mxu1 %v10023_v2  ;;  %v10110_v1 = vld [vmem:[%s14037_s1 + $0x12c0] ss:$16 sps:$4 sm:$0xff]   ;;  %v10113_v2 = vld [vmem:[%s14037_s1 + $0x12c8] ss:$16 sps:$4 sm:$0xff]  }
 0x224   : > { %6897 = vmatprep.subr.bf16.mxu0 %v10028_v3  ;;  %7585 = vmatprep.subr.bf16.mxu1 %v10031_v4  ;;  %v10118_v3 = vld [vmem:[%s14037_s1 + $0x12e4] ss:$16 sps:$4 sm:$0xff]   ;;  %v10121_v4 = vld [vmem:[%s14037_s1 + $0x12ec] ss:$16 sps:$4 sm:$0xff]  }
 0x227   : > { %6898 = vmatpush1.bf16.msra.mxu0 %v10026_v5  ;;  %7586 = vmatpush1.bf16.msra.mxu1 %v10029_v6  ;;  %v10116_v5 = vld [vmem:[%s14037_s1 + $0x12e0] ss:$16 sps:$4 sm:$0xff]   ;;  %v10119_v6 = vld [vmem:[%s14037_s1 + $0x12e8] ss:$16 sps:$4 sm:$0xff]  }
 0x228   : > { %6899 = vmatprep.subr.bf16.mxu0 %v10034_v7  ;;  %7587 = vmatprep.subr.bf16.mxu1 %v10037_v8  ;;  %v10124_v7 = vld [vmem:[%s14037_s1 + $0x1304] ss:$16 sps:$4 sm:$0xff]   ;;  %v10127_v8 = vld [vmem:[%s14037_s1 + $0x130c] ss:$16 sps:$4 sm:$0xff]  }
 0x22b   : > { %6900 = vmatpush1.bf16.msra.mxu0 %v10032_v9  ;;  %7588 = vmatpush1.bf16.msra.mxu1 %v10035_v10  ;;  %v10122_v9 = vld [vmem:[%s14037_s1 + $0x1300] ss:$16 sps:$4 sm:$0xff]   ;;  %v10125_v10 = vld [vmem:[%s14037_s1 + $0x1308] ss:$16 sps:$4 sm:$0xff]  }
 0x22c   : > { %6901 = vmatprep.subr.bf16.mxu0 %v10040_v11  ;;  %7589 = vmatprep.subr.bf16.mxu1 %v10043_v12  ;;  %v10130_v11 = vld [vmem:[%s14037_s1 + $0x1324] ss:$16 sps:$4 sm:$0xff]   ;;  %v10133_v12 = vld [vmem:[%s14037_s1 + $0x132c] ss:$16 sps:$4 sm:$0xff]  }
 0x22f   : > { %6902 = vmatpush1.bf16.msra.mxu0 %v10038_v13  ;;  %7590 = vmatpush1.bf16.msra.mxu1 %v10041_v16  ;;  %v10128_v13 = vld [vmem:[%s14037_s1 + $0x1320] ss:$16 sps:$4 sm:$0xff]   ;;  %v10131_v16 = vld [vmem:[%s14037_s1 + $0x1328] ss:$16 sps:$4 sm:$0xff]  }
 0x230   : > { %6903 = vmatprep.subr.bf16.mxu0 %v10046_v17  ;;  %7591 = vmatprep.subr.bf16.mxu1 %v10049_v20  ;;  %v10136_v17 = vld [vmem:[%s14037_s1 + $0x1344] ss:$16 sps:$4 sm:$0xff]   ;;  %v10139_v20 = vld [vmem:[%s14037_s1 + $0x134c] ss:$16 sps:$4 sm:$0xff]  }
 0x233   : > { %6904 = vmatpush1.bf16.msra.mxu0 %v10044_v22  ;;  %7592 = vmatpush1.bf16.msra.mxu1 %v10047_v15  ;;  %v10134_v22 = vld [vmem:[%s14037_s1 + $0x1340] ss:$16 sps:$4 sm:$0xff]   ;;  %v10137_v15 = vld [vmem:[%s14037_s1 + $0x1348] ss:$16 sps:$4 sm:$0xff]  }
 0x234   : > { %6905 = vmatprep.subr.bf16.mxu0 %v10052_v23  ;;  %7593 = vmatprep.subr.bf16.mxu1 %v10055_v24  ;;  %v10142_v23 = vld [vmem:[%s14037_s1 + $0x1364] ss:$16 sps:$4 sm:$0xff]   ;;  %v10145_v24 = vld [vmem:[%s14037_s1 + $0x136c] ss:$16 sps:$4 sm:$0xff]  }
 0x237   : > { %6906 = vmatpush1.bf16.msra.mxu0 %v10050_v25  ;;  %7594 = vmatpush1.bf16.msra.mxu1 %v10053_v26  ;;  %v10140_v25 = vld [vmem:[%s14037_s1 + $0x1360] ss:$16 sps:$4 sm:$0xff]   ;;  %v10143_v26 = vld [vmem:[%s14037_s1 + $0x1368] ss:$16 sps:$4 sm:$0xff]  }
 0x238   : > { %6907 = vmatprep.subr.bf16.mxu0 %v10058_v27  ;;  %7595 = vmatprep.subr.bf16.mxu1 %v10061_v28  ;;  %v10148_v27 = vld [vmem:[%s14037_s1 + $0x1384] ss:$16 sps:$4 sm:$0xff]   ;;  %v10151_v28 = vld [vmem:[%s14037_s1 + $0x138c] ss:$16 sps:$4 sm:$0xff]  }
 0x23b   : > { %6908 = vmatpush1.bf16.msra.mxu0 %v10056_v29  ;;  %7596 = vmatpush1.bf16.msra.mxu1 %v10059_v30  ;;  %v10146_v29 = vld [vmem:[%s14037_s1 + $0x1380] ss:$16 sps:$4 sm:$0xff]   ;;  %v10149_v30 = vld [vmem:[%s14037_s1 + $0x1388] ss:$16 sps:$4 sm:$0xff]  }
 0x23c   : > { %6909 = vmatprep.subr.bf16.mxu0 %v10064_v31  ;;  %7597 = vmatprep.subr.bf16.mxu1 %v10067_v32  ;;  %v10154_v31 = vld [vmem:[%s14037_s1 + $0x13a4] ss:$16 sps:$4 sm:$0xff]   ;;  %v10157_v32 = vld [vmem:[%s14037_s1 + $0x13ac] ss:$16 sps:$4 sm:$0xff]  }
 0x23f   : > { %6910 = vmatpush1.bf16.msra.mxu0 %v10062_v33  ;;  %7598 = vmatpush1.bf16.msra.mxu1 %v10065_v34  ;;  %v10152_v33 = vld [vmem:[%s14037_s1 + $0x13a0] ss:$16 sps:$4 sm:$0xff]   ;;  %v10155_v34 = vld [vmem:[%s14037_s1 + $0x13a8] ss:$16 sps:$4 sm:$0xff]  }
 0x240   : > { %6911 = vmatprep.subr.bf16.mxu0 %v10070_v35  ;;  %7599 = vmatprep.subr.bf16.mxu1 %v10073_v36  ;;  %v10160_v35 = vld [vmem:[%s14037_s1 + $0x13c4] ss:$16 sps:$4 sm:$0xff]   ;;  %v10163_v36 = vld [vmem:[%s14037_s1 + $0x13cc] ss:$16 sps:$4 sm:$0xff]  }
 0x243   : > { %6912 = vmatpush1.bf16.msra.mxu0 %v10068_v37  ;;  %7600 = vmatpush1.bf16.msra.mxu1 %v10071_v38  ;;  %v10158_v37 = vld [vmem:[%s14037_s1 + $0x13c0] ss:$16 sps:$4 sm:$0xff]   ;;  %v10161_v38 = vld [vmem:[%s14037_s1 + $0x13c8] ss:$16 sps:$4 sm:$0xff]  }
 0x244   : > { %6924 = vmatprep.subr.bf16.mxu0 %v10076_v39  ;;  %7612 = vmatprep.subr.bf16.mxu1 %v10079_v40  ;;  %v10166_v39 = vld [vmem:[%s14037_s1 + $0x13e4] ss:$16 sps:$4 sm:$0xff]   ;;  %v10169_v40 = vld [vmem:[%s14037_s1 + $0x13ec] ss:$16 sps:$4 sm:$0xff]  }
 0x246   : > { %6914 = vmatmul.mubr.bf16.vlgmr.msra.gmra.mrb[0].mxu0 %v8030_v41  ;;  %7602 = vmatmul.mubr.bf16.vlgmr.msra.gmra.mrb[0].mxu1 %v8030_v41  ;;  %v10164_v41 = vld [vmem:[%s14037_s1 + $0x13e0] ss:$16 sps:$4 sm:$0xff]  }
 0x247   : > { %6925 = vmatpush1.bf16.msra.mxu0 %v10074_v42  ;;  %7613 = vmatpush1.bf16.msra.mxu1 %v10077_v43  ;;  %v10167_v42 = vld [vmem:[%s14037_s1 + $0x13e8] ss:$16 sps:$4 sm:$0xff]   ;;  %v10172_v43 = vld [vmem:[%s14037_s1 + $0x1404] ss:$16 sps:$4 sm:$0xff]  }
 0x248   : > { %6926 = vmatprep.subr.bf16.mxu0 %v10082_v44  ;;  %7614 = vmatprep.subr.bf16.mxu1 %v10085_v21  ;;  %v10175_v44 = vld [vmem:[%s14037_s1 + $0x140c] ss:$16 sps:$4 sm:$0xff]   ;;  %v8032_v21 = vcombine.low %v12607_v18, %v12610_v19  ;;  %v10178_v18 = vld [vmem:[%s14037_s1 + $0x1424] ss:$16 sps:$4 sm:$0xff]  }
 0x249   : > { %6956 = vmatprep.mubr.bf16.mxu0 %v8033_v14  ;;  %7644 = vmatprep.mubr.bf16.mxu1 %v8033_v14  ;;  %v12811_v14 = vld [vmem:[%s10922_s4 + $0x50] sm:$0xff]  ;;  %v10181_v19 = vld [vmem:[%s14037_s1 + $0x142c] ss:$16 sps:$4 sm:$0xff]  }
 0x24b   : > { %6927 = vmatpush1.bf16.msra.mxu0 %v10080_v45  ;;  %7615 = vmatpush1.bf16.msra.mxu1 %v10083_v46  ;;  %v12814_v45 = vld [vmem:[%s10922_s4 + $0xd0] sm:$0xff] }
 0x24c   : > { %6928 = vmatprep.subr.bf16.mxu0 %v10088_v47  ;;  %7616 = vmatprep.subr.bf16.mxu1 %v10091_v48  ;;  %v10170_v46 = vld [vmem:[%s14037_s1 + $0x1400] ss:$16 sps:$4 sm:$0xff]   ;;  %v10173_v47 = vld [vmem:[%s14037_s1 + $0x1408] ss:$16 sps:$4 sm:$0xff]   ;;  %v8035_v48 = vcombine.high %v12811_v14, %v12814_v45 }
 0x24f   : > { %6929 = vmatpush1.bf16.msra.mxu0 %v10086_v49  ;;  %7617 = vmatpush1.bf16.msra.mxu1 %v10089_v50  ;;  %v10176_v49 = vld [vmem:[%s14037_s1 + $0x1420] ss:$16 sps:$4 sm:$0xff]   ;;  %v10179_v50 = vld [vmem:[%s14037_s1 + $0x1428] ss:$16 sps:$4 sm:$0xff]  }
 0x250   : > { %6930 = vmatprep.subr.bf16.mxu0 %v10094_v51  ;;  %7618 = vmatprep.subr.bf16.mxu1 %v10097_v52  ;;  %v10184_v51 = vld [vmem:[%s14037_s1 + $0x1444] ss:$16 sps:$4 sm:$0xff]   ;;  %v10187_v52 = vld [vmem:[%s14037_s1 + $0x144c] ss:$16 sps:$4 sm:$0xff]  }
 0x253   : > { %6931 = vmatpush1.bf16.msra.mxu0 %v10092_v53  ;;  %7619 = vmatpush1.bf16.msra.mxu1 %v10095_v54  ;;  %v10182_v53 = vld [vmem:[%s14037_s1 + $0x1440] ss:$16 sps:$4 sm:$0xff]   ;;  %v10185_v54 = vld [vmem:[%s14037_s1 + $0x1448] ss:$16 sps:$4 sm:$0xff]  }
 0x254   : > { %6932 = vmatprep.subr.bf16.mxu0 %v10100_v55  ;;  %7620 = vmatprep.subr.bf16.mxu1 %v10103_v56  ;;  %v10190_v55 = vld [vmem:[%s14037_s1 + $0x1464] ss:$16 sps:$4 sm:$0xff]   ;;  %v10193_v56 = vld [vmem:[%s14037_s1 + $0x146c] ss:$16 sps:$4 sm:$0xff]  }
 0x257   : > { %6933 = vmatpush1.bf16.msra.mxu0 %v10098_v57  ;;  %7621 = vmatpush1.bf16.msra.mxu1 %v10101_v58  ;;  %v10188_v57 = vld [vmem:[%s14037_s1 + $0x1460] ss:$16 sps:$4 sm:$0xff]   ;;  %v10191_v58 = vld [vmem:[%s14037_s1 + $0x1468] ss:$16 sps:$4 sm:$0xff]  }
 0x258   : > { %6934 = vmatprep.subr.bf16.mxu0 %v10106_v59  ;;  %7622 = vmatprep.subr.bf16.mxu1 %v10109_v60  ;;  %v10196_v59 = vld [vmem:[%s14037_s1 + $0x1484] ss:$16 sps:$4 sm:$0xff]   ;;  %v10199_v60 = vld [vmem:[%s14037_s1 + $0x148c] ss:$16 sps:$4 sm:$0xff]  }
 0x25b   : > { %6935 = vmatpush1.bf16.msra.mxu0 %v10104_v61  ;;  %7623 = vmatpush1.bf16.msra.mxu1 %v10107_v62  ;;  %v10194_v61 = vld [vmem:[%s14037_s1 + $0x1480] ss:$16 sps:$4 sm:$0xff]   ;;  %v10197_v62 = vld [vmem:[%s14037_s1 + $0x1488] ss:$16 sps:$4 sm:$0xff]  }
 0x25c   : > { %6936 = vmatprep.subr.bf16.mxu0 %v10112_v63  ;;  %7624 = vmatprep.subr.bf16.mxu1 %v10115_v0  ;;  %v10202_v63 = vld [vmem:[%s14037_s1 + $0x14a4] ss:$16 sps:$4 sm:$0xff]   ;;  %v10205_v0 = vld [vmem:[%s14037_s1 + $0x14ac] ss:$16 sps:$4 sm:$0xff]  }
 0x25f   : > { %6937 = vmatpush1.bf16.msra.mxu0 %v10110_v1  ;;  %7625 = vmatpush1.bf16.msra.mxu1 %v10113_v2  ;;  %v10200_v1 = vld [vmem:[%s14037_s1 + $0x14a0] ss:$16 sps:$4 sm:$0xff]   ;;  %v10203_v2 = vld [vmem:[%s14037_s1 + $0x14a8] ss:$16 sps:$4 sm:$0xff]  }
 0x260   : > { %6938 = vmatprep.subr.bf16.mxu0 %v10118_v3  ;;  %7626 = vmatprep.subr.bf16.mxu1 %v10121_v4  ;;  %v10208_v3 = vld [vmem:[%s14037_s1 + $0x14c4] ss:$16 sps:$4 sm:$0xff]   ;;  %v10211_v4 = vld [vmem:[%s14037_s1 + $0x14cc] ss:$16 sps:$4 sm:$0xff]  }
 0x263   : > { %6939 = vmatpush1.bf16.msra.mxu0 %v10116_v5  ;;  %7627 = vmatpush1.bf16.msra.mxu1 %v10119_v6  ;;  %v10206_v5 = vld [vmem:[%s14037_s1 + $0x14c0] ss:$16 sps:$4 sm:$0xff]   ;;  %v10209_v6 = vld [vmem:[%s14037_s1 + $0x14c8] ss:$16 sps:$4 sm:$0xff]  }
 0x264   : > { %6940 = vmatprep.subr.bf16.mxu0 %v10124_v7  ;;  %7628 = vmatprep.subr.bf16.mxu1 %v10127_v8  ;;  %v10214_v7 = vld [vmem:[%s14037_s1 + $0x14e4] ss:$16 sps:$4 sm:$0xff]   ;;  %v10217_v8 = vld [vmem:[%s14037_s1 + $0x14ec] ss:$16 sps:$4 sm:$0xff]  }
 0x267   : > { %6941 = vmatpush1.bf16.msra.mxu0 %v10122_v9  ;;  %7629 = vmatpush1.bf16.msra.mxu1 %v10125_v10  ;;  %v10212_v9 = vld [vmem:[%s14037_s1 + $0x14e0] ss:$16 sps:$4 sm:$0xff]   ;;  %v10215_v10 = vld [vmem:[%s14037_s1 + $0x14e8] ss:$16 sps:$4 sm:$0xff]  }
 0x268   : > { %6942 = vmatprep.subr.bf16.mxu0 %v10130_v11  ;;  %7630 = vmatprep.subr.bf16.mxu1 %v10133_v12  ;;  %v10220_v11 = vld [vmem:[%s14037_s1 + $0x1504] ss:$16 sps:$4 sm:$0xff]   ;;  %v10223_v12 = vld [vmem:[%s14037_s1 + $0x150c] ss:$16 sps:$4 sm:$0xff]  }
 0x26b   : > { %6943 = vmatpush1.bf16.msra.mxu0 %v10128_v13  ;;  %7631 = vmatpush1.bf16.msra.mxu1 %v10131_v16  ;;  %v10218_v13 = vld [vmem:[%s14037_s1 + $0x1500] ss:$16 sps:$4 sm:$0xff]   ;;  %v10221_v16 = vld [vmem:[%s14037_s1 + $0x1508] ss:$16 sps:$4 sm:$0xff]  }
 0x26c   : > { %6944 = vmatprep.subr.bf16.mxu0 %v10136_v17  ;;  %7632 = vmatprep.subr.bf16.mxu1 %v10139_v20  ;;  %v10226_v17 = vld [vmem:[%s14037_s1 + $0x1524] ss:$16 sps:$4 sm:$0xff]   ;;  %v10229_v20 = vld [vmem:[%s14037_s1 + $0x152c] ss:$16 sps:$4 sm:$0xff]  }
 0x26f   : > { %6945 = vmatpush1.bf16.msra.mxu0 %v10134_v22  ;;  %7633 = vmatpush1.bf16.msra.mxu1 %v10137_v15  ;;  %v10224_v22 = vld [vmem:[%s14037_s1 + $0x1520] ss:$16 sps:$4 sm:$0xff]   ;;  %v10227_v15 = vld [vmem:[%s14037_s1 + $0x1528] ss:$16 sps:$4 sm:$0xff]  }
 0x270   : > { %6946 = vmatprep.subr.bf16.mxu0 %v10142_v23  ;;  %7634 = vmatprep.subr.bf16.mxu1 %v10145_v24  ;;  %v10232_v23 = vld [vmem:[%s14037_s1 + $0x1544] ss:$16 sps:$4 sm:$0xff]   ;;  %v10235_v24 = vld [vmem:[%s14037_s1 + $0x154c] ss:$16 sps:$4 sm:$0xff]  }
 0x273   : > { %6947 = vmatpush1.bf16.msra.mxu0 %v10140_v25  ;;  %7635 = vmatpush1.bf16.msra.mxu1 %v10143_v26  ;;  %v10230_v25 = vld [vmem:[%s14037_s1 + $0x1540] ss:$16 sps:$4 sm:$0xff]   ;;  %v10233_v26 = vld [vmem:[%s14037_s1 + $0x1548] ss:$16 sps:$4 sm:$0xff]  }
 0x274   : > { %6948 = vmatprep.subr.bf16.mxu0 %v10148_v27  ;;  %7636 = vmatprep.subr.bf16.mxu1 %v10151_v28  ;;  %v10238_v27 = vld [vmem:[%s14037_s1 + $0x1564] ss:$16 sps:$4 sm:$0xff]   ;;  %v10241_v28 = vld [vmem:[%s14037_s1 + $0x156c] ss:$16 sps:$4 sm:$0xff]  }
 0x277   : > { %6949 = vmatpush1.bf16.msra.mxu0 %v10146_v29  ;;  %7637 = vmatpush1.bf16.msra.mxu1 %v10149_v30  ;;  %v10236_v29 = vld [vmem:[%s14037_s1 + $0x1560] ss:$16 sps:$4 sm:$0xff]   ;;  %v10239_v30 = vld [vmem:[%s14037_s1 + $0x1568] ss:$16 sps:$4 sm:$0xff]  }
 0x278   : > { %6950 = vmatprep.subr.bf16.mxu0 %v10154_v31  ;;  %7638 = vmatprep.subr.bf16.mxu1 %v10157_v32  ;;  %v10244_v31 = vld [vmem:[%s14037_s1 + $0x1584] ss:$16 sps:$4 sm:$0xff]   ;;  %v10247_v32 = vld [vmem:[%s14037_s1 + $0x158c] ss:$16 sps:$4 sm:$0xff]  }
 0x27b   : > { %6951 = vmatpush1.bf16.msra.mxu0 %v10152_v33  ;;  %7639 = vmatpush1.bf16.msra.mxu1 %v10155_v34  ;;  %v10242_v33 = vld [vmem:[%s14037_s1 + $0x1580] ss:$16 sps:$4 sm:$0xff]   ;;  %v10245_v34 = vld [vmem:[%s14037_s1 + $0x1588] ss:$16 sps:$4 sm:$0xff]  }
 0x27c   : > { %6952 = vmatprep.subr.bf16.mxu0 %v10160_v35  ;;  %7640 = vmatprep.subr.bf16.mxu1 %v10163_v36  ;;  %v10250_v35 = vld [vmem:[%s14037_s1 + $0x15a4] ss:$16 sps:$4 sm:$0xff]   ;;  %v10253_v36 = vld [vmem:[%s14037_s1 + $0x15ac] ss:$16 sps:$4 sm:$0xff]  }
 0x27f   : > { %6953 = vmatpush1.bf16.msra.mxu0 %v10158_v37  ;;  %7641 = vmatpush1.bf16.msra.mxu1 %v10161_v38  ;;  %v10248_v37 = vld [vmem:[%s14037_s1 + $0x15a0] ss:$16 sps:$4 sm:$0xff]   ;;  %v10251_v38 = vld [vmem:[%s14037_s1 + $0x15a8] ss:$16 sps:$4 sm:$0xff]  }
 0x280   : > { %6954 = vmatprep.subr.bf16.mxu0 %v10166_v39  ;;  %7642 = vmatprep.subr.bf16.mxu1 %v10169_v40  ;;  %v10256_v39 = vld [vmem:[%s14037_s1 + $0x15c4] ss:$16 sps:$4 sm:$0xff]   ;;  %v10259_v40 = vld [vmem:[%s14037_s1 + $0x15cc] ss:$16 sps:$4 sm:$0xff]  }
 0x283   : > { %6955 = vmatpush1.bf16.msra.mxu0 %v10164_v41  ;;  %7643 = vmatpush1.bf16.msra.mxu1 %v10167_v42  ;;  %v10254_v41 = vld [vmem:[%s14037_s1 + $0x15c0] ss:$16 sps:$4 sm:$0xff]   ;;  %v10257_v42 = vld [vmem:[%s14037_s1 + $0x15c8] ss:$16 sps:$4 sm:$0xff]  }
 0x284   : > { %6967 = vmatprep.subr.bf16.mxu0 %v10172_v43  ;;  %7655 = vmatprep.subr.bf16.mxu1 %v10175_v44  ;;  %v10262_v43 = vld [vmem:[%s14037_s1 + $0x15e4] ss:$16 sps:$4 sm:$0xff]   ;;  %v10265_v44 = vld [vmem:[%s14037_s1 + $0x15ec] ss:$16 sps:$4 sm:$0xff]  }
 0x286   : > { %6957 = vmatmul.mubr.bf16.vlgmr.msra.gmra.mrb[0].mxu0 %v8032_v21  ;;  %7645 = vmatmul.mubr.bf16.vlgmr.msra.gmra.mrb[0].mxu1 %v8032_v21  ;;  %v10260_v21 = vld [vmem:[%s14037_s1 + $0x15e0] ss:$16 sps:$4 sm:$0xff]  }
 0x287   : > { %6968 = vmatpush1.bf16.msra.mxu0 %v10170_v46  ;;  %7656 = vmatpush1.bf16.msra.mxu1 %v10173_v47  ;;  %v10263_v46 = vld [vmem:[%s14037_s1 + $0x15e8] ss:$16 sps:$4 sm:$0xff]   ;;  %v10268_v47 = vld [vmem:[%s14037_s1 + $0x1604] ss:$16 sps:$4 sm:$0xff]  }
 0x288   : > { %6969 = vmatprep.subr.bf16.mxu0 %v10178_v18  ;;  %7657 = vmatprep.subr.bf16.mxu1 %v10181_v19  ;;  %v10271_v18 = vld [vmem:[%s14037_s1 + $0x160c] ss:$16 sps:$4 sm:$0xff]   ;;  %v8034_v19 = vcombine.low %v12811_v14, %v12814_v45  ;;  %v10274_v14 = vld [vmem:[%s14037_s1 + $0x1624] ss:$16 sps:$4 sm:$0xff]  }
 0x289   : > { %6999 = vmatprep.mubr.bf16.mxu0 %v8035_v48  ;;  %7687 = vmatprep.mubr.bf16.mxu1 %v8035_v48  ;;  %v13013_v48 = vld [vmem:[%s10922_s4 + $0x58] sm:$0xff] }
 0x28a   : > { %v10277_v45 = vld [vmem:[%s14037_s1 + $0x162c] ss:$16 sps:$4 sm:$0xff]  }
 0x28b   : > { %6970 = vmatpush1.bf16.msra.mxu0 %v10176_v49  ;;  %7658 = vmatpush1.bf16.msra.mxu1 %v10179_v50  ;;  %v13016_v49 = vld [vmem:[%s10922_s4 + $0xd8] sm:$0xff]  ;;  %v10266_v50 = vld [vmem:[%s14037_s1 + $0x1600] ss:$16 sps:$4 sm:$0xff]  }
 0x28c   : > { %6971 = vmatprep.subr.bf16.mxu0 %v10184_v51  ;;  %7659 = vmatprep.subr.bf16.mxu1 %v10187_v52  ;;  %v10269_v51 = vld [vmem:[%s14037_s1 + $0x1608] ss:$16 sps:$4 sm:$0xff]   ;;  %v8037_v52 = vcombine.high %v13013_v48, %v13016_v49 }
 0x28f   : > { %6972 = vmatpush1.bf16.msra.mxu0 %v10182_v53  ;;  %7660 = vmatpush1.bf16.msra.mxu1 %v10185_v54  ;;  %v10272_v53 = vld [vmem:[%s14037_s1 + $0x1620] ss:$16 sps:$4 sm:$0xff]   ;;  %v10275_v54 = vld [vmem:[%s14037_s1 + $0x1628] ss:$16 sps:$4 sm:$0xff]  }
 0x290   : > { %6973 = vmatprep.subr.bf16.mxu0 %v10190_v55  ;;  %7661 = vmatprep.subr.bf16.mxu1 %v10193_v56  ;;  %v10280_v55 = vld [vmem:[%s14037_s1 + $0x1644] ss:$16 sps:$4 sm:$0xff]   ;;  %v10283_v56 = vld [vmem:[%s14037_s1 + $0x164c] ss:$16 sps:$4 sm:$0xff]  }
 0x293   : > { %6974 = vmatpush1.bf16.msra.mxu0 %v10188_v57  ;;  %7662 = vmatpush1.bf16.msra.mxu1 %v10191_v58  ;;  %v10278_v57 = vld [vmem:[%s14037_s1 + $0x1640] ss:$16 sps:$4 sm:$0xff]   ;;  %v10281_v58 = vld [vmem:[%s14037_s1 + $0x1648] ss:$16 sps:$4 sm:$0xff]  }
 0x294   : > { %6975 = vmatprep.subr.bf16.mxu0 %v10196_v59  ;;  %7663 = vmatprep.subr.bf16.mxu1 %v10199_v60  ;;  %v10286_v59 = vld [vmem:[%s14037_s1 + $0x1664] ss:$16 sps:$4 sm:$0xff]   ;;  %v10289_v60 = vld [vmem:[%s14037_s1 + $0x166c] ss:$16 sps:$4 sm:$0xff]  }
 0x297   : > { %6976 = vmatpush1.bf16.msra.mxu0 %v10194_v61  ;;  %7664 = vmatpush1.bf16.msra.mxu1 %v10197_v62  ;;  %v10284_v61 = vld [vmem:[%s14037_s1 + $0x1660] ss:$16 sps:$4 sm:$0xff]   ;;  %v10287_v62 = vld [vmem:[%s14037_s1 + $0x1668] ss:$16 sps:$4 sm:$0xff]  }
 0x298   : > { %6977 = vmatprep.subr.bf16.mxu0 %v10202_v63  ;;  %7665 = vmatprep.subr.bf16.mxu1 %v10205_v0  ;;  %v10292_v63 = vld [vmem:[%s14037_s1 + $0x1684] ss:$16 sps:$4 sm:$0xff]   ;;  %v10295_v0 = vld [vmem:[%s14037_s1 + $0x168c] ss:$16 sps:$4 sm:$0xff]  }
 0x29b   : > { %6978 = vmatpush1.bf16.msra.mxu0 %v10200_v1  ;;  %7666 = vmatpush1.bf16.msra.mxu1 %v10203_v2  ;;  %v10290_v1 = vld [vmem:[%s14037_s1 + $0x1680] ss:$16 sps:$4 sm:$0xff]   ;;  %v10293_v2 = vld [vmem:[%s14037_s1 + $0x1688] ss:$16 sps:$4 sm:$0xff]  }
 0x29c   : > { %6979 = vmatprep.subr.bf16.mxu0 %v10208_v3  ;;  %7667 = vmatprep.subr.bf16.mxu1 %v10211_v4  ;;  %v10298_v3 = vld [vmem:[%s14037_s1 + $0x16a4] ss:$16 sps:$4 sm:$0xff]   ;;  %v10301_v4 = vld [vmem:[%s14037_s1 + $0x16ac] ss:$16 sps:$4 sm:$0xff]  }
 0x29f   : > { %6980 = vmatpush1.bf16.msra.mxu0 %v10206_v5  ;;  %7668 = vmatpush1.bf16.msra.mxu1 %v10209_v6  ;;  %v10296_v5 = vld [vmem:[%s14037_s1 + $0x16a0] ss:$16 sps:$4 sm:$0xff]   ;;  %v10299_v6 = vld [vmem:[%s14037_s1 + $0x16a8] ss:$16 sps:$4 sm:$0xff]  }
 0x2a0   : > { %6981 = vmatprep.subr.bf16.mxu0 %v10214_v7  ;;  %7669 = vmatprep.subr.bf16.mxu1 %v10217_v8  ;;  %v10304_v7 = vld [vmem:[%s14037_s1 + $0x16c4] ss:$16 sps:$4 sm:$0xff]   ;;  %v10307_v8 = vld [vmem:[%s14037_s1 + $0x16cc] ss:$16 sps:$4 sm:$0xff]  }
 0x2a3   : > { %6982 = vmatpush1.bf16.msra.mxu0 %v10212_v9  ;;  %7670 = vmatpush1.bf16.msra.mxu1 %v10215_v10  ;;  %v10302_v9 = vld [vmem:[%s14037_s1 + $0x16c0] ss:$16 sps:$4 sm:$0xff]   ;;  %v10305_v10 = vld [vmem:[%s14037_s1 + $0x16c8] ss:$16 sps:$4 sm:$0xff]  }
 0x2a4   : > { %6983 = vmatprep.subr.bf16.mxu0 %v10220_v11  ;;  %7671 = vmatprep.subr.bf16.mxu1 %v10223_v12  ;;  %v10310_v11 = vld [vmem:[%s14037_s1 + $0x16e4] ss:$16 sps:$4 sm:$0xff]   ;;  %v10313_v12 = vld [vmem:[%s14037_s1 + $0x16ec] ss:$16 sps:$4 sm:$0xff]  }
 0x2a7   : > { %6984 = vmatpush1.bf16.msra.mxu0 %v10218_v13  ;;  %7672 = vmatpush1.bf16.msra.mxu1 %v10221_v16  ;;  %v10308_v13 = vld [vmem:[%s14037_s1 + $0x16e0] ss:$16 sps:$4 sm:$0xff]   ;;  %v10311_v16 = vld [vmem:[%s14037_s1 + $0x16e8] ss:$16 sps:$4 sm:$0xff]  }
 0x2a8   : > { %6985 = vmatprep.subr.bf16.mxu0 %v10226_v17  ;;  %7673 = vmatprep.subr.bf16.mxu1 %v10229_v20  ;;  %v10316_v17 = vld [vmem:[%s14037_s1 + $0x1704] ss:$16 sps:$4 sm:$0xff]   ;;  %v10319_v20 = vld [vmem:[%s14037_s1 + $0x170c] ss:$16 sps:$4 sm:$0xff]  }
 0x2ab   : > { %6986 = vmatpush1.bf16.msra.mxu0 %v10224_v22  ;;  %7674 = vmatpush1.bf16.msra.mxu1 %v10227_v15  ;;  %v10314_v22 = vld [vmem:[%s14037_s1 + $0x1700] ss:$16 sps:$4 sm:$0xff]   ;;  %v10317_v15 = vld [vmem:[%s14037_s1 + $0x1708] ss:$16 sps:$4 sm:$0xff]  }
 0x2ac   : > { %6987 = vmatprep.subr.bf16.mxu0 %v10232_v23  ;;  %7675 = vmatprep.subr.bf16.mxu1 %v10235_v24  ;;  %v10322_v23 = vld [vmem:[%s14037_s1 + $0x1724] ss:$16 sps:$4 sm:$0xff]   ;;  %v10325_v24 = vld [vmem:[%s14037_s1 + $0x172c] ss:$16 sps:$4 sm:$0xff]  }
 0x2af   : > { %6988 = vmatpush1.bf16.msra.mxu0 %v10230_v25  ;;  %7676 = vmatpush1.bf16.msra.mxu1 %v10233_v26  ;;  %v10320_v25 = vld [vmem:[%s14037_s1 + $0x1720] ss:$16 sps:$4 sm:$0xff]   ;;  %v10323_v26 = vld [vmem:[%s14037_s1 + $0x1728] ss:$16 sps:$4 sm:$0xff]  }
 0x2b0   : > { %6989 = vmatprep.subr.bf16.mxu0 %v10238_v27  ;;  %7677 = vmatprep.subr.bf16.mxu1 %v10241_v28  ;;  %v10328_v27 = vld [vmem:[%s14037_s1 + $0x1744] ss:$16 sps:$4 sm:$0xff]   ;;  %v10331_v28 = vld [vmem:[%s14037_s1 + $0x174c] ss:$16 sps:$4 sm:$0xff]  }
 0x2b3   : > { %6990 = vmatpush1.bf16.msra.mxu0 %v10236_v29  ;;  %7678 = vmatpush1.bf16.msra.mxu1 %v10239_v30  ;;  %v10326_v29 = vld [vmem:[%s14037_s1 + $0x1740] ss:$16 sps:$4 sm:$0xff]   ;;  %v10329_v30 = vld [vmem:[%s14037_s1 + $0x1748] ss:$16 sps:$4 sm:$0xff]  }
 0x2b4   : > { %6991 = vmatprep.subr.bf16.mxu0 %v10244_v31  ;;  %7679 = vmatprep.subr.bf16.mxu1 %v10247_v32  ;;  %v10334_v31 = vld [vmem:[%s14037_s1 + $0x1764] ss:$16 sps:$4 sm:$0xff]   ;;  %v10337_v32 = vld [vmem:[%s14037_s1 + $0x176c] ss:$16 sps:$4 sm:$0xff]  }
 0x2b7   : > { %6992 = vmatpush1.bf16.msra.mxu0 %v10242_v33  ;;  %7680 = vmatpush1.bf16.msra.mxu1 %v10245_v34  ;;  %v10332_v33 = vld [vmem:[%s14037_s1 + $0x1760] ss:$16 sps:$4 sm:$0xff]   ;;  %v10335_v34 = vld [vmem:[%s14037_s1 + $0x1768] ss:$16 sps:$4 sm:$0xff]  }
 0x2b8   : > { %6993 = vmatprep.subr.bf16.mxu0 %v10250_v35  ;;  %7681 = vmatprep.subr.bf16.mxu1 %v10253_v36  ;;  %v10340_v35 = vld [vmem:[%s14037_s1 + $0x1784] ss:$16 sps:$4 sm:$0xff]   ;;  %v10343_v36 = vld [vmem:[%s14037_s1 + $0x178c] ss:$16 sps:$4 sm:$0xff]  }
 0x2bb   : > { %6994 = vmatpush1.bf16.msra.mxu0 %v10248_v37  ;;  %7682 = vmatpush1.bf16.msra.mxu1 %v10251_v38  ;;  %v10338_v37 = vld [vmem:[%s14037_s1 + $0x1780] ss:$16 sps:$4 sm:$0xff]   ;;  %v10341_v38 = vld [vmem:[%s14037_s1 + $0x1788] ss:$16 sps:$4 sm:$0xff]  }
 0x2bc   : > { %6995 = vmatprep.subr.bf16.mxu0 %v10256_v39  ;;  %7683 = vmatprep.subr.bf16.mxu1 %v10259_v40  ;;  %v10346_v39 = vld [vmem:[%s14037_s1 + $0x17a4] ss:$16 sps:$4 sm:$0xff]   ;;  %v10349_v40 = vld [vmem:[%s14037_s1 + $0x17ac] ss:$16 sps:$4 sm:$0xff]  }
 0x2bf   : > { %6996 = vmatpush1.bf16.msra.mxu0 %v10254_v41  ;;  %7684 = vmatpush1.bf16.msra.mxu1 %v10257_v42  ;;  %v10344_v41 = vld [vmem:[%s14037_s1 + $0x17a0] ss:$16 sps:$4 sm:$0xff]   ;;  %v10347_v42 = vld [vmem:[%s14037_s1 + $0x17a8] ss:$16 sps:$4 sm:$0xff]  }
 0x2c0   : > { %6997 = vmatprep.subr.bf16.mxu0 %v10262_v43  ;;  %7685 = vmatprep.subr.bf16.mxu1 %v10265_v44  ;;  %v10352_v43 = vld [vmem:[%s14037_s1 + $0x17c4] ss:$16 sps:$4 sm:$0xff]   ;;  %v10355_v44 = vld [vmem:[%s14037_s1 + $0x17cc] ss:$16 sps:$4 sm:$0xff]  }
 0x2c3   : > { %6998 = vmatpush1.bf16.msra.mxu0 %v10260_v21  ;;  %7686 = vmatpush1.bf16.msra.mxu1 %v10263_v46  ;;  %v10350_v21 = vld [vmem:[%s14037_s1 + $0x17c0] ss:$16 sps:$4 sm:$0xff]   ;;  %v10353_v46 = vld [vmem:[%s14037_s1 + $0x17c8] ss:$16 sps:$4 sm:$0xff]  }
 0x2c4   : > { %7010 = vmatprep.subr.bf16.mxu0 %v10268_v47  ;;  %7698 = vmatprep.subr.bf16.mxu1 %v10271_v18  ;;  %v10358_v47 = vld [vmem:[%s14037_s1 + $0x17e4] ss:$16 sps:$4 sm:$0xff]   ;;  %v10361_v18 = vld [vmem:[%s14037_s1 + $0x17ec] ss:$16 sps:$4 sm:$0xff]  }
 0x2c6   : > { %7000 = vmatmul.mubr.bf16.vlgmr.msra.gmra.mrb[0].mxu0 %v8034_v19  ;;  %7688 = vmatmul.mubr.bf16.vlgmr.msra.gmra.mrb[0].mxu1 %v8034_v19  ;;  %v10356_v19 = vld [vmem:[%s14037_s1 + $0x17e0] ss:$16 sps:$4 sm:$0xff]  }
 0x2c7   : > { %7011 = vmatpush1.bf16.msra.mxu0 %v10266_v50  ;;  %7699 = vmatpush1.bf16.msra.mxu1 %v10269_v51  ;;  %v10359_v50 = vld [vmem:[%s14037_s1 + $0x17e8] ss:$16 sps:$4 sm:$0xff]   ;;  %v10364_v51 = vld [vmem:[%s14037_s1 + $0x1804] ss:$16 sps:$4 sm:$0xff]  }
 0x2c8   : > { %7012 = vmatprep.subr.bf16.mxu0 %v10274_v14  ;;  %7700 = vmatprep.subr.bf16.mxu1 %v10277_v45  ;;  %v10367_v14 = vld [vmem:[%s14037_s1 + $0x180c] ss:$16 sps:$4 sm:$0xff]   ;;  %v8036_v45 = vcombine.low %v13013_v48, %v13016_v49  ;;  %v10370_v48 = vld [vmem:[%s14037_s1 + $0x1824] ss:$16 sps:$4 sm:$0xff]  }
 0x2c9   : > { %7042 = vmatprep.mubr.bf16.mxu0 %v8037_v52  ;;  %7730 = vmatprep.mubr.bf16.mxu1 %v8037_v52  ;;  %v13215_v52 = vld [vmem:[%s10922_s4 + $0x60] sm:$0xff]  ;;  %v10373_v49 = vld [vmem:[%s14037_s1 + $0x182c] ss:$16 sps:$4 sm:$0xff]  }
 0x2cb   : > { %7013 = vmatpush1.bf16.msra.mxu0 %v10272_v53  ;;  %7701 = vmatpush1.bf16.msra.mxu1 %v10275_v54  ;;  %v13218_v53 = vld [vmem:[%s10922_s4 + $0xe0] sm:$0xff] }
 0x2cc   : > { %7014 = vmatprep.subr.bf16.mxu0 %v10280_v55  ;;  %7702 = vmatprep.subr.bf16.mxu1 %v10283_v56  ;;  %v10362_v54 = vld [vmem:[%s14037_s1 + $0x1800] ss:$16 sps:$4 sm:$0xff]   ;;  %v10365_v55 = vld [vmem:[%s14037_s1 + $0x1808] ss:$16 sps:$4 sm:$0xff]   ;;  %v8039_v56 = vcombine.high %v13215_v52, %v13218_v53 }
 0x2cf   : > { %7015 = vmatpush1.bf16.msra.mxu0 %v10278_v57  ;;  %7703 = vmatpush1.bf16.msra.mxu1 %v10281_v58  ;;  %v10368_v57 = vld [vmem:[%s14037_s1 + $0x1820] ss:$16 sps:$4 sm:$0xff]   ;;  %v10371_v58 = vld [vmem:[%s14037_s1 + $0x1828] ss:$16 sps:$4 sm:$0xff]  }
 0x2d0   : > { %7016 = vmatprep.subr.bf16.mxu0 %v10286_v59  ;;  %7704 = vmatprep.subr.bf16.mxu1 %v10289_v60  ;;  %v10376_v59 = vld [vmem:[%s14037_s1 + $0x1844] ss:$16 sps:$4 sm:$0xff]   ;;  %v10379_v60 = vld [vmem:[%s14037_s1 + $0x184c] ss:$16 sps:$4 sm:$0xff]  }
 0x2d3   : > { %7017 = vmatpush1.bf16.msra.mxu0 %v10284_v61  ;;  %7705 = vmatpush1.bf16.msra.mxu1 %v10287_v62  ;;  %v10374_v61 = vld [vmem:[%s14037_s1 + $0x1840] ss:$16 sps:$4 sm:$0xff]   ;;  %v10377_v62 = vld [vmem:[%s14037_s1 + $0x1848] ss:$16 sps:$4 sm:$0xff]  }
 0x2d4   : > { %7018 = vmatprep.subr.bf16.mxu0 %v10292_v63  ;;  %7706 = vmatprep.subr.bf16.mxu1 %v10295_v0  ;;  %v10382_v63 = vld [vmem:[%s14037_s1 + $0x1864] ss:$16 sps:$4 sm:$0xff]   ;;  %v10385_v0 = vld [vmem:[%s14037_s1 + $0x186c] ss:$16 sps:$4 sm:$0xff]  }
 0x2d7   : > { %7019 = vmatpush1.bf16.msra.mxu0 %v10290_v1  ;;  %7707 = vmatpush1.bf16.msra.mxu1 %v10293_v2  ;;  %v10380_v1 = vld [vmem:[%s14037_s1 + $0x1860] ss:$16 sps:$4 sm:$0xff]   ;;  %v10383_v2 = vld [vmem:[%s14037_s1 + $0x1868] ss:$16 sps:$4 sm:$0xff]  }
 0x2d8   : > { %7020 = vmatprep.subr.bf16.mxu0 %v10298_v3  ;;  %7708 = vmatprep.subr.bf16.mxu1 %v10301_v4  ;;  %v10388_v3 = vld [vmem:[%s14037_s1 + $0x1884] ss:$16 sps:$4 sm:$0xff]   ;;  %v10391_v4 = vld [vmem:[%s14037_s1 + $0x188c] ss:$16 sps:$4 sm:$0xff]  }
 0x2db   : > { %7021 = vmatpush1.bf16.msra.mxu0 %v10296_v5  ;;  %7709 = vmatpush1.bf16.msra.mxu1 %v10299_v6  ;;  %v10386_v5 = vld [vmem:[%s14037_s1 + $0x1880] ss:$16 sps:$4 sm:$0xff]   ;;  %v10389_v6 = vld [vmem:[%s14037_s1 + $0x1888] ss:$16 sps:$4 sm:$0xff]  }
 0x2dc   : > { %7022 = vmatprep.subr.bf16.mxu0 %v10304_v7  ;;  %7710 = vmatprep.subr.bf16.mxu1 %v10307_v8  ;;  %v10394_v7 = vld [vmem:[%s14037_s1 + $0x18a4] ss:$16 sps:$4 sm:$0xff]   ;;  %v10397_v8 = vld [vmem:[%s14037_s1 + $0x18ac] ss:$16 sps:$4 sm:$0xff]  }
 0x2df   : > { %7023 = vmatpush1.bf16.msra.mxu0 %v10302_v9  ;;  %7711 = vmatpush1.bf16.msra.mxu1 %v10305_v10  ;;  %v10392_v9 = vld [vmem:[%s14037_s1 + $0x18a0] ss:$16 sps:$4 sm:$0xff]   ;;  %v10395_v10 = vld [vmem:[%s14037_s1 + $0x18a8] ss:$16 sps:$4 sm:$0xff]  }
 0x2e0   : > { %7024 = vmatprep.subr.bf16.mxu0 %v10310_v11  ;;  %7712 = vmatprep.subr.bf16.mxu1 %v10313_v12  ;;  %v10400_v11 = vld [vmem:[%s14037_s1 + $0x18c4] ss:$16 sps:$4 sm:$0xff]   ;;  %v10403_v12 = vld [vmem:[%s14037_s1 + $0x18cc] ss:$16 sps:$4 sm:$0xff]  }
 0x2e3   : > { %7025 = vmatpush1.bf16.msra.mxu0 %v10308_v13  ;;  %7713 = vmatpush1.bf16.msra.mxu1 %v10311_v16  ;;  %v10398_v13 = vld [vmem:[%s14037_s1 + $0x18c0] ss:$16 sps:$4 sm:$0xff]   ;;  %v10401_v16 = vld [vmem:[%s14037_s1 + $0x18c8] ss:$16 sps:$4 sm:$0xff]  }
 0x2e4   : > { %7026 = vmatprep.subr.bf16.mxu0 %v10316_v17  ;;  %7714 = vmatprep.subr.bf16.mxu1 %v10319_v20  ;;  %v10406_v17 = vld [vmem:[%s14037_s1 + $0x18e4] ss:$16 sps:$4 sm:$0xff]   ;;  %v10409_v20 = vld [vmem:[%s14037_s1 + $0x18ec] ss:$16 sps:$4 sm:$0xff]  }
 0x2e7   : > { %7027 = vmatpush1.bf16.msra.mxu0 %v10314_v22  ;;  %7715 = vmatpush1.bf16.msra.mxu1 %v10317_v15  ;;  %v10404_v22 = vld [vmem:[%s14037_s1 + $0x18e0] ss:$16 sps:$4 sm:$0xff]   ;;  %v10407_v15 = vld [vmem:[%s14037_s1 + $0x18e8] ss:$16 sps:$4 sm:$0xff]  }
 0x2e8   : > { %7028 = vmatprep.subr.bf16.mxu0 %v10322_v23  ;;  %7716 = vmatprep.subr.bf16.mxu1 %v10325_v24  ;;  %v10412_v23 = vld [vmem:[%s14037_s1 + $0x1904] ss:$16 sps:$4 sm:$0xff]   ;;  %v10415_v24 = vld [vmem:[%s14037_s1 + $0x190c] ss:$16 sps:$4 sm:$0xff]  }
 0x2eb   : > { %7029 = vmatpush1.bf16.msra.mxu0 %v10320_v25  ;;  %7717 = vmatpush1.bf16.msra.mxu1 %v10323_v26  ;;  %v10410_v25 = vld [vmem:[%s14037_s1 + $0x1900] ss:$16 sps:$4 sm:$0xff]   ;;  %v10413_v26 = vld [vmem:[%s14037_s1 + $0x1908] ss:$16 sps:$4 sm:$0xff]  }
 0x2ec   : > { %7030 = vmatprep.subr.bf16.mxu0 %v10328_v27  ;;  %7718 = vmatprep.subr.bf16.mxu1 %v10331_v28  ;;  %v10418_v27 = vld [vmem:[%s14037_s1 + $0x1924] ss:$16 sps:$4 sm:$0xff]   ;;  %v10421_v28 = vld [vmem:[%s14037_s1 + $0x192c] ss:$16 sps:$4 sm:$0xff]  }
 0x2ef   : > { %7031 = vmatpush1.bf16.msra.mxu0 %v10326_v29  ;;  %7719 = vmatpush1.bf16.msra.mxu1 %v10329_v30  ;;  %v10416_v29 = vld [vmem:[%s14037_s1 + $0x1920] ss:$16 sps:$4 sm:$0xff]   ;;  %v10419_v30 = vld [vmem:[%s14037_s1 + $0x1928] ss:$16 sps:$4 sm:$0xff]  }
 0x2f0   : > { %7032 = vmatprep.subr.bf16.mxu0 %v10334_v31  ;;  %7720 = vmatprep.subr.bf16.mxu1 %v10337_v32  ;;  %v10424_v31 = vld [vmem:[%s14037_s1 + $0x1944] ss:$16 sps:$4 sm:$0xff]   ;;  %v10427_v32 = vld [vmem:[%s14037_s1 + $0x194c] ss:$16 sps:$4 sm:$0xff]  }
 0x2f3   : > { %7033 = vmatpush1.bf16.msra.mxu0 %v10332_v33  ;;  %7721 = vmatpush1.bf16.msra.mxu1 %v10335_v34  ;;  %v10422_v33 = vld [vmem:[%s14037_s1 + $0x1940] ss:$16 sps:$4 sm:$0xff]   ;;  %v10425_v34 = vld [vmem:[%s14037_s1 + $0x1948] ss:$16 sps:$4 sm:$0xff]  }
 0x2f4   : > { %7034 = vmatprep.subr.bf16.mxu0 %v10340_v35  ;;  %7722 = vmatprep.subr.bf16.mxu1 %v10343_v36  ;;  %v10430_v35 = vld [vmem:[%s14037_s1 + $0x1964] ss:$16 sps:$4 sm:$0xff]   ;;  %v10433_v36 = vld [vmem:[%s14037_s1 + $0x196c] ss:$16 sps:$4 sm:$0xff]  }
 0x2f7   : > { %7035 = vmatpush1.bf16.msra.mxu0 %v10338_v37  ;;  %7723 = vmatpush1.bf16.msra.mxu1 %v10341_v38  ;;  %v10428_v37 = vld [vmem:[%s14037_s1 + $0x1960] ss:$16 sps:$4 sm:$0xff]   ;;  %v10431_v38 = vld [vmem:[%s14037_s1 + $0x1968] ss:$16 sps:$4 sm:$0xff]  }
 0x2f8   : > { %7036 = vmatprep.subr.bf16.mxu0 %v10346_v39  ;;  %7724 = vmatprep.subr.bf16.mxu1 %v10349_v40  ;;  %v10436_v39 = vld [vmem:[%s14037_s1 + $0x1984] ss:$16 sps:$4 sm:$0xff]   ;;  %v10439_v40 = vld [vmem:[%s14037_s1 + $0x198c] ss:$16 sps:$4 sm:$0xff]  }
 0x2fb   : > { %7037 = vmatpush1.bf16.msra.mxu0 %v10344_v41  ;;  %7725 = vmatpush1.bf16.msra.mxu1 %v10347_v42  ;;  %v10434_v41 = vld [vmem:[%s14037_s1 + $0x1980] ss:$16 sps:$4 sm:$0xff]   ;;  %v10437_v42 = vld [vmem:[%s14037_s1 + $0x1988] ss:$16 sps:$4 sm:$0xff]  }
 0x2fc   : > { %7038 = vmatprep.subr.bf16.mxu0 %v10352_v43  ;;  %7726 = vmatprep.subr.bf16.mxu1 %v10355_v44  ;;  %v10442_v43 = vld [vmem:[%s14037_s1 + $0x19a4] ss:$16 sps:$4 sm:$0xff]   ;;  %v10445_v44 = vld [vmem:[%s14037_s1 + $0x19ac] ss:$16 sps:$4 sm:$0xff]  }
 0x2ff   : > { %7039 = vmatpush1.bf16.msra.mxu0 %v10350_v21  ;;  %7727 = vmatpush1.bf16.msra.mxu1 %v10353_v46  ;;  %v10440_v21 = vld [vmem:[%s14037_s1 + $0x19a0] ss:$16 sps:$4 sm:$0xff]   ;;  %v10443_v46 = vld [vmem:[%s14037_s1 + $0x19a8] ss:$16 sps:$4 sm:$0xff]  }
 0x300   : > { %7040 = vmatprep.subr.bf16.mxu0 %v10358_v47  ;;  %7728 = vmatprep.subr.bf16.mxu1 %v10361_v18  ;;  %v10448_v47 = vld [vmem:[%s14037_s1 + $0x19c4] ss:$16 sps:$4 sm:$0xff]   ;;  %v10451_v18 = vld [vmem:[%s14037_s1 + $0x19cc] ss:$16 sps:$4 sm:$0xff]  }
 0x303   : > { %7041 = vmatpush1.bf16.msra.mxu0 %v10356_v19  ;;  %7729 = vmatpush1.bf16.msra.mxu1 %v10359_v50  ;;  %v10446_v19 = vld [vmem:[%s14037_s1 + $0x19c0] ss:$16 sps:$4 sm:$0xff]   ;;  %v10449_v50 = vld [vmem:[%s14037_s1 + $0x19c8] ss:$16 sps:$4 sm:$0xff]  }
 0x304   : > { %7053 = vmatprep.subr.bf16.mxu0 %v10364_v51  ;;  %7741 = vmatprep.subr.bf16.mxu1 %v10367_v14  ;;  %v10454_v51 = vld [vmem:[%s14037_s1 + $0x19e4] ss:$16 sps:$4 sm:$0xff]   ;;  %v10457_v14 = vld [vmem:[%s14037_s1 + $0x19ec] ss:$16 sps:$4 sm:$0xff]  }
 0x306   : > { %7043 = vmatmul.mubr.bf16.vlgmr.msra.gmra.mrb[0].mxu0 %v8036_v45  ;;  %7731 = vmatmul.mubr.bf16.vlgmr.msra.gmra.mrb[0].mxu1 %v8036_v45  ;;  %v10452_v45 = vld [vmem:[%s14037_s1 + $0x19e0] ss:$16 sps:$4 sm:$0xff]  }
 0x307   : > { %7054 = vmatpush1.bf16.msra.mxu0 %v10362_v54  ;;  %7742 = vmatpush1.bf16.msra.mxu1 %v10365_v55  ;;  %v10455_v54 = vld [vmem:[%s14037_s1 + $0x19e8] ss:$16 sps:$4 sm:$0xff]   ;;  %v10460_v55 = vld [vmem:[%s14037_s1 + $0x1a04] ss:$16 sps:$4 sm:$0xff]  }
 0x308   : > { %7055 = vmatprep.subr.bf16.mxu0 %v10370_v48  ;;  %7743 = vmatprep.subr.bf16.mxu1 %v10373_v49  ;;  %v10463_v48 = vld [vmem:[%s14037_s1 + $0x1a0c] ss:$16 sps:$4 sm:$0xff]   ;;  %v8038_v49 = vcombine.low %v13215_v52, %v13218_v53  ;;  %v10466_v52 = vld [vmem:[%s14037_s1 + $0x1a24] ss:$16 sps:$4 sm:$0xff]  }
 0x309   : > { %7085 = vmatprep.mubr.bf16.mxu0 %v8039_v56  ;;  %7773 = vmatprep.mubr.bf16.mxu1 %v8039_v56  ;;  %v13417_v56 = vld [vmem:[%s10922_s4 + $0x68] sm:$0xff] }
 0x30a   : > { %v10469_v53 = vld [vmem:[%s14037_s1 + $0x1a2c] ss:$16 sps:$4 sm:$0xff]  }
 0x30b   : > { %7056 = vmatpush1.bf16.msra.mxu0 %v10368_v57  ;;  %7744 = vmatpush1.bf16.msra.mxu1 %v10371_v58  ;;  %v13420_v57 = vld [vmem:[%s10922_s4 + $0xe8] sm:$0xff]  ;;  %v10458_v58 = vld [vmem:[%s14037_s1 + $0x1a00] ss:$16 sps:$4 sm:$0xff]  }
 0x30c   : > { %7057 = vmatprep.subr.bf16.mxu0 %v10376_v59  ;;  %7745 = vmatprep.subr.bf16.mxu1 %v10379_v60  ;;  %v10461_v59 = vld [vmem:[%s14037_s1 + $0x1a08] ss:$16 sps:$4 sm:$0xff]   ;;  %v8041_v60 = vcombine.high %v13417_v56, %v13420_v57 }
 0x30f   : > { %7058 = vmatpush1.bf16.msra.mxu0 %v10374_v61  ;;  %7746 = vmatpush1.bf16.msra.mxu1 %v10377_v62  ;;  %v10464_v61 = vld [vmem:[%s14037_s1 + $0x1a20] ss:$16 sps:$4 sm:$0xff]   ;;  %v10467_v62 = vld [vmem:[%s14037_s1 + $0x1a28] ss:$16 sps:$4 sm:$0xff]  }
 0x310   : > { %7059 = vmatprep.subr.bf16.mxu0 %v10382_v63  ;;  %7747 = vmatprep.subr.bf16.mxu1 %v10385_v0  ;;  %v10472_v63 = vld [vmem:[%s14037_s1 + $0x1a44] ss:$16 sps:$4 sm:$0xff]   ;;  %v10475_v0 = vld [vmem:[%s14037_s1 + $0x1a4c] ss:$16 sps:$4 sm:$0xff]  }
 0x313   : > { %7060 = vmatpush1.bf16.msra.mxu0 %v10380_v1  ;;  %7748 = vmatpush1.bf16.msra.mxu1 %v10383_v2  ;;  %v10470_v1 = vld [vmem:[%s14037_s1 + $0x1a40] ss:$16 sps:$4 sm:$0xff]   ;;  %v10473_v2 = vld [vmem:[%s14037_s1 + $0x1a48] ss:$16 sps:$4 sm:$0xff]  }
 0x314   : > { %7061 = vmatprep.subr.bf16.mxu0 %v10388_v3  ;;  %7749 = vmatprep.subr.bf16.mxu1 %v10391_v4  ;;  %v10478_v3 = vld [vmem:[%s14037_s1 + $0x1a64] ss:$16 sps:$4 sm:$0xff]   ;;  %v10481_v4 = vld [vmem:[%s14037_s1 + $0x1a6c] ss:$16 sps:$4 sm:$0xff]  }
 0x317   : > { %7062 = vmatpush1.bf16.msra.mxu0 %v10386_v5  ;;  %7750 = vmatpush1.bf16.msra.mxu1 %v10389_v6  ;;  %v10476_v5 = vld [vmem:[%s14037_s1 + $0x1a60] ss:$16 sps:$4 sm:$0xff]   ;;  %v10479_v6 = vld [vmem:[%s14037_s1 + $0x1a68] ss:$16 sps:$4 sm:$0xff]  }
 0x318   : > { %7063 = vmatprep.subr.bf16.mxu0 %v10394_v7  ;;  %7751 = vmatprep.subr.bf16.mxu1 %v10397_v8  ;;  %v10484_v7 = vld [vmem:[%s14037_s1 + $0x1a84] ss:$16 sps:$4 sm:$0xff]   ;;  %v10487_v8 = vld [vmem:[%s14037_s1 + $0x1a8c] ss:$16 sps:$4 sm:$0xff]  }
 0x31b   : > { %7064 = vmatpush1.bf16.msra.mxu0 %v10392_v9  ;;  %7752 = vmatpush1.bf16.msra.mxu1 %v10395_v10  ;;  %v10482_v9 = vld [vmem:[%s14037_s1 + $0x1a80] ss:$16 sps:$4 sm:$0xff]   ;;  %v10485_v10 = vld [vmem:[%s14037_s1 + $0x1a88] ss:$16 sps:$4 sm:$0xff]  }
 0x31c   : > { %7065 = vmatprep.subr.bf16.mxu0 %v10400_v11  ;;  %7753 = vmatprep.subr.bf16.mxu1 %v10403_v12  ;;  %v10490_v11 = vld [vmem:[%s14037_s1 + $0x1aa4] ss:$16 sps:$4 sm:$0xff]   ;;  %v10493_v12 = vld [vmem:[%s14037_s1 + $0x1aac] ss:$16 sps:$4 sm:$0xff]  }
 0x31f   : > { %7066 = vmatpush1.bf16.msra.mxu0 %v10398_v13  ;;  %7754 = vmatpush1.bf16.msra.mxu1 %v10401_v16  ;;  %v10488_v13 = vld [vmem:[%s14037_s1 + $0x1aa0] ss:$16 sps:$4 sm:$0xff]   ;;  %v10491_v16 = vld [vmem:[%s14037_s1 + $0x1aa8] ss:$16 sps:$4 sm:$0xff]  }
 0x320   : > { %7067 = vmatprep.subr.bf16.mxu0 %v10406_v17  ;;  %7755 = vmatprep.subr.bf16.mxu1 %v10409_v20  ;;  %v10496_v17 = vld [vmem:[%s14037_s1 + $0x1ac4] ss:$16 sps:$4 sm:$0xff]   ;;  %v10499_v20 = vld [vmem:[%s14037_s1 + $0x1acc] ss:$16 sps:$4 sm:$0xff]  }
 0x323   : > { %7068 = vmatpush1.bf16.msra.mxu0 %v10404_v22  ;;  %7756 = vmatpush1.bf16.msra.mxu1 %v10407_v15  ;;  %v10494_v22 = vld [vmem:[%s14037_s1 + $0x1ac0] ss:$16 sps:$4 sm:$0xff]   ;;  %v10497_v15 = vld [vmem:[%s14037_s1 + $0x1ac8] ss:$16 sps:$4 sm:$0xff]  }
 0x324   : > { %7069 = vmatprep.subr.bf16.mxu0 %v10412_v23  ;;  %7757 = vmatprep.subr.bf16.mxu1 %v10415_v24  ;;  %v10502_v23 = vld [vmem:[%s14037_s1 + $0x1ae4] ss:$16 sps:$4 sm:$0xff]   ;;  %v10505_v24 = vld [vmem:[%s14037_s1 + $0x1aec] ss:$16 sps:$4 sm:$0xff]  }
 0x327   : > { %7070 = vmatpush1.bf16.msra.mxu0 %v10410_v25  ;;  %7758 = vmatpush1.bf16.msra.mxu1 %v10413_v26  ;;  %v10500_v25 = vld [vmem:[%s14037_s1 + $0x1ae0] ss:$16 sps:$4 sm:$0xff]   ;;  %v10503_v26 = vld [vmem:[%s14037_s1 + $0x1ae8] ss:$16 sps:$4 sm:$0xff]  }
 0x328   : > { %7071 = vmatprep.subr.bf16.mxu0 %v10418_v27  ;;  %7759 = vmatprep.subr.bf16.mxu1 %v10421_v28  ;;  %v10508_v27 = vld [vmem:[%s14037_s1 + $0x1b04] ss:$16 sps:$4 sm:$0xff]   ;;  %v10511_v28 = vld [vmem:[%s14037_s1 + $0x1b0c] ss:$16 sps:$4 sm:$0xff]  }
 0x32b   : > { %7072 = vmatpush1.bf16.msra.mxu0 %v10416_v29  ;;  %7760 = vmatpush1.bf16.msra.mxu1 %v10419_v30  ;;  %v10506_v29 = vld [vmem:[%s14037_s1 + $0x1b00] ss:$16 sps:$4 sm:$0xff]   ;;  %v10509_v30 = vld [vmem:[%s14037_s1 + $0x1b08] ss:$16 sps:$4 sm:$0xff]  }
 0x32c   : > { %7073 = vmatprep.subr.bf16.mxu0 %v10424_v31  ;;  %7761 = vmatprep.subr.bf16.mxu1 %v10427_v32  ;;  %v10514_v31 = vld [vmem:[%s14037_s1 + $0x1b24] ss:$16 sps:$4 sm:$0xff]   ;;  %v10517_v32 = vld [vmem:[%s14037_s1 + $0x1b2c] ss:$16 sps:$4 sm:$0xff]  }
 0x32f   : > { %7074 = vmatpush1.bf16.msra.mxu0 %v10422_v33  ;;  %7762 = vmatpush1.bf16.msra.mxu1 %v10425_v34  ;;  %v10512_v33 = vld [vmem:[%s14037_s1 + $0x1b20] ss:$16 sps:$4 sm:$0xff]   ;;  %v10515_v34 = vld [vmem:[%s14037_s1 + $0x1b28] ss:$16 sps:$4 sm:$0xff]  }
 0x330   : > { %7075 = vmatprep.subr.bf16.mxu0 %v10430_v35  ;;  %7763 = vmatprep.subr.bf16.mxu1 %v10433_v36  ;;  %v10520_v35 = vld [vmem:[%s14037_s1 + $0x1b44] ss:$16 sps:$4 sm:$0xff]   ;;  %v10523_v36 = vld [vmem:[%s14037_s1 + $0x1b4c] ss:$16 sps:$4 sm:$0xff]  }
 0x333   : > { %7076 = vmatpush1.bf16.msra.mxu0 %v10428_v37  ;;  %7764 = vmatpush1.bf16.msra.mxu1 %v10431_v38  ;;  %v10518_v37 = vld [vmem:[%s14037_s1 + $0x1b40] ss:$16 sps:$4 sm:$0xff]   ;;  %v10521_v38 = vld [vmem:[%s14037_s1 + $0x1b48] ss:$16 sps:$4 sm:$0xff]  }
 0x334   : > { %7077 = vmatprep.subr.bf16.mxu0 %v10436_v39  ;;  %7765 = vmatprep.subr.bf16.mxu1 %v10439_v40  ;;  %v10526_v39 = vld [vmem:[%s14037_s1 + $0x1b64] ss:$16 sps:$4 sm:$0xff]   ;;  %v10529_v40 = vld [vmem:[%s14037_s1 + $0x1b6c] ss:$16 sps:$4 sm:$0xff]  }
 0x337   : > { %7078 = vmatpush1.bf16.msra.mxu0 %v10434_v41  ;;  %7766 = vmatpush1.bf16.msra.mxu1 %v10437_v42  ;;  %v10524_v41 = vld [vmem:[%s14037_s1 + $0x1b60] ss:$16 sps:$4 sm:$0xff]   ;;  %v10527_v42 = vld [vmem:[%s14037_s1 + $0x1b68] ss:$16 sps:$4 sm:$0xff]  }
 0x338   : > { %7079 = vmatprep.subr.bf16.mxu0 %v10442_v43  ;;  %7767 = vmatprep.subr.bf16.mxu1 %v10445_v44  ;;  %v10532_v43 = vld [vmem:[%s14037_s1 + $0x1b84] ss:$16 sps:$4 sm:$0xff]   ;;  %v10535_v44 = vld [vmem:[%s14037_s1 + $0x1b8c] ss:$16 sps:$4 sm:$0xff]  }
 0x33b   : > { %7080 = vmatpush1.bf16.msra.mxu0 %v10440_v21  ;;  %7768 = vmatpush1.bf16.msra.mxu1 %v10443_v46  ;;  %v10530_v21 = vld [vmem:[%s14037_s1 + $0x1b80] ss:$16 sps:$4 sm:$0xff]   ;;  %v10533_v46 = vld [vmem:[%s14037_s1 + $0x1b88] ss:$16 sps:$4 sm:$0xff]  }
 0x33c   : > { %7081 = vmatprep.subr.bf16.mxu0 %v10448_v47  ;;  %7769 = vmatprep.subr.bf16.mxu1 %v10451_v18  ;;  %v10538_v47 = vld [vmem:[%s14037_s1 + $0x1ba4] ss:$16 sps:$4 sm:$0xff]   ;;  %v10541_v18 = vld [vmem:[%s14037_s1 + $0x1bac] ss:$16 sps:$4 sm:$0xff]  }
 0x33f   : > { %7082 = vmatpush1.bf16.msra.mxu0 %v10446_v19  ;;  %7770 = vmatpush1.bf16.msra.mxu1 %v10449_v50  ;;  %v10536_v19 = vld [vmem:[%s14037_s1 + $0x1ba0] ss:$16 sps:$4 sm:$0xff]   ;;  %v10539_v50 = vld [vmem:[%s14037_s1 + $0x1ba8] ss:$16 sps:$4 sm:$0xff]  }
 0x340   : > { %7083 = vmatprep.subr.bf16.mxu0 %v10454_v51  ;;  %7771 = vmatprep.subr.bf16.mxu1 %v10457_v14  ;;  %v10544_v51 = vld [vmem:[%s14037_s1 + $0x1bc4] ss:$16 sps:$4 sm:$0xff]   ;;  %v10547_v14 = vld [vmem:[%s14037_s1 + $0x1bcc] ss:$16 sps:$4 sm:$0xff]  }
 0x343   : > { %7084 = vmatpush1.bf16.msra.mxu0 %v10452_v45  ;;  %7772 = vmatpush1.bf16.msra.mxu1 %v10455_v54  ;;  %v10542_v45 = vld [vmem:[%s14037_s1 + $0x1bc0] ss:$16 sps:$4 sm:$0xff]   ;;  %v10545_v54 = vld [vmem:[%s14037_s1 + $0x1bc8] ss:$16 sps:$4 sm:$0xff]  }
 0x344   : > { %7096 = vmatprep.subr.bf16.mxu0 %v10460_v55  ;;  %7784 = vmatprep.subr.bf16.mxu1 %v10463_v48  ;;  %v10550_v55 = vld [vmem:[%s14037_s1 + $0x1be4] ss:$16 sps:$4 sm:$0xff]   ;;  %v10553_v48 = vld [vmem:[%s14037_s1 + $0x1bec] ss:$16 sps:$4 sm:$0xff]  }
 0x346   : > { %7086 = vmatmul.mubr.bf16.vlgmr.msra.gmra.mrb[0].mxu0 %v8038_v49  ;;  %7774 = vmatmul.mubr.bf16.vlgmr.msra.gmra.mrb[0].mxu1 %v8038_v49  ;;  %v10548_v49 = vld [vmem:[%s14037_s1 + $0x1be0] ss:$16 sps:$4 sm:$0xff]  }
 0x347   : > { %7097 = vmatpush1.bf16.msra.mxu0 %v10458_v58  ;;  %7785 = vmatpush1.bf16.msra.mxu1 %v10461_v59  ;;  %v10551_v58 = vld [vmem:[%s14037_s1 + $0x1be8] ss:$16 sps:$4 sm:$0xff]   ;;  %v10556_v59 = vld [vmem:[%s14037_s1 + $0x1c04] ss:$16 sps:$4 sm:$0xff]  }
 0x348   : > { %7098 = vmatprep.subr.bf16.mxu0 %v10466_v52  ;;  %7786 = vmatprep.subr.bf16.mxu1 %v10469_v53  ;;  %v10559_v52 = vld [vmem:[%s14037_s1 + $0x1c0c] ss:$16 sps:$4 sm:$0xff]   ;;  %v8040_v53 = vcombine.low %v13417_v56, %v13420_v57  ;;  %v10562_v56 = vld [vmem:[%s14037_s1 + $0x1c24] ss:$16 sps:$4 sm:$0xff]  }
 0x349   : > { %7128 = vmatprep.mubr.bf16.mxu0 %v8041_v60  ;;  %7816 = vmatprep.mubr.bf16.mxu1 %v8041_v60  ;;  %v13619_v60 = vld [vmem:[%s10922_s4 + $0x70] sm:$0xff]  ;;  %v10565_v57 = vld [vmem:[%s14037_s1 + $0x1c2c] ss:$16 sps:$4 sm:$0xff]  }
 0x34b   : > { %7099 = vmatpush1.bf16.msra.mxu0 %v10464_v61  ;;  %7787 = vmatpush1.bf16.msra.mxu1 %v10467_v62  ;;  %v13622_v61 = vld [vmem:[%s10922_s4 + $0xf0] sm:$0xff] }
 0x34c   : > { %7100 = vmatprep.subr.bf16.mxu0 %v10472_v63  ;;  %7788 = vmatprep.subr.bf16.mxu1 %v10475_v0  ;;  %v10554_v62 = vld [vmem:[%s14037_s1 + $0x1c00] ss:$16 sps:$4 sm:$0xff]   ;;  %v10557_v63 = vld [vmem:[%s14037_s1 + $0x1c08] ss:$16 sps:$4 sm:$0xff]   ;;  %v8043_v0 = vcombine.high %v13619_v60, %v13622_v61 }
 0x34f   : > { %7101 = vmatpush1.bf16.msra.mxu0 %v10470_v1  ;;  %7789 = vmatpush1.bf16.msra.mxu1 %v10473_v2  ;;  %v10560_v1 = vld [vmem:[%s14037_s1 + $0x1c20] ss:$16 sps:$4 sm:$0xff]   ;;  %v10563_v2 = vld [vmem:[%s14037_s1 + $0x1c28] ss:$16 sps:$4 sm:$0xff]  }
 0x350   : > { %7102 = vmatprep.subr.bf16.mxu0 %v10478_v3  ;;  %7790 = vmatprep.subr.bf16.mxu1 %v10481_v4  ;;  %v10568_v3 = vld [vmem:[%s14037_s1 + $0x1c44] ss:$16 sps:$4 sm:$0xff]   ;;  %v10571_v4 = vld [vmem:[%s14037_s1 + $0x1c4c] ss:$16 sps:$4 sm:$0xff]  }
 0x353   : > { %7103 = vmatpush1.bf16.msra.mxu0 %v10476_v5  ;;  %7791 = vmatpush1.bf16.msra.mxu1 %v10479_v6  ;;  %v10566_v5 = vld [vmem:[%s14037_s1 + $0x1c40] ss:$16 sps:$4 sm:$0xff]   ;;  %v10569_v6 = vld [vmem:[%s14037_s1 + $0x1c48] ss:$16 sps:$4 sm:$0xff]  }
 0x354   : > { %7104 = vmatprep.subr.bf16.mxu0 %v10484_v7  ;;  %7792 = vmatprep.subr.bf16.mxu1 %v10487_v8  ;;  %v10574_v7 = vld [vmem:[%s14037_s1 + $0x1c64] ss:$16 sps:$4 sm:$0xff]   ;;  %v10577_v8 = vld [vmem:[%s14037_s1 + $0x1c6c] ss:$16 sps:$4 sm:$0xff]  }
 0x357   : > { %7105 = vmatpush1.bf16.msra.mxu0 %v10482_v9  ;;  %7793 = vmatpush1.bf16.msra.mxu1 %v10485_v10  ;;  %v10572_v9 = vld [vmem:[%s14037_s1 + $0x1c60] ss:$16 sps:$4 sm:$0xff]   ;;  %v10575_v10 = vld [vmem:[%s14037_s1 + $0x1c68] ss:$16 sps:$4 sm:$0xff]  }
 0x358   : > { %7106 = vmatprep.subr.bf16.mxu0 %v10490_v11  ;;  %7794 = vmatprep.subr.bf16.mxu1 %v10493_v12  ;;  %v10580_v11 = vld [vmem:[%s14037_s1 + $0x1c84] ss:$16 sps:$4 sm:$0xff]   ;;  %v10583_v12 = vld [vmem:[%s14037_s1 + $0x1c8c] ss:$16 sps:$4 sm:$0xff]  }
 0x35b   : > { %7107 = vmatpush1.bf16.msra.mxu0 %v10488_v13  ;;  %7795 = vmatpush1.bf16.msra.mxu1 %v10491_v16  ;;  %v10578_v13 = vld [vmem:[%s14037_s1 + $0x1c80] ss:$16 sps:$4 sm:$0xff]   ;;  %v10581_v16 = vld [vmem:[%s14037_s1 + $0x1c88] ss:$16 sps:$4 sm:$0xff]  }
 0x35c   : > { %7108 = vmatprep.subr.bf16.mxu0 %v10496_v17  ;;  %7796 = vmatprep.subr.bf16.mxu1 %v10499_v20  ;;  %v10586_v17 = vld [vmem:[%s14037_s1 + $0x1ca4] ss:$16 sps:$4 sm:$0xff]   ;;  %v10589_v20 = vld [vmem:[%s14037_s1 + $0x1cac] ss:$16 sps:$4 sm:$0xff]  }
 0x35f   : > { %7109 = vmatpush1.bf16.msra.mxu0 %v10494_v22  ;;  %7797 = vmatpush1.bf16.msra.mxu1 %v10497_v15  ;;  %v10584_v22 = vld [vmem:[%s14037_s1 + $0x1ca0] ss:$16 sps:$4 sm:$0xff]   ;;  %v10587_v15 = vld [vmem:[%s14037_s1 + $0x1ca8] ss:$16 sps:$4 sm:$0xff]  }
 0x360   : > { %7110 = vmatprep.subr.bf16.mxu0 %v10502_v23  ;;  %7798 = vmatprep.subr.bf16.mxu1 %v10505_v24  ;;  %v10592_v23 = vld [vmem:[%s14037_s1 + $0x1cc4] ss:$16 sps:$4 sm:$0xff]   ;;  %v10595_v24 = vld [vmem:[%s14037_s1 + $0x1ccc] ss:$16 sps:$4 sm:$0xff]  }
 0x363   : > { %7111 = vmatpush1.bf16.msra.mxu0 %v10500_v25  ;;  %7799 = vmatpush1.bf16.msra.mxu1 %v10503_v26  ;;  %v10590_v25 = vld [vmem:[%s14037_s1 + $0x1cc0] ss:$16 sps:$4 sm:$0xff]   ;;  %v10593_v26 = vld [vmem:[%s14037_s1 + $0x1cc8] ss:$16 sps:$4 sm:$0xff]  }
 0x364   : > { %7112 = vmatprep.subr.bf16.mxu0 %v10508_v27  ;;  %7800 = vmatprep.subr.bf16.mxu1 %v10511_v28  ;;  %v10598_v27 = vld [vmem:[%s14037_s1 + $0x1ce4] ss:$16 sps:$4 sm:$0xff]   ;;  %v10601_v28 = vld [vmem:[%s14037_s1 + $0x1cec] ss:$16 sps:$4 sm:$0xff]  }
 0x367   : > { %7113 = vmatpush1.bf16.msra.mxu0 %v10506_v29  ;;  %7801 = vmatpush1.bf16.msra.mxu1 %v10509_v30  ;;  %v10596_v29 = vld [vmem:[%s14037_s1 + $0x1ce0] ss:$16 sps:$4 sm:$0xff]   ;;  %v10599_v30 = vld [vmem:[%s14037_s1 + $0x1ce8] ss:$16 sps:$4 sm:$0xff]  }
 0x368   : > { %7114 = vmatprep.subr.bf16.mxu0 %v10514_v31  ;;  %7802 = vmatprep.subr.bf16.mxu1 %v10517_v32  ;;  %v10604_v31 = vld [vmem:[%s14037_s1 + $0x1d04] ss:$16 sps:$4 sm:$0xff]   ;;  %v10607_v32 = vld [vmem:[%s14037_s1 + $0x1d0c] ss:$16 sps:$4 sm:$0xff]  }
 0x36b   : > { %7115 = vmatpush1.bf16.msra.mxu0 %v10512_v33  ;;  %7803 = vmatpush1.bf16.msra.mxu1 %v10515_v34  ;;  %v10602_v33 = vld [vmem:[%s14037_s1 + $0x1d00] ss:$16 sps:$4 sm:$0xff]   ;;  %v10605_v34 = vld [vmem:[%s14037_s1 + $0x1d08] ss:$16 sps:$4 sm:$0xff]  }
 0x36c   : > { %7116 = vmatprep.subr.bf16.mxu0 %v10520_v35  ;;  %7804 = vmatprep.subr.bf16.mxu1 %v10523_v36  ;;  %v10610_v35 = vld [vmem:[%s14037_s1 + $0x1d24] ss:$16 sps:$4 sm:$0xff]   ;;  %v10613_v36 = vld [vmem:[%s14037_s1 + $0x1d2c] ss:$16 sps:$4 sm:$0xff]  }
 0x36f   : > { %7117 = vmatpush1.bf16.msra.mxu0 %v10518_v37  ;;  %7805 = vmatpush1.bf16.msra.mxu1 %v10521_v38  ;;  %v10608_v37 = vld [vmem:[%s14037_s1 + $0x1d20] ss:$16 sps:$4 sm:$0xff]   ;;  %v10611_v38 = vld [vmem:[%s14037_s1 + $0x1d28] ss:$16 sps:$4 sm:$0xff]  }
 0x370   : > { %7118 = vmatprep.subr.bf16.mxu0 %v10526_v39  ;;  %7806 = vmatprep.subr.bf16.mxu1 %v10529_v40  ;;  %v10616_v39 = vld [vmem:[%s14037_s1 + $0x1d44] ss:$16 sps:$4 sm:$0xff]   ;;  %v10619_v40 = vld [vmem:[%s14037_s1 + $0x1d4c] ss:$16 sps:$4 sm:$0xff]  }
 0x373   : > { %7119 = vmatpush1.bf16.msra.mxu0 %v10524_v41  ;;  %7807 = vmatpush1.bf16.msra.mxu1 %v10527_v42  ;;  %v10614_v41 = vld [vmem:[%s14037_s1 + $0x1d40] ss:$16 sps:$4 sm:$0xff]   ;;  %v10617_v42 = vld [vmem:[%s14037_s1 + $0x1d48] ss:$16 sps:$4 sm:$0xff]  }
 0x374   : > { %7120 = vmatprep.subr.bf16.mxu0 %v10532_v43  ;;  %7808 = vmatprep.subr.bf16.mxu1 %v10535_v44  ;;  %v10622_v43 = vld [vmem:[%s14037_s1 + $0x1d64] ss:$16 sps:$4 sm:$0xff]   ;;  %v10625_v44 = vld [vmem:[%s14037_s1 + $0x1d6c] ss:$16 sps:$4 sm:$0xff]  }
 0x377   : > { %7121 = vmatpush1.bf16.msra.mxu0 %v10530_v21  ;;  %7809 = vmatpush1.bf16.msra.mxu1 %v10533_v46  ;;  %v10620_v21 = vld [vmem:[%s14037_s1 + $0x1d60] ss:$16 sps:$4 sm:$0xff]   ;;  %v10623_v46 = vld [vmem:[%s14037_s1 + $0x1d68] ss:$16 sps:$4 sm:$0xff]  }
 0x378   : > { %7122 = vmatprep.subr.bf16.mxu0 %v10538_v47  ;;  %7810 = vmatprep.subr.bf16.mxu1 %v10541_v18  ;;  %v10628_v47 = vld [vmem:[%s14037_s1 + $0x1d84] ss:$16 sps:$4 sm:$0xff]   ;;  %v10631_v18 = vld [vmem:[%s14037_s1 + $0x1d8c] ss:$16 sps:$4 sm:$0xff]  }
 0x37b   : > { %7123 = vmatpush1.bf16.msra.mxu0 %v10536_v19  ;;  %7811 = vmatpush1.bf16.msra.mxu1 %v10539_v50  ;;  %v10626_v19 = vld [vmem:[%s14037_s1 + $0x1d80] ss:$16 sps:$4 sm:$0xff]   ;;  %v10629_v50 = vld [vmem:[%s14037_s1 + $0x1d88] ss:$16 sps:$4 sm:$0xff]  }
 0x37c   : > { %7124 = vmatprep.subr.bf16.mxu0 %v10544_v51  ;;  %7812 = vmatprep.subr.bf16.mxu1 %v10547_v14  ;;  %v10634_v51 = vld [vmem:[%s14037_s1 + $0x1da4] ss:$16 sps:$4 sm:$0xff]   ;;  %v10637_v14 = vld [vmem:[%s14037_s1 + $0x1dac] ss:$16 sps:$4 sm:$0xff]  }
 0x37f   : > { %7125 = vmatpush1.bf16.msra.mxu0 %v10542_v45  ;;  %7813 = vmatpush1.bf16.msra.mxu1 %v10545_v54  ;;  %v10632_v45 = vld [vmem:[%s14037_s1 + $0x1da0] ss:$16 sps:$4 sm:$0xff]   ;;  %v10635_v54 = vld [vmem:[%s14037_s1 + $0x1da8] ss:$16 sps:$4 sm:$0xff]  }
 0x380   : > { %7126 = vmatprep.subr.bf16.mxu0 %v10550_v55  ;;  %7814 = vmatprep.subr.bf16.mxu1 %v10553_v48  ;;  %v10640_v55 = vld [vmem:[%s14037_s1 + $0x1dc4] ss:$16 sps:$4 sm:$0xff]   ;;  %v10643_v48 = vld [vmem:[%s14037_s1 + $0x1dcc] ss:$16 sps:$4 sm:$0xff]  }
 0x383   : > { %7127 = vmatpush1.bf16.msra.mxu0 %v10548_v49  ;;  %7815 = vmatpush1.bf16.msra.mxu1 %v10551_v58  ;;  %v10638_v49 = vld [vmem:[%s14037_s1 + $0x1dc0] ss:$16 sps:$4 sm:$0xff]   ;;  %v10641_v58 = vld [vmem:[%s14037_s1 + $0x1dc8] ss:$16 sps:$4 sm:$0xff]  }
 0x384   : > { %7139 = vmatprep.subr.bf16.mxu0 %v10556_v59  ;;  %7827 = vmatprep.subr.bf16.mxu1 %v10559_v52  ;;  %v10646_v59 = vld [vmem:[%s14037_s1 + $0x1de4] ss:$16 sps:$4 sm:$0xff]   ;;  %v10649_v52 = vld [vmem:[%s14037_s1 + $0x1dec] ss:$16 sps:$4 sm:$0xff]  }
 0x386   : > { %7129 = vmatmul.mubr.bf16.vlgmr.msra.gmra.mrb[0].mxu0 %v8040_v53  ;;  %7817 = vmatmul.mubr.bf16.vlgmr.msra.gmra.mrb[0].mxu1 %v8040_v53  ;;  %v10644_v53 = vld [vmem:[%s14037_s1 + $0x1de0] ss:$16 sps:$4 sm:$0xff]  }
 0x387   : > { %7140 = vmatpush1.bf16.msra.mxu0 %v10554_v62  ;;  %7828 = vmatpush1.bf16.msra.mxu1 %v10557_v63  ;;  %v10647_v62 = vld [vmem:[%s14037_s1 + $0x1de8] ss:$16 sps:$4 sm:$0xff]   ;;  %v10652_v63 = vld [vmem:[%s14037_s1 + $0x1e04] ss:$16 sps:$4 sm:$0xff]  }
 0x388   : > { %7141 = vmatprep.subr.bf16.mxu0 %v10562_v56  ;;  %7829 = vmatprep.subr.bf16.mxu1 %v10565_v57  ;;  %v10655_v56 = vld [vmem:[%s14037_s1 + $0x1e0c] ss:$16 sps:$4 sm:$0xff]   ;;  %v8042_v57 = vcombine.low %v13619_v60, %v13622_v61  ;;  %v10658_v60 = vld [vmem:[%s14037_s1 + $0x1e24] ss:$16 sps:$4 sm:$0xff]  }
 0x389   : > { %7171 = vmatprep.mubr.bf16.mxu0 %v8043_v0  ;;  %7859 = vmatprep.mubr.bf16.mxu1 %v8043_v0  ;;  %v13821_v0 = vld [vmem:[%s10922_s4 + $0x78] sm:$0xff] }
 0x38a   : > { %v10661_v61 = vld [vmem:[%s14037_s1 + $0x1e2c] ss:$16 sps:$4 sm:$0xff]  }
 0x38b   : > { %7142 = vmatpush1.bf16.msra.mxu0 %v10560_v1  ;;  %7830 = vmatpush1.bf16.msra.mxu1 %v10563_v2  ;;  %v13824_v1 = vld [vmem:[%s10922_s4 + $0xf8] sm:$0xff]  ;;  %v10650_v2 = vld [vmem:[%s14037_s1 + $0x1e00] ss:$16 sps:$4 sm:$0xff]  }
 0x38c   : > { %7143 = vmatprep.subr.bf16.mxu0 %v10568_v3  ;;  %7831 = vmatprep.subr.bf16.mxu1 %v10571_v4  ;;  %v10653_v3 = vld [vmem:[%s14037_s1 + $0x1e08] ss:$16 sps:$4 sm:$0xff]   ;;  %v8045_v4 = vcombine.high %v13821_v0, %v13824_v1 }
 0x38f   : > { %7144 = vmatpush1.bf16.msra.mxu0 %v10566_v5  ;;  %7832 = vmatpush1.bf16.msra.mxu1 %v10569_v6  ;;  %v10656_v5 = vld [vmem:[%s14037_s1 + $0x1e20] ss:$16 sps:$4 sm:$0xff]   ;;  %v10659_v6 = vld [vmem:[%s14037_s1 + $0x1e28] ss:$16 sps:$4 sm:$0xff]  }
 0x390   : > { %7145 = vmatprep.subr.bf16.mxu0 %v10574_v7  ;;  %7833 = vmatprep.subr.bf16.mxu1 %v10577_v8  ;;  %v10664_v7 = vld [vmem:[%s14037_s1 + $0x1e44] ss:$16 sps:$4 sm:$0xff]   ;;  %v10667_v8 = vld [vmem:[%s14037_s1 + $0x1e4c] ss:$16 sps:$4 sm:$0xff]  }
 0x393   : > { %7146 = vmatpush1.bf16.msra.mxu0 %v10572_v9  ;;  %7834 = vmatpush1.bf16.msra.mxu1 %v10575_v10  ;;  %v10662_v9 = vld [vmem:[%s14037_s1 + $0x1e40] ss:$16 sps:$4 sm:$0xff]   ;;  %v10665_v10 = vld [vmem:[%s14037_s1 + $0x1e48] ss:$16 sps:$4 sm:$0xff]  }
 0x394   : > { %7147 = vmatprep.subr.bf16.mxu0 %v10580_v11  ;;  %7835 = vmatprep.subr.bf16.mxu1 %v10583_v12  ;;  %v10670_v11 = vld [vmem:[%s14037_s1 + $0x1e64] ss:$16 sps:$4 sm:$0xff]   ;;  %v10673_v12 = vld [vmem:[%s14037_s1 + $0x1e6c] ss:$16 sps:$4 sm:$0xff]  }
 0x397   : > { %7148 = vmatpush1.bf16.msra.mxu0 %v10578_v13  ;;  %7836 = vmatpush1.bf16.msra.mxu1 %v10581_v16  ;;  %v10668_v13 = vld [vmem:[%s14037_s1 + $0x1e60] ss:$16 sps:$4 sm:$0xff]   ;;  %v10671_v16 = vld [vmem:[%s14037_s1 + $0x1e68] ss:$16 sps:$4 sm:$0xff]  }
 0x398   : > { %7149 = vmatprep.subr.bf16.mxu0 %v10586_v17  ;;  %7837 = vmatprep.subr.bf16.mxu1 %v10589_v20  ;;  %v10676_v17 = vld [vmem:[%s14037_s1 + $0x1e84] ss:$16 sps:$4 sm:$0xff]   ;;  %v10679_v20 = vld [vmem:[%s14037_s1 + $0x1e8c] ss:$16 sps:$4 sm:$0xff]  }
 0x39b   : > { %7150 = vmatpush1.bf16.msra.mxu0 %v10584_v22  ;;  %7838 = vmatpush1.bf16.msra.mxu1 %v10587_v15  ;;  %v10674_v22 = vld [vmem:[%s14037_s1 + $0x1e80] ss:$16 sps:$4 sm:$0xff]   ;;  %v10677_v15 = vld [vmem:[%s14037_s1 + $0x1e88] ss:$16 sps:$4 sm:$0xff]  }
 0x39c   : > { %7151 = vmatprep.subr.bf16.mxu0 %v10592_v23  ;;  %7839 = vmatprep.subr.bf16.mxu1 %v10595_v24  ;;  %v10682_v23 = vld [vmem:[%s14037_s1 + $0x1ea4] ss:$16 sps:$4 sm:$0xff]   ;;  %v10685_v24 = vld [vmem:[%s14037_s1 + $0x1eac] ss:$16 sps:$4 sm:$0xff]  }
 0x39f   : > { %7152 = vmatpush1.bf16.msra.mxu0 %v10590_v25  ;;  %7840 = vmatpush1.bf16.msra.mxu1 %v10593_v26  ;;  %v10680_v25 = vld [vmem:[%s14037_s1 + $0x1ea0] ss:$16 sps:$4 sm:$0xff]   ;;  %v10683_v26 = vld [vmem:[%s14037_s1 + $0x1ea8] ss:$16 sps:$4 sm:$0xff]  }
 0x3a0   : > { %7153 = vmatprep.subr.bf16.mxu0 %v10598_v27  ;;  %7841 = vmatprep.subr.bf16.mxu1 %v10601_v28  ;;  %v10688_v27 = vld [vmem:[%s14037_s1 + $0x1ec4] ss:$16 sps:$4 sm:$0xff]   ;;  %v10691_v28 = vld [vmem:[%s14037_s1 + $0x1ecc] ss:$16 sps:$4 sm:$0xff]  }
 0x3a3   : > { %7154 = vmatpush1.bf16.msra.mxu0 %v10596_v29  ;;  %7842 = vmatpush1.bf16.msra.mxu1 %v10599_v30  ;;  %v10686_v29 = vld [vmem:[%s14037_s1 + $0x1ec0] ss:$16 sps:$4 sm:$0xff]   ;;  %v10689_v30 = vld [vmem:[%s14037_s1 + $0x1ec8] ss:$16 sps:$4 sm:$0xff]  }
 0x3a4   : > { %7155 = vmatprep.subr.bf16.mxu0 %v10604_v31  ;;  %7843 = vmatprep.subr.bf16.mxu1 %v10607_v32  ;;  %v10694_v31 = vld [vmem:[%s14037_s1 + $0x1ee4] ss:$16 sps:$4 sm:$0xff]   ;;  %v10697_v32 = vld [vmem:[%s14037_s1 + $0x1eec] ss:$16 sps:$4 sm:$0xff]  }
 0x3a7   : > { %7156 = vmatpush1.bf16.msra.mxu0 %v10602_v33  ;;  %7844 = vmatpush1.bf16.msra.mxu1 %v10605_v34  ;;  %v10692_v33 = vld [vmem:[%s14037_s1 + $0x1ee0] ss:$16 sps:$4 sm:$0xff]   ;;  %v10695_v34 = vld [vmem:[%s14037_s1 + $0x1ee8] ss:$16 sps:$4 sm:$0xff]  }
 0x3a8   : > { %7157 = vmatprep.subr.bf16.mxu0 %v10610_v35  ;;  %7845 = vmatprep.subr.bf16.mxu1 %v10613_v36  ;;  %v10700_v35 = vld [vmem:[%s14037_s1 + $0x1f04] ss:$16 sps:$4 sm:$0xff]   ;;  %v10703_v36 = vld [vmem:[%s14037_s1 + $0x1f0c] ss:$16 sps:$4 sm:$0xff]  }
 0x3ab   : > { %7158 = vmatpush1.bf16.msra.mxu0 %v10608_v37  ;;  %7846 = vmatpush1.bf16.msra.mxu1 %v10611_v38  ;;  %v10698_v37 = vld [vmem:[%s14037_s1 + $0x1f00] ss:$16 sps:$4 sm:$0xff]   ;;  %v10701_v38 = vld [vmem:[%s14037_s1 + $0x1f08] ss:$16 sps:$4 sm:$0xff]  }
 0x3ac   : > { %7159 = vmatprep.subr.bf16.mxu0 %v10616_v39  ;;  %7847 = vmatprep.subr.bf16.mxu1 %v10619_v40  ;;  %v10706_v39 = vld [vmem:[%s14037_s1 + $0x1f24] ss:$16 sps:$4 sm:$0xff]   ;;  %v10709_v40 = vld [vmem:[%s14037_s1 + $0x1f2c] ss:$16 sps:$4 sm:$0xff]  }
 0x3af   : > { %7160 = vmatpush1.bf16.msra.mxu0 %v10614_v41  ;;  %7848 = vmatpush1.bf16.msra.mxu1 %v10617_v42  ;;  %v10704_v41 = vld [vmem:[%s14037_s1 + $0x1f20] ss:$16 sps:$4 sm:$0xff]   ;;  %v10707_v42 = vld [vmem:[%s14037_s1 + $0x1f28] ss:$16 sps:$4 sm:$0xff]  }
 0x3b0   : > { %7161 = vmatprep.subr.bf16.mxu0 %v10622_v43  ;;  %7849 = vmatprep.subr.bf16.mxu1 %v10625_v44  ;;  %v10712_v43 = vld [vmem:[%s14037_s1 + $0x1f44] ss:$16 sps:$4 sm:$0xff]   ;;  %v10715_v44 = vld [vmem:[%s14037_s1 + $0x1f4c] ss:$16 sps:$4 sm:$0xff]  }
 0x3b3   : > { %7162 = vmatpush1.bf16.msra.mxu0 %v10620_v21  ;;  %7850 = vmatpush1.bf16.msra.mxu1 %v10623_v46  ;;  %v10710_v21 = vld [vmem:[%s14037_s1 + $0x1f40] ss:$16 sps:$4 sm:$0xff]   ;;  %v10713_v46 = vld [vmem:[%s14037_s1 + $0x1f48] ss:$16 sps:$4 sm:$0xff]  }
 0x3b4   : > { %7163 = vmatprep.subr.bf16.mxu0 %v10628_v47  ;;  %7851 = vmatprep.subr.bf16.mxu1 %v10631_v18  ;;  %v10718_v47 = vld [vmem:[%s14037_s1 + $0x1f64] ss:$16 sps:$4 sm:$0xff]   ;;  %v10721_v18 = vld [vmem:[%s14037_s1 + $0x1f6c] ss:$16 sps:$4 sm:$0xff]  }
 0x3b7   : > { %7164 = vmatpush1.bf16.msra.mxu0 %v10626_v19  ;;  %7852 = vmatpush1.bf16.msra.mxu1 %v10629_v50  ;;  %v10716_v19 = vld [vmem:[%s14037_s1 + $0x1f60] ss:$16 sps:$4 sm:$0xff]   ;;  %v10719_v50 = vld [vmem:[%s14037_s1 + $0x1f68] ss:$16 sps:$4 sm:$0xff]  }
 0x3b8   : > { %7165 = vmatprep.subr.bf16.mxu0 %v10634_v51  ;;  %7853 = vmatprep.subr.bf16.mxu1 %v10637_v14  ;;  %v10724_v51 = vld [vmem:[%s14037_s1 + $0x1f84] ss:$16 sps:$4 sm:$0xff]   ;;  %v10727_v14 = vld [vmem:[%s14037_s1 + $0x1f8c] ss:$16 sps:$4 sm:$0xff]  }
 0x3bb   : > { %7166 = vmatpush1.bf16.msra.mxu0 %v10632_v45  ;;  %7854 = vmatpush1.bf16.msra.mxu1 %v10635_v54  ;;  %v10722_v45 = vld [vmem:[%s14037_s1 + $0x1f80] ss:$16 sps:$4 sm:$0xff]   ;;  %v10725_v54 = vld [vmem:[%s14037_s1 + $0x1f88] ss:$16 sps:$4 sm:$0xff]  }
 0x3bc   : > { %7167 = vmatprep.subr.bf16.mxu0 %v10640_v55  ;;  %7855 = vmatprep.subr.bf16.mxu1 %v10643_v48  ;;  %v10730_v55 = vld [vmem:[%s14037_s1 + $0x1fa4] ss:$16 sps:$4 sm:$0xff]   ;;  %v10733_v48 = vld [vmem:[%s14037_s1 + $0x1fac] ss:$16 sps:$4 sm:$0xff]  }
 0x3bf   : > { %7168 = vmatpush1.bf16.msra.mxu0 %v10638_v49  ;;  %7856 = vmatpush1.bf16.msra.mxu1 %v10641_v58  ;;  %v10728_v49 = vld [vmem:[%s14037_s1 + $0x1fa0] ss:$16 sps:$4 sm:$0xff]   ;;  %v10731_v58 = vld [vmem:[%s14037_s1 + $0x1fa8] ss:$16 sps:$4 sm:$0xff]  }
 0x3c0   : > { %7169 = vmatprep.subr.bf16.mxu0 %v10646_v59  ;;  %7857 = vmatprep.subr.bf16.mxu1 %v10649_v52  ;;  %v10736_v59 = vld [vmem:[%s14037_s1 + $0x1fc4] ss:$16 sps:$4 sm:$0xff]   ;;  %v10739_v52 = vld [vmem:[%s14037_s1 + $0x1fcc] ss:$16 sps:$4 sm:$0xff]  }
 0x3c3   : > { %7170 = vmatpush1.bf16.msra.mxu0 %v10644_v53  ;;  %7858 = vmatpush1.bf16.msra.mxu1 %v10647_v62  ;;  %v10734_v53 = vld [vmem:[%s14037_s1 + $0x1fc0] ss:$16 sps:$4 sm:$0xff]   ;;  %v10737_v62 = vld [vmem:[%s14037_s1 + $0x1fc8] ss:$16 sps:$4 sm:$0xff]  }
 0x3c4   : > { %7182 = vmatprep.subr.bf16.mxu0 %v10652_v63  ;;  %7870 = vmatprep.subr.bf16.mxu1 %v10655_v56  ;;  %v10742_v63 = vld [vmem:[%s14037_s1 + $0x1fe4] ss:$16 sps:$4 sm:$0xff]   ;;  %v10745_v56 = vld [vmem:[%s14037_s1 + $0x1fec] ss:$16 sps:$4 sm:$0xff]  }
 0x3c6   : > { %7172 = vmatmul.mubr.bf16.vlgmr.msra.gmra.mrb[0].mxu0 %v8042_v57  ;;  %7860 = vmatmul.mubr.bf16.vlgmr.msra.gmra.mrb[0].mxu1 %v8042_v57  ;;  %v10740_v57 = vld [vmem:[%s14037_s1 + $0x1fe0] ss:$16 sps:$4 sm:$0xff]  }
 0x3c7   : > { %7183 = vmatpush1.bf16.msra.mxu0 %v10650_v2  ;;  %7871 = vmatpush1.bf16.msra.mxu1 %v10653_v3  ;;  %v10743_v2 = vld [vmem:[%s14037_s1 + $0x1fe8] ss:$16 sps:$4 sm:$0xff]   ;;  %v8044_v3 = vcombine.low %v13821_v0, %v13824_v1 }
 0x3c8   : > { %7184 = vmatprep.subr.bf16.mxu0 %v10658_v60  ;;  %7872 = vmatprep.subr.bf16.mxu1 %v10661_v61  ;;  %v1237_v60 = vlaneseq }
 0x3c9   : > { %7214 = vmatprep.mubr.bf16.mxu0 %v8045_v4  ;;  %7902 = vmatprep.mubr.bf16.mxu1 %v8045_v4 }
 0x3ca   : > { %v1238_v61 = vshrl.u32 %v1237_v60, 7 }
 0x3cb   : > { %7185 = vmatpush1.bf16.msra.mxu0 %v10656_v5  ;;  %7873 = vmatpush1.bf16.msra.mxu1 %v10659_v6  ;;  %v1235_v6 = vld [vmem:[%s14038_s2] sm:$0xf] }
 0x3cc   : > { %7186 = vmatprep.subr.bf16.mxu0 %v10664_v7  ;;  %7874 = vmatprep.subr.bf16.mxu1 %v10667_v8  ;;  %v1239_v4 = vsub.s32 0, %v1238_v61  ;;  %v1247_v5 = vsub.s32 2, %v1238_v61  ;;  %v1243_v7 = vsub.s32 1, %v1238_v61  ;;  %v1251_v8 = vsub.s32 3, %v1238_v61 }
 0x3cf   : > { %7187 = vmatpush1.bf16.msra.mxu0 %v10662_v9  ;;  %7875 = vmatpush1.bf16.msra.mxu1 %v10665_v10  ;;  %v1240_v9 = vrot.slane %v1235_v6, %v1239_v4  ;;  %v1248_v10 = vrot.slane %v1235_v6, %v1247_v5 }
 0x3d0   : > { %7188 = vmatprep.subr.bf16.mxu0 %v10670_v11  ;;  %7876 = vmatprep.subr.bf16.mxu1 %v10673_v12  ;;  %v1244_v11 = vrot.slane %v1235_v6, %v1243_v7  ;;  %v1252_v12 = vrot.slane %v1235_v6, %v1251_v8 }
 0x3d3   : > { %7189 = vmatpush1.bf16.msra.mxu0 %v10668_v13  ;;  %7877 = vmatpush1.bf16.msra.mxu1 %v10671_v16 }
 0x3d4   : > { %7190 = vmatprep.subr.bf16.mxu0 %v10676_v17  ;;  %7878 = vmatprep.subr.bf16.mxu1 %v10679_v20 }
 0x3d7   : > { %7191 = vmatpush1.bf16.msra.mxu0 %v10674_v22  ;;  %7879 = vmatpush1.bf16.msra.mxu1 %v10677_v15 }
 0x3d8   : > { %7192 = vmatprep.subr.bf16.mxu0 %v10682_v23  ;;  %7880 = vmatprep.subr.bf16.mxu1 %v10685_v24 }
 0x3db   : > { %7193 = vmatpush1.bf16.msra.mxu0 %v10680_v25  ;;  %7881 = vmatpush1.bf16.msra.mxu1 %v10683_v26 }
 0x3dc   : > { %7194 = vmatprep.subr.bf16.mxu0 %v10688_v27  ;;  %7882 = vmatprep.subr.bf16.mxu1 %v10691_v28 }
 0x3df   : > { %7195 = vmatpush1.bf16.msra.mxu0 %v10686_v29  ;;  %7883 = vmatpush1.bf16.msra.mxu1 %v10689_v30 }
 0x3e0   : > { %7196 = vmatprep.subr.bf16.mxu0 %v10694_v31  ;;  %7884 = vmatprep.subr.bf16.mxu1 %v10697_v32 }
 0x3e3   : > { %7197 = vmatpush1.bf16.msra.mxu0 %v10692_v33  ;;  %7885 = vmatpush1.bf16.msra.mxu1 %v10695_v34 }
 0x3e4   : > { %7198 = vmatprep.subr.bf16.mxu0 %v10700_v35  ;;  %7886 = vmatprep.subr.bf16.mxu1 %v10703_v36 }
 0x3e7   : > { %7199 = vmatpush1.bf16.msra.mxu0 %v10698_v37  ;;  %7887 = vmatpush1.bf16.msra.mxu1 %v10701_v38 }
 0x3e8   : > { %7200 = vmatprep.subr.bf16.mxu0 %v10706_v39  ;;  %7888 = vmatprep.subr.bf16.mxu1 %v10709_v40 }
 0x3eb   : > { %7201 = vmatpush1.bf16.msra.mxu0 %v10704_v41  ;;  %7889 = vmatpush1.bf16.msra.mxu1 %v10707_v42 }
 0x3ec   : > { %7202 = vmatprep.subr.bf16.mxu0 %v10712_v43  ;;  %7890 = vmatprep.subr.bf16.mxu1 %v10715_v44 }
 0x3ef   : > { %7203 = vmatpush1.bf16.msra.mxu0 %v10710_v21  ;;  %7891 = vmatpush1.bf16.msra.mxu1 %v10713_v46 }
 0x3f0   : > { %7204 = vmatprep.subr.bf16.mxu0 %v10718_v47  ;;  %7892 = vmatprep.subr.bf16.mxu1 %v10721_v18 }
 0x3f3   : > { %7205 = vmatpush1.bf16.msra.mxu0 %v10716_v19  ;;  %7893 = vmatpush1.bf16.msra.mxu1 %v10719_v50 }
 0x3f4   : > { %7206 = vmatprep.subr.bf16.mxu0 %v10724_v51  ;;  %7894 = vmatprep.subr.bf16.mxu1 %v10727_v14 }
 0x3f7   : > { %7207 = vmatpush1.bf16.msra.mxu0 %v10722_v45  ;;  %7895 = vmatpush1.bf16.msra.mxu1 %v10725_v54 }
 0x3f8   : > { %7208 = vmatprep.subr.bf16.mxu0 %v10730_v55  ;;  %7896 = vmatprep.subr.bf16.mxu1 %v10733_v48 }
 0x3fb   : > { %7209 = vmatpush1.bf16.msra.mxu0 %v10728_v49  ;;  %7897 = vmatpush1.bf16.msra.mxu1 %v10731_v58 }
 0x3fc   : > { %7210 = vmatprep.subr.bf16.mxu0 %v10736_v59  ;;  %7898 = vmatprep.subr.bf16.mxu1 %v10739_v52 }
 0x3ff   : > { %7211 = vmatpush1.bf16.msra.mxu0 %v10734_v53  ;;  %7899 = vmatpush1.bf16.msra.mxu1 %v10737_v62 }
 0x400   : > { %7212 = vmatprep.subr.bf16.mxu0 %v10742_v63  ;;  %7900 = vmatprep.subr.bf16.mxu1 %v10745_v56 }
 0x403   : > { %7213 = vmatpush1.bf16.msra.mxu0 %v10740_v57  ;;  %7901 = vmatpush1.bf16.msra.mxu1 %v10743_v2 }
 0x406   : > { %7215 = vmatmul.mubr.bf16.vlgmr.msra.gmra.mrb[0].mxu0 %v8044_v3  ;;  %7903 = vmatmul.mubr.bf16.vlgmr.msra.gmra.mrb[0].mxu1 %v8044_v3 }
 0x4d9   : > { %v7216_v0 = vpop.f32.mrb[0].mxu0  ;;  %v7904_v1 = vpop.f32.mrb[0].mxu1 }
 0x4da   : > { %v9074_v13 = vadd.f32 %v7216_v0, %v1240_v9  ;;  %v9078_v16 = vadd.f32 %v7904_v1, %v1248_v10  ;;  %v7218_v17 = vpop.f32.mrb[1].mxu0  ;;  %v7906_v20 = vpop.f32.mrb[1].mxu1 }
 0x4db   : > { %v9075_v22 = vadd.f32 %v7218_v17, %v1244_v11  ;;  %v9079_v15 = vadd.f32 %v7906_v20, %v1252_v12  ;;  %v7220_v23 = vpop.f32.mrb[2].mxu0  ;;  %v7908_v24 = vpop.f32.mrb[2].mxu1 }
 0x4dc   : > { %vm7913_vm0 = vcmp.gt.f32.partialorder %v9074_v13, 0.0  ;;  %v7921_v25 = vmul.f32 0.1, %v9074_v13  ;;  %vm7915_vm1 = vcmp.gt.f32.partialorder %v9078_v16, 0.0  ;;  %v7923_v26 = vmul.f32 0.1, %v9078_v16 }
 0x4dd   : > { %vm7914_vm2 = vcmp.gt.f32.partialorder %v9075_v22, 0.0  ;;  %v7922_v27 = vmul.f32 0.1, %v9075_v22  ;;  %vm7916_vm3 = vcmp.gt.f32.partialorder %v9079_v15, 0.0  ;;  %v7924_v28 = vmul.f32 0.1, %v9079_v15 }
 0x4de   : > { %v7929_v29 = vsel %vm7913_vm0, %v9074_v13, %v7921_v25  ;;  %v7931_v30 = vsel %vm7915_vm1, %v9078_v16, %v7923_v26  ;;  %v9076_v31 = vadd.f32 %v7220_v23, %v1240_v9  ;;  %v9080_v32 = vadd.f32 %v7908_v24, %v1248_v10  ;;  %v7222_v33 = vpop.f32.mrb[3].mxu0  ;;  %v7910_v34 = vpop.f32.mrb[3].mxu1 }
 0x4df   : > { %7937 = vst [vmem:[%s14023_s22] sm:$0xff] %v7929_v29  ;;  %7939 = vst [vmem:[%s14023_s22 + $0x10] sm:$0xff] %v7931_v30  ;;  %v7930_v35 = vsel %vm7914_vm2, %v9075_v22, %v7922_v27  ;;  %v7932_v36 = vsel %vm7916_vm3, %v9079_v15, %v7924_v28  ;;  %v9077_v37 = vadd.f32 %v7222_v33, %v1244_v11 }
 0x4e0   : > { %v9081_v38 = vadd.f32 %v7910_v34, %v1252_v12  ;;  %7938 = vst [vmem:[%s14023_s22 + $0x8] sm:$0xff] %v7930_v35  ;;  %7940 = vst [vmem:[%s14023_s22 + $0x18] sm:$0xff] %v7932_v36  ;;  %vm7917_vm4 = vcmp.gt.f32.partialorder %v9076_v31, 0.0  ;;  %v7925_v39 = vmul.f32 0.1, %v9076_v31  ;;  %vm7919_vm5 = vcmp.gt.f32.partialorder %v9080_v32, 0.0 }
 0x4e1   : > { %v7927_v40 = vmul.f32 0.1, %v9080_v32  ;;  %vm7918_vm6 = vcmp.gt.f32.partialorder %v9077_v37, 0.0  ;;  %v7926_v41 = vmul.f32 0.1, %v9077_v37 }
 0x4e2   : > { %vm7920_vm7 = vcmp.gt.f32.partialorder %v9081_v38, 0.0  ;;  %v7928_v42 = vmul.f32 0.1, %v9081_v38  ;;  %v7933_v43 = vsel %vm7917_vm4, %v9076_v31, %v7925_v39 }
 0x4e3   : > { %v7935_v44 = vsel %vm7919_vm5, %v9080_v32, %v7927_v40  ;;  %7941 = vst [vmem:[%s14023_s22 + $0x20] sm:$0xff] %v7933_v43  ;;  %v7934_v21 = vsel %vm7918_vm6, %v9077_v37, %v7926_v41 }
 0x4e4   : > { %7943 = vst [vmem:[%s14023_s22 + $0x30] sm:$0xff] %v7935_v44  ;;  %v7936_v46 = vsel %vm7920_vm7, %v9081_v38, %v7928_v42  ;;  %7942 = vst [vmem:[%s14023_s22 + $0x28] sm:$0xff] %v7934_v21 }
 0x4e5   : > { %7944 = vst [vmem:[%s14023_s22 + $0x38] sm:$0xff] %v7936_v46 }
 0x4e6 PF: > { %s13_s12 = sadd.s32 1, %s10752_s12  }
 0x4e7   : > { %p10_p4 = scmp.ge.s32.totalorder %s13_s12, 4  }
 0x4e9   :  { %12 = sbr.rel (!%p10_p4) target bundleno = 1 (0x1), region = 62 }

</bundles_post_ra>
